<compile_context>
chip_gen: v6e
topology: v6e:2x2x1
jax: 0.10.0
libtpu: 0.0.40
codegen_flags: <defaults>
</compile_context>

<pallas_src>
import functools
import math

import jax
import jax.numpy as jnp
from jax.experimental import pallas as pl
from jax.experimental.pallas import tpu as pltpu

INV_SQRT2 = 1.0 / math.sqrt(2.0)
SQRT_2_OVER_PI = 0.7978845608028654
LN_EPS = 1e-6
KSIZE = 7
PAD = 3


def _round_up(n, m):
    return ((n + m - 1) // m) * m


def _gelu_exact(x):
    # PyTorch nn.GELU() default = exact erf formulation (reference only).
    return 0.5 * x * (1.0 + jax.lax.erf(x * INV_SQRT2))


def convnext_block_kernel(
    x_ref,     # (1, C, HW)  f32   channels-first input block (also the residual)
    pc_ref,    # (56, C)     f32   packed: 49 dw taps, dw bias, ln weight, ln bias, pad
    ph_ref,    # (48, 4*O)   bf16  packed: w1 rows (0..C-1), b1 row (C), pad
    po_ref,    # (112, O)    bf16  packed: (w2*gamma)@wf rows, wf rows, folded bias, pad
    out_ref,   # (1, O, HW)  f32   lane-dense output
    xpad_ref,  # VMEM (H+6, W+6, C) f32   zero-padded image
    yn_ref,    # VMEM (HW, C) bf16        normalized dwconv output
    xres_ref,  # VMEM (HW, C) bf16        residual operand for the fused matmul
    *, H, W, TH,
):
    C = x_ref.shape[1]
    HID = ph_ref.shape[1]
    K2 = HID + C

    # ---- load channels-first block, transpose on-chip (XLU) to channels-last ----
    x_cf = x_ref[0]                               # (C, HW) f32
    x_flat = x_cf.T                               # (HW, C) f32
    xres_ref[...] = x_flat.astype(jnp.bfloat16)   # residual, bf16 MXU operand

    # ---- zero-padded image in VMEM: one full zero, then interior write ----
    # (full-scratch zero each step: correct regardless of batch core-sharding)
    xpad_ref[...] = jnp.zeros_like(xpad_ref)
    xpad_ref[PAD:PAD + H, PAD:PAD + W, :] = x_flat.reshape(H, W, C)

    pc = pc_ref[...]                              # (56, C) f32
    dwb = pc[KSIZE * KSIZE]                       # depthwise bias
    lnw = pc[KSIZE * KSIZE + 1]                   # LayerNorm weight
    lnb = pc[KSIZE * KSIZE + 2]                   # LayerNorm bias

    # ---- depthwise 7x7 conv (padding=3, groups=C) + LayerNorm, row-tiled ----
    # W(sublane)-axis shifts hoisted (7 offset loads); dy shifts run on the free
    # leading axis; TH-row tiles keep the live set under the 64-vreg file.
    @pl.loop(0, H // TH)
    def _(t):
        r0 = pl.multiple_of(t * TH, TH)
        acc = None
        for dx in range(KSIZE):
            xcol = xpad_ref[pl.ds(r0, TH + 2 * PAD), dx:dx + W, :]   # (TH+6, W, C)
            for dy in range(KSIZE):
                term = xcol[dy:dy + TH] * pc[dy * KSIZE + dx]
                acc = term if acc is None else acc + term
        y = (acc + dwb).reshape(TH * W, C)                           # f32 (VPU path)

        # LayerNorm over channels (channels_last, eps=1e-6)
        u = jnp.mean(y, axis=-1, keepdims=True)
        d = y - u
        s = jnp.mean(d * d, axis=-1, keepdims=True)
        yn = d * jax.lax.rsqrt(s + LN_EPS) * lnw + lnb

        row0 = pl.multiple_of(t * (TH * W), TH * W)
        yn_ref[pl.ds(row0, TH * W), :] = yn.astype(jnp.bfloat16)

    # ---- pointwise MLP: yn@w1+b1 -> GELU -> fused [g, x] @ [w2p ; wf] + bias ----
    h = jnp.dot(yn_ref[...], ph_ref[0:C, :],
                preferred_element_type=jnp.float32)                  # (HW, 4O)
    h = h + ph_ref[C, :].astype(jnp.float32)
    # tanh-approx GELU -> EUP slot.
    g = 0.5 * h * (1.0 + jnp.tanh(SQRT_2_OVER_PI * (h + 0.044715 * h * h * h)))

    cat = jnp.concatenate([g.astype(jnp.bfloat16), xres_ref[...]], axis=-1)  # (HW, K2)
    out = jnp.dot(cat, po_ref[0:K2, :], preferred_element_type=jnp.float32)  # (HW, O)
    out = out + po_ref[K2, :].astype(jnp.float32)

    out_ref[0] = out.T                                               # (O, HW), lane-dense


def convnext_block(x_nchw, params):
    """x_nchw: (B, C, H, W) float32. Returns (B, O, H, W) float32."""
    B, C, H, W = x_nchw.shape
    O = params["wf"].shape[1]
    HID = params["w1"].shape[1]
    HW = H * W
    TH = 8 if H % 8 == 0 else H

    # ---- pack parameters into 3 slabs, rows padded to tile multiples ----
    pc = jnp.concatenate(
        [params["wdw"].reshape(KSIZE * KSIZE, C),
         params["bdw"], params["lnw"], params["lnb"]], axis=0)            # (52, C) f32
    pc = jnp.pad(pc, ((0, _round_up(pc.shape[0], 8) - pc.shape[0]), (0, 0)))

    ph = jnp.concatenate([params["w1"], params["b1"]], axis=0)            # (C+1, 4O)
    ph = jnp.pad(ph, ((0, _round_up(ph.shape[0], 16) - ph.shape[0]), (0, 0)))
    ph = ph.astype(jnp.bfloat16)

    # fold gamma / w2 / wf in f32, then cast the folded slab:
    #   out = x@wf + gelu(yn@w1+b1)@((w2*gamma)@wf) + ((b2*gamma)@wf + bf)
    w2p = (params["w2"] * params["gamma"]) @ params["wf"]                 # (4O, O)
    bp = (params["b2"] * params["gamma"]) @ params["wf"] + params["bf"]   # (1, O)
    po = jnp.concatenate([w2p, params["wf"], bp], axis=0)                 # (4O+C+1, O)
    po = jnp.pad(po, ((0, _round_up(po.shape[0], 16) - po.shape[0]), (0, 0)))
    po = po.astype(jnp.bfloat16)

    x_cf = x_nchw.reshape(B, C, HW)   # free contiguous reshape, no HBM transpose

    kernel = functools.partial(convnext_block_kernel, H=H, W=W, TH=TH)

    out_cf = pl.pallas_call(
        kernel,
        out_shape=jax.ShapeDtypeStruct((B, O, HW), jnp.float32),
        grid=(B,),
        in_specs=[
            pl.BlockSpec((1, C, HW), lambda b: (b, 0, 0)),
            pl.BlockSpec(pc.shape, lambda b: (0, 0)),
            pl.BlockSpec(ph.shape, lambda b: (0, 0)),
            pl.BlockSpec(po.shape, lambda b: (0, 0)),
        ],
        out_specs=pl.BlockSpec((1, O, HW), lambda b: (b, 0, 0)),
        scratch_shapes=[
            pltpu.VMEM((H + 2 * PAD, W + 2 * PAD, C), jnp.float32),
            pltpu.VMEM((HW, C), jnp.bfloat16),
            pltpu.VMEM((HW, C), jnp.bfloat16),
        ],
        compiler_params=pltpu.CompilerParams(
            dimension_semantics=("parallel",),
            vmem_limit_bytes=32 * 1024 * 1024,
        ),
    )(x_cf, pc, ph, po)

    return out_cf.reshape(B, O, H, W)   # free reshape, already channels-first


def convnext_block_reference(x_nchw, p):
    """Pure-JAX reference mirroring the PyTorch forward (exact erf GELU, f32, unfolded)."""
    x = jnp.transpose(x_nchw, (0, 2, 3, 1))
    B, H, W, C = x.shape
    xpad = jnp.pad(x, ((0, 0), (PAD, PAD), (PAD, PAD), (0, 0)))
    acc = jnp.zeros_like(x)
    for dy in range(KSIZE):
        for dx in range(KSIZE):
            acc = acc + xpad[:, dy:dy + H, dx:dx + W, :] * p["wdw"][dy, dx]
    y = acc + p["bdw"]
    u = y.mean(-1, keepdims=True)
    s = ((y - u) ** 2).mean(-1, keepdims=True)
    yn = (y - u) / jnp.sqrt(s + LN_EPS) * p["lnw"] + p["lnb"]
    h = yn @ p["w1"] + p["b1"]
    h = _gelu_exact(h)
    h = h @ p["w2"] + p["b2"]
    h = h * p["gamma"]
    res = x + h
    out = res @ p["wf"] + p["bf"]
    return jnp.transpose(out, (0, 3, 1, 2))


def make_params(key, dim, output_dim):
    hidden = 4 * output_dim
    ks = jax.random.split(key, 10)
    n = lambda k, shape, s=0.1: (s * jax.random.normal(k, shape)).astype(jnp.float32)
    return {
        # nn.Conv2d(dim, dim, 7, padding=3, groups=dim): weight (dim,1,7,7) -> stored (7,7,dim)
        "wdw": n(ks[0], (KSIZE, KSIZE, dim)),
        "bdw": n(ks[1], (1, dim)),
        # LayerNorm(dim)
        "lnw": jnp.ones((1, dim), jnp.float32) + n(ks[2], (1, dim), 0.05),
        "lnb": n(ks[3], (1, dim), 0.05),
        # nn.Linear(dim, 4*output_dim): stored transposed as (dim, hidden)
        "w1": n(ks[4], (dim, hidden)),
        "b1": n(ks[5], (1, hidden)),
        # nn.Linear(4*output_dim, dim)
        "w2": n(ks[6], (hidden, dim)),
        "b2": n(ks[7], (1, dim)),
        # gamma = layer_scale_init_value * ones(dim)  (perturbed to exercise the path)
        "gamma": jnp.full((1, dim), 1e-6, jnp.float32) + n(ks[8], (1, dim), 0.05),
        # nn.Conv2d(dim, output_dim, 1): weight (out,dim,1,1) -> stored (dim, out)
        "wf": n(ks[9], (dim, output_dim)),
        "bf": jnp.zeros((1, output_dim), jnp.float32),
    }


if __name__ == "__main__":
    B, dim, output_dim, H, W = 2, 32, 16, 16, 16

    key = jax.random.PRNGKey(0)
    kx, kp = jax.random.split(key)
    x = jax.random.normal(kx, (B, dim, H, W), dtype=jnp.float32)  # NCHW, PyTorch convention
    params = make_params(kp, dim, output_dim)

    out = jax.jit(convnext_block)(x, params)
    out = jax.block_until_ready(out)

    ref = convnext_block_reference(x, params)
    err = float(jnp.max(jnp.abs(out - ref)))
    assert out.shape == (B, output_dim, H, W), out.shape
    # Tolerance covers bf16 MXU operands + tanh-approx GELU vs exact-erf f32 reference.
    assert err < 2e-2, f"max abs error {err}"

    print("KERNEL_OK")
</pallas_src>

<mosaic_0001>
module attributes {stable_mosaic.version = 11 : i64} {
  func.func @convnext_block_kernel(%arg0: i32, %arg1: memref<1x32x256xf32, #tpu.memory_space<vmem>>, %arg2: memref<56x32xf32, #tpu.memory_space<vmem>>, %arg3: memref<48x64xbf16, #tpu.memory_space<vmem>>, %arg4: memref<112x16xbf16, #tpu.memory_space<vmem>>, %arg5: memref<1x16x256xf32, #tpu.memory_space<vmem>>, %arg6: memref<22x22x32xf32, #tpu.memory_space<vmem>>, %arg7: memref<256x32xbf16, #tpu.memory_space<vmem>>, %arg8: memref<256x32xbf16, #tpu.memory_space<vmem>>) attributes {dimension_semantics = [#tpu.dimension_semantics<parallel>], iteration_bounds = array<i64: 2>, scalar_prefetch = 0 : i64, scratch_operands = 3 : i64, tpu.core_type = #tpu.core_type<tc>, window_params = [{transform_indices = @transform_0, window_bounds = array<i64: 1, 32, 256>}, {pipeline_mode = #tpu.pipeline_mode<synchronous>, transform_indices = @transform_1, window_bounds = array<i64: 56, 32>}, {pipeline_mode = #tpu.pipeline_mode<synchronous>, transform_indices = @transform_2, window_bounds = array<i64: 48, 64>}, {pipeline_mode = #tpu.pipeline_mode<synchronous>, transform_indices = @transform_3, window_bounds = array<i64: 112, 16>}, {transform_indices = @transform_4, window_bounds = array<i64: 1, 16, 256>}]} {
    %c0 = arith.constant 0 : index
    %c0_0 = arith.constant 0 : index
    %c0_1 = arith.constant 0 : index
    %0 = vector.load %arg1[%c0, %c0_0, %c0_1] : memref<1x32x256xf32, #tpu.memory_space<vmem>>, vector<1x32x256xf32>
    %1 = vector.shape_cast %0 : vector<1x32x256xf32> to vector<32x256xf32>
    %2 = tpu.transpose %1, [1, 0] : vector<32x256xf32> -> vector<256x32xf32>
    %3 = arith.truncf %2 : vector<256x32xf32> to vector<256x32xbf16>
    %c0_2 = arith.constant 0 : index
    %c0_3 = arith.constant 0 : index
    %4 = vector.load %arg8[%c0_2, %c0_3] : memref<256x32xbf16, #tpu.memory_space<vmem>>, vector<256x32xbf16>
    tpu.vector_store %arg8[%c0_2, %c0_3], %3 {strides = array<i32>} : memref<256x32xbf16, #tpu.memory_space<vmem>>, vector<256x32xbf16>,
    %cst = arith.constant 0.000000e+00 : f32
    %5 = vector.broadcast %cst : f32 to vector<22x22x32xf32>
    %c0_4 = arith.constant 0 : index
    %c0_5 = arith.constant 0 : index
    %c0_6 = arith.constant 0 : index
    %6 = vector.load %arg6[%c0_4, %c0_5, %c0_6] : memref<22x22x32xf32, #tpu.memory_space<vmem>>, vector<22x22x32xf32>
    tpu.vector_store %arg6[%c0_4, %c0_5, %c0_6], %5 {strides = array<i32>} : memref<22x22x32xf32, #tpu.memory_space<vmem>>, vector<22x22x32xf32>,
    %7 = vector.shape_cast %2 : vector<256x32xf32> to vector<16x16x32xf32>
    %c3 = arith.constant 3 : index
    %c3_7 = arith.constant 3 : index
    %c0_8 = arith.constant 0 : index
    %8 = vector.load %arg6[%c3, %c3_7, %c0_8] : memref<22x22x32xf32, #tpu.memory_space<vmem>>, vector<16x16x32xf32>
    tpu.vector_store %arg6[%c3, %c3_7, %c0_8], %7 {strides = array<i32>} : memref<22x22x32xf32, #tpu.memory_space<vmem>>, vector<16x16x32xf32>,
    %c0_9 = arith.constant 0 : index
    %c0_10 = arith.constant 0 : index
    %9 = vector.load %arg2[%c0_9, %c0_10] : memref<56x32xf32, #tpu.memory_space<vmem>>, vector<56x32xf32>
    %10 = vector.extract_strided_slice %9 {offsets = [49, 0], sizes = [1, 32], strides = [1, 1]} : vector<56x32xf32> to vector<1x32xf32>
    %11 = vector.shape_cast %10 : vector<1x32xf32> to vector<32xf32>
    %12 = vector.extract_strided_slice %9 {offsets = [50, 0], sizes = [1, 32], strides = [1, 1]} : vector<56x32xf32> to vector<1x32xf32>
    %13 = vector.shape_cast %12 : vector<1x32xf32> to vector<32xf32>
    %14 = vector.extract_strided_slice %9 {offsets = [51, 0], sizes = [1, 32], strides = [1, 1]} : vector<56x32xf32> to vector<1x32xf32>
    %15 = vector.shape_cast %14 : vector<1x32xf32> to vector<32xf32>
    %c0_i32 = arith.constant 0 : i32
    %c2_i32 = arith.constant 2 : i32
    %16 = arith.addi %c0_i32, %c2_i32 : i32
    %c1_i32 = arith.constant 1 : i32
    scf.for %arg9 = %c0_i32 to %16 step %c1_i32  : i32 {
      %c1_i32_31 = arith.constant 1 : i32
      %54 = arith.muli %arg9, %c1_i32_31 : i32
      %c0_i32_32 = arith.constant 0 : i32
      %55 = arith.addi %c0_i32_32, %54 : i32
      %c8_i32 = arith.constant 8 : i32
      %56 = arith.muli %55, %c8_i32 : i32
      %57 = tpu.assume_multiple %56, 8 : i32
      %58 = arith.index_cast %57 : i32 to index
      %c0_33 = arith.constant 0 : index
      %c0_34 = arith.constant 0 : index
      %59 = vector.load %arg6[%58, %c0_33, %c0_34] : memref<22x22x32xf32, #tpu.memory_space<vmem>>, vector<14x16x32xf32>
      %60 = vector.extract_strided_slice %59 {offsets = [0, 0, 0], sizes = [8, 16, 32], strides = [1, 1, 1]} : vector<14x16x32xf32> to vector<8x16x32xf32>
      %61 = vector.extract_strided_slice %9 {offsets = [0, 0], sizes = [1, 32], strides = [1, 1]} : vector<56x32xf32> to vector<1x32xf32>
      %62 = vector.shape_cast %61 : vector<1x32xf32> to vector<32xf32>
      %63 = vector.shape_cast %62 : vector<32xf32> to vector<1x1x32xf32>
      %64 = vector.broadcast %63 : vector<1x1x32xf32> to vector<8x16x32xf32>
      %65 = arith.mulf %60, %64 : vector<8x16x32xf32>
      %66 = vector.extract_strided_slice %59 {offsets = [1, 0, 0], sizes = [8, 16, 32], strides = [1, 1, 1]} : vector<14x16x32xf32> to vector<8x16x32xf32>
      %67 = vector.extract_strided_slice %9 {offsets = [7, 0], sizes = [1, 32], strides = [1, 1]} : vector<56x32xf32> to vector<1x32xf32>
      %68 = vector.shape_cast %67 : vector<1x32xf32> to vector<32xf32>
      %69 = vector.shape_cast %68 : vector<32xf32> to vector<1x1x32xf32>
      %70 = vector.broadcast %69 : vector<1x1x32xf32> to vector<8x16x32xf32>
      %71 = arith.mulf %66, %70 : vector<8x16x32xf32>
      %72 = arith.addf %65, %71 : vector<8x16x32xf32>
      %73 = vector.extract_strided_slice %59 {offsets = [2, 0, 0], sizes = [8, 16, 32], strides = [1, 1, 1]} : vector<14x16x32xf32> to vector<8x16x32xf32>
      %74 = vector.extract_strided_slice %9 {offsets = [14, 0], sizes = [1, 32], strides = [1, 1]} : vector<56x32xf32> to vector<1x32xf32>
      %75 = vector.shape_cast %74 : vector<1x32xf32> to vector<32xf32>
      %76 = vector.shape_cast %75 : vector<32xf32> to vector<1x1x32xf32>
      %77 = vector.broadcast %76 : vector<1x1x32xf32> to vector<8x16x32xf32>
      %78 = arith.mulf %73, %77 : vector<8x16x32xf32>
      %79 = arith.addf %72, %78 : vector<8x16x32xf32>
      %80 = vector.extract_strided_slice %59 {offsets = [3, 0, 0], sizes = [8, 16, 32], strides = [1, 1, 1]} : vector<14x16x32xf32> to vector<8x16x32xf32>
      %81 = vector.extract_strided_slice %9 {offsets = [21, 0], sizes = [1, 32], strides = [1, 1]} : vector<56x32xf32> to vector<1x32xf32>
      %82 = vector.shape_cast %81 : vector<1x32xf32> to vector<32xf32>
      %83 = vector.shape_cast %82 : vector<32xf32> to vector<1x1x32xf32>
      %84 = vector.broadcast %83 : vector<1x1x32xf32> to vector<8x16x32xf32>
      %85 = arith.mulf %80, %84 : vector<8x16x32xf32>
      %86 = arith.addf %79, %85 : vector<8x16x32xf32>
      %87 = vector.extract_strided_slice %59 {offsets = [4, 0, 0], sizes = [8, 16, 32], strides = [1, 1, 1]} : vector<14x16x32xf32> to vector<8x16x32xf32>
      %88 = vector.extract_strided_slice %9 {offsets = [28, 0], sizes = [1, 32], strides = [1, 1]} : vector<56x32xf32> to vector<1x32xf32>
      %89 = vector.shape_cast %88 : vector<1x32xf32> to vector<32xf32>
      %90 = vector.shape_cast %89 : vector<32xf32> to vector<1x1x32xf32>
      %91 = vector.broadcast %90 : vector<1x1x32xf32> to vector<8x16x32xf32>
      %92 = arith.mulf %87, %91 : vector<8x16x32xf32>
      %93 = arith.addf %86, %92 : vector<8x16x32xf32>
      %94 = vector.extract_strided_slice %59 {offsets = [5, 0, 0], sizes = [8, 16, 32], strides = [1, 1, 1]} : vector<14x16x32xf32> to vector<8x16x32xf32>
      %95 = vector.extract_strided_slice %9 {offsets = [35, 0], sizes = [1, 32], strides = [1, 1]} : vector<56x32xf32> to vector<1x32xf32>
      %96 = vector.shape_cast %95 : vector<1x32xf32> to vector<32xf32>
      %97 = vector.shape_cast %96 : vector<32xf32> to vector<1x1x32xf32>
      %98 = vector.broadcast %97 : vector<1x1x32xf32> to vector<8x16x32xf32>
      %99 = arith.mulf %94, %98 : vector<8x16x32xf32>
      %100 = arith.addf %93, %99 : vector<8x16x32xf32>
      %101 = vector.extract_strided_slice %59 {offsets = [6, 0, 0], sizes = [8, 16, 32], strides = [1, 1, 1]} : vector<14x16x32xf32> to vector<8x16x32xf32>
      %102 = vector.extract_strided_slice %9 {offsets = [42, 0], sizes = [1, 32], strides = [1, 1]} : vector<56x32xf32> to vector<1x32xf32>
      %103 = vector.shape_cast %102 : vector<1x32xf32> to vector<32xf32>
      %104 = vector.shape_cast %103 : vector<32xf32> to vector<1x1x32xf32>
      %105 = vector.broadcast %104 : vector<1x1x32xf32> to vector<8x16x32xf32>
      %106 = arith.mulf %101, %105 : vector<8x16x32xf32>
      %107 = arith.addf %100, %106 : vector<8x16x32xf32>
      %108 = arith.index_cast %57 : i32 to index
      %c1 = arith.constant 1 : index
      %c0_35 = arith.constant 0 : index
      %109 = vector.load %arg6[%108, %c1, %c0_35] : memref<22x22x32xf32, #tpu.memory_space<vmem>>, vector<14x16x32xf32>
      %110 = vector.extract_strided_slice %109 {offsets = [0, 0, 0], sizes = [8, 16, 32], strides = [1, 1, 1]} : vector<14x16x32xf32> to vector<8x16x32xf32>
      %111 = vector.extract_strided_slice %9 {offsets = [1, 0], sizes = [1, 32], strides = [1, 1]} : vector<56x32xf32> to vector<1x32xf32>
      %112 = vector.shape_cast %111 : vector<1x32xf32> to vector<32xf32>
      %113 = vector.shape_cast %112 : vector<32xf32> to vector<1x1x32xf32>
      %114 = vector.broadcast %113 : vector<1x1x32xf32> to vector<8x16x32xf32>
      %115 = arith.mulf %110, %114 : vector<8x16x32xf32>
      %116 = arith.addf %107, %115 : vector<8x16x32xf32>
      %117 = vector.extract_strided_slice %109 {offsets = [1, 0, 0], sizes = [8, 16, 32], strides = [1, 1, 1]} : vector<14x16x32xf32> to vector<8x16x32xf32>
      %118 = vector.extract_strided_slice %9 {offsets = [8, 0], sizes = [1, 32], strides = [1, 1]} : vector<56x32xf32> to vector<1x32xf32>
      %119 = vector.shape_cast %118 : vector<1x32xf32> to vector<32xf32>
      %120 = vector.shape_cast %119 : vector<32xf32> to vector<1x1x32xf32>
      %121 = vector.broadcast %120 : vector<1x1x32xf32> to vector<8x16x32xf32>
      %122 = arith.mulf %117, %121 : vector<8x16x32xf32>
      %123 = arith.addf %116, %122 : vector<8x16x32xf32>
      %124 = vector.extract_strided_slice %109 {offsets = [2, 0, 0], sizes = [8, 16, 32], strides = [1, 1, 1]} : vector<14x16x32xf32> to vector<8x16x32xf32>
      %125 = vector.extract_strided_slice %9 {offsets = [15, 0], sizes = [1, 32], strides = [1, 1]} : vector<56x32xf32> to vector<1x32xf32>
      %126 = vector.shape_cast %125 : vector<1x32xf32> to vector<32xf32>
      %127 = vector.shape_cast %126 : vector<32xf32> to vector<1x1x32xf32>
      %128 = vector.broadcast %127 : vector<1x1x32xf32> to vector<8x16x32xf32>
      %129 = arith.mulf %124, %128 : vector<8x16x32xf32>
      %130 = arith.addf %123, %129 : vector<8x16x32xf32>
      %131 = vector.extract_strided_slice %109 {offsets = [3, 0, 0], sizes = [8, 16, 32], strides = [1, 1, 1]} : vector<14x16x32xf32> to vector<8x16x32xf32>
      %132 = vector.extract_strided_slice %9 {offsets = [22, 0], sizes = [1, 32], strides = [1, 1]} : vector<56x32xf32> to vector<1x32xf32>
      %133 = vector.shape_cast %132 : vector<1x32xf32> to vector<32xf32>
      %134 = vector.shape_cast %133 : vector<32xf32> to vector<1x1x32xf32>
      %135 = vector.broadcast %134 : vector<1x1x32xf32> to vector<8x16x32xf32>
      %136 = arith.mulf %131, %135 : vector<8x16x32xf32>
      %137 = arith.addf %130, %136 : vector<8x16x32xf32>
      %138 = vector.extract_strided_slice %109 {offsets = [4, 0, 0], sizes = [8, 16, 32], strides = [1, 1, 1]} : vector<14x16x32xf32> to vector<8x16x32xf32>
      %139 = vector.extract_strided_slice %9 {offsets = [29, 0], sizes = [1, 32], strides = [1, 1]} : vector<56x32xf32> to vector<1x32xf32>
      %140 = vector.shape_cast %139 : vector<1x32xf32> to vector<32xf32>
      %141 = vector.shape_cast %140 : vector<32xf32> to vector<1x1x32xf32>
      %142 = vector.broadcast %141 : vector<1x1x32xf32> to vector<8x16x32xf32>
      %143 = arith.mulf %138, %142 : vector<8x16x32xf32>
      %144 = arith.addf %137, %143 : vector<8x16x32xf32>
      %145 = vector.extract_strided_slice %109 {offsets = [5, 0, 0], sizes = [8, 16, 32], strides = [1, 1, 1]} : vector<14x16x32xf32> to vector<8x16x32xf32>
      %146 = vector.extract_strided_slice %9 {offsets = [36, 0], sizes = [1, 32], strides = [1, 1]} : vector<56x32xf32> to vector<1x32xf32>
      %147 = vector.shape_cast %146 : vector<1x32xf32> to vector<32xf32>
      %148 = vector.shape_cast %147 : vector<32xf32> to vector<1x1x32xf32>
      %149 = vector.broadcast %148 : vector<1x1x32xf32> to vector<8x16x32xf32>
      %150 = arith.mulf %145, %149 : vector<8x16x32xf32>
      %151 = arith.addf %144, %150 : vector<8x16x32xf32>
      %152 = vector.extract_strided_slice %109 {offsets = [6, 0, 0], sizes = [8, 16, 32], strides = [1, 1, 1]} : vector<14x16x32xf32> to vector<8x16x32xf32>
      %153 = vector.extract_strided_slice %9 {offsets = [43, 0], sizes = [1, 32], strides = [1, 1]} : vector<56x32xf32> to vector<1x32xf32>
      %154 = vector.shape_cast %153 : vector<1x32xf32> to vector<32xf32>
      %155 = vector.shape_cast %154 : vector<32xf32> to vector<1x1x32xf32>
      %156 = vector.broadcast %155 : vector<1x1x32xf32> to vector<8x16x32xf32>
      %157 = arith.mulf %152, %156 : vector<8x16x32xf32>
      %158 = arith.addf %151, %157 : vector<8x16x32xf32>
      %159 = arith.index_cast %57 : i32 to index
      %c2 = arith.constant 2 : index
      %c0_36 = arith.constant 0 : index
      %160 = vector.load %arg6[%159, %c2, %c0_36] : memref<22x22x32xf32, #tpu.memory_space<vmem>>, vector<14x16x32xf32>
      %161 = vector.extract_strided_slice %160 {offsets = [0, 0, 0], sizes = [8, 16, 32], strides = [1, 1, 1]} : vector<14x16x32xf32> to vector<8x16x32xf32>
      %162 = vector.extract_strided_slice %9 {offsets = [2, 0], sizes = [1, 32], strides = [1, 1]} : vector<56x32xf32> to vector<1x32xf32>
      %163 = vector.shape_cast %162 : vector<1x32xf32> to vector<32xf32>
      %164 = vector.shape_cast %163 : vector<32xf32> to vector<1x1x32xf32>
      %165 = vector.broadcast %164 : vector<1x1x32xf32> to vector<8x16x32xf32>
      %166 = arith.mulf %161, %165 : vector<8x16x32xf32>
      %167 = arith.addf %158, %166 : vector<8x16x32xf32>
      %168 = vector.extract_strided_slice %160 {offsets = [1, 0, 0], sizes = [8, 16, 32], strides = [1, 1, 1]} : vector<14x16x32xf32> to vector<8x16x32xf32>
      %169 = vector.extract_strided_slice %9 {offsets = [9, 0], sizes = [1, 32], strides = [1, 1]} : vector<56x32xf32> to vector<1x32xf32>
      %170 = vector.shape_cast %169 : vector<1x32xf32> to vector<32xf32>
      %171 = vector.shape_cast %170 : vector<32xf32> to vector<1x1x32xf32>
      %172 = vector.broadcast %171 : vector<1x1x32xf32> to vector<8x16x32xf32>
      %173 = arith.mulf %168, %172 : vector<8x16x32xf32>
      %174 = arith.addf %167, %173 : vector<8x16x32xf32>
      %175 = vector.extract_strided_slice %160 {offsets = [2, 0, 0], sizes = [8, 16, 32], strides = [1, 1, 1]} : vector<14x16x32xf32> to vector<8x16x32xf32>
      %176 = vector.extract_strided_slice %9 {offsets = [16, 0], sizes = [1, 32], strides = [1, 1]} : vector<56x32xf32> to vector<1x32xf32>
      %177 = vector.shape_cast %176 : vector<1x32xf32> to vector<32xf32>
      %178 = vector.shape_cast %177 : vector<32xf32> to vector<1x1x32xf32>
      %179 = vector.broadcast %178 : vector<1x1x32xf32> to vector<8x16x32xf32>
      %180 = arith.mulf %175, %179 : vector<8x16x32xf32>
      %181 = arith.addf %174, %180 : vector<8x16x32xf32>
      %182 = vector.extract_strided_slice %160 {offsets = [3, 0, 0], sizes = [8, 16, 32], strides = [1, 1, 1]} : vector<14x16x32xf32> to vector<8x16x32xf32>
      %183 = vector.extract_strided_slice %9 {offsets = [23, 0], sizes = [1, 32], strides = [1, 1]} : vector<56x32xf32> to vector<1x32xf32>
      %184 = vector.shape_cast %183 : vector<1x32xf32> to vector<32xf32>
      %185 = vector.shape_cast %184 : vector<32xf32> to vector<1x1x32xf32>
      %186 = vector.broadcast %185 : vector<1x1x32xf32> to vector<8x16x32xf32>
      %187 = arith.mulf %182, %186 : vector<8x16x32xf32>
      %188 = arith.addf %181, %187 : vector<8x16x32xf32>
      %189 = vector.extract_strided_slice %160 {offsets = [4, 0, 0], sizes = [8, 16, 32], strides = [1, 1, 1]} : vector<14x16x32xf32> to vector<8x16x32xf32>
      %190 = vector.extract_strided_slice %9 {offsets = [30, 0], sizes = [1, 32], strides = [1, 1]} : vector<56x32xf32> to vector<1x32xf32>
      %191 = vector.shape_cast %190 : vector<1x32xf32> to vector<32xf32>
      %192 = vector.shape_cast %191 : vector<32xf32> to vector<1x1x32xf32>
      %193 = vector.broadcast %192 : vector<1x1x32xf32> to vector<8x16x32xf32>
      %194 = arith.mulf %189, %193 : vector<8x16x32xf32>
      %195 = arith.addf %188, %194 : vector<8x16x32xf32>
      %196 = vector.extract_strided_slice %160 {offsets = [5, 0, 0], sizes = [8, 16, 32], strides = [1, 1, 1]} : vector<14x16x32xf32> to vector<8x16x32xf32>
      %197 = vector.extract_strided_slice %9 {offsets = [37, 0], sizes = [1, 32], strides = [1, 1]} : vector<56x32xf32> to vector<1x32xf32>
      %198 = vector.shape_cast %197 : vector<1x32xf32> to vector<32xf32>
      %199 = vector.shape_cast %198 : vector<32xf32> to vector<1x1x32xf32>
      %200 = vector.broadcast %199 : vector<1x1x32xf32> to vector<8x16x32xf32>
      %201 = arith.mulf %196, %200 : vector<8x16x32xf32>
      %202 = arith.addf %195, %201 : vector<8x16x32xf32>
      %203 = vector.extract_strided_slice %160 {offsets = [6, 0, 0], sizes = [8, 16, 32], strides = [1, 1, 1]} : vector<14x16x32xf32> to vector<8x16x32xf32>
      %204 = vector.extract_strided_slice %9 {offsets = [44, 0], sizes = [1, 32], strides = [1, 1]} : vector<56x32xf32> to vector<1x32xf32>
      %205 = vector.shape_cast %204 : vector<1x32xf32> to vector<32xf32>
      %206 = vector.shape_cast %205 : vector<32xf32> to vector<1x1x32xf32>
      %207 = vector.broadcast %206 : vector<1x1x32xf32> to vector<8x16x32xf32>
      %208 = arith.mulf %203, %207 : vector<8x16x32xf32>
      %209 = arith.addf %202, %208 : vector<8x16x32xf32>
      %210 = arith.index_cast %57 : i32 to index
      %c3_37 = arith.constant 3 : index
      %c0_38 = arith.constant 0 : index
      %211 = vector.load %arg6[%210, %c3_37, %c0_38] : memref<22x22x32xf32, #tpu.memory_space<vmem>>, vector<14x16x32xf32>
      %212 = vector.extract_strided_slice %211 {offsets = [0, 0, 0], sizes = [8, 16, 32], strides = [1, 1, 1]} : vector<14x16x32xf32> to vector<8x16x32xf32>
      %213 = vector.extract_strided_slice %9 {offsets = [3, 0], sizes = [1, 32], strides = [1, 1]} : vector<56x32xf32> to vector<1x32xf32>
      %214 = vector.shape_cast %213 : vector<1x32xf32> to vector<32xf32>
      %215 = vector.shape_cast %214 : vector<32xf32> to vector<1x1x32xf32>
      %216 = vector.broadcast %215 : vector<1x1x32xf32> to vector<8x16x32xf32>
      %217 = arith.mulf %212, %216 : vector<8x16x32xf32>
      %218 = arith.addf %209, %217 : vector<8x16x32xf32>
      %219 = vector.extract_strided_slice %211 {offsets = [1, 0, 0], sizes = [8, 16, 32], strides = [1, 1, 1]} : vector<14x16x32xf32> to vector<8x16x32xf32>
      %220 = vector.extract_strided_slice %9 {offsets = [10, 0], sizes = [1, 32], strides = [1, 1]} : vector<56x32xf32> to vector<1x32xf32>
      %221 = vector.shape_cast %220 : vector<1x32xf32> to vector<32xf32>
      %222 = vector.shape_cast %221 : vector<32xf32> to vector<1x1x32xf32>
      %223 = vector.broadcast %222 : vector<1x1x32xf32> to vector<8x16x32xf32>
      %224 = arith.mulf %219, %223 : vector<8x16x32xf32>
      %225 = arith.addf %218, %224 : vector<8x16x32xf32>
      %226 = vector.extract_strided_slice %211 {offsets = [2, 0, 0], sizes = [8, 16, 32], strides = [1, 1, 1]} : vector<14x16x32xf32> to vector<8x16x32xf32>
      %227 = vector.extract_strided_slice %9 {offsets = [17, 0], sizes = [1, 32], strides = [1, 1]} : vector<56x32xf32> to vector<1x32xf32>
      %228 = vector.shape_cast %227 : vector<1x32xf32> to vector<32xf32>
      %229 = vector.shape_cast %228 : vector<32xf32> to vector<1x1x32xf32>
      %230 = vector.broadcast %229 : vector<1x1x32xf32> to vector<8x16x32xf32>
      %231 = arith.mulf %226, %230 : vector<8x16x32xf32>
      %232 = arith.addf %225, %231 : vector<8x16x32xf32>
      %233 = vector.extract_strided_slice %211 {offsets = [3, 0, 0], sizes = [8, 16, 32], strides = [1, 1, 1]} : vector<14x16x32xf32> to vector<8x16x32xf32>
      %234 = vector.extract_strided_slice %9 {offsets = [24, 0], sizes = [1, 32], strides = [1, 1]} : vector<56x32xf32> to vector<1x32xf32>
      %235 = vector.shape_cast %234 : vector<1x32xf32> to vector<32xf32>
      %236 = vector.shape_cast %235 : vector<32xf32> to vector<1x1x32xf32>
      %237 = vector.broadcast %236 : vector<1x1x32xf32> to vector<8x16x32xf32>
      %238 = arith.mulf %233, %237 : vector<8x16x32xf32>
      %239 = arith.addf %232, %238 : vector<8x16x32xf32>
      %240 = vector.extract_strided_slice %211 {offsets = [4, 0, 0], sizes = [8, 16, 32], strides = [1, 1, 1]} : vector<14x16x32xf32> to vector<8x16x32xf32>
      %241 = vector.extract_strided_slice %9 {offsets = [31, 0], sizes = [1, 32], strides = [1, 1]} : vector<56x32xf32> to vector<1x32xf32>
      %242 = vector.shape_cast %241 : vector<1x32xf32> to vector<32xf32>
      %243 = vector.shape_cast %242 : vector<32xf32> to vector<1x1x32xf32>
      %244 = vector.broadcast %243 : vector<1x1x32xf32> to vector<8x16x32xf32>
      %245 = arith.mulf %240, %244 : vector<8x16x32xf32>
      %246 = arith.addf %239, %245 : vector<8x16x32xf32>
      %247 = vector.extract_strided_slice %211 {offsets = [5, 0, 0], sizes = [8, 16, 32], strides = [1, 1, 1]} : vector<14x16x32xf32> to vector<8x16x32xf32>
      %248 = vector.extract_strided_slice %9 {offsets = [38, 0], sizes = [1, 32], strides = [1, 1]} : vector<56x32xf32> to vector<1x32xf32>
      %249 = vector.shape_cast %248 : vector<1x32xf32> to vector<32xf32>
      %250 = vector.shape_cast %249 : vector<32xf32> to vector<1x1x32xf32>
      %251 = vector.broadcast %250 : vector<1x1x32xf32> to vector<8x16x32xf32>
      %252 = arith.mulf %247, %251 : vector<8x16x32xf32>
      %253 = arith.addf %246, %252 : vector<8x16x32xf32>
      %254 = vector.extract_strided_slice %211 {offsets = [6, 0, 0], sizes = [8, 16, 32], strides = [1, 1, 1]} : vector<14x16x32xf32> to vector<8x16x32xf32>
      %255 = vector.extract_strided_slice %9 {offsets = [45, 0], sizes = [1, 32], strides = [1, 1]} : vector<56x32xf32> to vector<1x32xf32>
      %256 = vector.shape_cast %255 : vector<1x32xf32> to vector<32xf32>
      %257 = vector.shape_cast %256 : vector<32xf32> to vector<1x1x32xf32>
      %258 = vector.broadcast %257 : vector<1x1x32xf32> to vector<8x16x32xf32>
      %259 = arith.mulf %254, %258 : vector<8x16x32xf32>
      %260 = arith.addf %253, %259 : vector<8x16x32xf32>
      %261 = arith.index_cast %57 : i32 to index
      %c4 = arith.constant 4 : index
      %c0_39 = arith.constant 0 : index
      %262 = vector.load %arg6[%261, %c4, %c0_39] : memref<22x22x32xf32, #tpu.memory_space<vmem>>, vector<14x16x32xf32>
      %263 = vector.extract_strided_slice %262 {offsets = [0, 0, 0], sizes = [8, 16, 32], strides = [1, 1, 1]} : vector<14x16x32xf32> to vector<8x16x32xf32>
      %264 = vector.extract_strided_slice %9 {offsets = [4, 0], sizes = [1, 32], strides = [1, 1]} : vector<56x32xf32> to vector<1x32xf32>
      %265 = vector.shape_cast %264 : vector<1x32xf32> to vector<32xf32>
      %266 = vector.shape_cast %265 : vector<32xf32> to vector<1x1x32xf32>
      %267 = vector.broadcast %266 : vector<1x1x32xf32> to vector<8x16x32xf32>
      %268 = arith.mulf %263, %267 : vector<8x16x32xf32>
      %269 = arith.addf %260, %268 : vector<8x16x32xf32>
      %270 = vector.extract_strided_slice %262 {offsets = [1, 0, 0], sizes = [8, 16, 32], strides = [1, 1, 1]} : vector<14x16x32xf32> to vector<8x16x32xf32>
      %271 = vector.extract_strided_slice %9 {offsets = [11, 0], sizes = [1, 32], strides = [1, 1]} : vector<56x32xf32> to vector<1x32xf32>
      %272 = vector.shape_cast %271 : vector<1x32xf32> to vector<32xf32>
      %273 = vector.shape_cast %272 : vector<32xf32> to vector<1x1x32xf32>
      %274 = vector.broadcast %273 : vector<1x1x32xf32> to vector<8x16x32xf32>
      %275 = arith.mulf %270, %274 : vector<8x16x32xf32>
      %276 = arith.addf %269, %275 : vector<8x16x32xf32>
      %277 = vector.extract_strided_slice %262 {offsets = [2, 0, 0], sizes = [8, 16, 32], strides = [1, 1, 1]} : vector<14x16x32xf32> to vector<8x16x32xf32>
      %278 = vector.extract_strided_slice %9 {offsets = [18, 0], sizes = [1, 32], strides = [1, 1]} : vector<56x32xf32> to vector<1x32xf32>
      %279 = vector.shape_cast %278 : vector<1x32xf32> to vector<32xf32>
      %280 = vector.shape_cast %279 : vector<32xf32> to vector<1x1x32xf32>
      %281 = vector.broadcast %280 : vector<1x1x32xf32> to vector<8x16x32xf32>
      %282 = arith.mulf %277, %281 : vector<8x16x32xf32>
      %283 = arith.addf %276, %282 : vector<8x16x32xf32>
      %284 = vector.extract_strided_slice %262 {offsets = [3, 0, 0], sizes = [8, 16, 32], strides = [1, 1, 1]} : vector<14x16x32xf32> to vector<8x16x32xf32>
      %285 = vector.extract_strided_slice %9 {offsets = [25, 0], sizes = [1, 32], strides = [1, 1]} : vector<56x32xf32> to vector<1x32xf32>
      %286 = vector.shape_cast %285 : vector<1x32xf32> to vector<32xf32>
      %287 = vector.shape_cast %286 : vector<32xf32> to vector<1x1x32xf32>
      %288 = vector.broadcast %287 : vector<1x1x32xf32> to vector<8x16x32xf32>
      %289 = arith.mulf %284, %288 : vector<8x16x32xf32>
      %290 = arith.addf %283, %289 : vector<8x16x32xf32>
      %291 = vector.extract_strided_slice %262 {offsets = [4, 0, 0], sizes = [8, 16, 32], strides = [1, 1, 1]} : vector<14x16x32xf32> to vector<8x16x32xf32>
      %292 = vector.extract_strided_slice %9 {offsets = [32, 0], sizes = [1, 32], strides = [1, 1]} : vector<56x32xf32> to vector<1x32xf32>
      %293 = vector.shape_cast %292 : vector<1x32xf32> to vector<32xf32>
      %294 = vector.shape_cast %293 : vector<32xf32> to vector<1x1x32xf32>
      %295 = vector.broadcast %294 : vector<1x1x32xf32> to vector<8x16x32xf32>
      %296 = arith.mulf %291, %295 : vector<8x16x32xf32>
      %297 = arith.addf %290, %296 : vector<8x16x32xf32>
      %298 = vector.extract_strided_slice %262 {offsets = [5, 0, 0], sizes = [8, 16, 32], strides = [1, 1, 1]} : vector<14x16x32xf32> to vector<8x16x32xf32>
      %299 = vector.extract_strided_slice %9 {offsets = [39, 0], sizes = [1, 32], strides = [1, 1]} : vector<56x32xf32> to vector<1x32xf32>
      %300 = vector.shape_cast %299 : vector<1x32xf32> to vector<32xf32>
      %301 = vector.shape_cast %300 : vector<32xf32> to vector<1x1x32xf32>
      %302 = vector.broadcast %301 : vector<1x1x32xf32> to vector<8x16x32xf32>
      %303 = arith.mulf %298, %302 : vector<8x16x32xf32>
      %304 = arith.addf %297, %303 : vector<8x16x32xf32>
      %305 = vector.extract_strided_slice %262 {offsets = [6, 0, 0], sizes = [8, 16, 32], strides = [1, 1, 1]} : vector<14x16x32xf32> to vector<8x16x32xf32>
      %306 = vector.extract_strided_slice %9 {offsets = [46, 0], sizes = [1, 32], strides = [1, 1]} : vector<56x32xf32> to vector<1x32xf32>
      %307 = vector.shape_cast %306 : vector<1x32xf32> to vector<32xf32>
      %308 = vector.shape_cast %307 : vector<32xf32> to vector<1x1x32xf32>
      %309 = vector.broadcast %308 : vector<1x1x32xf32> to vector<8x16x32xf32>
      %310 = arith.mulf %305, %309 : vector<8x16x32xf32>
      %311 = arith.addf %304, %310 : vector<8x16x32xf32>
      %312 = arith.index_cast %57 : i32 to index
      %c5 = arith.constant 5 : index
      %c0_40 = arith.constant 0 : index
      %313 = vector.load %arg6[%312, %c5, %c0_40] : memref<22x22x32xf32, #tpu.memory_space<vmem>>, vector<14x16x32xf32>
      %314 = vector.extract_strided_slice %313 {offsets = [0, 0, 0], sizes = [8, 16, 32], strides = [1, 1, 1]} : vector<14x16x32xf32> to vector<8x16x32xf32>
      %315 = vector.extract_strided_slice %9 {offsets = [5, 0], sizes = [1, 32], strides = [1, 1]} : vector<56x32xf32> to vector<1x32xf32>
      %316 = vector.shape_cast %315 : vector<1x32xf32> to vector<32xf32>
      %317 = vector.shape_cast %316 : vector<32xf32> to vector<1x1x32xf32>
      %318 = vector.broadcast %317 : vector<1x1x32xf32> to vector<8x16x32xf32>
      %319 = arith.mulf %314, %318 : vector<8x16x32xf32>
      %320 = arith.addf %311, %319 : vector<8x16x32xf32>
      %321 = vector.extract_strided_slice %313 {offsets = [1, 0, 0], sizes = [8, 16, 32], strides = [1, 1, 1]} : vector<14x16x32xf32> to vector<8x16x32xf32>
      %322 = vector.extract_strided_slice %9 {offsets = [12, 0], sizes = [1, 32], strides = [1, 1]} : vector<56x32xf32> to vector<1x32xf32>
      %323 = vector.shape_cast %322 : vector<1x32xf32> to vector<32xf32>
      %324 = vector.shape_cast %323 : vector<32xf32> to vector<1x1x32xf32>
      %325 = vector.broadcast %324 : vector<1x1x32xf32> to vector<8x16x32xf32>
      %326 = arith.mulf %321, %325 : vector<8x16x32xf32>
      %327 = arith.addf %320, %326 : vector<8x16x32xf32>
      %328 = vector.extract_strided_slice %313 {offsets = [2, 0, 0], sizes = [8, 16, 32], strides = [1, 1, 1]} : vector<14x16x32xf32> to vector<8x16x32xf32>
      %329 = vector.extract_strided_slice %9 {offsets = [19, 0], sizes = [1, 32], strides = [1, 1]} : vector<56x32xf32> to vector<1x32xf32>
      %330 = vector.shape_cast %329 : vector<1x32xf32> to vector<32xf32>
      %331 = vector.shape_cast %330 : vector<32xf32> to vector<1x1x32xf32>
      %332 = vector.broadcast %331 : vector<1x1x32xf32> to vector<8x16x32xf32>
      %333 = arith.mulf %328, %332 : vector<8x16x32xf32>
      %334 = arith.addf %327, %333 : vector<8x16x32xf32>
      %335 = vector.extract_strided_slice %313 {offsets = [3, 0, 0], sizes = [8, 16, 32], strides = [1, 1, 1]} : vector<14x16x32xf32> to vector<8x16x32xf32>
      %336 = vector.extract_strided_slice %9 {offsets = [26, 0], sizes = [1, 32], strides = [1, 1]} : vector<56x32xf32> to vector<1x32xf32>
      %337 = vector.shape_cast %336 : vector<1x32xf32> to vector<32xf32>
      %338 = vector.shape_cast %337 : vector<32xf32> to vector<1x1x32xf32>
      %339 = vector.broadcast %338 : vector<1x1x32xf32> to vector<8x16x32xf32>
      %340 = arith.mulf %335, %339 : vector<8x16x32xf32>
      %341 = arith.addf %334, %340 : vector<8x16x32xf32>
      %342 = vector.extract_strided_slice %313 {offsets = [4, 0, 0], sizes = [8, 16, 32], strides = [1, 1, 1]} : vector<14x16x32xf32> to vector<8x16x32xf32>
      %343 = vector.extract_strided_slice %9 {offsets = [33, 0], sizes = [1, 32], strides = [1, 1]} : vector<56x32xf32> to vector<1x32xf32>
      %344 = vector.shape_cast %343 : vector<1x32xf32> to vector<32xf32>
      %345 = vector.shape_cast %344 : vector<32xf32> to vector<1x1x32xf32>
      %346 = vector.broadcast %345 : vector<1x1x32xf32> to vector<8x16x32xf32>
      %347 = arith.mulf %342, %346 : vector<8x16x32xf32>
      %348 = arith.addf %341, %347 : vector<8x16x32xf32>
      %349 = vector.extract_strided_slice %313 {offsets = [5, 0, 0], sizes = [8, 16, 32], strides = [1, 1, 1]} : vector<14x16x32xf32> to vector<8x16x32xf32>
      %350 = vector.extract_strided_slice %9 {offsets = [40, 0], sizes = [1, 32], strides = [1, 1]} : vector<56x32xf32> to vector<1x32xf32>
      %351 = vector.shape_cast %350 : vector<1x32xf32> to vector<32xf32>
      %352 = vector.shape_cast %351 : vector<32xf32> to vector<1x1x32xf32>
      %353 = vector.broadcast %352 : vector<1x1x32xf32> to vector<8x16x32xf32>
      %354 = arith.mulf %349, %353 : vector<8x16x32xf32>
      %355 = arith.addf %348, %354 : vector<8x16x32xf32>
      %356 = vector.extract_strided_slice %313 {offsets = [6, 0, 0], sizes = [8, 16, 32], strides = [1, 1, 1]} : vector<14x16x32xf32> to vector<8x16x32xf32>
      %357 = vector.extract_strided_slice %9 {offsets = [47, 0], sizes = [1, 32], strides = [1, 1]} : vector<56x32xf32> to vector<1x32xf32>
      %358 = vector.shape_cast %357 : vector<1x32xf32> to vector<32xf32>
      %359 = vector.shape_cast %358 : vector<32xf32> to vector<1x1x32xf32>
      %360 = vector.broadcast %359 : vector<1x1x32xf32> to vector<8x16x32xf32>
      %361 = arith.mulf %356, %360 : vector<8x16x32xf32>
      %362 = arith.addf %355, %361 : vector<8x16x32xf32>
      %363 = arith.index_cast %57 : i32 to index
      %c6 = arith.constant 6 : index
      %c0_41 = arith.constant 0 : index
      %364 = vector.load %arg6[%363, %c6, %c0_41] : memref<22x22x32xf32, #tpu.memory_space<vmem>>, vector<14x16x32xf32>
      %365 = vector.extract_strided_slice %364 {offsets = [0, 0, 0], sizes = [8, 16, 32], strides = [1, 1, 1]} : vector<14x16x32xf32> to vector<8x16x32xf32>
      %366 = vector.extract_strided_slice %9 {offsets = [6, 0], sizes = [1, 32], strides = [1, 1]} : vector<56x32xf32> to vector<1x32xf32>
      %367 = vector.shape_cast %366 : vector<1x32xf32> to vector<32xf32>
      %368 = vector.shape_cast %367 : vector<32xf32> to vector<1x1x32xf32>
      %369 = vector.broadcast %368 : vector<1x1x32xf32> to vector<8x16x32xf32>
      %370 = arith.mulf %365, %369 : vector<8x16x32xf32>
      %371 = arith.addf %362, %370 : vector<8x16x32xf32>
      %372 = vector.extract_strided_slice %364 {offsets = [1, 0, 0], sizes = [8, 16, 32], strides = [1, 1, 1]} : vector<14x16x32xf32> to vector<8x16x32xf32>
      %373 = vector.extract_strided_slice %9 {offsets = [13, 0], sizes = [1, 32], strides = [1, 1]} : vector<56x32xf32> to vector<1x32xf32>
      %374 = vector.shape_cast %373 : vector<1x32xf32> to vector<32xf32>
      %375 = vector.shape_cast %374 : vector<32xf32> to vector<1x1x32xf32>
      %376 = vector.broadcast %375 : vector<1x1x32xf32> to vector<8x16x32xf32>
      %377 = arith.mulf %372, %376 : vector<8x16x32xf32>
      %378 = arith.addf %371, %377 : vector<8x16x32xf32>
      %379 = vector.extract_strided_slice %364 {offsets = [2, 0, 0], sizes = [8, 16, 32], strides = [1, 1, 1]} : vector<14x16x32xf32> to vector<8x16x32xf32>
      %380 = vector.extract_strided_slice %9 {offsets = [20, 0], sizes = [1, 32], strides = [1, 1]} : vector<56x32xf32> to vector<1x32xf32>
      %381 = vector.shape_cast %380 : vector<1x32xf32> to vector<32xf32>
      %382 = vector.shape_cast %381 : vector<32xf32> to vector<1x1x32xf32>
      %383 = vector.broadcast %382 : vector<1x1x32xf32> to vector<8x16x32xf32>
      %384 = arith.mulf %379, %383 : vector<8x16x32xf32>
      %385 = arith.addf %378, %384 : vector<8x16x32xf32>
      %386 = vector.extract_strided_slice %364 {offsets = [3, 0, 0], sizes = [8, 16, 32], strides = [1, 1, 1]} : vector<14x16x32xf32> to vector<8x16x32xf32>
      %387 = vector.extract_strided_slice %9 {offsets = [27, 0], sizes = [1, 32], strides = [1, 1]} : vector<56x32xf32> to vector<1x32xf32>
      %388 = vector.shape_cast %387 : vector<1x32xf32> to vector<32xf32>
      %389 = vector.shape_cast %388 : vector<32xf32> to vector<1x1x32xf32>
      %390 = vector.broadcast %389 : vector<1x1x32xf32> to vector<8x16x32xf32>
      %391 = arith.mulf %386, %390 : vector<8x16x32xf32>
      %392 = arith.addf %385, %391 : vector<8x16x32xf32>
      %393 = vector.extract_strided_slice %364 {offsets = [4, 0, 0], sizes = [8, 16, 32], strides = [1, 1, 1]} : vector<14x16x32xf32> to vector<8x16x32xf32>
      %394 = vector.extract_strided_slice %9 {offsets = [34, 0], sizes = [1, 32], strides = [1, 1]} : vector<56x32xf32> to vector<1x32xf32>
      %395 = vector.shape_cast %394 : vector<1x32xf32> to vector<32xf32>
      %396 = vector.shape_cast %395 : vector<32xf32> to vector<1x1x32xf32>
      %397 = vector.broadcast %396 : vector<1x1x32xf32> to vector<8x16x32xf32>
      %398 = arith.mulf %393, %397 : vector<8x16x32xf32>
      %399 = arith.addf %392, %398 : vector<8x16x32xf32>
      %400 = vector.extract_strided_slice %364 {offsets = [5, 0, 0], sizes = [8, 16, 32], strides = [1, 1, 1]} : vector<14x16x32xf32> to vector<8x16x32xf32>
      %401 = vector.extract_strided_slice %9 {offsets = [41, 0], sizes = [1, 32], strides = [1, 1]} : vector<56x32xf32> to vector<1x32xf32>
      %402 = vector.shape_cast %401 : vector<1x32xf32> to vector<32xf32>
      %403 = vector.shape_cast %402 : vector<32xf32> to vector<1x1x32xf32>
      %404 = vector.broadcast %403 : vector<1x1x32xf32> to vector<8x16x32xf32>
      %405 = arith.mulf %400, %404 : vector<8x16x32xf32>
      %406 = arith.addf %399, %405 : vector<8x16x32xf32>
      %407 = vector.extract_strided_slice %364 {offsets = [6, 0, 0], sizes = [8, 16, 32], strides = [1, 1, 1]} : vector<14x16x32xf32> to vector<8x16x32xf32>
      %408 = vector.extract_strided_slice %9 {offsets = [48, 0], sizes = [1, 32], strides = [1, 1]} : vector<56x32xf32> to vector<1x32xf32>
      %409 = vector.shape_cast %408 : vector<1x32xf32> to vector<32xf32>
      %410 = vector.shape_cast %409 : vector<32xf32> to vector<1x1x32xf32>
      %411 = vector.broadcast %410 : vector<1x1x32xf32> to vector<8x16x32xf32>
      %412 = arith.mulf %407, %411 : vector<8x16x32xf32>
      %413 = arith.addf %406, %412 : vector<8x16x32xf32>
      %414 = vector.shape_cast %11 : vector<32xf32> to vector<1x1x32xf32>
      %415 = vector.broadcast %414 : vector<1x1x32xf32> to vector<8x16x32xf32>
      %416 = arith.addf %413, %415 : vector<8x16x32xf32>
      %417 = vector.shape_cast %416 : vector<8x16x32xf32> to vector<128x32xf32>
      %cst_42 = arith.constant dense<0.000000e+00> : vector<128xf32>
      %418 = vector.multi_reduction <add>, %417, %cst_42 [1] : vector<128x32xf32> to vector<128xf32>
      %419 = vector.shape_cast %418 : vector<128xf32> to vector<128x1xf32>
      %cst_43 = arith.constant 3.200000e+01 : f32
      %420 = vector.broadcast %cst_43 : f32 to vector<128x1xf32>
      %421 = arith.divf %419, %420 : vector<128x1xf32>
      %422 = vector.broadcast %421 : vector<128x1xf32> to vector<128x32xf32>
      %423 = arith.subf %417, %422 : vector<128x32xf32>
      %424 = arith.mulf %423, %423 : vector<128x32xf32>
      %cst_44 = arith.constant dense<0.000000e+00> : vector<128xf32>
      %425 = vector.multi_reduction <add>, %424, %cst_44 [1] : vector<128x32xf32> to vector<128xf32>
      %426 = vector.shape_cast %425 : vector<128xf32> to vector<128x1xf32>
      %cst_45 = arith.constant 3.200000e+01 : f32
      %427 = vector.broadcast %cst_45 : f32 to vector<128x1xf32>
      %428 = arith.divf %426, %427 : vector<128x1xf32>
      %cst_46 = arith.constant 9.99999997E-7 : f32
      %429 = vector.broadcast %cst_46 : f32 to vector<128x1xf32>
      %430 = arith.addf %428, %429 : vector<128x1xf32>
      %431 = math.rsqrt %430 : vector<128x1xf32>
      %432 = vector.broadcast %431 : vector<128x1xf32> to vector<128x32xf32>
      %433 = arith.mulf %423, %432 : vector<128x32xf32>
      %434 = vector.shape_cast %13 : vector<32xf32> to vector<1x32xf32>
      %435 = vector.broadcast %434 : vector<1x32xf32> to vector<128x32xf32>
      %436 = arith.mulf %433, %435 : vector<128x32xf32>
      %437 = vector.shape_cast %15 : vector<32xf32> to vector<1x32xf32>
      %438 = vector.broadcast %437 : vector<1x32xf32> to vector<128x32xf32>
      %439 = arith.addf %436, %438 : vector<128x32xf32>
      %c128_i32 = arith.constant 128 : i32
      %440 = arith.muli %55, %c128_i32 : i32
      %441 = tpu.assume_multiple %440, 128 : i32
      %442 = arith.truncf %439 : vector<128x32xf32> to vector<128x32xbf16>
      %443 = arith.index_cast %441 : i32 to index
      %c0_47 = arith.constant 0 : index
      %444 = vector.load %arg7[%443, %c0_47] : memref<256x32xbf16, #tpu.memory_space<vmem>>, vector<128x32xbf16>
      tpu.vector_store %arg7[%443, %c0_47], %442 {strides = array<i32>} : memref<256x32xbf16, #tpu.memory_space<vmem>>, vector<128x32xbf16>,
    }
    %c2_i32_11 = arith.constant 2 : i32
    %c0_12 = arith.constant 0 : index
    %c0_13 = arith.constant 0 : index
    %17 = vector.load %arg7[%c0_12, %c0_13] : memref<256x32xbf16, #tpu.memory_space<vmem>>, vector<256x32xbf16>
    %c0_14 = arith.constant 0 : index
    %c0_15 = arith.constant 0 : index
    %18 = vector.load %arg3[%c0_14, %c0_15] : memref<48x64xbf16, #tpu.memory_space<vmem>>, vector<32x64xbf16>
    %cst_16 = arith.constant dense<0.000000e+00> : vector<256x64xf32>
    %19 = tpu.matmul %17, %18, %cst_16 {dimension_numbers = #tpu.dot_dimension_numbers<[1], [0], [0], [1], [0, 0, 1, 1], [], []>} : vector<256x32xbf16>, vector<32x64xbf16>, vector<256x64xf32> -> vector<256x64xf32>
    %c32 = arith.constant 32 : index
    %c0_17 = arith.constant 0 : index
    %20 = vector.load %arg3[%c32, %c0_17] : memref<48x64xbf16, #tpu.memory_space<vmem>>, vector<1x64xbf16>
    %21 = vector.shape_cast %20 : vector<1x64xbf16> to vector<64xbf16>
    %22 = arith.extf %21 : vector<64xbf16> to vector<64xf32>
    %23 = vector.shape_cast %22 : vector<64xf32> to vector<1x64xf32>
    %24 = vector.broadcast %23 : vector<1x64xf32> to vector<256x64xf32>
    %25 = arith.addf %19, %24 : vector<256x64xf32>
    %cst_18 = arith.constant 5.000000e-01 : f32
    %26 = vector.broadcast %cst_18 : f32 to vector<256x64xf32>
    %27 = arith.mulf %26, %25 : vector<256x64xf32>
    %cst_19 = arith.constant 4.471500e-02 : f32
    %28 = vector.broadcast %cst_19 : f32 to vector<256x64xf32>
    %29 = arith.mulf %28, %25 : vector<256x64xf32>
    %30 = arith.mulf %29, %25 : vector<256x64xf32>
    %31 = arith.mulf %30, %25 : vector<256x64xf32>
    %32 = arith.addf %25, %31 : vector<256x64xf32>
    %cst_20 = arith.constant 0.797884583 : f32
    %33 = vector.broadcast %cst_20 : f32 to vector<256x64xf32>
    %34 = arith.mulf %33, %32 : vector<256x64xf32>
    %35 = math.tanh %34 : vector<256x64xf32>
    %cst_21 = arith.constant 1.000000e+00 : f32
    %36 = vector.broadcast %cst_21 : f32 to vector<256x64xf32>
    %37 = arith.addf %36, %35 : vector<256x64xf32>
    %38 = arith.mulf %27, %37 : vector<256x64xf32>
    %39 = arith.truncf %38 : vector<256x64xf32> to vector<256x64xbf16>
    %c0_22 = arith.constant 0 : index
    %c0_23 = arith.constant 0 : index
    %40 = vector.load %arg8[%c0_22, %c0_23] : memref<256x32xbf16, #tpu.memory_space<vmem>>, vector<256x32xbf16>
    %41 = tpu.concatenate %39, %40 in 1 : vector<256x64xbf16>, vector<256x32xbf16> -> vector<256x96xbf16>
    %c0_24 = arith.constant 0 : index
    %c0_25 = arith.constant 0 : index
    %42 = vector.load %arg4[%c0_24, %c0_25] : memref<112x16xbf16, #tpu.memory_space<vmem>>, vector<96x16xbf16>
    %cst_26 = arith.constant dense<0.000000e+00> : vector<256x16xf32>
    %43 = tpu.matmul %41, %42, %cst_26 {dimension_numbers = #tpu.dot_dimension_numbers<[1], [0], [0], [1], [0, 0, 1, 1], [], []>} : vector<256x96xbf16>, vector<96x16xbf16>, vector<256x16xf32> -> vector<256x16xf32>
    %c96 = arith.constant 96 : index
    %c0_27 = arith.constant 0 : index
    %44 = vector.load %arg4[%c96, %c0_27] : memref<112x16xbf16, #tpu.memory_space<vmem>>, vector<1x16xbf16>
    %45 = vector.shape_cast %44 : vector<1x16xbf16> to vector<16xbf16>
    %46 = arith.extf %45 : vector<16xbf16> to vector<16xf32>
    %47 = vector.shape_cast %46 : vector<16xf32> to vector<1x16xf32>
    %48 = vector.broadcast %47 : vector<1x16xf32> to vector<256x16xf32>
    %49 = arith.addf %43, %48 : vector<256x16xf32>
    %50 = tpu.transpose %49, [1, 0] : vector<256x16xf32> -> vector<16x256xf32>
    %c0_28 = arith.constant 0 : index
    %c0_29 = arith.constant 0 : index
    %c0_30 = arith.constant 0 : index
    %51 = vector.load %arg5[%c0_28, %c0_29, %c0_30] : memref<1x16x256xf32, #tpu.memory_space<vmem>>, vector<1x16x256xf32>
    %52 = vector.shape_cast %51 : vector<1x16x256xf32> to vector<16x256xf32>
    %53 = vector.shape_cast %50 : vector<16x256xf32> to vector<1x16x256xf32>
    tpu.vector_store %arg5[%c0_28, %c0_29, %c0_30], %53 {strides = array<i32>} : memref<1x16x256xf32, #tpu.memory_space<vmem>>, vector<1x16x256xf32>,
    return
  }
  func.func @transform_0(%arg0: i32) -> (i32, i32, i32) {
    %c0_i32 = arith.constant 0 : i32
    %c0_i32_0 = arith.constant 0 : i32
    %c0_i32_1 = arith.constant 0 : i32
    return %arg0, %c0_i32, %c0_i32_0 : i32, i32, i32
  }
  func.func @transform_1(%arg0: i32) -> (i32, i32) {
    %c0_i32 = arith.constant 0 : i32
    %c0_i32_0 = arith.constant 0 : i32
    %c0_i32_1 = arith.constant 0 : i32
    return %c0_i32, %c0_i32_0 : i32, i32
  }
  func.func @transform_2(%arg0: i32) -> (i32, i32) {
    %c0_i32 = arith.constant 0 : i32
    %c0_i32_0 = arith.constant 0 : i32
    %c0_i32_1 = arith.constant 0 : i32
    return %c0_i32, %c0_i32_0 : i32, i32
  }
  func.func @transform_3(%arg0: i32) -> (i32, i32) {
    %c0_i32 = arith.constant 0 : i32
    %c0_i32_0 = arith.constant 0 : i32
    %c0_i32_1 = arith.constant 0 : i32
    return %c0_i32, %c0_i32_0 : i32, i32
  }
  func.func @transform_4(%arg0: i32) -> (i32, i32, i32) {
    %c0_i32 = arith.constant 0 : i32
    %c0_i32_0 = arith.constant 0 : i32
    %c0_i32_1 = arith.constant 0 : i32
    return %arg0, %c0_i32, %c0_i32_0 : i32, i32, i32
  }
}

</mosaic_0001>

<bundles_post_ra>
// kernel: convnext_block.1
= control target key start
LH: loop header
LB: loop body
LE: loop exit
PB: predicated region body
PF: predicated region fallthrough
CT: control target
= control target key end

     0   :  { %s4724_s15 = smov 0   ;;  %s8495_s0 = inlined_call_operand.vmem [shape: f32[2,32,256], index: 0, kind: input, shape index: {}]   ;;  %s8496_s1 = inlined_call_operand.vmem [shape: f32[56,32], index: 1, kind: input, shape index: {}]   ;;  %s8497_s2 = inlined_call_operand.vmem [shape: bf16[48,64], index: 2, kind: input, shape index: {}]   ;;  %s8498_s3 = inlined_call_operand.vmem [shape: bf16[112,16], index: 3, kind: input, shape index: {}]   ;;  %s8499_s4 = inlined_call_operand.vmem [shape: f32[2,16,256], index: 4, kind: output, shape index: {}]  }
   0x1 LB: > { %s4067_s16 = sadd.s32 4294967295, %s4691_s15   ;;  %p4071_p0 = scmp.ge.s32.totalorder %s4691_s15, 1  ;;  %s4691_s15 = sphi %s4724_s15, %s14_s15  }
   0x2   : > { %p162_p1 = scmp.lt.s32.totalorder %s4691_s15, 3 }
   0x4   : > { %p163_p2 = pnand %p4071_p0, %p162_p1 }
   0x6   : > { %166 = sbr.rel (%p163_p2) target bundleno = 1628 (0x65c), region = 36 }
   0xb   : > { %p4734_p3 = scmp.lt.s32.totalorder %s4067_s16, 1  ;;  %vm432_vm0 = vcmask 261120   ;;  %v4697_v0 = vmov 0.0   ;;  %vm435_vm1 = vcmask 259072   ;;  %v4895_v9 = vld [vmem:[%s8496_s1] sm:$0xff]  ;;  %v4900_v10 = vld [vmem:[%s8496_s1 + $0x8] sm:$0xff] }
   0xc   : > { %467 = vst.msk [vmem:[#allocation2 + $0x108] sm:$0xff] %vm432_vm0, %v4697_v0  ;;  %468 = vst.msk [vmem:[#allocation2 + $0x110] sm:$0xff] %vm432_vm0, %v4697_v0  ;;  %v4905_v11 = vld [vmem:[%s8496_s1 + $0x10] sm:$0xff]  ;;  %v4910_v12 = vld [vmem:[%s8496_s1 + $0x18] sm:$0xff]  ;;  %vm399_vm2 = vcmask 257024   ;;  %s4991_s14 = smov 0  }
   0xd   : > { %433 = vst.msk [vmem:[#allocation2] sm:$0xff] %vm432_vm0, %v4697_v0  ;;  %434 = vst.msk [vmem:[#allocation2 + $0x8] sm:$0xff] %vm432_vm0, %v4697_v0  ;;  %s10121_s16 = smov (!%p4734_p3, %s4067_s16), 1  ;;  %v4915_v13 = vld [vmem:[%s8496_s1 + $0x20] sm:$0xff]  ;;  %v4920_v14 = vld [vmem:[%s8496_s1 + $0x28] sm:$0xff] }
   0xe   : > { %437 = vst.msk [vmem:[#allocation2 + $0x18] sm:$0xff] %vm432_vm0, %v4697_v0  ;;  %438 = vst.msk [vmem:[#allocation2 + $0x20] sm:$0xff] %vm432_vm0, %v4697_v0  ;;  %s4202_s18 = sshll.u32 %s10121_s16, 6  ;;  %s4203_s19 = sshll.u32 %s10121_s16, 5  ;;  %v4925_v15 = vld [vmem:[%s8496_s1 + $0x30] sm:$0xff] }
   0xf   : > { %440 = vst.msk [vmem:[#allocation2 + $0x30] sm:$0xff] %vm432_vm0, %v4697_v0  ;;  %441 = vst.msk [vmem:[#allocation2 + $0x38] sm:$0xff] %vm432_vm0, %v4697_v0  ;;  %s4833_s22 = scalar_lea.vmem %s8495_s0, %s4202_s18  ;;  %s4838_s25 = scalar_lea.vmem %s8499_s4, %s4203_s19 }
  0x10   : > { %443 = vst.msk [vmem:[#allocation2 + $0x48] sm:$0xff] %vm432_vm0, %v4697_v0  ;;  %444 = vst.msk [vmem:[#allocation2 + $0x50] sm:$0xff] %vm432_vm0, %v4697_v0  ;;  %v200_v1 = vld [vmem:[%s4833_s22 + $0x8] sm:$0xff]  ;;  %v199_v2 = vld [vmem:[%s4833_s22] sm:$0xff] }
  0x11   : > { %446 = vst.msk [vmem:[#allocation2 + $0x60] sm:$0xff] %vm432_vm0, %v4697_v0  ;;  %447 = vst.msk [vmem:[#allocation2 + $0x68] sm:$0xff] %vm432_vm0, %v4697_v0  ;;  %239 = vxpose.xlu1.b32.start [1/4] (short) %v200_v1, 128  ;;  %207 = vxpose.xlu0.b32.start [1/4] (short) %v199_v2, 128  ;;  %v202_v3 = vld [vmem:[%s4833_s22 + $0x18] sm:$0xff]  ;;  %v201_v4 = vld [vmem:[%s4833_s22 + $0x10] sm:$0xff] }
  0x12   : > { %449 = vst.msk [vmem:[#allocation2 + $0x78] sm:$0xff] %vm432_vm0, %v4697_v0  ;;  %450 = vst.msk [vmem:[#allocation2 + $0x80] sm:$0xff] %vm432_vm0, %v4697_v0  ;;  %v204_v5 = vld [vmem:[%s4833_s22 + $0x28] sm:$0xff]  ;;  %v203_v6 = vld [vmem:[%s4833_s22 + $0x20] sm:$0xff] }
  0x13   : > { %452 = vst.msk [vmem:[#allocation2 + $0x90] sm:$0xff] %vm432_vm0, %v4697_v0  ;;  %453 = vst.msk [vmem:[#allocation2 + $0x98] sm:$0xff] %vm432_vm0, %v4697_v0  ;;  %v206_v7 = vld [vmem:[%s4833_s22 + $0x38] sm:$0xff]  ;;  %v205_v8 = vld [vmem:[%s4833_s22 + $0x30] sm:$0xff] }
  0x14   : > { %455 = vst.msk [vmem:[#allocation2 + $0xa8] sm:$0xff] %vm432_vm0, %v4697_v0  ;;  %456 = vst.msk [vmem:[#allocation2 + $0xb0] sm:$0xff] %vm432_vm0, %v4697_v0 }
  0x15   : > { %458 = vst.msk [vmem:[#allocation2 + $0xc0] sm:$0xff] %vm432_vm0, %v4697_v0  ;;  %459 = vst.msk [vmem:[#allocation2 + $0xc8] sm:$0xff] %vm432_vm0, %v4697_v0  ;;  %240 = vxpose.xlu1.b32.cont [2/4] (short) %v202_v3, 128  ;;  %208 = vxpose.xlu0.b32.cont [2/4] (short) %v201_v4, 128 }
  0x16   : > { %461 = vst.msk [vmem:[#allocation2 + $0xd8] sm:$0xff] %vm432_vm0, %v4697_v0  ;;  %462 = vst.msk [vmem:[#allocation2 + $0xe0] sm:$0xff] %vm432_vm0, %v4697_v0 }
  0x17   : > { %464 = vst.msk [vmem:[#allocation2 + $0xf0] sm:$0xff] %vm432_vm0, %v4697_v0  ;;  %465 = vst.msk [vmem:[#allocation2 + $0xf8] sm:$0xff] %vm432_vm0, %v4697_v0 }
  0x18   : > { %470 = vst.msk [vmem:[#allocation2 + $0x120] sm:$0xff] %vm432_vm0, %v4697_v0  ;;  %471 = vst.msk [vmem:[#allocation2 + $0x128] sm:$0xff] %vm432_vm0, %v4697_v0 }
  0x19   : > { %473 = vst.msk [vmem:[#allocation2 + $0x138] sm:$0xff] %vm432_vm0, %v4697_v0  ;;  %474 = vst.msk [vmem:[#allocation2 + $0x140] sm:$0xff] %vm432_vm0, %v4697_v0  ;;  %241 = vxpose.xlu1.b32.cont [3/4] (short) %v204_v5, 128  ;;  %209 = vxpose.xlu0.b32.cont [3/4] (short) %v203_v6, 128 }
  0x1a   : > { %476 = vst.msk [vmem:[#allocation2 + $0x150] sm:$0xff] %vm432_vm0, %v4697_v0  ;;  %477 = vst.msk [vmem:[#allocation2 + $0x158] sm:$0xff] %vm432_vm0, %v4697_v0 }
  0x1b   : > { %479 = vst.msk [vmem:[#allocation2 + $0x168] sm:$0xff] %vm432_vm0, %v4697_v0  ;;  %480 = vst.msk [vmem:[#allocation2 + $0x170] sm:$0xff] %vm432_vm0, %v4697_v0 }
  0x1c   : > { %482 = vst.msk [vmem:[#allocation2 + $0x180] sm:$0xff] %vm432_vm0, %v4697_v0  ;;  %483 = vst.msk [vmem:[#allocation2 + $0x188] sm:$0xff] %vm432_vm0, %v4697_v0 }
  0x1d   : > { %485 = vst.msk [vmem:[#allocation2 + $0x198] sm:$0xff] %vm432_vm0, %v4697_v0  ;;  %486 = vst.msk [vmem:[#allocation2 + $0x1a0] sm:$0xff] %vm432_vm0, %v4697_v0  ;;  %242 = vxpose.xlu1.b32.end [4/4] (short) %v206_v7, 128  ;;  %210 = vxpose.xlu0.b32.end [4/4] (short) %v205_v8, 128 }
  0x1e   : > { %488 = vst.msk [vmem:[#allocation2 + $0x1b0] sm:$0xff] %vm432_vm0, %v4697_v0  ;;  %489 = vst.msk [vmem:[#allocation2 + $0x1b8] sm:$0xff] %vm432_vm0, %v4697_v0 }
  0x1f   : > { %491 = vst.msk [vmem:[#allocation2 + $0x1c8] sm:$0xff] %vm432_vm0, %v4697_v0  ;;  %492 = vst.msk [vmem:[#allocation2 + $0x1d0] sm:$0xff] %vm432_vm0, %v4697_v0 }
  0x20   : > { %494 = vst.msk [vmem:[#allocation2 + $0x1e0] sm:$0xff] %vm432_vm0, %v4697_v0  ;;  %495 = vst.msk [vmem:[#allocation2 + $0x1e8] sm:$0xff] %vm432_vm0, %v4697_v0 }
  0x21   : > { %497 = vst.msk [vmem:[#allocation2 + $0x1f8] sm:$0xff] %vm432_vm0, %v4697_v0  ;;  %498 = vst.msk [vmem:[#allocation2 + $0x200] sm:$0xff] %vm432_vm0, %v4697_v0 }
  0x22   : > { %436 = vst.msk [vmem:[#allocation2 + $0x10] sm:$0x3f] %vm435_vm1, %v4697_v0  ;;  %439 = vst.msk [vmem:[#allocation2 + $0x28] sm:$0x3f] %vm435_vm1, %v4697_v0 }
  0x23   : > { %442 = vst.msk [vmem:[#allocation2 + $0x40] sm:$0x3f] %vm435_vm1, %v4697_v0  ;;  %469 = vst.msk [vmem:[#allocation2 + $0x118] sm:$0x3f] %vm435_vm1, %v4697_v0 }
  0x24   : > { %493 = vst.msk [vmem:[#allocation2 + $0x1d8] sm:$0x3f] %vm435_vm1, %v4697_v0  ;;  %496 = vst.msk [vmem:[#allocation2 + $0x1f0] sm:$0x3f] %vm435_vm1, %v4697_v0 }
  0x25   : > { %499 = vst.msk [vmem:[#allocation2 + $0x208] sm:$0x3f] %vm435_vm1, %v4697_v0  ;;  %445 = vst.msk [vmem:[#allocation2 + $0x58] sm:$0x3f] %vm435_vm1, %v4697_v0 }
  0x26   : > { %448 = vst.msk [vmem:[#allocation2 + $0x70] sm:$0x3f] %vm435_vm1, %v4697_v0  ;;  %451 = vst.msk [vmem:[#allocation2 + $0x88] sm:$0x3f] %vm435_vm1, %v4697_v0 }
  0x27   : > { %454 = vst.msk [vmem:[#allocation2 + $0xa0] sm:$0x3f] %vm435_vm1, %v4697_v0  ;;  %457 = vst.msk [vmem:[#allocation2 + $0xb8] sm:$0x3f] %vm435_vm1, %v4697_v0 }
  0x28   : > { %460 = vst.msk [vmem:[#allocation2 + $0xd0] sm:$0x3f] %vm435_vm1, %v4697_v0  ;;  %463 = vst.msk [vmem:[#allocation2 + $0xe8] sm:$0x3f] %vm435_vm1, %v4697_v0 }
  0x29   : > { %466 = vst.msk [vmem:[#allocation2 + $0x100] sm:$0x3f] %vm435_vm1, %v4697_v0  ;;  %472 = vst.msk [vmem:[#allocation2 + $0x130] sm:$0x3f] %vm435_vm1, %v4697_v0 }
  0x2a   : > { %475 = vst.msk [vmem:[#allocation2 + $0x148] sm:$0x3f] %vm435_vm1, %v4697_v0  ;;  %478 = vst.msk [vmem:[#allocation2 + $0x160] sm:$0x3f] %vm435_vm1, %v4697_v0 }
  0x2b   : > { %481 = vst.msk [vmem:[#allocation2 + $0x178] sm:$0x3f] %vm435_vm1, %v4697_v0  ;;  %484 = vst.msk [vmem:[#allocation2 + $0x190] sm:$0x3f] %vm435_vm1, %v4697_v0 }
  0x2c   : > { %487 = vst.msk [vmem:[#allocation2 + $0x1a8] sm:$0x3f] %vm435_vm1, %v4697_v0  ;;  %490 = vst.msk [vmem:[#allocation2 + $0x1c0] sm:$0x3f] %vm435_vm1, %v4697_v0 }
  0x2d   : > { %9089 = vst [vmem:[#allocation5_spill] sm:$0xff] %v4895_v9  ;;  %9090 = vst [vmem:[#allocation6_spill] sm:$0xff] %v4900_v10 }
  0x2e   : > { %9091 = vst [vmem:[#allocation7_spill] sm:$0xff] %v4905_v11  ;;  %9092 = vst [vmem:[#allocation8_spill] sm:$0xff] %v4910_v12 }
  0x2f   : > { %9093 = vst [vmem:[#allocation9_spill] sm:$0xff] %v4915_v13  ;;  %9094 = vst [vmem:[#allocation10_spill] sm:$0xff] %v4920_v14 }
  0x30   : > { %9095 = vst [vmem:[#allocation11_spill] sm:$0xff] %v4925_v15 }
  0x8d   : > { %v255_v16 = vpop.trf.xlu1  ;;  %v223_v17 = vpop.trf.xlu0 }
  0x8e   : > { %v4220_v18 = vpack.c.bf16 %v255_v16, %v255_v16  ;;  %517 = vst.msk [vmem:[#allocation2 + $0x10b] sm:$0xff] %vm432_vm0, %v255_v16  ;;  %v4204_v19 = vpack.c.bf16 %v223_v17, %v223_v17  ;;  %501 = vst.msk [vmem:[#allocation2 + $0x4b] sm:$0xff] %vm432_vm0, %v223_v17 }
  0x90   : > { %416 = vst.msk [vmem:[#allocation4 + $0x40] sm:$0xf] %vm399_vm2, %v4220_v18  ;;  %400 = vst.msk [vmem:[#allocation4] sm:$0xf] %vm399_vm2, %v4204_v19 }
  0x91   : > { %v256_v20 = vpop.trf.xlu1  ;;  %v224_v21 = vpop.trf.xlu0 }
  0x92   : > { %v4221_v22 = vpack.c.bf16 %v256_v20, %v256_v20  ;;  %518 = vst.msk [vmem:[#allocation2 + $0x113] sm:$0xff] %vm432_vm0, %v256_v20  ;;  %v4205_v23 = vpack.c.bf16 %v224_v21, %v224_v21  ;;  %502 = vst.msk [vmem:[#allocation2 + $0x53] sm:$0xff] %vm432_vm0, %v224_v21 }
  0x94   : > { %417 = vst.msk [vmem:[#allocation4 + $0x44] sm:$0xf] %vm399_vm2, %v4221_v22  ;;  %401 = vst.msk [vmem:[#allocation4 + $0x4] sm:$0xf] %vm399_vm2, %v4205_v23 }
  0x95   : > { %v257_v24 = vpop.trf.xlu1  ;;  %v225_v25 = vpop.trf.xlu0 }
  0x96   : > { %v4222_v26 = vpack.c.bf16 %v257_v24, %v257_v24  ;;  %519 = vst.msk [vmem:[#allocation2 + $0x123] sm:$0xff] %vm432_vm0, %v257_v24  ;;  %v4206_v27 = vpack.c.bf16 %v225_v25, %v225_v25  ;;  %503 = vst.msk [vmem:[#allocation2 + $0x63] sm:$0xff] %vm432_vm0, %v225_v25 }
  0x98   : > { %418 = vst.msk [vmem:[#allocation4 + $0x48] sm:$0xf] %vm399_vm2, %v4222_v26  ;;  %402 = vst.msk [vmem:[#allocation4 + $0x8] sm:$0xf] %vm399_vm2, %v4206_v27 }
  0x99   : > { %v258_v28 = vpop.trf.xlu1  ;;  %v226_v29 = vpop.trf.xlu0 }
  0x9a   : > { %v4223_v30 = vpack.c.bf16 %v258_v28, %v258_v28  ;;  %520 = vst.msk [vmem:[#allocation2 + $0x12b] sm:$0xff] %vm432_vm0, %v258_v28  ;;  %v4207_v31 = vpack.c.bf16 %v226_v29, %v226_v29  ;;  %504 = vst.msk [vmem:[#allocation2 + $0x6b] sm:$0xff] %vm432_vm0, %v226_v29 }
  0x9c   : > { %419 = vst.msk [vmem:[#allocation4 + $0x4c] sm:$0xf] %vm399_vm2, %v4223_v30  ;;  %403 = vst.msk [vmem:[#allocation4 + $0xc] sm:$0xf] %vm399_vm2, %v4207_v31 }
  0x9d   : > { %v259_v32 = vpop.trf.xlu1  ;;  %v227_v33 = vpop.trf.xlu0 }
  0x9e   : > { %v4224_v34 = vpack.c.bf16 %v259_v32, %v259_v32  ;;  %521 = vst.msk [vmem:[#allocation2 + $0x13b] sm:$0xff] %vm432_vm0, %v259_v32  ;;  %v4208_v35 = vpack.c.bf16 %v227_v33, %v227_v33  ;;  %505 = vst.msk [vmem:[#allocation2 + $0x7b] sm:$0xff] %vm432_vm0, %v227_v33 }
  0xa0   : > { %420 = vst.msk [vmem:[#allocation4 + $0x50] sm:$0xf] %vm399_vm2, %v4224_v34  ;;  %404 = vst.msk [vmem:[#allocation4 + $0x10] sm:$0xf] %vm399_vm2, %v4208_v35 }
  0xa1   : > { %v260_v36 = vpop.trf.xlu1  ;;  %v228_v37 = vpop.trf.xlu0 }
  0xa2   : > { %v4225_v38 = vpack.c.bf16 %v260_v36, %v260_v36  ;;  %522 = vst.msk [vmem:[#allocation2 + $0x143] sm:$0xff] %vm432_vm0, %v260_v36  ;;  %v4209_v39 = vpack.c.bf16 %v228_v37, %v228_v37  ;;  %506 = vst.msk [vmem:[#allocation2 + $0x83] sm:$0xff] %vm432_vm0, %v228_v37 }
  0xa4   : > { %421 = vst.msk [vmem:[#allocation4 + $0x54] sm:$0xf] %vm399_vm2, %v4225_v38  ;;  %405 = vst.msk [vmem:[#allocation4 + $0x14] sm:$0xf] %vm399_vm2, %v4209_v39 }
  0xa5   : > { %v261_v40 = vpop.trf.xlu1  ;;  %v229_v41 = vpop.trf.xlu0 }
  0xa6   : > { %v4226_v42 = vpack.c.bf16 %v261_v40, %v261_v40  ;;  %523 = vst.msk [vmem:[#allocation2 + $0x153] sm:$0xff] %vm432_vm0, %v261_v40  ;;  %v4210_v43 = vpack.c.bf16 %v229_v41, %v229_v41  ;;  %507 = vst.msk [vmem:[#allocation2 + $0x93] sm:$0xff] %vm432_vm0, %v229_v41 }
  0xa8   : > { %422 = vst.msk [vmem:[#allocation4 + $0x58] sm:$0xf] %vm399_vm2, %v4226_v42  ;;  %406 = vst.msk [vmem:[#allocation4 + $0x18] sm:$0xf] %vm399_vm2, %v4210_v43 }
  0xa9   : > { %v262_v44 = vpop.trf.xlu1  ;;  %v230_v45 = vpop.trf.xlu0 }
  0xaa   : > { %v4227_v46 = vpack.c.bf16 %v262_v44, %v262_v44  ;;  %524 = vst.msk [vmem:[#allocation2 + $0x15b] sm:$0xff] %vm432_vm0, %v262_v44  ;;  %v4211_v47 = vpack.c.bf16 %v230_v45, %v230_v45  ;;  %508 = vst.msk [vmem:[#allocation2 + $0x9b] sm:$0xff] %vm432_vm0, %v230_v45 }
  0xac   : > { %423 = vst.msk [vmem:[#allocation4 + $0x5c] sm:$0xf] %vm399_vm2, %v4227_v46  ;;  %407 = vst.msk [vmem:[#allocation4 + $0x1c] sm:$0xf] %vm399_vm2, %v4211_v47 }
  0xad   : > { %v263_v48 = vpop.trf.xlu1  ;;  %v231_v49 = vpop.trf.xlu0 }
  0xae   : > { %v4228_v50 = vpack.c.bf16 %v263_v48, %v263_v48  ;;  %525 = vst.msk [vmem:[#allocation2 + $0x16b] sm:$0xff] %vm432_vm0, %v263_v48  ;;  %v4212_v51 = vpack.c.bf16 %v231_v49, %v231_v49  ;;  %509 = vst.msk [vmem:[#allocation2 + $0xab] sm:$0xff] %vm432_vm0, %v231_v49 }
  0xb0   : > { %424 = vst.msk [vmem:[#allocation4 + $0x60] sm:$0xf] %vm399_vm2, %v4228_v50  ;;  %408 = vst.msk [vmem:[#allocation4 + $0x20] sm:$0xf] %vm399_vm2, %v4212_v51 }
  0xb1   : > { %v264_v52 = vpop.trf.xlu1  ;;  %v232_v53 = vpop.trf.xlu0 }
  0xb2   : > { %v4229_v54 = vpack.c.bf16 %v264_v52, %v264_v52  ;;  %526 = vst.msk [vmem:[#allocation2 + $0x173] sm:$0xff] %vm432_vm0, %v264_v52  ;;  %v4213_v55 = vpack.c.bf16 %v232_v53, %v232_v53  ;;  %510 = vst.msk [vmem:[#allocation2 + $0xb3] sm:$0xff] %vm432_vm0, %v232_v53 }
  0xb4   : > { %425 = vst.msk [vmem:[#allocation4 + $0x64] sm:$0xf] %vm399_vm2, %v4229_v54  ;;  %409 = vst.msk [vmem:[#allocation4 + $0x24] sm:$0xf] %vm399_vm2, %v4213_v55 }
  0xb5   : > { %v265_v56 = vpop.trf.xlu1  ;;  %v233_v57 = vpop.trf.xlu0 }
  0xb6   : > { %v4230_v58 = vpack.c.bf16 %v265_v56, %v265_v56  ;;  %527 = vst.msk [vmem:[#allocation2 + $0x183] sm:$0xff] %vm432_vm0, %v265_v56  ;;  %v4214_v59 = vpack.c.bf16 %v233_v57, %v233_v57  ;;  %511 = vst.msk [vmem:[#allocation2 + $0xc3] sm:$0xff] %vm432_vm0, %v233_v57 }
  0xb8   : > { %426 = vst.msk [vmem:[#allocation4 + $0x68] sm:$0xf] %vm399_vm2, %v4230_v58  ;;  %410 = vst.msk [vmem:[#allocation4 + $0x28] sm:$0xf] %vm399_vm2, %v4214_v59 }
  0xb9   : > { %v266_v60 = vpop.trf.xlu1  ;;  %v234_v61 = vpop.trf.xlu0 }
  0xba   : > { %v4231_v62 = vpack.c.bf16 %v266_v60, %v266_v60  ;;  %528 = vst.msk [vmem:[#allocation2 + $0x18b] sm:$0xff] %vm432_vm0, %v266_v60  ;;  %v4215_v63 = vpack.c.bf16 %v234_v61, %v234_v61  ;;  %512 = vst.msk [vmem:[#allocation2 + $0xcb] sm:$0xff] %vm432_vm0, %v234_v61 }
  0xbc   : > { %427 = vst.msk [vmem:[#allocation4 + $0x6c] sm:$0xf] %vm399_vm2, %v4231_v62  ;;  %411 = vst.msk [vmem:[#allocation4 + $0x2c] sm:$0xf] %vm399_vm2, %v4215_v63 }
  0xbd   : > { %v267_v0 = vpop.trf.xlu1  ;;  %v235_v1 = vpop.trf.xlu0 }
  0xbe   : > { %v4232_v2 = vpack.c.bf16 %v267_v0, %v267_v0  ;;  %529 = vst.msk [vmem:[#allocation2 + $0x19b] sm:$0xff] %vm432_vm0, %v267_v0  ;;  %v4216_v3 = vpack.c.bf16 %v235_v1, %v235_v1  ;;  %513 = vst.msk [vmem:[#allocation2 + $0xdb] sm:$0xff] %vm432_vm0, %v235_v1 }
  0xc0   : > { %428 = vst.msk [vmem:[#allocation4 + $0x70] sm:$0xf] %vm399_vm2, %v4232_v2  ;;  %412 = vst.msk [vmem:[#allocation4 + $0x30] sm:$0xf] %vm399_vm2, %v4216_v3 }
  0xc1   : > { %v268_v4 = vpop.trf.xlu1  ;;  %v236_v5 = vpop.trf.xlu0 }
  0xc2   : > { %v4233_v6 = vpack.c.bf16 %v268_v4, %v268_v4  ;;  %530 = vst.msk [vmem:[#allocation2 + $0x1a3] sm:$0xff] %vm432_vm0, %v268_v4  ;;  %v4217_v7 = vpack.c.bf16 %v236_v5, %v236_v5  ;;  %514 = vst.msk [vmem:[#allocation2 + $0xe3] sm:$0xff] %vm432_vm0, %v236_v5 }
  0xc4   : > { %429 = vst.msk [vmem:[#allocation4 + $0x74] sm:$0xf] %vm399_vm2, %v4233_v6  ;;  %413 = vst.msk [vmem:[#allocation4 + $0x34] sm:$0xf] %vm399_vm2, %v4217_v7 }
  0xc5   : > { %v269_v8 = vpop.trf.xlu1  ;;  %v237_v16 = vpop.trf.xlu0 }
  0xc6   : > { %v4234_v17 = vpack.c.bf16 %v269_v8, %v269_v8  ;;  %531 = vst.msk [vmem:[#allocation2 + $0x1b3] sm:$0xff] %vm432_vm0, %v269_v8  ;;  %v4218_v18 = vpack.c.bf16 %v237_v16, %v237_v16  ;;  %515 = vst.msk [vmem:[#allocation2 + $0xf3] sm:$0xff] %vm432_vm0, %v237_v16 }
  0xc8   : > { %430 = vst.msk [vmem:[#allocation4 + $0x78] sm:$0xf] %vm399_vm2, %v4234_v17  ;;  %414 = vst.msk [vmem:[#allocation4 + $0x38] sm:$0xf] %vm399_vm2, %v4218_v18 }
  0xc9   : > { %v270_v19 = vpop.trf.xlu1  ;;  %v238_v20 = vpop.trf.xlu0 }
  0xca   : > { %v4235_v21 = vpack.c.bf16 %v270_v19, %v270_v19  ;;  %532 = vst.msk [vmem:[#allocation2 + $0x1bb] sm:$0xff] %vm432_vm0, %v270_v19  ;;  %v4219_v22 = vpack.c.bf16 %v238_v20, %v238_v20  ;;  %516 = vst.msk [vmem:[#allocation2 + $0xfb] sm:$0xff] %vm432_vm0, %v238_v20 }
  0xcc   : > { %431 = vst.msk [vmem:[#allocation4 + $0x7c] sm:$0xf] %vm399_vm2, %v4235_v21  ;;  %415 = vst.msk [vmem:[#allocation4 + $0x3c] sm:$0xf] %vm399_vm2, %v4219_v22 }
  0xcd LB: >> { %v9096_v14 = vld [vmem:[#allocation10_spill] sm:$0xff]  ;;  %v9097_v13 = vld [vmem:[#allocation9_spill] sm:$0xff]  ;;  %v9098_v12 = vld [vmem:[#allocation8_spill] sm:$0xff]  ;;  %v577_v23 = vlaneseq  ;;  %s4109_s16 = smul.u32 192, %s4695_s14  ;;  %s4110_s18 = sshll.u32 %s4695_s14, 7  ;;  %s4695_s14 = sphi %s4991_s14, %s545_s14  }
  0xce   : >> { %v9099_v11 = vld [vmem:[#allocation7_spill] sm:$0xff]  ;;  %v9100_v10 = vld [vmem:[#allocation6_spill] sm:$0xff]  ;;  %v9101_v9 = vld [vmem:[#allocation5_spill] sm:$0xff]  ;;  %s2827_s19 = sshra.s32 %s4110_s18, 3  ;;  %s545_s14 = sadd.s32 1, %s4695_s14  }
  0xcf   : >> { %v578_v24 = vshrl.u32 %v577_v23, 7  ;;  %s5005_s17 = scalar_lea.vmem [#allocation2], %s4109_s16  ;;  %s4127_s20 = sshll.u32 %s2827_s19, 2 }
  0xd0   : >> { %s7978_s21 = scalar_lea.vmem [#allocation3], %s4127_s20  ;;  %p542_p4 = scmp.ge.s32.totalorder %s545_s14, 2  }
  0xd1   : >> { %v4997_v25 = vsub.s32 0, %v578_v24  ;;  %v4999_v26 = vsub.s32 7, %v578_v24  ;;  %v5001_v27 = vsub.s32 6, %v578_v24  ;;  %v5003_v28 = vsub.s32 5, %v578_v24  ;;  %v549_v29 = vld [vmem:[%s5005_s17] sm:$0xff]  ;;  %v5009_v30 = vld [vmem:[%s5005_s17 + $0x18] sm:$0xff] }
  0xd2   : >> { %v5012_v31 = vld [vmem:[%s5005_s17 + $0x30] sm:$0xff]  ;;  %v5014_v32 = vsub.s32 4, %v578_v24  ;;  %v5016_v33 = vsub.s32 3, %v578_v24  ;;  %v5035_v38 = vld [vmem:[%s5005_s17 + $0x48] sm:$0xff]  ;;  %v5037_v39 = vsub.s32 2, %v578_v24  ;;  %v5049_v44 = vld [vmem:[%s5005_s17 + $0x60] sm:$0xff] }
  0xd3   : >> { %9102 = vst [vmem:[#allocation12_spill] sm:$0xff] %v4997_v25  ;;  %9103 = vst [vmem:[#allocation13_spill] sm:$0xff] %v5012_v31  ;;  %v5020_v34 = vrot.slane %v9101_v9, %v4997_v25  ;;  %v5024_v35 = vrot.slane %v9101_v9, %v4999_v26  ;;  %v5028_v36 = vrot.slane %v9100_v10, %v5001_v27  ;;  %v5057_v48 = vsub.s32 1, %v578_v24  ;;  %v5060_v49 = vld [vmem:[%s5005_s17 + $0x78] sm:$0xff]  ;;  %v5069_v53 = vld [vmem:[%s5005_s17 + $0x90] sm:$0xff]  ;;  %s4698_s27 = smov (%p542_p4), 64  }
  0xd4   : >> { %9104 = vst [vmem:[#allocation14_spill] sm:$0xff] %v5016_v33  ;;  %v5032_v37 = vrot.slane %v9099_v11, %v5003_v28  ;;  %9108 = vst [vmem:[#allocation18_spill] sm:$0xff] %v5035_v38  ;;  %v5046_v43 = vrot.slane %v9098_v12, %v5014_v32  ;;  %v5055_v47 = vrot.slane %v9097_v13, %v5016_v33  ;;  %v813_v57 = vld [vmem:[%s5005_s17 + $0x1] sm:$0xff]  ;;  %v5085_v61 = vld [vmem:[%s5005_s17 + $0x19] sm:$0xff]  ;;  %vm3638_vm3 = vcmask (%p542_p4), 523264  }
  0xd5   : >> { %9105 = vst [vmem:[#allocation15_spill] sm:$0xff] %v5024_v35  ;;  %9106 = vst [vmem:[#allocation16_spill] sm:$0xff] %v5028_v36  ;;  %v581_v40 = vmul.f32 %v5020_v34, %v549_v29  ;;  %v601_v41 = vmul.f32 %v5024_v35, %v5009_v30  ;;  %v637_v42 = vmul.f32 %v5028_v36, %v5012_v31  ;;  %v5093_v1 = vld [vmem:[%s5005_s17 + $0x31] sm:$0xff]  ;;  %v5102_v5 = vld [vmem:[%s5005_s17 + $0x49] sm:$0xff]  ;;  %vm3741_vm4 = vcmask (%p542_p4), 785408  }
  0xd6   : >> { %9107 = vst [vmem:[#allocation17_spill] sm:$0xff] %v5032_v37  ;;  %9109 = vst [vmem:[#allocation19_spill] sm:$0xff] %v5037_v39  ;;  %v673_v46 = vmul.f32 %v5032_v37, %v5035_v38  ;;  %v709_v51 = vmul.f32 %v5046_v43, %v5049_v44  ;;  %v5066_v52 = vrot.slane %v9096_v14, %v5037_v39  ;;  %v5111_v16 = vld [vmem:[%s5005_s17 + $0x61] sm:$0xff]  ;;  %v5120_v20 = vld [vmem:[%s5005_s17 + $0x79] sm:$0xff] }
  0xd7   : >> { %9110 = vst [vmem:[#allocation20_spill] sm:$0xff] %v5046_v43  ;;  %9111 = vst [vmem:[#allocation21_spill] sm:$0xff] %v5049_v44  ;;  %v617_v45 = vadd.f32 %v601_v41, %v581_v40  ;;  %v745_v55 = vmul.f32 %v5055_v47, %v5060_v49  ;;  %v5075_v56 = vrot.slane %v9101_v9, %v5057_v48  ;;  %v5129_v24 = vld [vmem:[%s5005_s17 + $0x91] sm:$0xff] }
  0xd8   : >> { %9112 = vst [vmem:[#allocation22_spill] sm:$0xff] %v5055_v47  ;;  %9113 = vst [vmem:[#allocation23_spill] sm:$0xff] %v5060_v49  ;;  %v781_v59 = vmul.f32 %v5066_v52, %v5069_v53  ;;  %v5082_v60 = vrot.slane %v9100_v10, %v4997_v25  ;;  %v5090_v0 = vrot.slane %v9100_v10, %v4999_v26 }
  0xd9   : >> { %v653_v50 = vadd.f32 %v637_v42, %v617_v45  ;;  %9114 = vst [vmem:[#allocation24_spill] sm:$0xff] %v5066_v52  ;;  %9115 = vst [vmem:[#allocation25_spill] sm:$0xff] %v5069_v53  ;;  %v845_v63 = vmul.f32 %v5075_v56, %v813_v57  ;;  %v5099_v4 = vrot.slane %v9099_v11, %v5001_v27  ;;  %v1093_v42 = vld [vmem:[%s5005_s17 + $0x2] sm:$0xff] }
  0xda   : >> { %9116 = vst [vmem:[#allocation26_spill] sm:$0xff] %v5075_v56  ;;  %9117 = vst [vmem:[#allocation27_spill] sm:$0xff] %v5082_v60  ;;  %v881_v3 = vmul.f32 %v5082_v60, %v5085_v61  ;;  %v917_v7 = vmul.f32 %v5090_v0, %v5093_v1  ;;  %v5108_v8 = vrot.slane %v9098_v12, %v5003_v28 }
  0xdb   : >> { %v689_v54 = vadd.f32 %v673_v46, %v653_v50  ;;  %9118 = vst [vmem:[#allocation28_spill] sm:$0xff] %v5090_v0  ;;  %9119 = vst [vmem:[#allocation29_spill] sm:$0xff] %v5099_v4  ;;  %v953_v18 = vmul.f32 %v5099_v4, %v5102_v5  ;;  %v5117_v19 = vrot.slane %v9097_v13, %v5014_v32 }
  0xdc   : >> { %9120 = vst [vmem:[#allocation30_spill] sm:$0xff] %v5102_v5  ;;  %9121 = vst [vmem:[#allocation31_spill] sm:$0xff] %v5108_v8  ;;  %v989_v22 = vmul.f32 %v5108_v8, %v5111_v16  ;;  %v5126_v23 = vrot.slane %v9096_v14, %v5016_v33  ;;  %v5135_v41 = vrot.slane %v9101_v9, %v5037_v39 }
  0xdd   : >> { %v725_v58 = vadd.f32 %v709_v51, %v689_v54  ;;  %9122 = vst [vmem:[#allocation32_spill] sm:$0xff] %v5111_v16  ;;  %9123 = vst [vmem:[#allocation33_spill] sm:$0xff] %v5117_v19  ;;  %v1025_v40 = vmul.f32 %v5117_v19, %v5120_v20  ;;  %v5140_v45 = vrot.slane %v9100_v10, %v5057_v48  ;;  %v5149_v54 = vld [vmem:[%s5005_s17 + $0x1a] sm:$0xff] }
  0xde   : >> { %9124 = vst [vmem:[#allocation34_spill] sm:$0xff] %v5120_v20  ;;  %9125 = vst [vmem:[#allocation35_spill] sm:$0xff] %v5126_v23  ;;  %v5144_v46 = vrot.slane %v9099_v11, %v4997_v25  ;;  %v1061_v51 = vmul.f32 %v5126_v23, %v5129_v24  ;;  %v5156_v57 = vrot.slane %v9099_v11, %v4999_v26 }
  0xdf   : >> { %v761_v62 = vadd.f32 %v745_v55, %v725_v58  ;;  %9126 = vst [vmem:[#allocation36_spill] sm:$0xff] %v5129_v24  ;;  %9127 = vst [vmem:[#allocation37_spill] sm:$0xff] %v5135_v41  ;;  %v5152_v55 = vld [vmem:[%s5005_s17 + $0x32] sm:$0xff]  ;;  %v5160_v58 = vrot.slane %v9098_v12, %v5001_v27  ;;  %v5252_v15 = vrot.slane %v9097_v13, %v5001_v27 }
  0xe0   : >> { %9128 = vst [vmem:[#allocation38_spill] sm:$0xff] %v5140_v45  ;;  %9129 = vst [vmem:[#allocation39_spill] sm:$0xff] %v5144_v46 }
  0xe1   : >> { %v797_v2 = vadd.f32 %v781_v59, %v761_v62  ;;  %9130 = vst [vmem:[#allocation40_spill] sm:$0xff] %v5149_v54  ;;  %9131 = vst [vmem:[#allocation41_spill] sm:$0xff] %v5152_v55  ;;  %v5164_v59 = vmul.f32 %v5075_v56, %v5093_v1  ;;  %v5167_v62 = vld [vmem:[%s5005_s17 + $0x4a] sm:$0xff] }
  0xe2   : >> { %9132 = vst [vmem:[#allocation42_spill] sm:$0xff] %v5156_v57  ;;  %9133 = vst [vmem:[#allocation43_spill] sm:$0xff] %v5160_v58 }
  0xe3   : >> { %v861_v6 = vadd.f32 %v845_v63, %v797_v2  ;;  %9134 = vst [vmem:[#allocation44_spill] sm:$0xff] %v5164_v59  ;;  %9135 = vst [vmem:[#allocation45_spill] sm:$0xff] %v5167_v62  ;;  %v5170_v63 = vld [vmem:[%s5005_s17 + $0x62] sm:$0xff] }
  0xe4   : >> { %9136 = vst [vmem:[#allocation46_spill] sm:$0xff] %v5170_v63  ;;  %v1373_v59 = vld [vmem:[%s5005_s17 + $0x3] sm:$0xff]  ;;  %9151 = vst [vmem:[#allocation61_spill] sm:$0xff] %v5252_v15 }
  0xe5   : >> { %v897_v17 = vadd.f32 %v881_v3, %v861_v6  ;;  %v1125_v3 = vmul.f32 %v5135_v41, %v1093_v42  ;;  %v5175_v6 = vrot.slane %v9097_v13, %v5003_v28 }
  0xe7   : >> { %v933_v21 = vadd.f32 %v917_v7, %v897_v17  ;;  %9137 = vst [vmem:[#allocation47_spill] sm:$0xff] %v5175_v6  ;;  %v5179_v7 = vrot.slane %v9096_v14, %v5014_v32  ;;  %v5182_v17 = vld [vmem:[%s5005_s17 + $0x7a] sm:$0xff] }
  0xe8   : >> { %9139 = vst [vmem:[#allocation49_spill] sm:$0xff] %v5182_v17 }
  0xe9   : >> { %v969_v29 = vadd.f32 %v953_v18, %v933_v21  ;;  %9138 = vst [vmem:[#allocation48_spill] sm:$0xff] %v5179_v7  ;;  %v5185_v18 = vld [vmem:[%s5005_s17 + $0x92] sm:$0xff]  ;;  %v5189_v21 = vmul.f32 %v5135_v41, %v5152_v55 }
  0xea   : >> { %9140 = vst [vmem:[#allocation50_spill] sm:$0xff] %v5185_v18 }
  0xeb   : >> { %v1005_v50 = vadd.f32 %v989_v22, %v969_v29  ;;  %9141 = vst [vmem:[#allocation51_spill] sm:$0xff] %v5189_v21  ;;  %v1161_v22 = vmul.f32 %v5140_v45, %v5149_v54  ;;  %v1197_v29 = vmul.f32 %v5144_v46, %v5152_v55  ;;  %v1269_v21 = vmul.f32 %v5160_v58, %v5170_v63 }
  0xec   : >> { %v5206_v45 = vrot.slane %v9100_v10, %v5037_v39  ;;  %v5210_v46 = vrot.slane %v9099_v11, %v5057_v48  ;;  %v583_v55 = vmul.f32 %v5020_v34, %v5009_v30  ;;  %v5222_v63 = vmul.f32 %v5179_v7, %v5185_v18  ;;  %v5228_v30 = vld [vmem:[%s5005_s17 + $0x33] sm:$0xff] }
  0xed   : >> { %v1041_v2 = vadd.f32 %v1025_v40, %v1005_v50  ;;  %v5197_v40 = vrot.slane %v9101_v9, %v5016_v33  ;;  %v1233_v50 = vmul.f32 %v5156_v57, %v5167_v62  ;;  %v1305_v57 = vmul.f32 %v5175_v6, %v5182_v17  ;;  %v5225_v62 = vld [vmem:[%s5005_s17 + $0x1b] sm:$0xff]  ;;  %9146 = vst [vmem:[#allocation56_spill] sm:$0xff] %v5228_v30 }
  0xee   : >> { %9143 = vst [vmem:[#allocation53_spill] sm:$0xff] %v5206_v45  ;;  %9144 = vst [vmem:[#allocation54_spill] sm:$0xff] %v5210_v46  ;;  %v675_v7 = vmul.f32 %v5032_v37, %v5049_v44  ;;  %v5248_v17 = vrot.slane %v9098_v12, %v4999_v26  ;;  %v5279_v54 = vmul.f32 %v5210_v46, %v5228_v30 }
  0xef   : >> { %9142 = vst [vmem:[#allocation52_spill] sm:$0xff] %v5197_v40  ;;  %v1077_v42 = vadd.f32 %v1061_v51, %v1041_v2  ;;  %v603_v51 = vmul.f32 %v5024_v35, %v5012_v31  ;;  %v639_v2 = vmul.f32 %v5028_v36, %v5035_v38  ;;  %9145 = vst [vmem:[#allocation55_spill] sm:$0xff] %v5225_v62  ;;  %v5235_v38 = vld [vmem:[%s5005_s17 + $0x4b] sm:$0xff] }
  0xf0   : >> { %v5232_v31 = vrot.slane %v9098_v12, %v4997_v25  ;;  %9148 = vst [vmem:[#allocation58_spill] sm:$0xff] %v5235_v38  ;;  %9150 = vst [vmem:[#allocation60_spill] sm:$0xff] %v5248_v17 }
  0xf1   : >> { %v1141_v58 = vadd.f32 %v1125_v3, %v1077_v42  ;;  %v5238_v3 = vmul.f32 %v5197_v40, %v1373_v59  ;;  %v5242_v42 = vmul.f32 %v5197_v40, %v5228_v30  ;;  %v619_v6 = vadd.f32 %v603_v51, %v583_v55  ;;  %v5262_v55 = vld [vmem:[%s5005_s17 + $0x7b] sm:$0xff]  ;;  %v5265_v51 = vld [vmem:[%s5005_s17 + $0x93] sm:$0xff] }
  0xf2   : >> { %9147 = vst [vmem:[#allocation57_spill] sm:$0xff] %v5232_v31  ;;  %v5256_v59 = vrot.slane %v9096_v14, %v5003_v28  ;;  %9154 = vst [vmem:[#allocation64_spill] sm:$0xff] %v5262_v55  ;;  %v711_v40 = vmul.f32 %v5046_v43, %v5060_v49  ;;  %v5283_v23 = vmul.f32 %v5232_v31, %v5235_v38 }
  0xf3   : >> { %9149 = vst [vmem:[#allocation59_spill] sm:$0xff] %v5242_v42  ;;  %v1177_v18 = vadd.f32 %v1161_v22, %v1141_v58  ;;  %v5259_v42 = vld [vmem:[%s5005_s17 + $0x63] sm:$0xff]  ;;  %9155 = vst [vmem:[#allocation65_spill] sm:$0xff] %v5265_v51  ;;  %v5269_v58 = vmul.f32 %v5206_v45, %v5225_v62  ;;  %v5273_v22 = vrot.slane %v9101_v9, %v5014_v32 }
  0xf4   : >> { %9152 = vst [vmem:[#allocation62_spill] sm:$0xff] %v5256_v59  ;;  %9153 = vst [vmem:[#allocation63_spill] sm:$0xff] %v5259_v42  ;;  %v655_v44 = vadd.f32 %v639_v2, %v619_v6  ;;  %v1653_v45 = vld [vmem:[%s5005_s17 + $0x4] sm:$0xff]  ;;  %v5288_v62 = vrot.slane %v9100_v10, %v5016_v33  ;;  %v5295_v2 = vrot.slane %v9099_v11, %v5037_v39 }
  0xf5   : >> { %9156 = vst [vmem:[#allocation66_spill] sm:$0xff] %v5273_v22  ;;  %v1213_v41 = vadd.f32 %v1197_v29, %v1177_v18  ;;  %v5291_v6 = vld [vmem:[%s5005_s17 + $0xa8] sm:$0xff]  ;;  %v5299_v18 = vrot.slane %v9098_v12, %v5057_v48  ;;  %v747_v49 = vmul.f32 %v5055_v47, %v5069_v53  ;;  %v5305_v46 = vmul.f32 %v5248_v17, %v5259_v42 }
  0xf6   : >> { %9157 = vst [vmem:[#allocation67_spill] sm:$0xff] %v5288_v62  ;;  %9158 = vst [vmem:[#allocation68_spill] sm:$0xff] %v5291_v6  ;;  %v691_v29 = vadd.f32 %v675_v7, %v655_v44  ;;  %v5309_v38 = vmul.f32 %v5252_v15, %v5262_v55  ;;  %v5313_v30 = vmul.f32 %v5256_v59, %v5265_v51  ;;  %v5316_v44 = vld [vmem:[%s5005_s17 + $0x34] sm:$0xff]  ;;  %v5319_v7 = vld [vmem:[%s5005_s17 + $0x1c] sm:$0xff] }
  0xf7   : >> { %9159 = vst [vmem:[#allocation69_spill] sm:$0xff] %v5295_v2  ;;  %9160 = vst [vmem:[#allocation70_spill] sm:$0xff] %v5299_v18  ;;  %v1249_v31 = vadd.f32 %v1233_v50, %v1213_v41  ;;  %v5322_v41 = vmul.f32 %v5273_v22, %v1653_v45  ;;  %v5326_v50 = vmul.f32 %v5273_v22, %v5316_v44  ;;  %v5331_v59 = vld [vmem:[%s5005_s17 + $0x4c] sm:$0xff] }
  0xf8   : >> { %9161 = vst [vmem:[#allocation71_spill] sm:$0xff] %v5309_v38  ;;  %9162 = vst [vmem:[#allocation72_spill] sm:$0xff] %v5313_v30  ;;  %v727_v53 = vadd.f32 %v711_v40, %v691_v29  ;;  %v783_v15 = vmul.f32 %v5066_v52, %v5291_v6  ;;  %v5335_v51 = vrot.slane %v9097_v13, %v4997_v25  ;;  %v5346_v40 = vld [vmem:[%s5005_s17 + $0x64] sm:$0xff]  ;;  %v5349_v29 = vld [vmem:[%s5005_s17 + $0x7c] sm:$0xff] }
  0xf9   : >> { %9163 = vst [vmem:[#allocation73_spill] sm:$0xff] %v5316_v44  ;;  %9164 = vst [vmem:[#allocation74_spill] sm:$0xff] %v5319_v7  ;;  %v1285_v17 = vadd.f32 %v1269_v21, %v1249_v31  ;;  %v5339_v45 = vrot.slane %v9097_v13, %v4999_v26  ;;  %v5352_v31 = vld [vmem:[%s5005_s17 + $0x94] sm:$0xff]  ;;  %v5356_v21 = vrot.slane %v9101_v9, %v5003_v28  ;;  %v1933_v30 = vld [vmem:[%s5005_s17 + $0x5] sm:$0xff] }
  0xfa   : >> { %9165 = vst [vmem:[#allocation75_spill] sm:$0xff] %v5322_v41  ;;  %9166 = vst [vmem:[#allocation76_spill] sm:$0xff] %v5326_v50  ;;  %v5343_v50 = vrot.slane %v9096_v14, %v5001_v27  ;;  %v5360_v6 = vrot.slane %v9100_v10, %v5014_v32  ;;  %v763_v22 = vadd.f32 %v747_v49, %v727_v53  ;;  %v5370_v52 = vld [vmem:[%s5005_s17 + $0x1d] sm:$0xff] }
  0xfb   : >> { %9167 = vst [vmem:[#allocation77_spill] sm:$0xff] %v5331_v59  ;;  %9168 = vst [vmem:[#allocation78_spill] sm:$0xff] %v5335_v51  ;;  %v847_v55 = vmul.f32 %v5075_v56, %v5085_v61  ;;  %v1321_v42 = vadd.f32 %v1305_v57, %v1285_v17  ;;  %v5366_v41 = vmul.f32 %v5288_v62, %v5319_v7  ;;  %v5389_v61 = vld [vmem:[%s5005_s17 + $0x35] sm:$0xff]  ;;  %v5392_v57 = vld [vmem:[%s5005_s17 + $0x4d] sm:$0xff] }
  0xfc   : >> { %9169 = vst [vmem:[#allocation79_spill] sm:$0xff] %v5339_v45  ;;  %9170 = vst [vmem:[#allocation80_spill] sm:$0xff] %v5343_v50  ;;  %v5374_v38 = vrot.slane %v9099_v11, %v5016_v33  ;;  %v5378_v47 = vrot.slane %v9098_v12, %v5037_v39  ;;  %v5382_v49 = vmul.f32 %v5295_v2, %v5316_v44 }
  0xfd   : >> { %9171 = vst [vmem:[#allocation81_spill] sm:$0xff] %v5346_v40  ;;  %9172 = vst [vmem:[#allocation82_spill] sm:$0xff] %v5356_v21  ;;  %v5386_v53 = vmul.f32 %v5299_v18, %v5331_v59  ;;  %v799_v17 = vadd.f32 %v783_v15, %v763_v22  ;;  %v883_v62 = vmul.f32 %v5082_v60, %v5093_v1  ;;  %v550_v22 = vld [vmem:[%s5005_s17 + $0x8] sm:$0xff] }
  0xfe   : >> { %9173 = vst [vmem:[#allocation83_spill] sm:$0xff] %v5360_v6  ;;  %9174 = vst [vmem:[#allocation84_spill] sm:$0xff] %v5374_v38  ;;  %v1357_v7 = vadd.f32 %v5222_v63, %v1321_v42  ;;  %v5399_v2 = vmul.f32 %v5335_v51, %v5346_v40  ;;  %v5403_v44 = vmul.f32 %v5339_v45, %v5349_v29  ;;  %v5420_v45 = vld [vmem:[%s5005_s17 + $0x20] sm:$0xff]  ;;  %v5423_v51 = vld [vmem:[%s5005_s17 + $0x38] sm:$0xff] }
  0xff   : >> { %9175 = vst [vmem:[#allocation85_spill] sm:$0xff] %v5378_v47  ;;  %9176 = vst [vmem:[#allocation86_spill] sm:$0xff] %v5389_v61  ;;  %v5407_v18 = vmul.f32 %v5343_v50, %v5352_v31  ;;  %v5410_v15 = vmul.f32 %v5356_v21, %v1933_v30  ;;  %v5414_v1 = vmul.f32 %v5360_v6, %v5370_v52 }
 0x100   : >> { %9177 = vst [vmem:[#allocation87_spill] sm:$0xff] %v5392_v57  ;;  %v863_v63 = vadd.f32 %v847_v55, %v799_v17  ;;  %v919_v42 = vmul.f32 %v5090_v0, %v5102_v5  ;;  %9179 = vst [vmem:[#allocation89_spill] sm:$0xff] %v5423_v51  ;;  %v1421_v50 = vadd.f32 %v5238_v3, %v1357_v7  ;;  %v5439_v17 = vld [vmem:[%s5005_s17 + $0x65] sm:$0xff] }
 0x101   : >> { %9178 = vst [vmem:[#allocation88_spill] sm:$0xff] %v5414_v1  ;;  %v5428_v30 = vmul.f32 %v5374_v38, %v5389_v61  ;;  %v5432_v6 = vmul.f32 %v5378_v47, %v5392_v57  ;;  %v5436_v55 = vrot.slane %v9097_v13, %v5057_v48  ;;  %9183 = vst [vmem:[#allocation93_spill] sm:$0xff] %v5439_v17  ;;  %v5456_v38 = vld [vmem:[%s5005_s17 + $0x7d] sm:$0xff]  ;;  %v5478_v61 = vld [vmem:[%s5005_s17 + $0x95] sm:$0xff] }
 0x102   : >> { %v5443_v5 = vrot.slane %v9096_v14, %v4997_v25  ;;  %v5447_v3 = vrot.slane %v9096_v14, %v4999_v26  ;;  %v899_v7 = vadd.f32 %v883_v62, %v863_v63  ;;  %v1457_v47 = vadd.f32 %v5269_v58, %v1421_v50  ;;  %9187 = vst [vmem:[#allocation97_spill] sm:$0xff] %v5456_v38 }
 0x103   : >> { %9180 = vst [vmem:[#allocation90_spill] sm:$0xff] %v5428_v30  ;;  %9181 = vst [vmem:[#allocation91_spill] sm:$0xff] %v5432_v6  ;;  %v955_v6 = vmul.f32 %v5099_v4, %v5111_v16  ;;  %v5452_v30 = vld [vmem:[%s5005_s17 + $0x50] sm:$0xff]  ;;  %v582_v57 = vmul.f32 %v5020_v34, %v550_v22  ;;  %v602_v1 = vmul.f32 %v5024_v35, %v5420_v45  ;;  %v5474_v22 = vld [vmem:[%s5005_s17 + $0x68] sm:$0xff] }
 0x104   : >> { %9182 = vst [vmem:[#allocation92_spill] sm:$0xff] %v5436_v55  ;;  %9184 = vst [vmem:[#allocation94_spill] sm:$0xff] %v5443_v5  ;;  %v638_v26 = vmul.f32 %v5028_v36, %v5423_v51  ;;  %v5465_v62 = vrot.slane %v9101_v9, %v5001_v27  ;;  %v5469_v63 = vrot.slane %v9100_v10, %v5003_v28  ;;  %v2213_v27 = vld [vmem:[%s5005_s17 + $0x6] sm:$0xff] }
 0x105   : >> { %9185 = vst [vmem:[#allocation95_spill] sm:$0xff] %v5447_v3  ;;  %9186 = vst [vmem:[#allocation96_spill] sm:$0xff] %v5452_v30  ;;  %v935_v58 = vadd.f32 %v919_v42, %v899_v7  ;;  %v991_v50 = vmul.f32 %v5108_v8, %v5120_v20  ;;  %v1493_v16 = vadd.f32 %v5279_v54, %v1457_v47  ;;  %v5486_v9 = vld [vmem:[%s5005_s17 + $0xa9] sm:$0xff]  ;;  %v5495_v47 = vld [vmem:[%s5005_s17 + $0x1e] sm:$0xff] }
 0x106   : >> { %9188 = vst [vmem:[#allocation98_spill] sm:$0xff] %v5465_v62  ;;  %9189 = vst [vmem:[#allocation99_spill] sm:$0xff] %v5469_v63  ;;  %v5482_v21 = vmul.f32 %v5436_v55, %v5439_v17  ;;  %v618_v28 = vadd.f32 %v602_v1, %v582_v57  ;;  %v674_v42 = vmul.f32 %v5032_v37, %v5452_v30  ;;  %v5504_v1 = vld [vmem:[%s5005_s17 + $0x80] sm:$0xff] }
 0x107   : >> { %9190 = vst [vmem:[#allocation100_spill] sm:$0xff] %v5474_v22  ;;  %9191 = vst [vmem:[#allocation101_spill] sm:$0xff] %v5478_v61  ;;  %v5492_v7 = vmul.f32 %v5443_v5, %v5456_v38  ;;  %v5499_v54 = vrot.slane %v9099_v11, %v5014_v32  ;;  %v971_v10 = vadd.f32 %v955_v6, %v935_v58  ;;  %v5523_v11 = vld [vmem:[%s5005_s17 + $0x98] sm:$0xff]  ;;  %v5576_v55 = vld [vmem:[%s5005_s17 + $0x21] sm:$0xff] }
 0x108   : >> { %9192 = vst [vmem:[#allocation102_spill] sm:$0xff] %v5482_v21  ;;  %9193 = vst [vmem:[#allocation103_spill] sm:$0xff] %v5486_v9  ;;  %v1027_v57 = vmul.f32 %v5117_v19, %v5129_v24  ;;  %v1529_v20 = vadd.f32 %v5283_v23, %v1493_v16  ;;  %v5509_v21 = vrot.slane %v9098_v12, %v5016_v33  ;;  %v9201_v16 = vld [vmem:[#allocation35_spill] sm:$0xff]  ;;  %v5530_v12 = vld [vmem:[%s5005_s17 + $0x4e] sm:$0xff] }
 0x109   : >> { %9194 = vst [vmem:[#allocation104_spill] sm:$0xff] %v5492_v7  ;;  %9195 = vst [vmem:[#allocation105_spill] sm:$0xff] %v5495_v47  ;;  %v654_v7 = vadd.f32 %v638_v26, %v618_v28  ;;  %v710_v5 = vmul.f32 %v5046_v43, %v5474_v22  ;;  %v5515_v32 = vmul.f32 %v5447_v3, %v5478_v61  ;;  %v5527_v28 = vld [vmem:[%s5005_s17 + $0x36] sm:$0xff]  ;;  %v9209_v24 = vld [vmem:[#allocation40_spill] sm:$0xff] }
 0x10a   : >> { %9196 = vst [vmem:[#allocation106_spill] sm:$0xff] %v5499_v54  ;;  %9197 = vst [vmem:[#allocation107_spill] sm:$0xff] %v5504_v1  ;;  %v5518_v6 = vmul.f32 %v5465_v62, %v2213_v27  ;;  %v1007_v58 = vadd.f32 %v991_v50, %v971_v10  ;;  %v1063_v23 = vmul.f32 %v9201_v16, %v5486_v9  ;;  %v9206_v10 = vld [vmem:[#allocation22_spill] sm:$0xff]  ;;  %v814_v62 = vld [vmem:[%s5005_s17 + $0x9] sm:$0xff] }
 0x10b   : >> { %9198 = vst [vmem:[#allocation108_spill] sm:$0xff] %v5509_v21  ;;  %9199 = vst [vmem:[#allocation109_spill] sm:$0xff] %v5515_v32  ;;  %v1565_v26 = vadd.f32 %v5305_v46, %v1529_v20  ;;  %v5534_v33 = vmul.f32 %v5469_v63, %v5495_v47  ;;  %v690_v27 = vadd.f32 %v674_v42, %v654_v7  ;;  %v9211_v63 = vld [vmem:[#allocation71_spill] sm:$0xff]  ;;  %v9221_v61 = vld [vmem:[#allocation38_spill] sm:$0xff] }
 0x10c   : >> { %9200 = vst [vmem:[#allocation110_spill] sm:$0xff] %v5518_v6  ;;  %9202 = vst [vmem:[#allocation111_spill] sm:$0xff] %v5523_v11  ;;  %v746_v50 = vmul.f32 %v9206_v10, %v5504_v1  ;;  %v5540_v9 = vrot.slane %v9097_v13, %v5037_v39  ;;  %v5544_v20 = vrot.slane %v9096_v14, %v5057_v48  ;;  %v9210_v6 = vld [vmem:[#allocation37_spill] sm:$0xff]  ;;  %v5551_v42 = vld [vmem:[%s5005_s17 + $0x66] sm:$0xff] }
 0x10d   : >> { %9203 = vst [vmem:[#allocation112_spill] sm:$0xff] %v5527_v28  ;;  %9204 = vst [vmem:[#allocation113_spill] sm:$0xff] %v5530_v12  ;;  %v1043_v46 = vadd.f32 %v1027_v57, %v1007_v58  ;;  %v1127_v32 = vmul.f32 %v9210_v6, %v9209_v24  ;;  %v5554_v7 = vld [vmem:[%s5005_s17 + $0x7e] sm:$0xff]  ;;  %v726_v39 = vadd.f32 %v710_v5, %v690_v27  ;;  %v9216_v14 = vld [vmem:[#allocation24_spill] sm:$0xff] }
 0x10e   : >> { %9205 = vst [vmem:[#allocation114_spill] sm:$0xff] %v5534_v33  ;;  %9207 = vst [vmem:[#allocation115_spill] sm:$0xff] %v5540_v9  ;;  %v1601_v33 = vadd.f32 %v9211_v63, %v1565_v26  ;;  %v9214_v47 = vld [vmem:[#allocation11_spill] sm:$0xff]  ;;  %v782_v3 = vmul.f32 %v9216_v14, %v5523_v11  ;;  %v5563_v57 = vld [vmem:[%s5005_s17 + $0x96] sm:$0xff]  ;;  %v5567_v24 = vmul.f32 %v5499_v54, %v5527_v28 }
 0x10f   : >> { %9208 = vst [vmem:[#allocation116_spill] sm:$0xff] %v5544_v20  ;;  %9212 = vst [vmem:[#allocation40_spill] sm:$0xff] %v5551_v42  ;;  %v5558_v13 = vrot.slane %v9214_v47, %v4997_v25  ;;  %v5571_v63 = vmul.f32 %v5509_v21, %v5530_v12  ;;  %v1079_v58 = vadd.f32 %v1063_v23, %v1043_v46  ;;  %v9220_v26 = vld [vmem:[#allocation41_spill] sm:$0xff]  ;;  %v9222_v5 = vld [vmem:[#allocation72_spill] sm:$0xff] }
 0x110   : >> { %9213 = vst [vmem:[#allocation71_spill] sm:$0xff] %v5554_v7  ;;  %9217 = vst [vmem:[#allocation118_spill] sm:$0xff] %v5563_v57  ;;  %v1163_v25 = vmul.f32 %v9221_v61, %v9220_v26  ;;  %v1637_v27 = vadd.f32 %v9222_v5, %v1601_v33  ;;  %v5581_v38 = vrot.slane %v9214_v47, %v5057_v48  ;;  %v5593_v46 = vld [vmem:[%s5005_s17 + $0xaa] sm:$0xff]  ;;  %v9228_v5 = vld [vmem:[#allocation39_spill] sm:$0xff] }
 0x111   : >> { %9215 = vst [vmem:[#allocation117_spill] sm:$0xff] %v5558_v13  ;;  %9218 = vst [vmem:[#allocation119_spill] sm:$0xff] %v5567_v24  ;;  %v762_v17 = vadd.f32 %v746_v50, %v726_v39  ;;  %v846_v24 = vmul.f32 %v5075_v56, %v814_v62  ;;  %v5586_v21 = vmul.f32 %v5540_v9, %v5551_v42  ;;  %v9227_v26 = vld [vmem:[#allocation45_spill] sm:$0xff]  ;;  %v5598_v47 = vld [vmem:[%s5005_s17 + $0x39] sm:$0xff] }
 0x112   : >> { %9219 = vst [vmem:[#allocation120_spill] sm:$0xff] %v5571_v63  ;;  %9223 = vst [vmem:[#allocation41_spill] sm:$0xff] %v5581_v38  ;;  %v5590_v23 = vmul.f32 %v5544_v20, %v5554_v7  ;;  %v1143_v33 = vadd.f32 %v1127_v32, %v1079_v58  ;;  %v1199_v48 = vmul.f32 %v9228_v5, %v9227_v26  ;;  %v9230_v39 = vld [vmem:[#allocation75_spill] sm:$0xff]  ;;  %v9232_v63 = vld [vmem:[#allocation46_spill] sm:$0xff] }
 0x113   : >> { %9224 = vst [vmem:[#allocation72_spill] sm:$0xff] %v5586_v21  ;;  %9226 = vst [vmem:[#allocation122_spill] sm:$0xff] %v5593_v46  ;;  %v1701_v50 = vadd.f32 %v9230_v39, %v1637_v27  ;;  %v5603_v62 = vmul.f32 %v5558_v13, %v5563_v57  ;;  %v798_v38 = vadd.f32 %v782_v3, %v762_v17  ;;  %v9233_v20 = vld [vmem:[#allocation42_spill] sm:$0xff]  ;;  %v9234_v58 = vld [vmem:[#allocation49_spill] sm:$0xff] }
 0x114   : >> { %9225 = vst [vmem:[#allocation121_spill] sm:$0xff] %v5590_v23  ;;  %9229 = vst [vmem:[#allocation123_spill] sm:$0xff] %v5598_v47  ;;  %v882_v23 = vmul.f32 %v5082_v60, %v5576_v55  ;;  %v1179_v21 = vadd.f32 %v1163_v25, %v1143_v33  ;;  %v1235_v32 = vmul.f32 %v9233_v20, %v9232_v63  ;;  %v9235_v9 = vld [vmem:[#allocation43_spill] sm:$0xff]  ;;  %v9236_v7 = vld [vmem:[#allocation50_spill] sm:$0xff] }
 0x115   : >> { %9231 = vst [vmem:[#allocation75_spill] sm:$0xff] %v5603_v62  ;;  %v1271_v26 = vmul.f32 %v9235_v9, %v9234_v58  ;;  %v9237_v42 = vld [vmem:[#allocation47_spill] sm:$0xff]  ;;  %v5614_v27 = vld [vmem:[%s5005_s17 + $0x51] sm:$0xff]  ;;  %v1737_v39 = vadd.f32 %v5366_v41, %v1701_v50  ;;  %v9239_v17 = vld [vmem:[#allocation48_spill] sm:$0xff]  ;;  %v862_v25 = vadd.f32 %v846_v24, %v798_v38  ;;  %v918_v33 = vmul.f32 %v5090_v0, %v5598_v47 }
 0x116   : >> { %v1307_v54 = vmul.f32 %v9237_v42, %v9236_v7  ;;  %9238 = vst [vmem:[#allocation124_spill] sm:$0xff] %v5614_v27  ;;  %v1343_v3 = vmul.f32 %v9239_v17, %v5593_v46  ;;  %v5620_v62 = vld [vmem:[%s5005_s17 + $0xab] sm:$0xff]  ;;  %v1215_v63 = vadd.f32 %v1199_v48, %v1179_v21  ;;  %v9241_v13 = vld [vmem:[#allocation55_spill] sm:$0xff]  ;;  %v9245_v28 = vld [vmem:[#allocation58_spill] sm:$0xff]  ;;  %v954_v21 = vmul.f32 %v5099_v4, %v5614_v27 }
 0x117   : >> { %9240 = vst [vmem:[#allocation125_spill] sm:$0xff] %v5620_v62  ;;  %v9242_v58 = vld [vmem:[#allocation52_spill] sm:$0xff]  ;;  %v9244_v7 = vld [vmem:[#allocation53_spill] sm:$0xff]  ;;  %v9246_v9 = vld [vmem:[#allocation54_spill] sm:$0xff]  ;;  %v1773_v46 = vadd.f32 %v5382_v49, %v1737_v39  ;;  %v898_v0 = vadd.f32 %v882_v23, %v862_v25 }
 0x118   : >> { %v1407_v57 = vmul.f32 %v9242_v58, %v9241_v13  ;;  %v9243_v12 = vld [vmem:[#allocation56_spill] sm:$0xff]  ;;  %v1479_v41 = vmul.f32 %v9246_v9, %v9245_v28  ;;  %v9248_v17 = vld [vmem:[#allocation63_spill] sm:$0xff]  ;;  %v9249_v38 = vld [vmem:[#allocation57_spill] sm:$0xff]  ;;  %v1251_v13 = vadd.f32 %v1235_v32, %v1215_v63 }
 0x119   : >> { %v1443_v42 = vmul.f32 %v9244_v7, %v9243_v12  ;;  %v5631_v50 = vld [vmem:[%s5005_s17 + $0x69] sm:$0xff]  ;;  %v5636_v24 = vmul.f32 %v9249_v38, %v9248_v17  ;;  %v9254_v60 = vld [vmem:[#allocation62_spill] sm:$0xff]  ;;  %v5653_v39 = vld [vmem:[%s5005_s17 + $0x81] sm:$0xff]  ;;  %v1809_v23 = vadd.f32 %v5386_v53, %v1773_v46  ;;  %v934_v32 = vadd.f32 %v918_v33, %v898_v0 }
 0x11a   : >> { %9247 = vst [vmem:[#allocation55_spill] sm:$0xff] %v5631_v50  ;;  %v9250_v48 = vld [vmem:[#allocation64_spill] sm:$0xff]  ;;  %v9252_v7 = vld [vmem:[#allocation65_spill] sm:$0xff]  ;;  %v5650_v49 = vmul.f32 %v9254_v60, %v5620_v62  ;;  %9255 = vst [vmem:[#allocation56_spill] sm:$0xff] %v5653_v39  ;;  %v584_v60 = vmul.f32 %v5020_v34, %v5420_v45  ;;  %v604_v53 = vmul.f32 %v5024_v35, %v5423_v51 }
 0x11b   : >> { %v9251_v58 = vld [vmem:[#allocation60_spill] sm:$0xff]  ;;  %v9253_v28 = vld [vmem:[#allocation61_spill] sm:$0xff]  ;;  %v9256_v25 = vld [vmem:[#allocation74_spill] sm:$0xff]  ;;  %v1845_v46 = vadd.f32 %v5399_v2, %v1809_v23  ;;  %v970_v0 = vadd.f32 %v954_v21, %v934_v32  ;;  %v1026_v33 = vmul.f32 %v5117_v19, %v5653_v39  ;;  %v676_v51 = vmul.f32 %v5032_v37, %v5474_v22 }
 0x11c   : >> { %v5642_v12 = vmul.f32 %v9251_v58, %v9250_v48  ;;  %v5646_v9 = vmul.f32 %v9253_v28, %v9252_v7  ;;  %v9257_v17 = vld [vmem:[#allocation66_spill] sm:$0xff]  ;;  %v990_v48 = vmul.f32 %v5108_v8, %v5631_v50  ;;  %v1287_v7 = vadd.f32 %v1271_v26, %v1251_v13  ;;  %v9258_v28 = vld [vmem:[#allocation73_spill] sm:$0xff]  ;;  %v9259_v58 = vld [vmem:[#allocation67_spill] sm:$0xff] }
 0x11d   : >> { %v5658_v63 = vmul.f32 %v9257_v17, %v9256_v25  ;;  %v5664_v38 = vmul.f32 %v9259_v58, %v9258_v28  ;;  %v5667_v62 = vld [vmem:[%s5005_s17 + $0x99] sm:$0xff]  ;;  %v640_v26 = vmul.f32 %v5028_v36, %v5452_v30  ;;  %v9261_v13 = vld [vmem:[#allocation69_spill] sm:$0xff]  ;;  %v620_v45 = vadd.f32 %v604_v53, %v584_v60  ;;  %v5700_v30 = vld [vmem:[%s5005_s17 + $0x22] sm:$0xff] }
 0x11e   : >> { %9260 = vst [vmem:[#allocation74_spill] sm:$0xff] %v5667_v62  ;;  %v1323_v28 = vadd.f32 %v1307_v54, %v1287_v7  ;;  %v5680_v25 = vmul.f32 %v9261_v13, %v5331_v59  ;;  %v1094_v58 = vld [vmem:[%s5005_s17 + $0xa] sm:$0xff]  ;;  %v1881_v2 = vadd.f32 %v5403_v44, %v1845_v46  ;;  %v9263_v23 = vld [vmem:[#allocation70_spill] sm:$0xff]  ;;  %v1006_v54 = vadd.f32 %v990_v48, %v970_v0 }
 0x11f   : >> { %v5687_v21 = vld [vmem:[%s5005_s17 + $0xac] sm:$0xff]  ;;  %v5691_v32 = vmul.f32 %v9263_v23, %v5346_v40  ;;  %v1062_v7 = vmul.f32 %v9201_v16, %v5667_v62  ;;  %v9264_v60 = vld [vmem:[#allocation78_spill] sm:$0xff]  ;;  %v656_v22 = vadd.f32 %v640_v26, %v620_v45  ;;  %v712_v44 = vmul.f32 %v5046_v43, %v5504_v1  ;;  %v9265_v40 = vld [vmem:[#allocation79_spill] sm:$0xff] }
 0x120   : >> { %9262 = vst [vmem:[#allocation73_spill] sm:$0xff] %v5687_v21  ;;  %v1359_v59 = vadd.f32 %v1343_v3, %v1323_v28  ;;  %v5697_v53 = vmul.f32 %v9264_v60, %v5349_v29  ;;  %v1917_v46 = vadd.f32 %v5407_v18, %v1881_v2  ;;  %v5707_v48 = vmul.f32 %v9265_v40, %v5352_v31  ;;  %v5711_v28 = vld [vmem:[%s5005_s17 + $0xb0] sm:$0xff]  ;;  %v9267_v60 = vld [vmem:[#allocation80_spill] sm:$0xff]  ;;  %v5718_v26 = vld [vmem:[%s5005_s17 + $0x3a] sm:$0xff] }
 0x121   : >> { %v1042_v0 = vadd.f32 %v1026_v33, %v1006_v54  ;;  %v1126_v3 = vmul.f32 %v9210_v6, %v1094_v58  ;;  %9266 = vst [vmem:[#allocation126_spill] sm:$0xff] %v5711_v28  ;;  %v5715_v23 = vmul.f32 %v9267_v60, %v5687_v21  ;;  %9268 = vst [vmem:[#allocation127_spill] sm:$0xff] %v5718_v26  ;;  %v9269_v33 = vld [vmem:[#allocation82_spill] sm:$0xff]  ;;  %v9271_v21 = vld [vmem:[#allocation83_spill] sm:$0xff] }
 0x122   : >> { %v1423_v29 = vadd.f32 %v1407_v57, %v1359_v59  ;;  %v692_v45 = vadd.f32 %v676_v51, %v656_v22  ;;  %v748_v18 = vmul.f32 %v9206_v10, %v5523_v11  ;;  %v1981_v31 = vadd.f32 %v5410_v15, %v1917_v46  ;;  %v9270_v54 = vld [vmem:[#allocation86_spill] sm:$0xff]  ;;  %v9273_v46 = vld [vmem:[#allocation88_spill] sm:$0xff]  ;;  %v9274_v60 = vld [vmem:[#allocation87_spill] sm:$0xff] }
 0x123   : >> { %v5725_v58 = vmul.f32 %v9269_v33, %v5370_v52  ;;  %v1078_v2 = vadd.f32 %v1062_v7, %v1042_v0  ;;  %v1162_v59 = vmul.f32 %v9221_v61, %v5700_v30  ;;  %v5731_v1 = vmul.f32 %v9271_v21, %v9270_v54  ;;  %v5734_v51 = vld [vmem:[%s5005_s17 + $0x52] sm:$0xff]  ;;  %v9275_v52 = vld [vmem:[#allocation84_spill] sm:$0xff] }
 0x124   : >> { %v1459_v57 = vadd.f32 %v1443_v42, %v1423_v29  ;;  %9272 = vst [vmem:[#allocation86_spill] sm:$0xff] %v5734_v51  ;;  %v728_v22 = vadd.f32 %v712_v44, %v692_v45  ;;  %v784_v15 = vmul.f32 %v9216_v14, %v5711_v28  ;;  %v2017_v11 = vadd.f32 %v9273_v46, %v1981_v31  ;;  %v5746_v54 = vld [vmem:[%s5005_s17 + $0xad] sm:$0xff]  ;;  %v9282_v46 = vld [vmem:[#allocation90_spill] sm:$0xff] }
 0x125   : >> { %v5741_v7 = vmul.f32 %v9275_v52, %v9274_v60  ;;  %v1142_v0 = vadd.f32 %v1126_v3, %v1078_v2  ;;  %v1198_v42 = vmul.f32 %v9228_v5, %v5718_v26  ;;  %9277 = vst [vmem:[#allocation87_spill] sm:$0xff] %v5746_v54  ;;  %v9278_v21 = vld [vmem:[#allocation93_spill] sm:$0xff]  ;;  %v848_v31 = vmul.f32 %v5075_v56, %v5576_v55  ;;  %v9284_v2 = vld [vmem:[#allocation92_spill] sm:$0xff] }
 0x126   : >> { %v1495_v29 = vadd.f32 %v1479_v41, %v1459_v57  ;;  %v9279_v33 = vld [vmem:[#allocation85_spill] sm:$0xff]  ;;  %v764_v28 = vadd.f32 %v748_v18, %v728_v22  ;;  %v2053_v60 = vadd.f32 %v9282_v46, %v2017_v11  ;;  %v1234_v57 = vmul.f32 %v9233_v20, %v5734_v51  ;;  %v5770_v18 = vld [vmem:[%s5005_s17 + $0x82] sm:$0xff] }
 0x127   : >> { %9276 = vst [vmem:[#allocation88_spill] sm:$0xff] %v5741_v7  ;;  %v5750_v44 = vmul.f32 %v9279_v33, %v9278_v21  ;;  %v5753_v45 = vld [vmem:[%s5005_s17 + $0x6a] sm:$0xff]  ;;  %v1178_v41 = vadd.f32 %v1162_v59, %v1142_v0  ;;  %v9290_v22 = vld [vmem:[#allocation27_spill] sm:$0xff] }
 0x128   : >> { %9281 = vst [vmem:[#allocation128_spill] sm:$0xff] %v5753_v45  ;;  %v9283_v3 = vld [vmem:[#allocation97_spill] sm:$0xff]  ;;  %v1531_v21 = vadd.f32 %v5636_v24, %v1495_v29  ;;  %v800_v55 = vadd.f32 %v784_v15, %v764_v28  ;;  %v884_v11 = vmul.f32 %v9290_v22, %v5598_v47  ;;  %v9291_v46 = vld [vmem:[#allocation91_spill] sm:$0xff] }
 0x129   : >> { %9280 = vst [vmem:[#allocation93_spill] sm:$0xff] %v5750_v44  ;;  %v5760_v52 = vmul.f32 %v9284_v2, %v9283_v3  ;;  %v9286_v33 = vld [vmem:[#allocation101_spill] sm:$0xff]  ;;  %v9287_v44 = vld [vmem:[#allocation94_spill] sm:$0xff]  ;;  %v2089_v3 = vadd.f32 %v9291_v46, %v2053_v60  ;;  %v9292_v59 = vld [vmem:[#allocation95_spill] sm:$0xff]  ;;  %v1214_v56 = vadd.f32 %v1198_v42, %v1178_v41 }
 0x12a   : >> { %v5767_v7 = vmul.f32 %v9287_v44, %v9286_v33  ;;  %9289 = vst [vmem:[#allocation101_spill] sm:$0xff] %v5770_v18  ;;  %v5777_v0 = vmul.f32 %v9292_v59, %v5746_v54  ;;  %v9294_v24 = vld [vmem:[#allocation43_spill] sm:$0xff]  ;;  %v1567_v33 = vadd.f32 %v5642_v12, %v1531_v21  ;;  %v9295_v44 = vld [vmem:[#allocation105_spill] sm:$0xff]  ;;  %v864_v47 = vadd.f32 %v848_v31, %v800_v55  ;;  %v9299_v60 = vld [vmem:[#allocation28_spill] sm:$0xff] }
 0x12b   : >> { %9285 = vst [vmem:[#allocation90_spill] sm:$0xff] %v5760_v52  ;;  %v1270_v29 = vmul.f32 %v9294_v24, %v5753_v45  ;;  %v5787_v15 = vld [vmem:[%s5005_s17 + $0x9a] sm:$0xff]  ;;  %v920_v46 = vmul.f32 %v9299_v60, %v5614_v27  ;;  %v1250_v59 = vadd.f32 %v1234_v57, %v1214_v56  ;;  %v1374_v55 = vld [vmem:[%s5005_s17 + $0xb] sm:$0xff] }
 0x12c   : >> { %9288 = vst [vmem:[#allocation97_spill] sm:$0xff] %v5767_v7  ;;  %9293 = vst [vmem:[#allocation91_spill] sm:$0xff] %v5777_v0  ;;  %v9296_v7 = vld [vmem:[#allocation98_spill] sm:$0xff]  ;;  %v9301_v0 = vld [vmem:[#allocation112_spill] sm:$0xff]  ;;  %v900_v27 = vadd.f32 %v884_v11, %v864_v47 }
 0x12d   : >> { %v5784_v28 = vmul.f32 %v9296_v7, %v9295_v44  ;;  %9298 = vst [vmem:[#allocation129_spill] sm:$0xff] %v5787_v15  ;;  %v9300_v2 = vld [vmem:[#allocation102_spill] sm:$0xff]  ;;  %v9302_v42 = vld [vmem:[#allocation99_spill] sm:$0xff]  ;;  %v1603_v44 = vadd.f32 %v5646_v9, %v1567_v33  ;;  %v9310_v56 = vld [vmem:[#allocation40_spill] sm:$0xff]  ;;  %v1286_v9 = vadd.f32 %v1270_v29, %v1250_v59 }
 0x12e   : >> { %v2125_v54 = vadd.f32 %v9300_v2, %v2089_v3  ;;  %v5794_v41 = vmul.f32 %v9302_v42, %v9301_v0  ;;  %v9304_v12 = vld [vmem:[#allocation47_spill] sm:$0xff]  ;;  %v9306_v7 = vld [vmem:[#allocation106_spill] sm:$0xff]  ;;  %v956_v2 = vmul.f32 %v5099_v4, %v5631_v50  ;;  %v9308_v3 = vld [vmem:[#allocation104_spill] sm:$0xff] }
 0x12f   : >> { %9297 = vst [vmem:[#allocation105_spill] sm:$0xff] %v5784_v28  ;;  %v1306_v21 = vmul.f32 %v9304_v12, %v5770_v18  ;;  %v9305_v28 = vld [vmem:[#allocation113_spill] sm:$0xff]  ;;  %v9311_v57 = vld [vmem:[#allocation108_spill] sm:$0xff]  ;;  %v1639_v47 = vadd.f32 %v5650_v49, %v1603_v44  ;;  %v9314_v11 = vld [vmem:[#allocation71_spill] sm:$0xff] }
 0x130   : >> { %9303 = vst [vmem:[#allocation102_spill] sm:$0xff] %v5794_v41  ;;  %v5801_v31 = vmul.f32 %v9306_v7, %v9305_v28  ;;  %v2161_v0 = vadd.f32 %v9308_v3, %v2125_v54  ;;  %v5808_v41 = vld [vmem:[%s5005_s17 + $0xae] sm:$0xff]  ;;  %v5812_v42 = vmul.f32 %v9311_v57, %v9310_v56  ;;  %v9315_v7 = vld [vmem:[#allocation115_spill] sm:$0xff]  ;;  %v992_v56 = vmul.f32 %v5108_v8, %v5653_v39  ;;  %v9319_v57 = vld [vmem:[#allocation118_spill] sm:$0xff] }
 0x131   : >> { %9309 = vst [vmem:[#allocation113_spill] sm:$0xff] %v5808_v41  ;;  %v9313_v33 = vld [vmem:[#allocation48_spill] sm:$0xff]  ;;  %v5819_v50 = vmul.f32 %v9315_v7, %v9314_v11  ;;  %v5825_v3 = vld [vmem:[%s5005_s17 + $0x3b] sm:$0xff]  ;;  %v9318_v59 = vld [vmem:[#allocation109_spill] sm:$0xff]  ;;  %v1322_v4 = vadd.f32 %v1306_v21, %v1286_v9  ;;  %v1028_v21 = vmul.f32 %v5117_v19, %v5667_v62 }
 0x132   : >> { %9307 = vst [vmem:[#allocation112_spill] sm:$0xff] %v5801_v31  ;;  %9312 = vst [vmem:[#allocation104_spill] sm:$0xff] %v5812_v42  ;;  %v1342_v28 = vmul.f32 %v9313_v33, %v5787_v15  ;;  %v5822_v54 = vld [vmem:[%s5005_s17 + $0x23] sm:$0xff]  ;;  %v936_v31 = vadd.f32 %v920_v46, %v900_v27  ;;  %v2197_v29 = vadd.f32 %v9318_v59, %v2161_v0  ;;  %v5835_v49 = vld [vmem:[%s5005_s17 + $0x53] sm:$0xff] }
 0x133   : >> { %9316 = vst [vmem:[#allocation40_spill] sm:$0xff] %v5819_v50  ;;  %9317 = vst [vmem:[#allocation71_spill] sm:$0xff] %v5825_v3  ;;  %v9320_v42 = vld [vmem:[#allocation116_spill] sm:$0xff]  ;;  %v5839_v7 = vld [vmem:[%s5005_s17 + $0xb1] sm:$0xff]  ;;  %v1703_v50 = vadd.f32 %v5658_v63, %v1639_v47 }
 0x134   : >> { %v5832_v52 = vmul.f32 %v9320_v42, %v9319_v57  ;;  %9322 = vst [vmem:[#allocation118_spill] sm:$0xff] %v5835_v49  ;;  %v9323_v44 = vld [vmem:[#allocation52_spill] sm:$0xff]  ;;  %9324 = vst [vmem:[#allocation130_spill] sm:$0xff] %v5839_v7  ;;  %v9325_v27 = vld [vmem:[#allocation117_spill] sm:$0xff]  ;;  %v972_v57 = vadd.f32 %v956_v2, %v936_v31  ;;  %v1064_v31 = vmul.f32 %v9201_v16, %v5839_v7 }
 0x135   : >> { %v1406_v11 = vmul.f32 %v9323_v44, %v1374_v55  ;;  %v5844_v46 = vmul.f32 %v9325_v27, %v5808_v41  ;;  %v5847_v39 = vld [vmem:[%s5005_s17 + $0x6b] sm:$0xff]  ;;  %v5850_v0 = vld [vmem:[%s5005_s17 + $0x83] sm:$0xff]  ;;  %v9329_v9 = vld [vmem:[#allocation110_spill] sm:$0xff]  ;;  %v1358_v55 = vadd.f32 %v1342_v28, %v1322_v4  ;;  %v1739_v41 = vadd.f32 %v5664_v38, %v1703_v50 }
 0x136   : >> { %9321 = vst [vmem:[#allocation109_spill] sm:$0xff] %v5832_v52  ;;  %9327 = vst [vmem:[#allocation132_spill] sm:$0xff] %v5847_v39  ;;  %v2261_v59 = vadd.f32 %v9329_v9, %v2197_v29  ;;  %v9330_v42 = vld [vmem:[#allocation53_spill] sm:$0xff]  ;;  %v9331_v63 = vld [vmem:[#allocation54_spill] sm:$0xff]  ;;  %v1008_v8 = vadd.f32 %v992_v56, %v972_v57  ;;  %v1128_v56 = vmul.f32 %v9210_v6, %v5700_v30 }
 0x137   : >> { %9326 = vst [vmem:[#allocation131_spill] sm:$0xff] %v5844_v46  ;;  %9328 = vst [vmem:[#allocation133_spill] sm:$0xff] %v5850_v0  ;;  %v1442_v52 = vmul.f32 %v9330_v42, %v5822_v54  ;;  %v1478_v47 = vmul.f32 %v9331_v63, %v5825_v3  ;;  %v9332_v27 = vld [vmem:[#allocation57_spill] sm:$0xff]  ;;  %v9333_v2 = vld [vmem:[#allocation114_spill] sm:$0xff]  ;;  %v1422_v4 = vadd.f32 %v1406_v11, %v1358_v55 }
 0x138   : >> { %v1514_v46 = vmul.f32 %v9332_v27, %v5835_v49  ;;  %v2297_v62 = vadd.f32 %v9333_v2, %v2261_v59  ;;  %v5866_v29 = vld [vmem:[%s5005_s17 + $0x9b] sm:$0xff]  ;;  %v9335_v28 = vld [vmem:[#allocation60_spill] sm:$0xff]  ;;  %v9336_v19 = vld [vmem:[#allocation61_spill] sm:$0xff]  ;;  %v1775_v50 = vadd.f32 %v5680_v25, %v1739_v41  ;;  %v1044_v38 = vadd.f32 %v1028_v21, %v1008_v8 }
 0x139   : >> { %9334 = vst [vmem:[#allocation110_spill] sm:$0xff] %v5866_v29  ;;  %v1550_v9 = vmul.f32 %v9335_v28, %v5847_v39  ;;  %v1586_v63 = vmul.f32 %v9336_v19, %v5850_v0  ;;  %v9337_v57 = vld [vmem:[#allocation13_spill] sm:$0xff]  ;;  %v9338_v59 = vld [vmem:[#allocation119_spill] sm:$0xff]  ;;  %v1458_v16 = vadd.f32 %v1442_v52, %v1422_v4  ;;  %v9339_v55 = vld [vmem:[#allocation18_spill] sm:$0xff]  ;;  %v1164_v21 = vmul.f32 %v9221_v61, %v5718_v26 }
 0x13a   : >> { %v585_v7 = vmul.f32 %v5020_v34, %v9337_v57  ;;  %v2333_v2 = vadd.f32 %v9338_v59, %v2297_v62  ;;  %v1654_v11 = vld [vmem:[%s5005_s17 + $0xc] sm:$0xff]  ;;  %v605_v28 = vmul.f32 %v5024_v35, %v9339_v55  ;;  %v1811_v25 = vadd.f32 %v5691_v32, %v1775_v50  ;;  %v9341_v8 = vld [vmem:[#allocation62_spill] sm:$0xff]  ;;  %v5890_v4 = vld [vmem:[%s5005_s17 + $0x24] sm:$0xff] }
 0x13b   : >> { %v9340_v27 = vld [vmem:[#allocation21_spill] sm:$0xff]  ;;  %v1622_v41 = vmul.f32 %v9341_v8, %v5866_v29  ;;  %v1080_v30 = vadd.f32 %v1064_v31, %v1044_v38  ;;  %v9342_v57 = vld [vmem:[#allocation120_spill] sm:$0xff]  ;;  %v1494_v52 = vadd.f32 %v1478_v47, %v1458_v16  ;;  %v9343_v55 = vld [vmem:[#allocation23_spill] sm:$0xff]  ;;  %v1686_v32 = vmul.f32 %v9257_v17, %v1654_v11 }
 0x13c   : >> { %v641_v19 = vmul.f32 %v5028_v36, %v9340_v27  ;;  %v2369_v62 = vadd.f32 %v9342_v57, %v2333_v2  ;;  %v621_v59 = vadd.f32 %v605_v28, %v585_v7  ;;  %v677_v27 = vmul.f32 %v5032_v37, %v9343_v55  ;;  %v9344_v38 = vld [vmem:[#allocation72_spill] sm:$0xff]  ;;  %v5900_v47 = vld [vmem:[%s5005_s17 + $0x3c] sm:$0xff]  ;;  %v9346_v7 = vld [vmem:[#allocation25_spill] sm:$0xff] }
 0x13d   : >> { %v1847_v6 = vadd.f32 %v5697_v53, %v1811_v25  ;;  %v1144_v50 = vadd.f32 %v1128_v56, %v1080_v30  ;;  %v1200_v31 = vmul.f32 %v9228_v5, %v5734_v51  ;;  %v1530_v16 = vadd.f32 %v1514_v46, %v1494_v52  ;;  %9345 = vst [vmem:[#allocation114_spill] sm:$0xff] %v5900_v47  ;;  %v9347_v53 = vld [vmem:[#allocation67_spill] sm:$0xff]  ;;  %v9349_v46 = vld [vmem:[#allocation121_spill] sm:$0xff]  ;;  %v9351_v55 = vld [vmem:[#allocation68_spill] sm:$0xff] }
 0x13e   : >> { %v2405_v26 = vadd.f32 %v9344_v38, %v2369_v62  ;;  %v657_v2 = vadd.f32 %v641_v19, %v621_v59  ;;  %v713_v28 = vmul.f32 %v5046_v43, %v9346_v7  ;;  %v1722_v25 = vmul.f32 %v9347_v53, %v5890_v4  ;;  %v5910_v30 = vld [vmem:[%s5005_s17 + $0xc0] sm:$0xff]  ;;  %v5914_v19 = vld [vmem:[%s5005_s17 + $0x54] sm:$0xff]  ;;  %v5920_v38 = vld [vmem:[%s5005_s17 + $0x6c] sm:$0xff] }
 0x13f   : >> { %v1883_v57 = vadd.f32 %v5707_v48, %v1847_v6  ;;  %v1180_v56 = vadd.f32 %v1164_v21, %v1144_v50  ;;  %v1236_v11 = vmul.f32 %v9233_v20, %v5753_v45  ;;  %9348 = vst [vmem:[#allocation13_spill] sm:$0xff] %v5910_v30  ;;  %v1566_v52 = vadd.f32 %v1550_v9, %v1530_v16  ;;  %v9364_v51 = vld [vmem:[#allocation80_spill] sm:$0xff] }
 0x140   : >> { %v2441_v62 = vadd.f32 %v9349_v46, %v2405_v26  ;;  %9350 = vst [vmem:[#allocation119_spill] sm:$0xff] %v5914_v19  ;;  %v693_v59 = vadd.f32 %v677_v27, %v657_v2  ;;  %v749_v6 = vmul.f32 %v9206_v10, %v9351_v55  ;;  %9352 = vst [vmem:[#allocation18_spill] sm:$0xff] %v5920_v38  ;;  %v9353_v26 = vld [vmem:[#allocation75_spill] sm:$0xff]  ;;  %v5931_v2 = vld [vmem:[%s5005_s17 + $0xb2] sm:$0xff] }
 0x141   : >> { %v1919_v48 = vadd.f32 %v5715_v23, %v1883_v57  ;;  %v1758_v21 = vmul.f32 %v9261_v13, %v5900_v47  ;;  %v1216_v50 = vadd.f32 %v1200_v31, %v1180_v56  ;;  %v1272_v7 = vmul.f32 %v9294_v24, %v5770_v18  ;;  %v5928_v27 = vld [vmem:[%s5005_s17 + $0x84] sm:$0xff]  ;;  %9355 = vst [vmem:[#allocation120_spill] sm:$0xff] %v5931_v2  ;;  %v9356_v55 = vld [vmem:[#allocation70_spill] sm:$0xff] }
 0x142   : >> { %v2477_v9 = vadd.f32 %v9353_v26, %v2441_v62  ;;  %v1602_v16 = vadd.f32 %v1586_v63, %v1566_v52  ;;  %9354 = vst [vmem:[#allocation21_spill] sm:$0xff] %v5928_v27  ;;  %v729_v46 = vadd.f32 %v713_v28, %v693_v59  ;;  %v785_v23 = vmul.f32 %v9216_v14, %v5910_v30  ;;  %v9357_v63 = vld [vmem:[#allocation41_spill] sm:$0xff]  ;;  %v5944_v18 = vld [vmem:[%s5005_s17 + $0x9c] sm:$0xff] }
 0x143   : >> { %v1983_v57 = vadd.f32 %v5725_v58, %v1919_v48  ;;  %v1794_v31 = vmul.f32 %v9356_v55, %v5914_v19  ;;  %v1252_v56 = vadd.f32 %v1236_v11, %v1216_v50  ;;  %v1308_v62 = vmul.f32 %v9304_v12, %v5787_v15  ;;  %9359 = vst [vmem:[#allocation72_spill] sm:$0xff] %v5944_v18  ;;  %v9360_v28 = vld [vmem:[#allocation78_spill] sm:$0xff]  ;;  %v1934_v11 = vld [vmem:[%s5005_s17 + $0xd] sm:$0xff]  ;;  %v5957_v15 = vld [vmem:[%s5005_s17 + $0x25] sm:$0xff] }
 0x144   : >> { %v5941_v52 = vadd.f32 %v9357_v63, %v2477_v9  ;;  %v1638_v26 = vadd.f32 %v1622_v41, %v1602_v16  ;;  %v1830_v59 = vmul.f32 %v9360_v28, %v5920_v38  ;;  %v765_v30 = vadd.f32 %v749_v6, %v729_v46  ;;  %9361 = vst [vmem:[#allocation25_spill] sm:$0xff] %v5957_v15  ;;  %v9362_v6 = vld [vmem:[#allocation30_spill] sm:$0xff]  ;;  %v9363_v46 = vld [vmem:[#allocation88_spill] sm:$0xff] }
 0x145   : >> { %v2019_v58 = vadd.f32 %v5731_v1, %v1983_v57  ;;  %v1866_v48 = vmul.f32 %v9265_v40, %v5928_v27  ;;  %v1288_v50 = vadd.f32 %v1272_v7, %v1252_v56  ;;  %v1344_v9 = vmul.f32 %v9313_v33, %v5931_v2  ;;  %v5965_v56 = vld [vmem:[%s5005_s17 + $0x3d] sm:$0xff]  ;;  %v9369_v40 = vld [vmem:[#allocation32_spill] sm:$0xff] }
 0x146   : >> { %9358 = vst [vmem:[#allocation23_spill] sm:$0xff] %v5941_v52  ;;  %v2513_v41 = vsel %vm432_vm0, %v5941_v52, 0.0  ;;  %v1702_v16 = vadd.f32 %v1686_v32, %v1638_v26  ;;  %v801_v45 = vadd.f32 %v785_v23, %v765_v30  ;;  %v885_v1 = vmul.f32 %v9290_v22, %v9362_v6  ;;  %9365 = vst [vmem:[#allocation121_spill] sm:$0xff] %v5965_v56  ;;  %v5970_v52 = vld [vmem:[%s5005_s17 + $0x55] sm:$0xff]  ;;  %v9368_v6 = vld [vmem:[#allocation44_spill] sm:$0xff] }
 0x147   : >> { %2514 = vadd.xlane.f32.xlu0 %v2513_v41  ;;  %v2055_v57 = vadd.f32 %v9363_v46, %v2019_v58  ;;  %v1902_v7 = vmul.f32 %v9364_v51, %v5944_v18  ;;  %v1324_v2 = vadd.f32 %v1308_v62, %v1288_v50  ;;  %v1408_v32 = vmul.f32 %v9323_v44, %v5822_v54  ;;  %v9367_v30 = vld [vmem:[#allocation82_spill] sm:$0xff]  ;;  %v9370_v46 = vld [vmem:[#allocation93_spill] sm:$0xff]  ;;  %v9372_v62 = vld [vmem:[#allocation83_spill] sm:$0xff] }
 0x148   : >> { %v1738_v26 = vadd.f32 %v1722_v25, %v1702_v16  ;;  %9366 = vst [vmem:[#allocation68_spill] sm:$0xff] %v5970_v52  ;;  %v1966_v23 = vmul.f32 %v9367_v30, %v1934_v11  ;;  %v865_v41 = vadd.f32 %v9368_v6, %v801_v45  ;;  %v921_v58 = vmul.f32 %v9299_v60, %v9369_v40  ;;  %v5978_v51 = vld [vmem:[%s5005_s17 + $0x6d] sm:$0xff]  ;;  %v5985_v44 = vld [vmem:[%s5005_s17 + $0x85] sm:$0xff]  ;;  %v9375_v6 = vld [vmem:[#allocation34_spill] sm:$0xff] }
 0x149   : >> { %v2091_v63 = vadd.f32 %v9370_v46, %v2055_v57  ;;  %9371 = vst [vmem:[#allocation75_spill] sm:$0xff] %v5978_v51  ;;  %v2002_v50 = vmul.f32 %v9372_v62, %v5957_v15  ;;  %v1360_v54 = vadd.f32 %v1344_v9, %v1324_v2  ;;  %v1444_v25 = vmul.f32 %v9330_v42, %v5825_v3  ;;  %v9374_v45 = vld [vmem:[#allocation84_spill] sm:$0xff]  ;;  %v9376_v57 = vld [vmem:[#allocation29_spill] sm:$0xff]  ;;  %v9377_v30 = vld [vmem:[#allocation90_spill] sm:$0xff] }
 0x14a   : >> { %v1774_v16 = vadd.f32 %v1758_v21, %v1738_v26  ;;  %9373 = vst [vmem:[#allocation30_spill] sm:$0xff] %v5985_v44  ;;  %v2038_v11 = vmul.f32 %v9374_v45, %v5965_v56  ;;  %v901_v40 = vadd.f32 %v885_v1, %v865_v41  ;;  %v957_v46 = vmul.f32 %v9376_v57, %v9375_v6  ;;  %v5993_v18 = vld [vmem:[%s5005_s17 + $0x9d] sm:$0xff]  ;;  %v9379_v2 = vld [vmem:[#allocation85_spill] sm:$0xff]  ;;  %v9381_v1 = vld [vmem:[#allocation92_spill] sm:$0xff] }
 0x14b   : >> { %v2127_v60 = vadd.f32 %v9377_v30, %v2091_v63  ;;  %9378 = vst [vmem:[#allocation88_spill] sm:$0xff] %v5993_v18  ;;  %v5997_v9 = vmul.f32 %v9379_v2, %v5970_v52  ;;  %v1424_v21 = vadd.f32 %v1408_v32, %v1360_v54  ;;  %v9380_v26 = vld [vmem:[#allocation54_spill] sm:$0xff]  ;;  %v6003_v41 = vmul.f32 %v9381_v1, %v5978_v51  ;;  %v2214_v6 = vld [vmem:[%s5005_s17 + $0xe] sm:$0xff]  ;;  %v9383_v63 = vld [vmem:[#allocation31_spill] sm:$0xff] }
 0x14c   : >> { %v1480_v3 = vmul.f32 %v9380_v26, %v5835_v49  ;;  %v1810_v62 = vadd.f32 %v1794_v31, %v1774_v16  ;;  %v937_v45 = vadd.f32 %v921_v58, %v901_v40  ;;  %v9382_v56 = vld [vmem:[#allocation36_spill] sm:$0xff]  ;;  %v9384_v15 = vld [vmem:[#allocation97_spill] sm:$0xff]  ;;  %v9385_v2 = vld [vmem:[#allocation94_spill] sm:$0xff] }
 0x14d   : >> { %v993_v30 = vmul.f32 %v9383_v63, %v9382_v56  ;;  %v2163_v57 = vadd.f32 %v9384_v15, %v2127_v60  ;;  %v6011_v52 = vmul.f32 %v9385_v2, %v5985_v44  ;;  %v6014_v32 = vld [vmem:[%s5005_s17 + $0x26] sm:$0xff]  ;;  %v1460_v54 = vadd.f32 %v1444_v25, %v1424_v21  ;;  %v9386_v31 = vld [vmem:[#allocation57_spill] sm:$0xff]  ;;  %v9393_v26 = vld [vmem:[#allocation98_spill] sm:$0xff] }
 0x14e   : >> { %v1516_v16 = vmul.f32 %v9386_v31, %v5847_v39  ;;  %v6019_v49 = vld [vmem:[%s5005_s17 + $0xc1] sm:$0xff]  ;;  %v1846_v1 = vadd.f32 %v1830_v59, %v1810_v62  ;;  %v6026_v56 = vld [vmem:[%s5005_s17 + $0xb3] sm:$0xff]  ;;  %v973_v15 = vadd.f32 %v957_v46, %v937_v45  ;;  %v6032_v25 = vmul.f32 %v9393_v26, %v2214_v6 }
 0x14f   : >> { %9387 = vst [vmem:[#allocation44_spill] sm:$0xff] %v6019_v49  ;;  %v9388_v58 = vld [vmem:[#allocation95_spill] sm:$0xff]  ;;  %9389 = vst [vmem:[#allocation32_spill] sm:$0xff] %v6026_v56  ;;  %v9391_v51 = vld [vmem:[#allocation33_spill] sm:$0xff]  ;;  %v1496_v21 = vadd.f32 %v1480_v3, %v1460_v54  ;;  %v1624_v3 = vmul.f32 %v9341_v8, %v6026_v56 }
 0x150   : >> { %v6023_v40 = vmul.f32 %v9388_v58, %v5993_v18  ;;  %v9390_v60 = vld [vmem:[#allocation103_spill] sm:$0xff]  ;;  %v9394_v39 = vld [vmem:[#allocation60_spill] sm:$0xff]  ;;  %v1882_v59 = vadd.f32 %v1866_v48, %v1846_v1  ;;  %v1009_v18 = vadd.f32 %v993_v30, %v973_v15  ;;  %v9397_v42 = vld [vmem:[#allocation105_spill] sm:$0xff] }
 0x151   : >> { %v1029_v2 = vmul.f32 %v9391_v51, %v9390_v60  ;;  %v9392_v44 = vld [vmem:[#allocation91_spill] sm:$0xff]  ;;  %v1552_v31 = vmul.f32 %v9394_v39, %v5850_v0  ;;  %v1532_v51 = vadd.f32 %v1516_v16, %v1496_v21  ;;  %v9399_v48 = vld [vmem:[#allocation89_spill] sm:$0xff]  ;;  %v9400_v0 = vld [vmem:[#allocation96_spill] sm:$0xff] }
 0x152   : >> { %v2199_v63 = vadd.f32 %v9392_v44, %v2163_v57  ;;  %v9395_v62 = vld [vmem:[#allocation99_spill] sm:$0xff]  ;;  %v9398_v44 = vld [vmem:[#allocation61_spill] sm:$0xff]  ;;  %v1918_v6 = vadd.f32 %v1902_v7, %v1882_v59  ;;  %v586_v1 = vmul.f32 %v5020_v34, %v9399_v48  ;;  %v606_v30 = vmul.f32 %v5024_v35, %v9400_v0  ;;  %v9401_v15 = vld [vmem:[#allocation102_spill] sm:$0xff] }
 0x153   : >> { %v6038_v58 = vmul.f32 %v9395_v62, %v6014_v32  ;;  %v9396_v45 = vld [vmem:[#allocation35_spill] sm:$0xff]  ;;  %v1588_v57 = vmul.f32 %v9398_v44, %v5866_v29  ;;  %v1045_v54 = vadd.f32 %v1029_v2, %v1009_v18  ;;  %v9402_v26 = vld [vmem:[#allocation45_spill] sm:$0xff]  ;;  %v9405_v59 = vld [vmem:[#allocation112_spill] sm:$0xff]  ;;  %v1688_v0 = vmul.f32 %v9257_v17, %v5890_v4 }
 0x154   : >> { %v1065_v46 = vmul.f32 %v9396_v45, %v6019_v49  ;;  %v2263_v60 = vadd.f32 %v9397_v42, %v2199_v63  ;;  %v1568_v49 = vadd.f32 %v1552_v31, %v1532_v51  ;;  %v1165_v42 = vmul.f32 %v9221_v61, %v9402_v26  ;;  %v9403_v63 = vld [vmem:[#allocation100_spill] sm:$0xff]  ;;  %v9404_v18 = vld [vmem:[#allocation107_spill] sm:$0xff]  ;;  %v9406_v51 = vld [vmem:[#allocation46_spill] sm:$0xff] }
 0x155   : >> { %v642_v16 = vmul.f32 %v5028_v36, %v9403_v63  ;;  %v1982_v21 = vadd.f32 %v1966_v23, %v1918_v6  ;;  %v622_v7 = vadd.f32 %v606_v30, %v586_v1  ;;  %v678_v2 = vmul.f32 %v5032_v37, %v9404_v18  ;;  %v9408_v23 = vld [vmem:[#allocation111_spill] sm:$0xff]  ;;  %v9409_v6 = vld [vmem:[#allocation104_spill] sm:$0xff] }
 0x156   : >> { %v2299_v62 = vadd.f32 %v9401_v15, %v2263_v60  ;;  %v1081_v56 = vadd.f32 %v1065_v46, %v1045_v54  ;;  %v1604_v29 = vadd.f32 %v1588_v57, %v1568_v49  ;;  %v1201_v31 = vmul.f32 %v9228_v5, %v9406_v51  ;;  %v9407_v60 = vld [vmem:[#allocation51_spill] sm:$0xff]  ;;  %v6072_v57 = vld [vmem:[%s5005_s17 + $0xc8] sm:$0xff] }
 0x157   : >> { %v2018_v26 = vadd.f32 %v2002_v50, %v1982_v21  ;;  %v658_v63 = vadd.f32 %v642_v16, %v622_v7  ;;  %v714_v46 = vmul.f32 %v5046_v43, %v9408_v23  ;;  %v1724_v49 = vmul.f32 %v9347_v53, %v5900_v47  ;;  %9411 = vst [vmem:[#allocation93_spill] sm:$0xff] %v6072_v57  ;;  %v9413_v7 = vld [vmem:[#allocation40_spill] sm:$0xff]  ;;  %v9417_v23 = vld [vmem:[#allocation122_spill] sm:$0xff]  ;;  %v9447_v17 = vld [vmem:[#allocation115_spill] sm:$0xff] }
 0x158   : >> { %v2335_v48 = vadd.f32 %v9405_v59, %v2299_v62  ;;  %v1145_v15 = vadd.f32 %v9407_v60, %v1081_v56  ;;  %v1640_v1 = vadd.f32 %v1624_v3, %v1604_v29  ;;  %v9410_v62 = vld [vmem:[#allocation49_spill] sm:$0xff]  ;;  %v9412_v56 = vld [vmem:[#allocation126_spill] sm:$0xff]  ;;  %v1760_v29 = vmul.f32 %v9261_v13, %v5914_v19  ;;  %v6083_v60 = vld [vmem:[%s5005_s17 + $0xc2] sm:$0xff] }
 0x159   : >> { %v1237_v4 = vmul.f32 %v9233_v20, %v9410_v62  ;;  %v2054_v30 = vadd.f32 %v2038_v11, %v2018_v26  ;;  %v694_v21 = vadd.f32 %v678_v2, %v658_v63  ;;  %v750_v16 = vmul.f32 %v9206_v10, %v9412_v56  ;;  %v9414_v3 = vld [vmem:[#allocation50_spill] sm:$0xff]  ;;  %9415 = vst [vmem:[#allocation34_spill] sm:$0xff] %v6083_v60  ;;  %v9416_v26 = vld [vmem:[#allocation109_spill] sm:$0xff]  ;;  %v6141_v19 = vld [vmem:[%s5005_s17 + $0x86] sm:$0xff] }
 0x15a   : >> { %v2371_v54 = vadd.f32 %v9409_v6, %v2335_v48  ;;  %v1181_v50 = vadd.f32 %v1165_v42, %v1145_v15  ;;  %v1704_v59 = vadd.f32 %v1688_v0, %v1640_v1  ;;  %v1273_v48 = vmul.f32 %v9294_v24, %v9414_v3  ;;  %v9420_v62 = vld [vmem:[#allocation26_spill] sm:$0xff]  ;;  %9443 = vst [vmem:[#allocation105_spill] sm:$0xff] %v6141_v19  ;;  %v9448_v47 = vld [vmem:[#allocation121_spill] sm:$0xff] }
 0x15b   : >> { %v2090_v51 = vadd.f32 %v5997_v9, %v2054_v30  ;;  %v730_v42 = vadd.f32 %v714_v46, %v694_v21  ;;  %v786_v2 = vmul.f32 %v9216_v14, %v6072_v57  ;;  %v1796_v0 = vmul.f32 %v9356_v55, %v5920_v38  ;;  %v6094_v9 = vld [vmem:[%s5005_s17 + $0x3e] sm:$0xff]  ;;  %v9434_v57 = vld [vmem:[#allocation53_spill] sm:$0xff] }
 0x15c   : >> { %v2407_v18 = vadd.f32 %v9413_v7, %v2371_v54  ;;  %v1217_v11 = vadd.f32 %v1201_v31, %v1181_v50  ;;  %v1740_v63 = vadd.f32 %v1724_v49, %v1704_v59  ;;  %v1309_v6 = vmul.f32 %v9304_v12, %v9417_v23  ;;  %9418 = vst [vmem:[#allocation90_spill] sm:$0xff] %v6094_v9  ;;  %v9419_v46 = vld [vmem:[#allocation123_spill] sm:$0xff] }
 0x15d   : >> { %v2126_v54 = vadd.f32 %v6003_v41, %v2090_v51  ;;  %v766_v31 = vadd.f32 %v750_v16, %v730_v42  ;;  %v850_v30 = vmul.f32 %v9420_v62, %v9419_v46  ;;  %v9421_v50 = vld [vmem:[#allocation131_spill] sm:$0xff]  ;;  %v1832_v49 = vmul.f32 %v9360_v28, %v5928_v27  ;;  %v6105_v41 = vld [vmem:[%s5005_s17 + $0xb4] sm:$0xff]  ;;  %v9423_v16 = vld [vmem:[#allocation124_spill] sm:$0xff] }
 0x15e   : >> { %v2443_v15 = vadd.f32 %v9416_v26, %v2407_v18  ;;  %v1253_v1 = vadd.f32 %v1237_v4, %v1217_v11  ;;  %v1776_v7 = vadd.f32 %v1760_v29, %v1740_v63  ;;  %v1345_v18 = vmul.f32 %v9313_v33, %v6083_v60  ;;  %9422 = vst [vmem:[#allocation36_spill] sm:$0xff] %v6105_v41  ;;  %v9424_v11 = vld [vmem:[#allocation41_spill] sm:$0xff]  ;;  %v9426_v29 = vld [vmem:[#allocation106_spill] sm:$0xff]  ;;  %v9427_v63 = vld [vmem:[#allocation72_spill] sm:$0xff] }
 0x15f   : >> { %v2162_v59 = vadd.f32 %v6011_v52, %v2126_v54  ;;  %v802_v4 = vadd.f32 %v786_v2, %v766_v31  ;;  %v886_v51 = vmul.f32 %v9290_v22, %v9423_v16  ;;  %v2318_v26 = vmul.f32 %v9426_v29, %v6094_v9  ;;  %v9428_v23 = vld [vmem:[#allocation79_spill] sm:$0xff]  ;;  %v6118_v54 = vld [vmem:[%s5005_s17 + $0x56] sm:$0xff]  ;;  %v9431_v31 = vld [vmem:[#allocation28_spill] sm:$0xff] }
 0x160   : >> { %v2479_v21 = vadd.f32 %v9421_v50, %v2443_v15  ;;  %v1289_v3 = vadd.f32 %v1273_v48, %v1253_v1  ;;  %v1812_v15 = vadd.f32 %v1796_v0, %v1776_v7  ;;  %v1868_v46 = vmul.f32 %v9428_v23, %v9427_v63  ;;  %9429 = vst [vmem:[#allocation103_spill] sm:$0xff] %v6118_v54  ;;  %v9430_v1 = vld [vmem:[#allocation55_spill] sm:$0xff]  ;;  %v9432_v60 = vld [vmem:[#allocation80_spill] sm:$0xff]  ;;  %v9433_v7 = vld [vmem:[#allocation58_spill] sm:$0xff] }
 0x161   : >> { %v2198_v52 = vadd.f32 %v6023_v40, %v2162_v59  ;;  %v866_v2 = vadd.f32 %v850_v30, %v802_v4  ;;  %v922_v50 = vmul.f32 %v9431_v31, %v9430_v1  ;;  %v1904_v0 = vmul.f32 %v9432_v60, %v6105_v41  ;;  %v6129_v40 = vld [vmem:[%s5005_s17 + $0x6e] sm:$0xff]  ;;  %v9440_v27 = vld [vmem:[#allocation82_spill] sm:$0xff]  ;;  %v6168_v60 = vld [vmem:[%s5005_s17 + $0xc3] sm:$0xff] }
 0x162   : >> { %v6110_v42 = vadd.f32 %v9424_v11, %v2479_v21  ;;  %v1325_v48 = vadd.f32 %v1309_v6, %v1289_v3  ;;  %v1848_v16 = vadd.f32 %v1832_v49, %v1812_v15  ;;  %v1445_v63 = vmul.f32 %v9434_v57, %v9433_v7  ;;  %9435 = vst [vmem:[#allocation91_spill] sm:$0xff] %v6129_v40  ;;  %v9436_v3 = vld [vmem:[#allocation56_spill] sm:$0xff]  ;;  %v9437_v4 = vld [vmem:[#allocation29_spill] sm:$0xff]  ;;  %v9441_v7 = vld [vmem:[#allocation63_spill] sm:$0xff] }
 0x163   : >> { %v2262_v6 = vadd.f32 %v6032_v25, %v2198_v52  ;;  %v902_v59 = vadd.f32 %v886_v51, %v866_v2  ;;  %v958_v1 = vmul.f32 %v9437_v4, %v9436_v3  ;;  %v9438_v49 = vld [vmem:[#allocation108_spill] sm:$0xff]  ;;  %v9439_v41 = vld [vmem:[#allocation25_spill] sm:$0xff]  ;;  %v9446_v2 = vld [vmem:[#allocation31_spill] sm:$0xff]  ;;  %9460 = vst [vmem:[#allocation102_spill] sm:$0xff] %v6168_v60 }
 0x164   : >> { %9425 = vst [vmem:[#allocation97_spill] sm:$0xff] %v6110_v42  ;;  %v2519_v21 = vsel %vm432_vm0, %v6110_v42, 0.0  ;;  %v1361_v30 = vadd.f32 %v1345_v18, %v1325_v48  ;;  %v2354_v15 = vmul.f32 %v9438_v49, %v6118_v54  ;;  %v1884_v42 = vadd.f32 %v1868_v46, %v1848_v16  ;;  %v9444_v18 = vld [vmem:[#allocation59_spill] sm:$0xff]  ;;  %v9445_v48 = vld [vmem:[#allocation74_spill] sm:$0xff]  ;;  %v9450_v31 = vld [vmem:[#allocation64_spill] sm:$0xff] }
 0x165   : >> { %2520 = vadd.xlane.f32.xlu1 %v2519_v21  ;;  %v1968_v56 = vmul.f32 %v9440_v27, %v9439_v41  ;;  %v9442_v21 = vld [vmem:[#allocation54_spill] sm:$0xff]  ;;  %v2298_v25 = vadd.f32 %v6038_v58, %v2262_v6  ;;  %v938_v52 = vadd.f32 %v922_v50, %v902_v59  ;;  %v994_v3 = vmul.f32 %v9446_v2, %v9445_v48  ;;  %v9449_v41 = vld [vmem:[#allocation83_spill] sm:$0xff]  ;;  %v6154_v27 = vld [vmem:[%s5005_s17 + $0xc9] sm:$0xff] }
 0x166   : >> { %v1481_v38 = vmul.f32 %v9442_v21, %v9441_v7  ;;  %v1425_v51 = vadd.f32 %v9444_v18, %v1361_v30  ;;  %v2390_v46 = vmul.f32 %v9447_v17, %v6129_v40  ;;  %v1920_v16 = vadd.f32 %v1904_v0, %v1884_v42  ;;  %v9451_v7 = vld [vmem:[#allocation57_spill] sm:$0xff]  ;;  %9452 = vst [vmem:[#allocation89_spill] sm:$0xff] %v6154_v27  ;;  %v6157_v58 = vld [vmem:[%s5005_s17 + $0x9e] sm:$0xff]  ;;  %v9456_v2 = vld [vmem:[#allocation116_spill] sm:$0xff] }
 0x167   : >> { %v2004_v4 = vmul.f32 %v9449_v41, %v9448_v47  ;;  %v1517_v21 = vmul.f32 %v9451_v7, %v9450_v31  ;;  %9453 = vst [vmem:[#allocation96_spill] sm:$0xff] %v6157_v58  ;;  %v2334_v6 = vadd.f32 %v2318_v26, %v2298_v25  ;;  %v974_v30 = vadd.f32 %v958_v1, %v938_v52  ;;  %v9454_v59 = vld [vmem:[#allocation130_spill] sm:$0xff]  ;;  %v9455_v18 = vld [vmem:[#allocation33_spill] sm:$0xff]  ;;  %v9457_v22 = vld [vmem:[#allocation68_spill] sm:$0xff] }
 0x168   : >> { %v1461_v50 = vadd.f32 %v1445_v63, %v1425_v51  ;;  %v1030_v48 = vmul.f32 %v9455_v18, %v9454_v59  ;;  %v2426_v42 = vmul.f32 %v9456_v2, %v6141_v19  ;;  %v1984_v0 = vadd.f32 %v1968_v56, %v1920_v16  ;;  %v9458_v47 = vld [vmem:[#allocation84_spill] sm:$0xff]  ;;  %v9459_v57 = vld [vmem:[#allocation65_spill] sm:$0xff]  ;;  %v9462_v59 = vld [vmem:[#allocation75_spill] sm:$0xff] }
 0x169   : >> { %v2040_v41 = vmul.f32 %v9458_v47, %v9457_v22  ;;  %v1553_v31 = vmul.f32 %v9394_v39, %v9459_v57  ;;  %v2370_v7 = vadd.f32 %v2354_v15, %v2334_v6  ;;  %v1010_v63 = vadd.f32 %v994_v3, %v974_v30  ;;  %v9461_v25 = vld [vmem:[#allocation117_spill] sm:$0xff] }
 0x16a   : >> { %v1497_v26 = vadd.f32 %v1481_v38, %v1461_v50  ;;  %v1066_v1 = vmul.f32 %v9396_v45, %v6154_v27  ;;  %v2462_v51 = vmul.f32 %v9461_v25, %v6157_v58  ;;  %v2020_v52 = vadd.f32 %v2004_v4, %v1984_v0  ;;  %v9463_v56 = vld [vmem:[#allocation85_spill] sm:$0xff]  ;;  %v9466_v38 = vld [vmem:[#allocation127_spill] sm:$0xff]  ;;  %v9468_v27 = vld [vmem:[#allocation30_spill] sm:$0xff] }
 0x16b   : >> { %v2076_v16 = vmul.f32 %v9463_v56, %v9462_v59  ;;  %v9464_v18 = vld [vmem:[#allocation125_spill] sm:$0xff]  ;;  %v2406_v47 = vadd.f32 %v2390_v46, %v2370_v7  ;;  %v1046_v6 = vadd.f32 %v1030_v48, %v1010_v63  ;;  %v9469_v45 = vld [vmem:[#allocation92_spill] sm:$0xff]  ;;  %v9471_v0 = vld [vmem:[#allocation94_spill] sm:$0xff]  ;;  %v1625_v59 = vmul.f32 %v9341_v8, %v6168_v60 }
 0x16c   : >> { %v1589_v22 = vmul.f32 %v9398_v44, %v9464_v18  ;;  %v6179_v57 = vld [vmem:[%s5005_s17 + $0xb5] sm:$0xff]  ;;  %v1533_v15 = vadd.f32 %v1517_v21, %v1497_v26  ;;  %v2056_v30 = vadd.f32 %v2040_v41, %v2020_v52  ;;  %v2112_v39 = vmul.f32 %v9469_v45, %v9468_v27  ;;  %v9470_v4 = vld [vmem:[#allocation88_spill] sm:$0xff]  ;;  %v9473_v41 = vld [vmem:[#allocation95_spill] sm:$0xff] }
 0x16d   : >> { %9465 = vst [vmem:[#allocation45_spill] sm:$0xff] %v6179_v57  ;;  %v9467_v3 = vld [vmem:[#allocation37_spill] sm:$0xff]  ;;  %v2148_v25 = vmul.f32 %v9471_v0, %v9470_v4  ;;  %v2442_v46 = vadd.f32 %v2426_v42, %v2406_v47  ;;  %v1082_v21 = vadd.f32 %v1066_v1, %v1046_v6  ;;  %v9472_v18 = vld [vmem:[#allocation86_spill] sm:$0xff]  ;;  %v2184_v63 = vmul.f32 %v9473_v41, %v6179_v57  ;;  %v9475_v27 = vld [vmem:[#allocation128_spill] sm:$0xff] }
 0x16e   : >> { %v1130_v50 = vmul.f32 %v9467_v3, %v9466_v38  ;;  %v1569_v7 = vadd.f32 %v1553_v31, %v1533_v15  ;;  %v1166_v48 = vmul.f32 %v9221_v61, %v9472_v18  ;;  %v2092_v26 = vadd.f32 %v2076_v16, %v2056_v30  ;;  %v9474_v52 = vld [vmem:[#allocation98_spill] sm:$0xff]  ;;  %v4434_v47 = vld [vmem:[%s5005_s17 + $0x48] sm:$0xff]  ;;  %v9476_v1 = vld [vmem:[#allocation77_spill] sm:$0xff] }
 0x16f   : >> { %v2248_v38 = vmul.f32 %v9474_v52, %v6014_v32  ;;  %v1202_v4 = vmul.f32 %v9228_v5, %v9475_v27  ;;  %v2478_v3 = vadd.f32 %v2462_v51, %v2442_v46  ;;  %v587_v42 = vmul.f32 %v4434_v47, %v5020_v34  ;;  %v6202_v15 = vld [vmem:[%s5005_s17 + $0x60] sm:$0xff]  ;;  %v6207_v32 = vld [vmem:[%s5005_s17 + $0x78] sm:$0xff] }
 0x170   : >> { %v1605_v60 = vadd.f32 %v1589_v22, %v1569_v7  ;;  %v1146_v0 = vadd.f32 %v1130_v50, %v1082_v21  ;;  %v2128_v31 = vadd.f32 %v2112_v39, %v2092_v26  ;;  %v1725_v16 = vmul.f32 %v9347_v53, %v9476_v1  ;;  %9477 = vst [vmem:[#allocation100_spill] sm:$0xff] %v6202_v15  ;;  %v9480_v39 = vld [vmem:[#allocation101_spill] sm:$0xff]  ;;  %v9485_v1 = vld [vmem:[#allocation99_spill] sm:$0xff] }
 0x171   : >> { %v607_v6 = vmul.f32 %v6202_v15, %v5024_v35  ;;  %9478 = vst [vmem:[#allocation107_spill] sm:$0xff] %v6207_v32  ;;  %v643_v27 = vmul.f32 %v6207_v32, %v5028_v36  ;;  %v6212_v22 = vadd.f32 %v9424_v11, %v2478_v3  ;;  %v1238_v30 = vmul.f32 %v9233_v20, %v9480_v39  ;;  %v9481_v7 = vld [vmem:[#allocation81_spill] sm:$0xff]  ;;  %v9505_v15 = vld [vmem:[#allocation54_spill] sm:$0xff] }
 0x172   : >> { %v1641_v51 = vadd.f32 %v1625_v59, %v1605_v60  ;;  %v1182_v50 = vadd.f32 %v1166_v48, %v1146_v0  ;;  %v2164_v46 = vadd.f32 %v2148_v25, %v2128_v31  ;;  %v1761_v21 = vmul.f32 %v9261_v13, %v9481_v7  ;;  %v6219_v26 = vld [vmem:[%s5005_s17 + $0x90] sm:$0xff]  ;;  %v9483_v60 = vld [vmem:[#allocation76_spill] sm:$0xff] }
 0x173   : >> { %9479 = vst [vmem:[#allocation112_spill] sm:$0xff] %v6212_v22  ;;  %v623_v18 = vadd.f32 %v607_v6, %v587_v42  ;;  %9482 = vst [vmem:[#allocation46_spill] sm:$0xff] %v6219_v26  ;;  %v679_v47 = vmul.f32 %v6219_v26, %v5032_v37  ;;  %v2516_v3 = vsel %vm432_vm0, %v6212_v22, 0.0  ;;  %v9484_v48 = vld [vmem:[#allocation129_spill] sm:$0xff]  ;;  %v2284_v42 = vmul.f32 %v9485_v1, %v6094_v9  ;;  %v6234_v7 = vld [vmem:[%s5005_s17 + $0xa8] sm:$0xff] }
 0x174   : >> { %v1705_v59 = vadd.f32 %v9483_v60, %v1641_v51  ;;  %v1218_v0 = vadd.f32 %v1202_v4, %v1182_v50  ;;  %v1274_v25 = vmul.f32 %v9294_v24, %v9484_v48  ;;  %2517 = vadd.xlane.f32.xlu0 %v2516_v3  ;;  %v2200_v31 = vadd.f32 %v2184_v63, %v2164_v46  ;;  %v6231_v6 = vld [vmem:[%s5005_s17 + $0xca] sm:$0xff]  ;;  %v6239_v51 = vld [vmem:[%s5005_s17 + $0x7c] sm:$0xff] }
 0x175   : >> { %9486 = vst [vmem:[#allocation51_spill] sm:$0xff] %v6231_v6  ;;  %v659_v39 = vadd.f32 %v643_v27, %v623_v18  ;;  %9487 = vst [vmem:[#allocation111_spill] sm:$0xff] %v6234_v7  ;;  %v715_v22 = vmul.f32 %v6234_v7, %v5046_v43  ;;  %v1797_v4 = vmul.f32 %v6239_v51, %v9356_v55  ;;  %v9489_v50 = vld [vmem:[#allocation120_spill] sm:$0xff]  ;;  %v6246_v3 = vld [vmem:[%s5005_s17 + $0xd8] sm:$0xff] }
 0x176   : >> { %v1741_v26 = vadd.f32 %v1725_v16, %v1705_v59  ;;  %9488 = vst [vmem:[#allocation104_spill] sm:$0xff] %v6239_v51  ;;  %v1254_v63 = vadd.f32 %v1238_v30, %v1218_v0  ;;  %v1310_v46 = vmul.f32 %v9304_v12, %v9489_v50  ;;  %9490 = vst [vmem:[#allocation49_spill] sm:$0xff] %v6246_v3  ;;  %v9491_v48 = vld [vmem:[#allocation13_spill] sm:$0xff]  ;;  %v9508_v9 = vld [vmem:[#allocation28_spill] sm:$0xff] }
 0x177   : >> { %v2264_v60 = vadd.f32 %v2248_v38, %v2200_v31  ;;  %v2320_v27 = vmul.f32 %v9426_v29, %v6118_v54  ;;  %v695_v18 = vadd.f32 %v679_v47, %v659_v39  ;;  %v751_v16 = vmul.f32 %v9206_v10, %v9491_v48  ;;  %v6253_v7 = vld [vmem:[%s5005_s17 + $0x94] sm:$0xff]  ;;  %v6262_v47 = vld [vmem:[%s5005_s17 + $0xc4] sm:$0xff] }
 0x178   : >> { %v1777_v59 = vadd.f32 %v1761_v21, %v1741_v26  ;;  %9492 = vst [vmem:[#allocation40_spill] sm:$0xff] %v6253_v7  ;;  %v1833_v30 = vmul.f32 %v6253_v7, %v9360_v28  ;;  %v1290_v0 = vadd.f32 %v1274_v25, %v1254_v63  ;;  %v1346_v50 = vmul.f32 %v9313_v33, %v6231_v6  ;;  %v9494_v51 = vld [vmem:[#allocation73_spill] sm:$0xff]  ;;  %v9495_v63 = vld [vmem:[#allocation71_spill] sm:$0xff]  ;;  %v9496_v7 = vld [vmem:[#allocation52_spill] sm:$0xff] }
 0x179   : >> { %v2300_v38 = vadd.f32 %v2284_v42, %v2264_v60  ;;  %v2356_v31 = vmul.f32 %v9438_v49, %v6129_v40  ;;  %9493 = vst [vmem:[#allocation50_spill] sm:$0xff] %v6262_v47  ;;  %v731_v39 = vadd.f32 %v715_v22, %v695_v18  ;;  %v787_v21 = vmul.f32 %v9216_v14, %v6246_v3  ;;  %v4441_v40 = vld [vmem:[%s5005_s17 + $0x49] sm:$0xff]  ;;  %v6275_v18 = vld [vmem:[%s5005_s17 + $0xb6] sm:$0xff] }
 0x17a   : >> { %v1813_v26 = vadd.f32 %v1797_v4, %v1777_v59  ;;  %v1869_v48 = vmul.f32 %v9428_v23, %v9494_v51  ;;  %v1326_v25 = vadd.f32 %v1310_v46, %v1290_v0  ;;  %v1410_v32 = vmul.f32 %v9496_v7, %v9495_v63  ;;  %9497 = vst [vmem:[#allocation109_spill] sm:$0xff] %v6275_v18  ;;  %v9498_v59 = vld [vmem:[#allocation80_spill] sm:$0xff]  ;;  %v9499_v0 = vld [vmem:[#allocation118_spill] sm:$0xff]  ;;  %v9500_v3 = vld [vmem:[#allocation53_spill] sm:$0xff] }
 0x17b   : >> { %v2336_v42 = vadd.f32 %v2320_v27, %v2300_v38  ;;  %v2392_v60 = vmul.f32 %v9447_v17, %v6141_v19  ;;  %v767_v6 = vadd.f32 %v751_v16, %v731_v39  ;;  %v851_v22 = vmul.f32 %v4441_v40, %v9420_v62  ;;  %v6284_v38 = vld [vmem:[%s5005_s17 + $0x61] sm:$0xff] }
 0x17c   : >> { %v1849_v4 = vadd.f32 %v1833_v30, %v1813_v26  ;;  %v1905_v51 = vmul.f32 %v9498_v59, %v6262_v47  ;;  %v1362_v46 = vadd.f32 %v1346_v50, %v1326_v25  ;;  %v1446_v63 = vmul.f32 %v9500_v3, %v9499_v0  ;;  %9501 = vst [vmem:[#allocation122_spill] sm:$0xff] %v6284_v38  ;;  %v9502_v40 = vld [vmem:[#allocation27_spill] sm:$0xff]  ;;  %v4443_v30 = vld [vmem:[%s5005_s17 + $0x35] sm:$0xff]  ;;  %v9504_v25 = vld [vmem:[#allocation132_spill] sm:$0xff] }
 0x17d   : >> { %v2372_v54 = vadd.f32 %v2356_v31, %v2336_v42  ;;  %v2428_v27 = vmul.f32 %v9456_v2, %v6157_v58  ;;  %v803_v16 = vadd.f32 %v787_v21, %v767_v6  ;;  %v887_v39 = vmul.f32 %v6284_v38, %v9502_v40  ;;  %v9503_v26 = vld [vmem:[#allocation82_spill] sm:$0xff]  ;;  %v9506_v42 = vld [vmem:[#allocation117_spill] sm:$0xff]  ;;  %v9518_v3 = vld [vmem:[#allocation60_spill] sm:$0xff] }
 0x17e   : >> { %v1969_v19 = vmul.f32 %v4443_v30, %v9503_v26  ;;  %v1885_v47 = vadd.f32 %v1869_v48, %v1849_v4  ;;  %v1426_v50 = vadd.f32 %v1410_v32, %v1362_v46  ;;  %v1482_v0 = vmul.f32 %v9505_v15, %v9504_v25  ;;  %v6295_v21 = vld [vmem:[%s5005_s17 + $0x79] sm:$0xff]  ;;  %v6300_v30 = vld [vmem:[%s5005_s17 + $0x4d] sm:$0xff] }
 0x17f   : >> { %v2408_v31 = vadd.f32 %v2392_v60, %v2372_v54  ;;  %v2464_v58 = vmul.f32 %v9506_v42, %v6275_v18  ;;  %v867_v6 = vadd.f32 %v851_v22, %v803_v16  ;;  %9507 = vst [vmem:[#allocation123_spill] sm:$0xff] %v6295_v21  ;;  %v923_v38 = vmul.f32 %v6295_v21, %v9508_v9  ;;  %v9510_v48 = vld [vmem:[#allocation83_spill] sm:$0xff]  ;;  %v9511_v46 = vld [vmem:[#allocation133_spill] sm:$0xff]  ;;  %v9516_v15 = vld [vmem:[#allocation84_spill] sm:$0xff] }
 0x180   : >> { %v1921_v57 = vadd.f32 %v1905_v51, %v1885_v47  ;;  %9509 = vst [vmem:[#allocation131_spill] sm:$0xff] %v6300_v30  ;;  %v2005_v32 = vmul.f32 %v6300_v30, %v9510_v48  ;;  %v1462_v4 = vadd.f32 %v1446_v63, %v1426_v50  ;;  %v9512_v54 = vld [vmem:[#allocation57_spill] sm:$0xff]  ;;  %v6312_v51 = vld [vmem:[%s5005_s17 + $0x65] sm:$0xff]  ;;  %v9517_v50 = vld [vmem:[#allocation110_spill] sm:$0xff] }
 0x181   : >> { %v1518_v60 = vmul.f32 %v9512_v54, %v9511_v46  ;;  %v2444_v25 = vadd.f32 %v2428_v27, %v2408_v31  ;;  %v903_v22 = vadd.f32 %v887_v39, %v867_v6  ;;  %v6307_v16 = vld [vmem:[%s5005_s17 + $0x91] sm:$0xff]  ;;  %9515 = vst [vmem:[#allocation55_spill] sm:$0xff] %v6312_v51  ;;  %v2041_v30 = vmul.f32 %v6312_v51, %v9516_v15  ;;  %v6322_v31 = vld [vmem:[%s5005_s17 + $0xa9] sm:$0xff]  ;;  %v9521_v6 = vld [vmem:[#allocation31_spill] sm:$0xff] }
 0x182   : >> { %9513 = vst [vmem:[#allocation124_spill] sm:$0xff] %v6307_v16  ;;  %v9514_v18 = vld [vmem:[#allocation29_spill] sm:$0xff]  ;;  %v1985_v47 = vadd.f32 %v1969_v19, %v1921_v57  ;;  %v1498_v63 = vadd.f32 %v1482_v0, %v1462_v4  ;;  %v1554_v46 = vmul.f32 %v9518_v3, %v9517_v50  ;;  %9520 = vst [vmem:[#allocation56_spill] sm:$0xff] %v6322_v31  ;;  %v9523_v4 = vld [vmem:[#allocation32_spill] sm:$0xff] }
 0x183   : >> { %v959_v21 = vmul.f32 %v6307_v16, %v9514_v18  ;;  %v2480_v54 = vadd.f32 %v2464_v58, %v2444_v25  ;;  %v6319_v27 = vld [vmem:[%s5005_s17 + $0xcb] sm:$0xff]  ;;  %v939_v39 = vadd.f32 %v923_v38, %v903_v22  ;;  %v995_v19 = vmul.f32 %v6322_v31, %v9521_v6  ;;  %v6327_v16 = vld [vmem:[%s5005_s17 + $0x7d] sm:$0xff]  ;;  %v6345_v6 = vld [vmem:[%s5005_s17 + $0x95] sm:$0xff] }
 0x184   : >> { %9519 = vst [vmem:[#allocation58_spill] sm:$0xff] %v6319_v27  ;;  %v2021_v57 = vadd.f32 %v2005_v32, %v1985_v47  ;;  %9522 = vst [vmem:[#allocation25_spill] sm:$0xff] %v6327_v16  ;;  %v2077_v51 = vmul.f32 %v6327_v16, %v9463_v56  ;;  %v1534_v0 = vadd.f32 %v1518_v60, %v1498_v63  ;;  %v6334_v58 = vld [vmem:[%s5005_s17 + $0xd9] sm:$0xff]  ;;  %v6340_v38 = vld [vmem:[%s5005_s17 + $0xc5] sm:$0xff] }
 0x185   : >> { %v1590_v50 = vmul.f32 %v9398_v44, %v9523_v4  ;;  %9524 = vst [vmem:[#allocation63_spill] sm:$0xff] %v6334_v58  ;;  %v6337_v25 = vadd.f32 %v9424_v11, %v2480_v54  ;;  %9526 = vst [vmem:[#allocation74_spill] sm:$0xff] %v6340_v38  ;;  %v975_v22 = vadd.f32 %v959_v21, %v939_v39  ;;  %v9527_v3 = vld [vmem:[#allocation44_spill] sm:$0xff]  ;;  %v9528_v31 = vld [vmem:[#allocation33_spill] sm:$0xff] }
 0x186   : >> { %v1031_v32 = vmul.f32 %v9528_v31, %v9527_v3  ;;  %v2057_v47 = vadd.f32 %v2041_v30, %v2021_v57  ;;  %9529 = vst [vmem:[#allocation64_spill] sm:$0xff] %v6345_v6  ;;  %v2113_v60 = vmul.f32 %v6345_v6, %v9469_v45  ;;  %v1570_v63 = vadd.f32 %v1554_v46, %v1534_v0  ;;  %v9530_v21 = vld [vmem:[#allocation87_spill] sm:$0xff]  ;;  %v9531_v39 = vld [vmem:[#allocation94_spill] sm:$0xff]  ;;  %v9535_v31 = vld [vmem:[#allocation37_spill] sm:$0xff] }
 0x187   : >> { %9525 = vst [vmem:[#allocation59_spill] sm:$0xff] %v6337_v25  ;;  %v1626_v54 = vmul.f32 %v9341_v8, %v6319_v27  ;;  %v2522_v4 = vsel %vm432_vm0, %v6337_v25, 0.0  ;;  %v2149_v16 = vmul.f32 %v9531_v39, %v9530_v21  ;;  %v1011_v3 = vadd.f32 %v995_v19, %v975_v22  ;;  %v9532_v30 = vld [vmem:[#allocation35_spill] sm:$0xff]  ;;  %v9533_v6 = vld [vmem:[#allocation114_spill] sm:$0xff]  ;;  %v4451_v25 = vld [vmem:[%s5005_s17 + $0x4a] sm:$0xff] }
 0x188   : >> { %v1067_v57 = vmul.f32 %v9532_v30, %v6334_v58  ;;  %2523 = vadd.xlane.f32.xlu1 %v2522_v4  ;;  %v2093_v44 = vadd.f32 %v2077_v51, %v2057_v47  ;;  %v2185_v46 = vmul.f32 %v9473_v41, %v6340_v38  ;;  %v1606_v0 = vadd.f32 %v1590_v50, %v1570_v63  ;;  %v9534_v27 = vld [vmem:[#allocation66_spill] sm:$0xff]  ;;  %v4452_v19 = vld [vmem:[%s5005_s17 + $0x50] sm:$0xff]  ;;  %v6366_v58 = vld [vmem:[%s5005_s17 + $0x68] sm:$0xff] }
 0x189   : >> { %v1690_v8 = vmul.f32 %v9534_v27, %v9533_v6  ;;  %v1047_v11 = vadd.f32 %v1031_v32, %v1011_v3  ;;  %v1131_v21 = vmul.f32 %v4451_v25, %v9535_v31  ;;  %v588_v22 = vmul.f32 %v4452_v19, %v5020_v34  ;;  %9536 = vst [vmem:[#allocation65_spill] sm:$0xff] %v6366_v58  ;;  %v9537_v50 = vld [vmem:[#allocation119_spill] sm:$0xff] }
 0x18a   : >> { %v608_v51 = vmul.f32 %v6366_v58, %v5024_v35  ;;  %v2129_v4 = vadd.f32 %v2113_v60, %v2093_v44  ;;  %v1642_v47 = vadd.f32 %v1626_v54, %v1606_v0  ;;  %v1726_v6 = vmul.f32 %v9347_v53, %v9537_v50  ;;  %v6373_v3 = vld [vmem:[%s5005_s17 + $0x80] sm:$0xff]  ;;  %v6383_v58 = vld [vmem:[%s5005_s17 + $0x98] sm:$0xff] }
 0x18b   : >> { %9538 = vst [vmem:[#allocation125_spill] sm:$0xff] %v6373_v3  ;;  %v644_v25 = vmul.f32 %v6373_v3, %v5028_v36  ;;  %v1083_v32 = vadd.f32 %v1067_v57, %v1047_v11  ;;  %v6378_v63 = vld [vmem:[%s5005_s17 + $0x62] sm:$0xff]  ;;  %9540 = vst [vmem:[#allocation86_spill] sm:$0xff] %v6383_v58  ;;  %v680_v44 = vmul.f32 %v6383_v58, %v5032_v37  ;;  %v4457_v60 = vld [vmem:[%s5005_s17 + $0x36] sm:$0xff] }
 0x18c   : >> { %9539 = vst [vmem:[#allocation127_spill] sm:$0xff] %v6378_v63  ;;  %v1167_v19 = vmul.f32 %v6378_v63, %v9221_v61  ;;  %v624_v38 = vadd.f32 %v608_v51, %v588_v22  ;;  %v2249_v54 = vmul.f32 %v4457_v60, %v9474_v52  ;;  %v2165_v0 = vadd.f32 %v2149_v16, %v2129_v4  ;;  %v9541_v11 = vld [vmem:[#allocation18_spill] sm:$0xff]  ;;  %v6399_v60 = vld [vmem:[%s5005_s17 + $0x4e] sm:$0xff] }
 0x18d   : >> { %v1706_v50 = vadd.f32 %v1690_v8, %v1642_v47  ;;  %v1762_v57 = vmul.f32 %v9261_v13, %v9541_v11  ;;  %v1147_v3 = vadd.f32 %v1131_v21, %v1083_v32  ;;  %v6392_v53 = vld [vmem:[%s5005_s17 + $0x7a] sm:$0xff]  ;;  %9544 = vst [vmem:[#allocation77_spill] sm:$0xff] %v6399_v60  ;;  %v2285_v8 = vmul.f32 %v6399_v60, %v9485_v1  ;;  %v9545_v21 = vld [vmem:[#allocation21_spill] sm:$0xff] }
 0x18e   : >> { %9542 = vst [vmem:[#allocation128_spill] sm:$0xff] %v6392_v53  ;;  %v1203_v22 = vmul.f32 %v6392_v53, %v9228_v5  ;;  %v660_v51 = vadd.f32 %v644_v25, %v624_v38  ;;  %v9543_v63 = vld [vmem:[#allocation126_spill] sm:$0xff]  ;;  %v2201_v27 = vadd.f32 %v2185_v46, %v2165_v0  ;;  %v1798_v4 = vmul.f32 %v9356_v55, %v9545_v21  ;;  %v6406_v47 = vld [vmem:[%s5005_s17 + $0xe0] sm:$0xff]  ;;  %v9548_v25 = vld [vmem:[#allocation93_spill] sm:$0xff] }
 0x18f   : >> { %v716_v58 = vmul.f32 %v5046_v43, %v9543_v63  ;;  %v1742_v16 = vadd.f32 %v1726_v6, %v1706_v50  ;;  %9546 = vst [vmem:[#allocation101_spill] sm:$0xff] %v6406_v47  ;;  %v1183_v32 = vadd.f32 %v1167_v19, %v1147_v3  ;;  %v6409_v11 = vld [vmem:[%s5005_s17 + $0x92] sm:$0xff]  ;;  %v752_v63 = vmul.f32 %v9206_v10, %v9548_v25  ;;  %v6416_v53 = vld [vmem:[%s5005_s17 + $0x66] sm:$0xff] }
 0x190   : >> { %9547 = vst [vmem:[#allocation81_spill] sm:$0xff] %v6409_v11  ;;  %v1239_v38 = vmul.f32 %v6409_v11, %v9233_v20  ;;  %v696_v46 = vadd.f32 %v680_v44, %v660_v51  ;;  %v2265_v0 = vadd.f32 %v2249_v54, %v2201_v27  ;;  %9549 = vst [vmem:[#allocation76_spill] sm:$0xff] %v6416_v53  ;;  %v9550_v21 = vld [vmem:[#allocation72_spill] sm:$0xff] }
 0x191   : >> { %v2321_v6 = vmul.f32 %v6416_v53, %v9426_v29  ;;  %v1778_v50 = vadd.f32 %v1762_v57, %v1742_v16  ;;  %v1834_v3 = vmul.f32 %v9360_v28, %v9550_v21  ;;  %v6423_v19 = vld [vmem:[%s5005_s17 + $0xcc] sm:$0xff]  ;;  %v1219_v60 = vadd.f32 %v1203_v22, %v1183_v32  ;;  %v6433_v57 = vld [vmem:[%s5005_s17 + $0x7e] sm:$0xff]  ;;  %v6447_v28 = vld [vmem:[%s5005_s17 + $0x96] sm:$0xff] }
 0x192   : >> { %9551 = vst [vmem:[#allocation129_spill] sm:$0xff] %v6423_v19  ;;  %v6426_v11 = vld [vmem:[%s5005_s17 + $0xaa] sm:$0xff]  ;;  %v732_v44 = vadd.f32 %v716_v58, %v696_v46  ;;  %v788_v54 = vmul.f32 %v9216_v14, %v6406_v47  ;;  %v2301_v51 = vadd.f32 %v2285_v8, %v2265_v0  ;;  %9553 = vst [vmem:[#allocation71_spill] sm:$0xff] %v6433_v57  ;;  %v6440_v32 = vld [vmem:[%s5005_s17 + $0xda] sm:$0xff] }
 0x193   : >> { %9552 = vst [vmem:[#allocation73_spill] sm:$0xff] %v6426_v11  ;;  %v1275_v27 = vmul.f32 %v6426_v11, %v9294_v24  ;;  %v2357_v16 = vmul.f32 %v6433_v57, %v9438_v49  ;;  %v1814_v21 = vadd.f32 %v1798_v4, %v1778_v50  ;;  %v9554_v25 = vld [vmem:[#allocation36_spill] sm:$0xff]  ;;  %9555 = vst [vmem:[#allocation118_spill] sm:$0xff] %v6440_v32  ;;  %v9556_v11 = vld [vmem:[#allocation34_spill] sm:$0xff] }
 0x194   : >> { %v1870_v22 = vmul.f32 %v9428_v23, %v9554_v25  ;;  %v1255_v53 = vadd.f32 %v1239_v38, %v1219_v60  ;;  %v1311_v58 = vmul.f32 %v9304_v12, %v9556_v11  ;;  %v768_v46 = vadd.f32 %v752_v63, %v732_v44  ;;  %v4464_v47 = vld [vmem:[%s5005_s17 + $0x51] sm:$0xff]  ;;  %9557 = vst [vmem:[#allocation132_spill] sm:$0xff] %v6447_v28  ;;  %v6454_v60 = vld [vmem:[%s5005_s17 + $0xc6] sm:$0xff] }
 0x195   : >> { %v852_v8 = vmul.f32 %v4464_v47, %v9420_v62  ;;  %v2337_v0 = vadd.f32 %v2321_v6, %v2301_v51  ;;  %v2393_v4 = vmul.f32 %v6447_v28, %v9447_v17  ;;  %v1850_v50 = vadd.f32 %v1834_v3, %v1814_v21  ;;  %9558 = vst [vmem:[#allocation28_spill] sm:$0xff] %v6454_v60  ;;  %v6459_v47 = vld [vmem:[%s5005_s17 + $0x69] sm:$0xff]  ;;  %v9572_v57 = vld [vmem:[#allocation31_spill] sm:$0xff] }
 0x196   : >> { %v1906_v25 = vmul.f32 %v9498_v59, %v6423_v19  ;;  %v1291_v38 = vadd.f32 %v1275_v27, %v1255_v53  ;;  %v1347_v63 = vmul.f32 %v9313_v33, %v6440_v32  ;;  %v804_v44 = vadd.f32 %v788_v54, %v768_v46  ;;  %9559 = vst [vmem:[#allocation133_spill] sm:$0xff] %v6459_v47  ;;  %v9560_v11 = vld [vmem:[#allocation113_spill] sm:$0xff]  ;;  %v6470_v46 = vld [vmem:[%s5005_s17 + $0x81] sm:$0xff] }
 0x197   : >> { %v888_v6 = vmul.f32 %v6459_v47, %v9502_v40  ;;  %v2373_v51 = vadd.f32 %v2357_v16, %v2337_v0  ;;  %v2429_v3 = vmul.f32 %v9456_v2, %v9560_v11  ;;  %v1886_v21 = vadd.f32 %v1870_v22, %v1850_v50  ;;  %v9561_v28 = vld [vmem:[#allocation121_spill] sm:$0xff]  ;;  %9562 = vst [vmem:[#allocation110_spill] sm:$0xff] %v6470_v46  ;;  %v9563_v0 = vld [vmem:[#allocation68_spill] sm:$0xff] }
 0x198   : >> { %v1970_v19 = vmul.f32 %v9503_v26, %v9561_v28  ;;  %v1327_v53 = vadd.f32 %v1311_v58, %v1291_v38  ;;  %v4467_v27 = vld [vmem:[%s5005_s17 + $0x4b] sm:$0xff]  ;;  %v868_v54 = vadd.f32 %v852_v8, %v804_v44  ;;  %v924_v47 = vmul.f32 %v6470_v46, %v9508_v9  ;;  %v6479_v50 = vld [vmem:[%s5005_s17 + $0x63] sm:$0xff] }
 0x199   : >> { %v1411_v32 = vmul.f32 %v4467_v27, %v9496_v7  ;;  %v2409_v16 = vadd.f32 %v2393_v4, %v2373_v51  ;;  %v2465_v11 = vmul.f32 %v9506_v42, %v6454_v60  ;;  %v1922_v22 = vadd.f32 %v1906_v25, %v1886_v21  ;;  %9564 = vst [vmem:[#allocation87_spill] sm:$0xff] %v6479_v50  ;;  %v9565_v38 = vld [vmem:[#allocation53_spill] sm:$0xff]  ;;  %v6484_v27 = vld [vmem:[%s5005_s17 + $0x99] sm:$0xff] }
 0x19a   : >> { %v2006_v28 = vmul.f32 %v9510_v48, %v9563_v0  ;;  %v1363_v58 = vadd.f32 %v1347_v63, %v1327_v53  ;;  %v1447_v8 = vmul.f32 %v6479_v50, %v9565_v38  ;;  %v904_v44 = vadd.f32 %v888_v6, %v868_v54  ;;  %9566 = vst [vmem:[#allocation114_spill] sm:$0xff] %v6484_v27  ;;  %v9567_v25 = vld [vmem:[#allocation75_spill] sm:$0xff]  ;;  %v6491_v0 = vld [vmem:[%s5005_s17 + $0xcd] sm:$0xff]  ;;  %v9570_v60 = vld [vmem:[#allocation54_spill] sm:$0xff] }
 0x19b   : >> { %v960_v4 = vmul.f32 %v6484_v27, %v9514_v18  ;;  %v2445_v51 = vadd.f32 %v2429_v3, %v2409_v16  ;;  %v1986_v46 = vadd.f32 %v1970_v19, %v1922_v22  ;;  %v2042_v21 = vmul.f32 %v9516_v15, %v9567_v25  ;;  %9568 = vst [vmem:[#allocation119_spill] sm:$0xff] %v6491_v0  ;;  %v6494_v53 = vld [vmem:[%s5005_s17 + $0x7b] sm:$0xff]  ;;  %v9574_v16 = vld [vmem:[#allocation88_spill] sm:$0xff]  ;;  %v9577_v15 = vld [vmem:[#allocation57_spill] sm:$0xff] }
 0x19c   : >> { %v1427_v63 = vadd.f32 %v1411_v32, %v1363_v58  ;;  %9569 = vst [vmem:[#allocation18_spill] sm:$0xff] %v6494_v53  ;;  %v1483_v6 = vmul.f32 %v6494_v53, %v9570_v60  ;;  %v940_v54 = vadd.f32 %v924_v47, %v904_v44  ;;  %v9571_v50 = vld [vmem:[#allocation130_spill] sm:$0xff]  ;;  %v2114_v22 = vmul.f32 %v9469_v45, %v9574_v16  ;;  %v6505_v25 = vld [vmem:[%s5005_s17 + $0xe1] sm:$0xff]  ;;  %v9579_v53 = vld [vmem:[#allocation33_spill] sm:$0xff] }
 0x19d   : >> { %v996_v38 = vmul.f32 %v9572_v57, %v9571_v50  ;;  %v2481_v27 = vadd.f32 %v2465_v11, %v2445_v51  ;;  %v2022_v18 = vadd.f32 %v2006_v28, %v1986_v46  ;;  %v9573_v3 = vld [vmem:[#allocation30_spill] sm:$0xff]  ;;  %9575 = vst [vmem:[#allocation126_spill] sm:$0xff] %v6505_v25  ;;  %v9578_v50 = vld [vmem:[#allocation89_spill] sm:$0xff]  ;;  %v9584_v45 = vld [vmem:[#allocation60_spill] sm:$0xff] }
 0x19e   : >> { %v2078_v19 = vmul.f32 %v9463_v56, %v9573_v3  ;;  %v1463_v32 = vadd.f32 %v1447_v8, %v1427_v63  ;;  %v6508_v58 = vld [vmem:[%s5005_s17 + $0x93] sm:$0xff]  ;;  %v976_v44 = vadd.f32 %v960_v4, %v940_v54  ;;  %v1032_v11 = vmul.f32 %v9579_v53, %v9578_v50  ;;  %v6522_v57 = vld [vmem:[%s5005_s17 + $0xab] sm:$0xff] }
 0x19f   : >> { %9576 = vst [vmem:[#allocation21_spill] sm:$0xff] %v6508_v58  ;;  %v1519_v47 = vmul.f32 %v6508_v58, %v9577_v15  ;;  %v9580_v46 = vld [vmem:[#allocation41_spill] sm:$0xff]  ;;  %v2058_v51 = vadd.f32 %v2042_v21, %v2022_v18  ;;  %v2186_v8 = vmul.f32 %v9473_v41, %v6491_v0  ;;  %9583 = vst [vmem:[#allocation113_spill] sm:$0xff] %v6522_v57  ;;  %v9585_v21 = vld [vmem:[#allocation90_spill] sm:$0xff] }
 0x1a0   : >> { %v6515_v28 = vadd.f32 %v9580_v46, %v2481_v27  ;;  %v9582_v3 = vld [vmem:[#allocation45_spill] sm:$0xff]  ;;  %v1499_v63 = vadd.f32 %v1483_v6, %v1463_v32  ;;  %v1555_v4 = vmul.f32 %v6522_v57, %v9584_v45  ;;  %v1012_v54 = vadd.f32 %v996_v38, %v976_v44  ;;  %v9587_v6 = vld [vmem:[#allocation102_spill] sm:$0xff] }
 0x1a1   : >> { %v2150_v16 = vmul.f32 %v9531_v39, %v9582_v3  ;;  %v1068_v50 = vmul.f32 %v9532_v30, %v6505_v25  ;;  %v2094_v27 = vadd.f32 %v2078_v19, %v2058_v51  ;;  %v2250_v58 = vmul.f32 %v9474_v52, %v9585_v21  ;;  %v6533_v3 = vld [vmem:[%s5005_s17 + $0xdb] sm:$0xff]  ;;  %v9588_v32 = vld [vmem:[#allocation61_spill] sm:$0xff]  ;;  %v9589_v25 = vld [vmem:[#allocation100_spill] sm:$0xff] }
 0x1a2   : >> { %9581 = vst [vmem:[#allocation72_spill] sm:$0xff] %v6515_v28  ;;  %v2525_v18 = vsel %vm432_vm0, %v6515_v28, 0.0  ;;  %9586 = vst [vmem:[#allocation121_spill] sm:$0xff] %v6533_v3  ;;  %v1591_v0 = vmul.f32 %v9588_v32, %v9587_v6  ;;  %v1535_v53 = vadd.f32 %v1519_v47, %v1499_v63  ;;  %v1048_v57 = vadd.f32 %v1032_v11, %v1012_v54  ;;  %v4474_v38 = vld [vmem:[%s5005_s17 + $0x52] sm:$0xff]  ;;  %v9590_v51 = vld [vmem:[#allocation103_spill] sm:$0xff] }
 0x1a3   : >> { %2526 = vadd.xlane.f32.xlu0 %v2525_v18  ;;  %v1132_v44 = vmul.f32 %v4474_v38, %v9535_v31  ;;  %v589_v28 = vmul.f32 %v9589_v25, %v5020_v34  ;;  %v2130_v19 = vadd.f32 %v2114_v22, %v2094_v27  ;;  %v2286_v21 = vmul.f32 %v9485_v1, %v9590_v51  ;;  %v9591_v30 = vld [vmem:[#allocation107_spill] sm:$0xff]  ;;  %v9592_v6 = vld [vmem:[#allocation46_spill] sm:$0xff]  ;;  %v6550_v38 = vld [vmem:[%s5005_s17 + $0x6a] sm:$0xff] }
 0x1a4   : >> { %v609_v45 = vmul.f32 %v9591_v30, %v5024_v35  ;;  %v645_v18 = vmul.f32 %v9592_v6, %v5028_v36  ;;  %v1571_v47 = vadd.f32 %v1555_v4, %v1535_v53  ;;  %v9593_v11 = vld [vmem:[#allocation62_spill] sm:$0xff]  ;;  %v1084_v54 = vadd.f32 %v1068_v50, %v1048_v57  ;;  %9594 = vst [vmem:[#allocation68_spill] sm:$0xff] %v6550_v38  ;;  %v9595_v27 = vld [vmem:[#allocation91_spill] sm:$0xff]  ;;  %v4476_v4 = vld [vmem:[%s5005_s17 + $0x4c] sm:$0xff] }
 0x1a5   : >> { %v1627_v63 = vmul.f32 %v9593_v11, %v6533_v3  ;;  %v1168_v22 = vmul.f32 %v6550_v38, %v9221_v61  ;;  %v2166_v25 = vadd.f32 %v2150_v16, %v2130_v19  ;;  %v2322_v51 = vmul.f32 %v9426_v29, %v9595_v27  ;;  %v9596_v30 = vld [vmem:[#allocation111_spill] sm:$0xff]  ;;  %v9597_v3 = vld [vmem:[#allocation66_spill] sm:$0xff]  ;;  %v9599_v19 = vld [vmem:[#allocation105_spill] sm:$0xff] }
 0x1a6   : >> { %v625_v31 = vadd.f32 %v609_v45, %v589_v28  ;;  %v681_v6 = vmul.f32 %v9596_v30, %v5032_v37  ;;  %v1607_v53 = vadd.f32 %v1591_v0, %v1571_v47  ;;  %v1691_v57 = vmul.f32 %v4476_v4, %v9597_v3  ;;  %v6561_v11 = vld [vmem:[%s5005_s17 + $0x82] sm:$0xff]  ;;  %v9600_v27 = vld [vmem:[#allocation13_spill] sm:$0xff]  ;;  %v6575_v4 = vld [vmem:[%s5005_s17 + $0x9a] sm:$0xff] }
 0x1a7   : >> { %v1148_v50 = vadd.f32 %v1132_v44, %v1084_v54  ;;  %9598 = vst [vmem:[#allocation75_spill] sm:$0xff] %v6561_v11  ;;  %v1204_v38 = vmul.f32 %v6561_v11, %v9228_v5  ;;  %v2202_v16 = vadd.f32 %v2186_v8, %v2166_v25  ;;  %v2358_v45 = vmul.f32 %v9438_v49, %v9599_v19  ;;  %v6570_v47 = vld [vmem:[%s5005_s17 + $0x64] sm:$0xff]  ;;  %v6580_v25 = vld [vmem:[%s5005_s17 + $0xf0] sm:$0xff] }
 0x1a8   : >> { %v661_v28 = vadd.f32 %v645_v18, %v625_v31  ;;  %v717_v30 = vmul.f32 %v5046_v43, %v9600_v27  ;;  %v1643_v0 = vadd.f32 %v1627_v63, %v1607_v53  ;;  %9601 = vst [vmem:[#allocation130_spill] sm:$0xff] %v6570_v47  ;;  %v9602_v37 = vld [vmem:[#allocation67_spill] sm:$0xff]  ;;  %9603 = vst [vmem:[#allocation30_spill] sm:$0xff] %v6575_v4  ;;  %v9605_v31 = vld [vmem:[#allocation96_spill] sm:$0xff] }
 0x1a9   : >> { %v1727_v44 = vmul.f32 %v6570_v47, %v9602_v37  ;;  %v1184_v54 = vadd.f32 %v1168_v22, %v1148_v50  ;;  %v1240_v8 = vmul.f32 %v6575_v4, %v9233_v20  ;;  %9604 = vst [vmem:[#allocation88_spill] sm:$0xff] %v6580_v25  ;;  %v2266_v19 = vadd.f32 %v2250_v58, %v2202_v16  ;;  %v9606_v63 = vld [vmem:[#allocation49_spill] sm:$0xff]  ;;  %v9608_v22 = vld [vmem:[#allocation104_spill] sm:$0xff] }
 0x1aa   : >> { %v2394_v18 = vmul.f32 %v9447_v17, %v9605_v31  ;;  %v697_v27 = vadd.f32 %v681_v6, %v661_v28  ;;  %v753_v53 = vmul.f32 %v9206_v10, %v9606_v63  ;;  %v6587_v11 = vld [vmem:[%s5005_s17 + $0xce] sm:$0xff]  ;;  %v1707_v47 = vadd.f32 %v1691_v57, %v1643_v0  ;;  %v6596_v6 = vld [vmem:[%s5005_s17 + $0xe2] sm:$0xff] }
 0x1ab   : >> { %9607 = vst [vmem:[#allocation90_spill] sm:$0xff] %v6587_v11  ;;  %v1763_v50 = vmul.f32 %v9608_v22, %v9261_v13  ;;  %v1220_v37 = vadd.f32 %v1204_v38, %v1184_v54  ;;  %v9609_v43 = vld [vmem:[#allocation120_spill] sm:$0xff]  ;;  %v2302_v58 = vadd.f32 %v2286_v21, %v2266_v19  ;;  %v9610_v16 = vld [vmem:[#allocation109_spill] sm:$0xff]  ;;  %9611 = vst [vmem:[#allocation100_spill] sm:$0xff] %v6596_v6 }
 0x1ac   : >> { %v1276_v4 = vmul.f32 %v9294_v24, %v9609_v43  ;;  %v2430_v31 = vmul.f32 %v9456_v2, %v9610_v16  ;;  %v733_v28 = vadd.f32 %v717_v30, %v697_v27  ;;  %v789_v63 = vmul.f32 %v9216_v14, %v6580_v25  ;;  %v9612_v57 = vld [vmem:[#allocation40_spill] sm:$0xff]  ;;  %v9613_v38 = vld [vmem:[#allocation51_spill] sm:$0xff]  ;;  %v9615_v30 = vld [vmem:[#allocation122_spill] sm:$0xff] }
 0x1ad   : >> { %v1743_v10 = vadd.f32 %v1727_v44, %v1707_v47  ;;  %v1799_v0 = vmul.f32 %v9612_v57, %v9356_v55  ;;  %v1256_v22 = vadd.f32 %v1240_v8, %v1220_v37  ;;  %v1312_v54 = vmul.f32 %v9304_v12, %v9613_v38  ;;  %v6607_v19 = vld [vmem:[%s5005_s17 + $0xdc] sm:$0xff]  ;;  %v6612_v47 = vld [vmem:[%s5005_s17 + $0xac] sm:$0xff] }
 0x1ae   : >> { %v2338_v43 = vadd.f32 %v2322_v51, %v2302_v58  ;;  %v2466_v21 = vmul.f32 %v9506_v42, %v6587_v11  ;;  %9614 = vst [vmem:[#allocation66_spill] sm:$0xff] %v6607_v19  ;;  %v769_v16 = vadd.f32 %v753_v53, %v733_v28  ;;  %v853_v27 = vmul.f32 %v9615_v30, %v9420_v62  ;;  %v9617_v44 = vld [vmem:[#allocation78_spill] sm:$0xff]  ;;  %v9619_v53 = vld [vmem:[#allocation123_spill] sm:$0xff] }
 0x1af   : >> { %v1779_v25 = vadd.f32 %v1763_v50, %v1743_v10  ;;  %9616 = vst [vmem:[#allocation13_spill] sm:$0xff] %v6612_v47  ;;  %v1835_v37 = vmul.f32 %v6612_v47, %v9617_v44  ;;  %v1292_v8 = vadd.f32 %v1276_v4, %v1256_v22  ;;  %v1348_v51 = vmul.f32 %v9313_v33, %v6596_v6  ;;  %v9618_v38 = vld [vmem:[#allocation50_spill] sm:$0xff] }
 0x1b0   : >> { %v2374_v58 = vadd.f32 %v2358_v45, %v2338_v43  ;;  %v1871_v11 = vmul.f32 %v9428_v23, %v9618_v38  ;;  %v805_v57 = vadd.f32 %v789_v63, %v769_v16  ;;  %v889_v28 = vmul.f32 %v9619_v53, %v9502_v40  ;;  %v4481_v62 = vld [vmem:[%s5005_s17 + $0x53] sm:$0xff]  ;;  %v9620_v45 = vld [vmem:[#allocation131_spill] sm:$0xff]  ;;  %v9621_v63 = vld [vmem:[#allocation124_spill] sm:$0xff] }
 0x1b1   : >> { %v1815_v30 = vadd.f32 %v1799_v0, %v1779_v25  ;;  %v1907_v10 = vmul.f32 %v9498_v59, %v6607_v19  ;;  %v1328_v50 = vadd.f32 %v1312_v54, %v1292_v8  ;;  %v1412_v4 = vmul.f32 %v4481_v62, %v9496_v7  ;;  %v9622_v25 = vld [vmem:[#allocation55_spill] sm:$0xff]  ;;  %v6633_v54 = vld [vmem:[%s5005_s17 + $0x6b] sm:$0xff] }
 0x1b2   : >> { %v2410_v22 = vadd.f32 %v2394_v18, %v2374_v58  ;;  %v1971_v43 = vmul.f32 %v9620_v45, %v9503_v26  ;;  %v869_v6 = vadd.f32 %v853_v27, %v805_v57  ;;  %v925_v16 = vmul.f32 %v9621_v63, %v9508_v9  ;;  %9623 = vst [vmem:[#allocation120_spill] sm:$0xff] %v6633_v54  ;;  %v9624_v8 = vld [vmem:[#allocation53_spill] sm:$0xff]  ;;  %v9625_v58 = vld [vmem:[#allocation84_spill] sm:$0xff] }
 0x1b3   : >> { %v1851_v38 = vadd.f32 %v1835_v37, %v1815_v30  ;;  %v2007_v0 = vmul.f32 %v9622_v25, %v9510_v48  ;;  %v1364_v19 = vadd.f32 %v1348_v51, %v1328_v50  ;;  %v1448_v62 = vmul.f32 %v6633_v54, %v9624_v8  ;;  %v9626_v53 = vld [vmem:[#allocation25_spill] sm:$0xff]  ;;  %v9628_v27 = vld [vmem:[#allocation56_spill] sm:$0xff]  ;;  %v6642_v30 = vld [vmem:[%s5005_s17 + $0xdd] sm:$0xff] }
 0x1b4   : >> { %v2446_v18 = vadd.f32 %v2430_v31, %v2410_v22  ;;  %v2043_v45 = vmul.f32 %v9626_v53, %v9625_v58  ;;  %v905_v47 = vadd.f32 %v889_v28, %v869_v6  ;;  %v9627_v57 = vld [vmem:[#allocation29_spill] sm:$0xff]  ;;  %9629 = vst [vmem:[#allocation122_spill] sm:$0xff] %v6642_v30  ;;  %v9630_v51 = vld [vmem:[#allocation64_spill] sm:$0xff]  ;;  %v9636_v8 = vld [vmem:[#allocation74_spill] sm:$0xff] }
 0x1b5   : >> { %v961_v63 = vmul.f32 %v9628_v27, %v9627_v57  ;;  %v1887_v37 = vadd.f32 %v1871_v11, %v1851_v38  ;;  %v2079_v50 = vmul.f32 %v9630_v51, %v9463_v56  ;;  %v1428_v25 = vadd.f32 %v1412_v4, %v1364_v19  ;;  %v6647_v48 = vld [vmem:[%s5005_s17 + $0x83] sm:$0xff]  ;;  %v6652_v53 = vld [vmem:[%s5005_s17 + $0xad] sm:$0xff]  ;;  %v6661_v51 = vld [vmem:[%s5005_s17 + $0x9b] sm:$0xff] }
 0x1b6   : >> { %9631 = vst [vmem:[#allocation131_spill] sm:$0xff] %v6647_v48  ;;  %v1484_v31 = vmul.f32 %v6647_v48, %v9570_v60  ;;  %v2482_v22 = vadd.f32 %v2466_v21, %v2446_v18  ;;  %9632 = vst [vmem:[#allocation134_spill] sm:$0xff] %v6652_v53  ;;  %v9633_v6 = vld [vmem:[#allocation92_spill] sm:$0xff]  ;;  %v941_v27 = vadd.f32 %v925_v16, %v905_v47  ;;  %v9635_v38 = vld [vmem:[#allocation31_spill] sm:$0xff] }
 0x1b7   : >> { %v2115_v28 = vmul.f32 %v6652_v53, %v9633_v6  ;;  %v9634_v11 = vld [vmem:[#allocation44_spill] sm:$0xff]  ;;  %v1923_v57 = vadd.f32 %v1907_v10, %v1887_v37  ;;  %v2151_v19 = vmul.f32 %v9531_v39, %v9636_v8  ;;  %v1464_v4 = vadd.f32 %v1448_v62, %v1428_v25  ;;  %v6666_v18 = vld [vmem:[%s5005_s17 + $0xf1] sm:$0xff]  ;;  %v9640_v10 = vld [vmem:[#allocation63_spill] sm:$0xff] }
 0x1b8   : >> { %v997_v54 = vmul.f32 %v9635_v38, %v9634_v11  ;;  %9637 = vst [vmem:[#allocation44_spill] sm:$0xff] %v6661_v51  ;;  %v1520_v21 = vmul.f32 %v6661_v51, %v9577_v15  ;;  %9638 = vst [vmem:[#allocation135_spill] sm:$0xff] %v6666_v18  ;;  %v6669_v48 = vadd.f32 %v9580_v46, %v2482_v22  ;;  %v9641_v37 = vld [vmem:[#allocation33_spill] sm:$0xff]  ;;  %v9643_v39 = vld [vmem:[#allocation32_spill] sm:$0xff] }
 0x1b9   : >> { %v2187_v47 = vmul.f32 %v9473_v41, %v6642_v30  ;;  %v977_v16 = vadd.f32 %v961_v63, %v941_v27  ;;  %v1033_v11 = vmul.f32 %v9641_v37, %v9640_v10  ;;  %v1987_v53 = vadd.f32 %v1971_v43, %v1923_v57  ;;  %v9642_v25 = vld [vmem:[#allocation77_spill] sm:$0xff]  ;;  %v9644_v51 = vld [vmem:[#allocation60_spill] sm:$0xff]  ;;  %v9647_v43 = vld [vmem:[#allocation35_spill] sm:$0xff] }
 0x1ba   : >> { %9639 = vst [vmem:[#allocation136_spill] sm:$0xff] %v6669_v48  ;;  %v6677_v62 = vmul.f32 %v9642_v25, %v9474_v52  ;;  %v1500_v8 = vadd.f32 %v1484_v31, %v1464_v4  ;;  %v1556_v15 = vmul.f32 %v9644_v51, %v9643_v39  ;;  %v2528_v22 = vsel %vm432_vm0, %v6669_v48, 0.0  ;;  %v9645_v46 = vld [vmem:[#allocation76_spill] sm:$0xff]  ;;  %v9648_v4 = vld [vmem:[#allocation58_spill] sm:$0xff]  ;;  %v9649_v30 = vld [vmem:[#allocation65_spill] sm:$0xff] }
 0x1bb   : >> { %v6685_v38 = vmul.f32 %v9645_v46, %v9485_v1  ;;  %v6688_v63 = vld [vmem:[%s5005_s17 + $0xe3] sm:$0xff]  ;;  %v1013_v27 = vadd.f32 %v997_v54, %v977_v16  ;;  %v1069_v57 = vmul.f32 %v9647_v43, %v6666_v18  ;;  %2529 = vadd.xlane.f32.xlu1 %v2528_v22  ;;  %v2023_v25 = vadd.f32 %v2007_v0, %v1987_v53  ;;  %v9650_v51 = vld [vmem:[#allocation37_spill] sm:$0xff]  ;;  %v9653_v18 = vld [vmem:[#allocation86_spill] sm:$0xff] }
 0x1bc   : >> { %9646 = vst [vmem:[#allocation77_spill] sm:$0xff] %v6688_v63  ;;  %v1536_v31 = vadd.f32 %v1520_v21, %v1500_v8  ;;  %v1592_v39 = vmul.f32 %v9588_v32, %v9648_v4  ;;  %v590_v48 = vmul.f32 %v9649_v30, %v5020_v34  ;;  %v9651_v46 = vld [vmem:[#allocation127_spill] sm:$0xff]  ;;  %v9652_v54 = vld [vmem:[#allocation125_spill] sm:$0xff]  ;;  %v646_v22 = vmul.f32 %v9653_v18, %v5028_v36  ;;  %v9655_v21 = vld [vmem:[#allocation62_spill] sm:$0xff] }
 0x1bd   : >> { %v1049_v10 = vadd.f32 %v1033_v11, %v1013_v27  ;;  %v1133_v1 = vmul.f32 %v9651_v46, %v9650_v51  ;;  %v610_v16 = vmul.f32 %v9652_v54, %v5024_v35  ;;  %v2059_v43 = vadd.f32 %v2043_v45, %v2023_v25  ;;  %v9654_v53 = vld [vmem:[#allocation71_spill] sm:$0xff]  ;;  %v9656_v27 = vld [vmem:[#allocation128_spill] sm:$0xff]  ;;  %v6711_v54 = vld [vmem:[%s5005_s17 + $0xb0] sm:$0xff] }
 0x1be   : >> { %v6704_v0 = vmul.f32 %v9654_v53, %v9426_v29  ;;  %v1572_v8 = vadd.f32 %v1556_v15, %v1536_v31  ;;  %v1628_v30 = vmul.f32 %v9655_v21, %v6688_v63  ;;  %v1169_v46 = vmul.f32 %v9656_v27, %v9221_v61  ;;  %9657 = vst [vmem:[#allocation32_spill] sm:$0xff] %v6711_v54  ;;  %v9658_v35 = vld [vmem:[#allocation17_spill] sm:$0xff]  ;;  %v9659_v53 = vld [vmem:[#allocation132_spill] sm:$0xff] }
 0x1bf   : >> { %v1085_v11 = vadd.f32 %v1069_v57, %v1049_v10  ;;  %v626_v4 = vadd.f32 %v610_v16, %v590_v48  ;;  %v682_v45 = vmul.f32 %v6711_v54, %v9658_v35  ;;  %v2095_v25 = vadd.f32 %v2079_v50, %v2059_v43  ;;  %v4487_v18 = vld [vmem:[%s5005_s17 + $0x54] sm:$0xff]  ;;  %v9662_v29 = vld [vmem:[#allocation20_spill] sm:$0xff] }
 0x1c0   : >> { %v6717_v15 = vmul.f32 %v9659_v53, %v9438_v49  ;;  %v1608_v31 = vadd.f32 %v1592_v39, %v1572_v8  ;;  %v1692_v10 = vmul.f32 %v4487_v18, %v9597_v3  ;;  %v9660_v48 = vld [vmem:[#allocation81_spill] sm:$0xff]  ;;  %v9665_v18 = vld [vmem:[#allocation67_spill] sm:$0xff] }
 0x1c1   : >> { %v1149_v57 = vadd.f32 %v1133_v1, %v1085_v11  ;;  %v1205_v16 = vmul.f32 %v9660_v48, %v9228_v5  ;;  %v662_v27 = vadd.f32 %v646_v22, %v626_v4  ;;  %v9661_v63 = vld [vmem:[#allocation93_spill] sm:$0xff]  ;;  %v2131_v54 = vadd.f32 %v2115_v28, %v2095_v25  ;;  %v6738_v11 = vld [vmem:[%s5005_s17 + $0xf8] sm:$0xff]  ;;  %v6752_v49 = vld [vmem:[%s5005_s17 + $0x84] sm:$0xff] }
 0x1c2   : >> { %v718_v61 = vmul.f32 %v9662_v29, %v9661_v63  ;;  %v6726_v50 = vld [vmem:[%s5005_s17 + $0xae] sm:$0xff]  ;;  %v1644_v39 = vadd.f32 %v1628_v30, %v1608_v31  ;;  %9666 = vst [vmem:[#allocation127_spill] sm:$0xff] %v6738_v11  ;;  %v6741_v4 = vld [vmem:[%s5005_s17 + $0xde] sm:$0xff]  ;;  %9672 = vst [vmem:[#allocation93_spill] sm:$0xff] %v6752_v49 }
 0x1c3   : >> { %9663 = vst [vmem:[#allocation65_spill] sm:$0xff] %v6726_v50  ;;  %v6730_v43 = vmul.f32 %v6726_v50, %v9447_v17  ;;  %v6733_v8 = vld [vmem:[%s5005_s17 + $0x6c] sm:$0xff]  ;;  %9667 = vst [vmem:[#allocation62_spill] sm:$0xff] %v6741_v4  ;;  %v1185_v22 = vadd.f32 %v1169_v46, %v1149_v57  ;;  %v698_v25 = vadd.f32 %v682_v45, %v662_v27  ;;  %v9670_v48 = vld [vmem:[#allocation22_spill] sm:$0xff] }
 0x1c4   : >> { %9664 = vst [vmem:[#allocation37_spill] sm:$0xff] %v6733_v8  ;;  %v1728_v1 = vmul.f32 %v6733_v8, %v9665_v18  ;;  %v9668_v63 = vld [vmem:[#allocation73_spill] sm:$0xff]  ;;  %v2167_v30 = vadd.f32 %v2151_v19, %v2131_v54  ;;  %v9671_v31 = vld [vmem:[#allocation28_spill] sm:$0xff]  ;;  %v1708_v8 = vadd.f32 %v1692_v10, %v1644_v39  ;;  %v1764_v46 = vmul.f32 %v6752_v49, %v9261_v13  ;;  %v9673_v18 = vld [vmem:[#allocation34_spill] sm:$0xff] }
 0x1c5   : >> { %v1241_v28 = vmul.f32 %v9668_v63, %v9233_v20  ;;  %v9669_v53 = vld [vmem:[#allocation101_spill] sm:$0xff]  ;;  %v6749_v17 = vmul.f32 %v9456_v2, %v9671_v31  ;;  %v1221_v57 = vadd.f32 %v1205_v16, %v1185_v22  ;;  %v1277_v27 = vmul.f32 %v9294_v24, %v9673_v18  ;;  %v6765_v10 = vld [vmem:[%s5005_s17 + $0x9c] sm:$0xff]  ;;  %v6773_v16 = vld [vmem:[%s5005_s17 + $0xe4] sm:$0xff] }
 0x1c6   : >> { %v754_v50 = vmul.f32 %v9670_v48, %v9669_v53  ;;  %v734_v45 = vadd.f32 %v718_v61, %v698_v25  ;;  %v790_v53 = vmul.f32 %v9216_v14, %v6738_v11  ;;  %v2203_v63 = vadd.f32 %v2187_v47, %v2167_v30  ;;  %9674 = vst [vmem:[#allocation34_spill] sm:$0xff] %v6765_v10  ;;  %v6770_v31 = vld [vmem:[%s5005_s17 + $0xf2] sm:$0xff]  ;;  %v9680_v11 = vld [vmem:[#allocation36_spill] sm:$0xff] }
 0x1c7   : >> { %v6762_v19 = vmul.f32 %v9506_v42, %v6741_v4  ;;  %v1744_v54 = vadd.f32 %v1728_v1, %v1708_v8  ;;  %v1800_v39 = vmul.f32 %v6765_v10, %v9356_v55  ;;  %9675 = vst [vmem:[#allocation137_spill] sm:$0xff] %v6770_v31  ;;  %9676 = vst [vmem:[#allocation138_spill] sm:$0xff] %v6773_v16  ;;  %v9677_v18 = vld [vmem:[#allocation118_spill] sm:$0xff]  ;;  %v9679_v30 = vld [vmem:[#allocation133_spill] sm:$0xff] }
 0x1c8   : >> { %v1257_v61 = vadd.f32 %v1241_v28, %v1221_v57  ;;  %v1313_v22 = vmul.f32 %v9304_v12, %v9677_v18  ;;  %v770_v47 = vadd.f32 %v754_v50, %v734_v45  ;;  %v9678_v25 = vld [vmem:[#allocation26_spill] sm:$0xff]  ;;  %v2267_v8 = vadd.f32 %v6677_v62, %v2203_v63  ;;  %v9681_v10 = vld [vmem:[#allocation129_spill] sm:$0xff] }
 0x1c9   : >> { %v854_v4 = vmul.f32 %v9679_v30, %v9678_v25  ;;  %v1780_v1 = vadd.f32 %v1764_v46, %v1744_v54  ;;  %v1836_v49 = vmul.f32 %v9617_v44, %v9680_v11  ;;  %v1872_v42 = vmul.f32 %v9428_v23, %v9681_v10  ;;  %v9682_v50 = vld [vmem:[#allocation110_spill] sm:$0xff]  ;;  %v9694_v18 = vld [vmem:[#allocation45_spill] sm:$0xff] }
 0x1ca   : >> { %v1293_v2 = vadd.f32 %v1277_v27, %v1257_v61  ;;  %v1349_v28 = vmul.f32 %v9313_v33, %v6770_v31  ;;  %v806_v57 = vadd.f32 %v790_v53, %v770_v47  ;;  %v890_v45 = vmul.f32 %v9682_v50, %v9502_v40  ;;  %v4492_v46 = vld [vmem:[%s5005_s17 + $0x55] sm:$0xff]  ;;  %v9683_v61 = vld [vmem:[#allocation87_spill] sm:$0xff] }
 0x1cb   : >> { %v2303_v62 = vadd.f32 %v6685_v38, %v2267_v8  ;;  %v1816_v63 = vadd.f32 %v1800_v39, %v1780_v1  ;;  %v1908_v11 = vmul.f32 %v9498_v59, %v6773_v16  ;;  %v1972_v54 = vmul.f32 %v4492_v46, %v9503_v26  ;;  %v9684_v53 = vld [vmem:[#allocation114_spill] sm:$0xff]  ;;  %v6799_v39 = vld [vmem:[%s5005_s17 + $0x6d] sm:$0xff]  ;;  %v9686_v8 = vld [vmem:[#allocation83_spill] sm:$0xff] }
 0x1cc   : >> { %v1329_v27 = vadd.f32 %v1313_v22, %v1293_v2  ;;  %v1413_v30 = vmul.f32 %v9683_v61, %v9496_v7  ;;  %v870_v10 = vadd.f32 %v854_v4, %v806_v57  ;;  %v926_v47 = vmul.f32 %v9684_v53, %v9508_v9  ;;  %9685 = vst [vmem:[#allocation133_spill] sm:$0xff] %v6799_v39  ;;  %v6804_v16 = vld [vmem:[%s5005_s17 + $0x85] sm:$0xff]  ;;  %v9689_v57 = vld [vmem:[#allocation53_spill] sm:$0xff]  ;;  %v9690_v46 = vld [vmem:[#allocation18_spill] sm:$0xff] }
 0x1cd   : >> { %v2339_v50 = vadd.f32 %v6704_v0, %v2303_v62  ;;  %v1852_v38 = vadd.f32 %v1836_v49, %v1816_v63  ;;  %v2008_v1 = vmul.f32 %v6799_v39, %v9686_v8  ;;  %9687 = vst [vmem:[#allocation36_spill] sm:$0xff] %v6804_v16  ;;  %v2044_v2 = vmul.f32 %v6804_v16, %v9625_v58  ;;  %v6809_v22 = vld [vmem:[%s5005_s17 + $0xe5] sm:$0xff]  ;;  %v6814_v0 = vld [vmem:[%s5005_s17 + $0xb1] sm:$0xff]  ;;  %v6820_v31 = vld [vmem:[%s5005_s17 + $0x9d] sm:$0xff] }
 0x1ce   : >> { %9688 = vst [vmem:[#allocation87_spill] sm:$0xff] %v6809_v22  ;;  %v1365_v4 = vadd.f32 %v1349_v28, %v1329_v27  ;;  %v1449_v61 = vmul.f32 %v9690_v46, %v9689_v57  ;;  %v906_v53 = vadd.f32 %v890_v45, %v870_v10  ;;  %9691 = vst [vmem:[#allocation139_spill] sm:$0xff] %v6814_v0  ;;  %v9692_v49 = vld [vmem:[#allocation29_spill] sm:$0xff]  ;;  %v9697_v8 = vld [vmem:[#allocation31_spill] sm:$0xff] }
 0x1cf   : >> { %v962_v62 = vmul.f32 %v6814_v0, %v9692_v49  ;;  %v2375_v63 = vadd.f32 %v6717_v15, %v2339_v50  ;;  %v1888_v39 = vadd.f32 %v1872_v42, %v1852_v38  ;;  %9693 = vst [vmem:[#allocation140_spill] sm:$0xff] %v6820_v31  ;;  %v2080_v16 = vmul.f32 %v6820_v31, %v9463_v56  ;;  %v9695_v10 = vld [vmem:[#allocation21_spill] sm:$0xff]  ;;  %v9698_v50 = vld [vmem:[#allocation119_spill] sm:$0xff]  ;;  %v9699_v38 = vld [vmem:[#allocation94_spill] sm:$0xff] }
 0x1d0   : >> { %v2116_v28 = vmul.f32 %v9633_v6, %v9694_v18  ;;  %v1429_v27 = vadd.f32 %v1413_v30, %v1365_v4  ;;  %v1485_v45 = vmul.f32 %v9695_v10, %v9570_v60  ;;  %v942_v46 = vadd.f32 %v926_v47, %v906_v53  ;;  %v9696_v58 = vld [vmem:[#allocation89_spill] sm:$0xff]  ;;  %v6836_v56 = vld [vmem:[%s5005_s17 + $0xf9] sm:$0xff] }
 0x1d1   : >> { %v998_v0 = vmul.f32 %v9697_v8, %v9696_v58  ;;  %v2411_v15 = vadd.f32 %v6730_v43, %v2375_v63  ;;  %v1924_v42 = vadd.f32 %v1908_v11, %v1888_v39  ;;  %v2152_v26 = vmul.f32 %v9699_v38, %v9698_v50  ;;  %9700 = vst [vmem:[#allocation45_spill] sm:$0xff] %v6836_v56  ;;  %v9701_v30 = vld [vmem:[#allocation57_spill] sm:$0xff]  ;;  %v9703_v53 = vld [vmem:[#allocation126_spill] sm:$0xff]  ;;  %v9704_v11 = vld [vmem:[#allocation103_spill] sm:$0xff] }
 0x1d2   : >> { %v2188_v31 = vmul.f32 %v9473_v41, %v6809_v22  ;;  %v1465_v18 = vadd.f32 %v1449_v61, %v1429_v27  ;;  %v9702_v4 = vld [vmem:[#allocation113_spill] sm:$0xff]  ;;  %v978_v6 = vadd.f32 %v962_v62, %v942_v46  ;;  %v1034_v47 = vmul.f32 %v9641_v37, %v9703_v53  ;;  %v9705_v63 = vld [vmem:[#allocation102_spill] sm:$0xff]  ;;  %v9706_v50 = vld [vmem:[#allocation60_spill] sm:$0xff] }
 0x1d3   : >> { %v1521_v10 = vmul.f32 %v9702_v4, %v9701_v30  ;;  %v2447_v58 = vadd.f32 %v6749_v17, %v2411_v15  ;;  %v1988_v43 = vadd.f32 %v1972_v54, %v1924_v42  ;;  %v2252_v39 = vmul.f32 %v9474_v52, %v9704_v11  ;;  %v6848_v22 = vld [vmem:[%s5005_s17 + $0xf3] sm:$0xff]  ;;  %v9709_v46 = vld [vmem:[#allocation35_spill] sm:$0xff]  ;;  %v9710_v15 = vld [vmem:[#allocation68_spill] sm:$0xff] }
 0x1d4   : >> { %v1557_v38 = vmul.f32 %v9706_v50, %v9705_v63  ;;  %9707 = vst [vmem:[#allocation89_spill] sm:$0xff] %v6848_v22  ;;  %v1501_v41 = vadd.f32 %v1485_v45, %v1465_v18  ;;  %v9708_v61 = vld [vmem:[#allocation121_spill] sm:$0xff]  ;;  %v1014_v4 = vadd.f32 %v998_v0, %v978_v6  ;;  %v1070_v62 = vmul.f32 %v9709_v46, %v6836_v56  ;;  %v9711_v11 = vld [vmem:[#allocation107_spill] sm:$0xff]  ;;  %v9713_v18 = vld [vmem:[#allocation46_spill] sm:$0xff] }
 0x1d5   : >> { %v1593_v27 = vmul.f32 %v9588_v32, %v9708_v61  ;;  %v2483_v17 = vadd.f32 %v6762_v19, %v2447_v58  ;;  %v2024_v54 = vadd.f32 %v2008_v1, %v1988_v43  ;;  %v1134_v42 = vmul.f32 %v9710_v15, %v9650_v51  ;;  %v9712_v45 = vld [vmem:[#allocation15_spill] sm:$0xff]  ;;  %v9715_v61 = vld [vmem:[#allocation41_spill] sm:$0xff]  ;;  %v9717_v1 = vld [vmem:[#allocation38_spill] sm:$0xff] }
 0x1d6   : >> { %v591_v63 = vmul.f32 %v9711_v11, %v5020_v34  ;;  %v1537_v53 = vadd.f32 %v1521_v10, %v1501_v41  ;;  %v1050_v52 = vadd.f32 %v1034_v47, %v1014_v4  ;;  %v611_v50 = vmul.f32 %v9713_v18, %v9712_v45  ;;  %v9714_v6 = vld [vmem:[#allocation111_spill] sm:$0xff]  ;;  %v9721_v18 = vld [vmem:[#allocation30_spill] sm:$0xff] }
 0x1d7   : >> { %v647_v0 = vmul.f32 %v9714_v6, %v5028_v36  ;;  %v6864_v56 = vadd.f32 %v9715_v61, %v2483_v17  ;;  %v2060_v32 = vadd.f32 %v2044_v2, %v2024_v54  ;;  %v1629_v19 = vmul.f32 %v9655_v21, %v6848_v22  ;;  %v9718_v58 = vld [vmem:[#allocation75_spill] sm:$0xff]  ;;  %v9720_v17 = vld [vmem:[#allocation130_spill] sm:$0xff] }
 0x1d8   : >> { %v1170_v43 = vmul.f32 %v9718_v58, %v9717_v1  ;;  %v1573_v15 = vadd.f32 %v1557_v38, %v1537_v53  ;;  %v1086_v11 = vadd.f32 %v1070_v62, %v1050_v52  ;;  %v627_v41 = vadd.f32 %v611_v50, %v591_v63  ;;  %v6871_v10 = vld [vmem:[%s5005_s17 + $0xc0] sm:$0xff]  ;;  %v9722_v53 = vld [vmem:[#allocation49_spill] sm:$0xff] }
 0x1d9   : >> { %9716 = vst [vmem:[#allocation103_spill] sm:$0xff] %v6864_v56  ;;  %9719 = vst [vmem:[#allocation102_spill] sm:$0xff] %v6871_v10  ;;  %v683_v4 = vmul.f32 %v6871_v10, %v9658_v35  ;;  %v2531_v47 = vsel %vm432_vm0, %v6864_v56, 0.0  ;;  %v2096_v2 = vadd.f32 %v2080_v16, %v2060_v32  ;;  %v1693_v54 = vmul.f32 %v9720_v17, %v9597_v3  ;;  %v9723_v10 = vld [vmem:[#allocation91_spill] sm:$0xff]  ;;  %v9726_v32 = vld [vmem:[#allocation104_spill] sm:$0xff] }
 0x1da   : >> { %v1206_v6 = vmul.f32 %v9721_v18, %v9228_v5  ;;  %2532 = vadd.xlane.f32.xlu0 %v2531_v47  ;;  %v1609_v52 = vadd.f32 %v1593_v27, %v1573_v15  ;;  %v1150_v38 = vadd.f32 %v1134_v42, %v1086_v11  ;;  %v663_v50 = vadd.f32 %v647_v0, %v627_v41  ;;  %v9724_v58 = vld [vmem:[#allocation99_spill] sm:$0xff]  ;;  %v6888_v35 = vld [vmem:[%s5005_s17 + $0xb2] sm:$0xff]  ;;  %v6893_v47 = vld [vmem:[%s5005_s17 + $0x108] sm:$0xff] }
 0x1db   : >> { %v719_v62 = vmul.f32 %v9662_v29, %v9722_v53  ;;  %v2132_v63 = vadd.f32 %v2116_v28, %v2096_v2  ;;  %v2288_v22 = vmul.f32 %v9724_v58, %v9723_v10  ;;  %v9725_v56 = vld [vmem:[#allocation67_spill] sm:$0xff]  ;;  %9727 = vst [vmem:[#allocation35_spill] sm:$0xff] %v6888_v35  ;;  %v1242_v17 = vmul.f32 %v6888_v35, %v9233_v20  ;;  %v9729_v15 = vld [vmem:[#allocation88_spill] sm:$0xff]  ;;  %v9730_v41 = vld [vmem:[#allocation105_spill] sm:$0xff] }
 0x1dc   : >> { %v1729_v16 = vmul.f32 %v9726_v32, %v9725_v56  ;;  %9728 = vst [vmem:[#allocation68_spill] sm:$0xff] %v6893_v47  ;;  %v1645_v27 = vadd.f32 %v1629_v19, %v1609_v52  ;;  %v1186_v42 = vadd.f32 %v1170_v43, %v1150_v38  ;;  %v699_v0 = vadd.f32 %v683_v4, %v663_v50  ;;  %v9731_v2 = vld [vmem:[#allocation106_spill] sm:$0xff]  ;;  %v9732_v53 = vld [vmem:[#allocation40_spill] sm:$0xff]  ;;  %v9733_v18 = vld [vmem:[#allocation51_spill] sm:$0xff] }
 0x1dd   : >> { %v755_v11 = vmul.f32 %v9670_v48, %v9729_v15  ;;  %v2168_v28 = vadd.f32 %v2152_v26, %v2132_v63  ;;  %v2324_v10 = vmul.f32 %v9731_v2, %v9730_v41  ;;  %v1765_v32 = vmul.f32 %v9732_v53, %v9261_v13  ;;  %v6904_v35 = vld [vmem:[%s5005_s17 + $0xfa] sm:$0xff]  ;;  %v9735_v52 = vld [vmem:[#allocation96_spill] sm:$0xff]  ;;  %v9737_v63 = vld [vmem:[#allocation13_spill] sm:$0xff] }
 0x1de   : >> { %v1278_v58 = vmul.f32 %v9294_v24, %v9733_v18  ;;  %v1709_v29 = vadd.f32 %v1693_v54, %v1645_v27  ;;  %9734 = vst [vmem:[#allocation107_spill] sm:$0xff] %v6904_v35  ;;  %v1222_v19 = vadd.f32 %v1206_v6, %v1186_v42  ;;  %v735_v43 = vadd.f32 %v719_v62, %v699_v0  ;;  %v9736_v38 = vld [vmem:[#allocation108_spill] sm:$0xff]  ;;  %v9739_v6 = vld [vmem:[#allocation123_spill] sm:$0xff]  ;;  %v9740_v0 = vld [vmem:[#allocation109_spill] sm:$0xff] }
 0x1df   : >> { %v791_v4 = vmul.f32 %v9216_v14, %v6893_v47  ;;  %v2204_v26 = vadd.f32 %v2188_v31, %v2168_v28  ;;  %v2360_v50 = vmul.f32 %v9736_v38, %v9735_v52  ;;  %v1801_v41 = vmul.f32 %v9737_v63, %v9356_v55  ;;  %v9738_v53 = vld [vmem:[#allocation100_spill] sm:$0xff]  ;;  %v9741_v2 = vld [vmem:[#allocation115_spill] sm:$0xff]  ;;  %v9742_v31 = vld [vmem:[#allocation50_spill] sm:$0xff] }
 0x1e0   : >> { %v1314_v18 = vmul.f32 %v9304_v12, %v9738_v53  ;;  %v1745_v54 = vadd.f32 %v1729_v16, %v1709_v29  ;;  %v1258_v27 = vadd.f32 %v1242_v17, %v1222_v19  ;;  %v771_v15 = vadd.f32 %v755_v11, %v735_v43  ;;  %v6923_v63 = vld [vmem:[%s5005_s17 + $0xe6] sm:$0xff]  ;;  %v6926_v38 = vld [vmem:[%s5005_s17 + $0xf4] sm:$0xff] }
 0x1e1   : >> { %v855_v42 = vmul.f32 %v9739_v6, %v9678_v25  ;;  %v2268_v62 = vadd.f32 %v2252_v39, %v2204_v26  ;;  %v2396_v47 = vmul.f32 %v9741_v2, %v9740_v0  ;;  %v1837_v28 = vmul.f32 %v9617_v44, %v9742_v31  ;;  %9743 = vst [vmem:[#allocation15_spill] sm:$0xff] %v6923_v63  ;;  %v9745_v11 = vld [vmem:[#allocation124_spill] sm:$0xff]  ;;  %v9746_v43 = vld [vmem:[#allocation90_spill] sm:$0xff] }
 0x1e2   : >> { %v1350_v52 = vmul.f32 %v9313_v33, %v6904_v35  ;;  %9744 = vst [vmem:[#allocation46_spill] sm:$0xff] %v6926_v38  ;;  %v1781_v29 = vadd.f32 %v1765_v32, %v1745_v54  ;;  %v1294_v16 = vadd.f32 %v1278_v58, %v1258_v27  ;;  %v807_v17 = vadd.f32 %v791_v4, %v771_v15  ;;  %v9747_v26 = vld [vmem:[#allocation116_spill] sm:$0xff]  ;;  %v9748_v0 = vld [vmem:[#allocation66_spill] sm:$0xff]  ;;  %v9751_v4 = vld [vmem:[#allocation117_spill] sm:$0xff] }
 0x1e3   : >> { %v891_v19 = vmul.f32 %v9745_v11, %v9502_v40  ;;  %v2304_v39 = vadd.f32 %v2288_v22, %v2268_v62  ;;  %v2432_v6 = vmul.f32 %v9747_v26, %v9746_v43  ;;  %v1873_v31 = vmul.f32 %v9428_v23, %v9748_v0  ;;  %v9749_v35 = vld [vmem:[#allocation120_spill] sm:$0xff]  ;;  %v9752_v27 = vld [vmem:[#allocation131_spill] sm:$0xff]  ;;  %v9763_v0 = vld [vmem:[#allocation134_spill] sm:$0xff] }
 0x1e4   : >> { %v1414_v53 = vmul.f32 %v9749_v35, %v9496_v7  ;;  %v1817_v2 = vadd.f32 %v1801_v41, %v1781_v29  ;;  %v1330_v33 = vadd.f32 %v1314_v18, %v1294_v16  ;;  %v871_v25 = vadd.f32 %v855_v42, %v807_v17  ;;  %v9750_v58 = vld [vmem:[#allocation56_spill] sm:$0xff]  ;;  %v9754_v42 = vld [vmem:[#allocation82_spill] sm:$0xff]  ;;  %v9755_v29 = vld [vmem:[#allocation55_spill] sm:$0xff] }
 0x1e5   : >> { %v927_v15 = vmul.f32 %v9750_v58, %v9508_v9  ;;  %v2340_v32 = vadd.f32 %v2324_v10, %v2304_v39  ;;  %v2468_v54 = vmul.f32 %v9751_v4, %v6923_v63  ;;  %v1909_v22 = vmul.f32 %v9498_v59, %v6926_v38  ;;  %v6945_v41 = vld [vmem:[%s5005_s17 + $0xc1] sm:$0xff]  ;;  %v9757_v39 = vld [vmem:[#allocation25_spill] sm:$0xff] }
 0x1e6   : >> { %v1450_v62 = vmul.f32 %v9752_v27, %v9689_v57  ;;  %v1853_v11 = vadd.f32 %v1837_v28, %v1817_v2  ;;  %v1366_v43 = vadd.f32 %v1350_v52, %v1330_v33  ;;  %v907_v35 = vadd.f32 %v891_v19, %v871_v25  ;;  %9753 = vst [vmem:[#allocation111_spill] sm:$0xff] %v6945_v41  ;;  %v9756_v17 = vld [vmem:[#allocation83_spill] sm:$0xff]  ;;  %v9758_v2 = vld [vmem:[#allocation44_spill] sm:$0xff] }
 0x1e7   : >> { %v963_v18 = vmul.f32 %v6945_v41, %v9692_v49  ;;  %v2376_v10 = vadd.f32 %v2360_v50, %v2340_v32  ;;  %v1973_v16 = vmul.f32 %v9755_v29, %v9754_v42  ;;  %v2009_v58 = vmul.f32 %v9757_v39, %v9756_v17  ;;  %v9759_v19 = vld [vmem:[#allocation63_spill] sm:$0xff]  ;;  %v9760_v41 = vld [vmem:[#allocation84_spill] sm:$0xff]  ;;  %v9762_v32 = vld [vmem:[#allocation85_spill] sm:$0xff] }
 0x1e8   : >> { %v1486_v28 = vmul.f32 %v9758_v2, %v9570_v60  ;;  %v1889_v33 = vadd.f32 %v1873_v31, %v1853_v11  ;;  %v1430_v25 = vadd.f32 %v1414_v53, %v1366_v43  ;;  %v943_v52 = vadd.f32 %v927_v15, %v907_v35  ;;  %v9761_v38 = vld [vmem:[#allocation64_spill] sm:$0xff]  ;;  %v6962_v29 = vld [vmem:[%s5005_s17 + $0xb3] sm:$0xff]  ;;  %v6973_v43 = vld [vmem:[%s5005_s17 + $0xfb] sm:$0xff] }
 0x1e9   : >> { %v999_v63 = vmul.f32 %v9697_v8, %v9759_v19  ;;  %v2412_v27 = vadd.f32 %v2396_v47, %v2376_v10  ;;  %v2045_v50 = vmul.f32 %v9761_v38, %v9760_v41  ;;  %v2081_v49 = vmul.f32 %v9763_v0, %v9762_v32  ;;  %9764 = vst [vmem:[#allocation41_spill] sm:$0xff] %v6962_v29  ;;  %v6967_v17 = vld [vmem:[%s5005_s17 + $0x109] sm:$0xff]  ;;  %v6970_v53 = vld [vmem:[%s5005_s17 + $0xf5] sm:$0xff]  ;;  %v9768_v11 = vld [vmem:[#allocation135_spill] sm:$0xff] }
 0x1ea   : >> { %v1522_v39 = vmul.f32 %v6962_v29, %v9701_v30  ;;  %9765 = vst [vmem:[#allocation38_spill] sm:$0xff] %v6967_v17  ;;  %v1925_v31 = vadd.f32 %v1909_v22, %v1889_v33  ;;  %9766 = vst [vmem:[#allocation130_spill] sm:$0xff] %v6970_v53  ;;  %v1466_v15 = vadd.f32 %v1450_v62, %v1430_v25  ;;  %v9769_v10 = vld [vmem:[#allocation74_spill] sm:$0xff]  ;;  %v9770_v19 = vld [vmem:[#allocation92_spill] sm:$0xff] }
 0x1eb   : >> { %9767 = vst [vmem:[#allocation49_spill] sm:$0xff] %v6973_v43  ;;  %v979_v47 = vadd.f32 %v963_v18, %v943_v52  ;;  %v1035_v38 = vmul.f32 %v9641_v37, %v9768_v11  ;;  %v2448_v35 = vadd.f32 %v2432_v6, %v2412_v27  ;;  %v2117_v0 = vmul.f32 %v9770_v19, %v9769_v10  ;;  %v9771_v2 = vld [vmem:[#allocation122_spill] sm:$0xff]  ;;  %v9774_v30 = vld [vmem:[#allocation60_spill] sm:$0xff]  ;;  %v9775_v25 = vld [vmem:[#allocation95_spill] sm:$0xff] }
 0x1ec   : >> { %v9772_v32 = vld [vmem:[#allocation94_spill] sm:$0xff]  ;;  %v1989_v22 = vadd.f32 %v1973_v16, %v1925_v31  ;;  %v1502_v33 = vadd.f32 %v1486_v28, %v1466_v15  ;;  %v1071_v62 = vmul.f32 %v9709_v46, %v6967_v17  ;;  %v2189_v52 = vmul.f32 %v9775_v25, %v6970_v53  ;;  %v9776_v6 = vld [vmem:[#allocation77_spill] sm:$0xff]  ;;  %v9778_v16 = vld [vmem:[#allocation128_spill] sm:$0xff] }
 0x1ed   : >> { %v2153_v8 = vmul.f32 %v9772_v32, %v9771_v2  ;;  %v9773_v29 = vld [vmem:[#allocation58_spill] sm:$0xff]  ;;  %v1015_v60 = vadd.f32 %v999_v63, %v979_v47  ;;  %v2484_v18 = vadd.f32 %v2468_v54, %v2448_v35  ;;  %v9777_v27 = vld [vmem:[#allocation61_spill] sm:$0xff]  ;;  %v1630_v10 = vmul.f32 %v9655_v21, %v6973_v43  ;;  %v9782_v35 = vld [vmem:[#allocation32_spill] sm:$0xff] }
 0x1ee   : >> { %v1558_v41 = vmul.f32 %v9774_v30, %v9773_v29  ;;  %v1594_v11 = vmul.f32 %v9777_v27, %v9776_v6  ;;  %v2025_v2 = vadd.f32 %v2009_v58, %v1989_v22  ;;  %v1538_v32 = vadd.f32 %v1522_v39, %v1502_v33  ;;  %v9780_v54 = vld [vmem:[#allocation125_spill] sm:$0xff]  ;;  %v9781_v15 = vld [vmem:[#allocation86_spill] sm:$0xff]  ;;  %v9792_v17 = vld [vmem:[#allocation20_spill] sm:$0xff] }
 0x1ef   : >> { %v1051_v29 = vadd.f32 %v1035_v38, %v1015_v60  ;;  %v1135_v63 = vmul.f32 %v9778_v16, %v9650_v51  ;;  %v6994_v28 = vadd.f32 %v9715_v61, %v2484_v18  ;;  %v592_v31 = vmul.f32 %v9780_v54, %v5020_v34  ;;  %v9783_v60 = vld [vmem:[#allocation81_spill] sm:$0xff]  ;;  %v7009_v16 = vld [vmem:[%s5005_s17 + $0xc8] sm:$0xff] }
 0x1f0   : >> { %v612_v47 = vmul.f32 %v9781_v15, %v9712_v45  ;;  %v648_v53 = vmul.f32 %v9782_v35, %v5028_v36  ;;  %v2061_v43 = vadd.f32 %v2045_v50, %v2025_v2  ;;  %v1574_v6 = vadd.f32 %v1558_v41, %v1538_v32  ;;  %v9784_v22 = vld [vmem:[#allocation37_spill] sm:$0xff]  ;;  %9785 = vst [vmem:[#allocation104_spill] sm:$0xff] %v7009_v16 }
 0x1f1   : >> { %9779 = vst [vmem:[#allocation91_spill] sm:$0xff] %v6994_v28  ;;  %v1087_v58 = vadd.f32 %v1071_v62, %v1051_v29  ;;  %v1171_v39 = vmul.f32 %v9783_v60, %v9717_v1  ;;  %v2534_v38 = vsel %vm432_vm0, %v6994_v28, 0.0  ;;  %v1694_v33 = vmul.f32 %v9784_v22, %v9597_v3  ;;  %v9786_v54 = vld [vmem:[#allocation17_spill] sm:$0xff]  ;;  %v9788_v29 = vld [vmem:[#allocation98_spill] sm:$0xff]  ;;  %v9789_v60 = vld [vmem:[#allocation76_spill] sm:$0xff] }
 0x1f2   : >> { %v628_v18 = vadd.f32 %v612_v47, %v592_v31  ;;  %v684_v15 = vmul.f32 %v7009_v16, %v9786_v54  ;;  %2535 = vadd.xlane.f32.xlu1 %v2534_v38  ;;  %v2097_v41 = vadd.f32 %v2081_v49, %v2061_v43  ;;  %v1610_v2 = vadd.f32 %v1594_v11, %v1574_v6  ;;  %v9787_v32 = vld [vmem:[#allocation73_spill] sm:$0xff]  ;;  %v7022_v43 = vld [vmem:[%s5005_s17 + $0xc2] sm:$0xff] }
 0x1f3   : >> { %v1151_v50 = vadd.f32 %v1135_v63, %v1087_v58  ;;  %v1207_v62 = vmul.f32 %v9787_v32, %v9228_v5  ;;  %v2253_v28 = vmul.f32 %v9789_v60, %v9788_v29  ;;  %v9790_v22 = vld [vmem:[#allocation93_spill] sm:$0xff]  ;;  %9793 = vst [vmem:[#allocation105_spill] sm:$0xff] %v7022_v43  ;;  %v1243_v11 = vmul.f32 %v7022_v43, %v9233_v20  ;;  %v9795_v63 = vld [vmem:[#allocation99_spill] sm:$0xff]  ;;  %v9801_v43 = vld [vmem:[#allocation132_spill] sm:$0xff] }
 0x1f4   : >> { %v1730_v35 = vmul.f32 %v9790_v22, %v9725_v56  ;;  %v664_v31 = vadd.f32 %v648_v53, %v628_v18  ;;  %v9791_v47 = vld [vmem:[#allocation101_spill] sm:$0xff]  ;;  %v2133_v36 = vadd.f32 %v2117_v0, %v2097_v41  ;;  %v1646_v16 = vadd.f32 %v1630_v10, %v1610_v2  ;;  %v9796_v58 = vld [vmem:[#allocation71_spill] sm:$0xff]  ;;  %v9797_v53 = vld [vmem:[#allocation34_spill] sm:$0xff] }
 0x1f5   : >> { %v720_v25 = vmul.f32 %v9792_v17, %v9791_v47  ;;  %v1187_v49 = vadd.f32 %v1171_v39, %v1151_v50  ;;  %v7027_v6 = vld [vmem:[%s5005_s17 + $0x110] sm:$0xff]  ;;  %v2289_v38 = vmul.f32 %v9796_v58, %v9795_v63  ;;  %v1766_v18 = vmul.f32 %v9797_v53, %v9261_v13  ;;  %v9798_v60 = vld [vmem:[#allocation127_spill] sm:$0xff]  ;;  %v9799_v2 = vld [vmem:[#allocation118_spill] sm:$0xff] }
 0x1f6   : >> { %9794 = vst [vmem:[#allocation40_spill] sm:$0xff] %v7027_v6  ;;  %v700_v32 = vadd.f32 %v684_v15, %v664_v31  ;;  %v756_v0 = vmul.f32 %v9670_v48, %v9798_v60  ;;  %v2169_v10 = vadd.f32 %v2153_v8, %v2133_v36  ;;  %v1710_v41 = vadd.f32 %v1694_v33, %v1646_v16  ;;  %v9800_v47 = vld [vmem:[#allocation106_spill] sm:$0xff]  ;;  %v7045_v53 = vld [vmem:[%s5005_s17 + $0x10a] sm:$0xff] }
 0x1f7   : >> { %v1223_v39 = vadd.f32 %v1207_v62, %v1187_v49  ;;  %v1279_v50 = vmul.f32 %v9294_v24, %v9799_v2  ;;  %v2325_v22 = vmul.f32 %v9801_v43, %v9800_v47  ;;  %v7040_v20 = vld [vmem:[%s5005_s17 + $0xb4] sm:$0xff]  ;;  %9803 = vst [vmem:[#allocation96_spill] sm:$0xff] %v7045_v53  ;;  %v792_v36 = vmul.f32 %v9216_v14, %v7027_v6  ;;  %v9805_v49 = vld [vmem:[#allocation108_spill] sm:$0xff]  ;;  %v7058_v63 = vld [vmem:[%s5005_s17 + $0xfc] sm:$0xff] }
 0x1f8   : >> { %9802 = vst [vmem:[#allocation51_spill] sm:$0xff] %v7040_v20  ;;  %v1802_v58 = vmul.f32 %v7040_v20, %v9356_v55  ;;  %v736_v15 = vadd.f32 %v720_v25, %v700_v32  ;;  %v2205_v8 = vadd.f32 %v2189_v52, %v2169_v10  ;;  %v1746_v33 = vadd.f32 %v1730_v35, %v1710_v41  ;;  %v9804_v62 = vld [vmem:[#allocation137_spill] sm:$0xff]  ;;  %v9808_v24 = vld [vmem:[#allocation26_spill] sm:$0xff]  ;;  %v9812_v41 = vld [vmem:[#allocation28_spill] sm:$0xff] }
 0x1f9   : >> { %v1259_v16 = vadd.f32 %v1243_v11, %v1223_v39  ;;  %v1315_v31 = vmul.f32 %v9304_v12, %v9804_v62  ;;  %v9806_v43 = vld [vmem:[#allocation65_spill] sm:$0xff]  ;;  %v9809_v55 = vld [vmem:[#allocation110_spill] sm:$0xff]  ;;  %9810 = vst [vmem:[#allocation123_spill] sm:$0xff] %v7058_v63  ;;  %v9811_v11 = vld [vmem:[#allocation48_spill] sm:$0xff] }
 0x1fa   : >> { %v2361_v2 = vmul.f32 %v9806_v43, %v9805_v49  ;;  %v9807_v60 = vld [vmem:[#allocation129_spill] sm:$0xff]  ;;  %v772_v20 = vadd.f32 %v756_v0, %v736_v15  ;;  %v856_v25 = vmul.f32 %v9809_v55, %v9808_v24  ;;  %v2269_v32 = vadd.f32 %v2253_v28, %v2205_v8  ;;  %v9813_v39 = vld [vmem:[#allocation115_spill] sm:$0xff]  ;;  %v9814_v6 = vld [vmem:[#allocation138_spill] sm:$0xff] }
 0x1fb   : >> { %v1838_v47 = vmul.f32 %v9617_v44, %v9807_v60  ;;  %v1782_v52 = vadd.f32 %v1766_v18, %v1746_v33  ;;  %v1295_v35 = vadd.f32 %v1279_v50, %v1259_v16  ;;  %v1351_v10 = vmul.f32 %v9811_v11, %v7045_v53  ;;  %v9815_v60 = vld [vmem:[#allocation114_spill] sm:$0xff] }
 0x1fc   : >> { %v2397_v62 = vmul.f32 %v9813_v39, %v9812_v41  ;;  %v1874_v43 = vmul.f32 %v9428_v23, %v9814_v6  ;;  %v808_v49 = vadd.f32 %v792_v36, %v772_v20  ;;  %v892_v0 = vmul.f32 %v9815_v60, %v9502_v40  ;;  %v7069_v15 = vld [vmem:[%s5005_s17 + $0xf6] sm:$0xff]  ;;  %v9819_v20 = vld [vmem:[#allocation139_spill] sm:$0xff] }
 0x1fd   : >> { %9816 = vst [vmem:[#allocation109_spill] sm:$0xff] %v7069_v15  ;;  %v2305_v55 = vadd.f32 %v2289_v38, %v2269_v32  ;;  %v1818_v28 = vadd.f32 %v1802_v58, %v1782_v52  ;;  %v1331_v18 = vadd.f32 %v1315_v31, %v1295_v35  ;;  %v9817_v50 = vld [vmem:[#allocation18_spill] sm:$0xff]  ;;  %v1910_v41 = vmul.f32 %v9498_v59, %v7058_v63  ;;  %v9820_v38 = vld [vmem:[#allocation21_spill] sm:$0xff] }
 0x1fe   : >> { %v1415_v8 = vmul.f32 %v9817_v50, %v9496_v7  ;;  %v9818_v33 = vld [vmem:[#allocation62_spill] sm:$0xff]  ;;  %v872_v6 = vadd.f32 %v856_v25, %v808_v49  ;;  %v928_v36 = vmul.f32 %v9819_v20, %v9508_v9  ;;  %v1451_v58 = vmul.f32 %v9820_v38, %v9689_v57  ;;  %v9821_v32 = vld [vmem:[#allocation133_spill] sm:$0xff]  ;;  %v9826_v38 = vld [vmem:[#allocation83_spill] sm:$0xff] }
 0x1ff   : >> { %v2433_v16 = vmul.f32 %v9747_v26, %v9818_v33  ;;  %v2341_v60 = vadd.f32 %v2325_v22, %v2305_v55  ;;  %v1854_v53 = vadd.f32 %v1838_v47, %v1818_v28  ;;  %v1367_v39 = vadd.f32 %v1351_v10, %v1331_v18  ;;  %v7086_v50 = vld [vmem:[%s5005_s17 + $0xc9] sm:$0xff]  ;;  %v9824_v55 = vld [vmem:[#allocation54_spill] sm:$0xff] }
 0x200   : >> { %v2469_v31 = vmul.f32 %v9751_v4, %v7069_v15  ;;  %v1974_v52 = vmul.f32 %v9821_v32, %v9754_v42  ;;  %v908_v35 = vadd.f32 %v892_v0, %v872_v6  ;;  %9822 = vst [vmem:[#allocation50_spill] sm:$0xff] %v7086_v50  ;;  %v9823_v49 = vld [vmem:[#allocation29_spill] sm:$0xff]  ;;  %v9827_v15 = vld [vmem:[#allocation36_spill] sm:$0xff]  ;;  %v9830_v63 = vld [vmem:[#allocation126_spill] sm:$0xff] }
 0x201   : >> { %v964_v22 = vmul.f32 %v7086_v50, %v9823_v49  ;;  %v2377_v47 = vadd.f32 %v2361_v2, %v2341_v60  ;;  %v1890_v25 = vadd.f32 %v1874_v43, %v1854_v53  ;;  %v1431_v10 = vadd.f32 %v1415_v8, %v1367_v39  ;;  %v9825_v28 = vld [vmem:[#allocation113_spill] sm:$0xff]  ;;  %v9828_v20 = vld [vmem:[#allocation84_spill] sm:$0xff]  ;;  %v9831_v4 = vld [vmem:[#allocation31_spill] sm:$0xff] }
 0x202   : >> { %v1487_v18 = vmul.f32 %v9825_v28, %v9824_v55  ;;  %v2010_v33 = vmul.f32 %v9827_v15, %v9826_v38  ;;  %v9829_v32 = vld [vmem:[#allocation140_spill] sm:$0xff]  ;;  %v944_v0 = vadd.f32 %v928_v36, %v908_v35  ;;  %v1000_v57 = vmul.f32 %v9831_v4, %v9830_v63  ;;  %v9833_v53 = vld [vmem:[#allocation57_spill] sm:$0xff]  ;;  %v9841_v15 = vld [vmem:[#allocation87_spill] sm:$0xff] }
 0x203   : >> { %v2046_v6 = vmul.f32 %v9829_v32, %v9828_v20  ;;  %v2413_v42 = vadd.f32 %v2397_v62, %v2377_v47  ;;  %v1926_v26 = vadd.f32 %v1910_v41, %v1890_v25  ;;  %v1467_v50 = vadd.f32 %v1451_v58, %v1431_v10  ;;  %v7099_v2 = vld [vmem:[%s5005_s17 + $0xc3] sm:$0xff]  ;;  %v7104_v39 = vld [vmem:[%s5005_s17 + $0x111] sm:$0xff] }
 0x204   : >> { %9832 = vst [vmem:[#allocation124_spill] sm:$0xff] %v7099_v2  ;;  %v1523_v43 = vmul.f32 %v7099_v2, %v9833_v53  ;;  %9834 = vst [vmem:[#allocation120_spill] sm:$0xff] %v7104_v39  ;;  %v7107_v8 = vld [vmem:[%s5005_s17 + $0xb5] sm:$0xff]  ;;  %v9837_v32 = vld [vmem:[#allocation119_spill] sm:$0xff]  ;;  %v980_v62 = vadd.f32 %v964_v22, %v944_v0  ;;  %v1072_v22 = vmul.f32 %v9709_v46, %v7104_v39 }
 0x205   : >> { %9835 = vst [vmem:[#allocation56_spill] sm:$0xff] %v7107_v8  ;;  %v9836_v60 = vld [vmem:[#allocation85_spill] sm:$0xff]  ;;  %v2118_v36 = vmul.f32 %v9770_v19, %v9837_v32  ;;  %v2449_v35 = vadd.f32 %v2433_v16, %v2413_v42  ;;  %v1990_v47 = vadd.f32 %v1974_v52, %v1926_v26  ;;  %v1503_v25 = vadd.f32 %v1487_v18, %v1467_v50  ;;  %v9842_v53 = vld [vmem:[#allocation94_spill] sm:$0xff] }
 0x206   : >> { %v2082_v28 = vmul.f32 %v7107_v8, %v9836_v60  ;;  %v7114_v63 = vld [vmem:[%s5005_s17 + $0x10b] sm:$0xff]  ;;  %v2154_v8 = vmul.f32 %v9842_v53, %v9841_v15  ;;  %v1016_v19 = vadd.f32 %v1000_v57, %v980_v62  ;;  %v4507_v52 = vld [vmem:[%s5005_s17 + $0x7c] sm:$0xff] }
 0x207   : >> { %9838 = vst [vmem:[#allocation55_spill] sm:$0xff] %v7114_v63  ;;  %v9839_v41 = vld [vmem:[#allocation45_spill] sm:$0xff]  ;;  %v2485_v0 = vadd.f32 %v2469_v31, %v2449_v35  ;;  %v2026_v42 = vadd.f32 %v2010_v33, %v1990_v47  ;;  %v1539_v16 = vadd.f32 %v1523_v43, %v1503_v25  ;;  %v1631_v26 = vmul.f32 %v9655_v21, %v7114_v63  ;;  %v7138_v31 = vld [vmem:[%s5005_s17 + $0xfd] sm:$0xff]  ;;  %v7141_v35 = vld [vmem:[%s5005_s17 + $0xa8] sm:$0xff] }
 0x208   : >> { %v1036_v58 = vmul.f32 %v9641_v37, %v9839_v41  ;;  %v9840_v10 = vld [vmem:[#allocation121_spill] sm:$0xff]  ;;  %v1695_v50 = vmul.f32 %v4507_v52, %v9597_v3  ;;  %9846 = vst [vmem:[#allocation63_spill] sm:$0xff] %v7138_v31  ;;  %9847 = vst [vmem:[#allocation64_spill] sm:$0xff] %v7141_v35  ;;  %v613_v47 = vmul.f32 %v7141_v35, %v9712_v45  ;;  %v9849_v52 = vld [vmem:[#allocation16_spill] sm:$0xff] }
 0x209   : >> { %v1559_v2 = vmul.f32 %v9774_v30, %v9840_v10  ;;  %v9843_v60 = vld [vmem:[#allocation89_spill] sm:$0xff]  ;;  %v9844_v10 = vld [vmem:[#allocation75_spill] sm:$0xff]  ;;  %v7135_v62 = vadd.f32 %v9715_v61, %v2485_v0  ;;  %v2062_v33 = vadd.f32 %v2046_v6, %v2026_v42  ;;  %v7150_v63 = vld [vmem:[%s5005_s17 + $0xd8] sm:$0xff] }
 0x20a   : >> { %v1595_v32 = vmul.f32 %v9777_v27, %v9843_v60  ;;  %v1052_v18 = vadd.f32 %v1036_v58, %v1016_v19  ;;  %v1136_v15 = vmul.f32 %v9844_v10, %v9650_v51  ;;  %v4508_v60 = vld [vmem:[%s5005_s17 + $0x90] sm:$0xff]  ;;  %v9848_v58 = vld [vmem:[#allocation30_spill] sm:$0xff]  ;;  %9851 = vst [vmem:[#allocation74_spill] sm:$0xff] %v7150_v63  ;;  %v685_v0 = vmul.f32 %v7150_v63, %v9786_v54  ;;  %v9854_v63 = vld [vmem:[#allocation35_spill] sm:$0xff] }
 0x20b   : >> { %v593_v57 = vmul.f32 %v4508_v60, %v5020_v34  ;;  %9845 = vst [vmem:[#allocation25_spill] sm:$0xff] %v7135_v62  ;;  %v1575_v43 = vadd.f32 %v1559_v2, %v1539_v16  ;;  %v1172_v25 = vmul.f32 %v9848_v58, %v9717_v1  ;;  %v9850_v10 = vld [vmem:[#allocation102_spill] sm:$0xff]  ;;  %v2537_v6 = vsel %vm432_vm0, %v7135_v62, 0.0 }
 0x20c   : >> { %v1088_v19 = vadd.f32 %v1072_v22, %v1052_v18  ;;  %v649_v60 = vmul.f32 %v9850_v10, %v9849_v52  ;;  %v2098_v2 = vadd.f32 %v2082_v28, %v2062_v33  ;;  %2538 = vadd.xlane.f32.xlu0 %v2537_v6  ;;  %v9852_v22 = vld [vmem:[#allocation95_spill] sm:$0xff]  ;;  %v7159_v58 = vld [vmem:[%s5005_s17 + $0x94] sm:$0xff]  ;;  %v1208_v39 = vmul.f32 %v9854_v63, %v9228_v5 }
 0x20d   : >> { %v1611_v42 = vadd.f32 %v1595_v32, %v1575_v43  ;;  %v629_v16 = vadd.f32 %v613_v47, %v593_v57  ;;  %v2190_v18 = vmul.f32 %v9852_v22, %v7138_v31  ;;  %9853 = vst [vmem:[#allocation58_spill] sm:$0xff] %v7159_v58  ;;  %v1731_v10 = vmul.f32 %v7159_v58, %v9725_v56  ;;  %v9855_v57 = vld [vmem:[#allocation88_spill] sm:$0xff]  ;;  %v9856_v6 = vld [vmem:[#allocation13_spill] sm:$0xff] }
 0x20e   : >> { %v1152_v35 = vadd.f32 %v1136_v15, %v1088_v19  ;;  %v2134_v62 = vadd.f32 %v2118_v36, %v2098_v2  ;;  %v721_v33 = vmul.f32 %v9792_v17, %v9855_v57  ;;  %v4512_v43 = vld [vmem:[%s5005_s17 + $0x6e] sm:$0xff]  ;;  %v1767_v31 = vmul.f32 %v9856_v6, %v9261_v13  ;;  %v9858_v19 = vld [vmem:[#allocation42_spill] sm:$0xff]  ;;  %v7177_v36 = vld [vmem:[%s5005_s17 + $0x120] sm:$0xff] }
 0x20f   : >> { %v1647_v28 = vadd.f32 %v1631_v26, %v1611_v42  ;;  %v665_v32 = vadd.f32 %v649_v60, %v629_v16  ;;  %v2254_v47 = vmul.f32 %v4512_v43, %v9788_v29  ;;  %v7172_v15 = vld [vmem:[%s5005_s17 + $0xca] sm:$0xff]  ;;  %9859 = vst [vmem:[#allocation61_spill] sm:$0xff] %v7177_v36  ;;  %v9862_v43 = vld [vmem:[#allocation99_spill] sm:$0xff]  ;;  %v9864_v6 = vld [vmem:[#allocation70_spill] sm:$0xff] }
 0x210   : >> { %v1188_v41 = vadd.f32 %v1172_v25, %v1152_v35  ;;  %9857 = vst [vmem:[#allocation60_spill] sm:$0xff] %v7172_v15  ;;  %v1244_v58 = vmul.f32 %v7172_v15, %v9858_v19  ;;  %v2170_v26 = vadd.f32 %v2154_v8, %v2134_v62  ;;  %v9860_v42 = vld [vmem:[#allocation68_spill] sm:$0xff]  ;;  %v9866_v19 = vld [vmem:[#allocation43_spill] sm:$0xff] }
 0x211   : >> { %v1711_v60 = vadd.f32 %v1695_v50, %v1647_v28  ;;  %v701_v2 = vadd.f32 %v685_v0, %v665_v32  ;;  %v757_v16 = vmul.f32 %v9670_v48, %v9860_v42  ;;  %v7182_v57 = vld [vmem:[%s5005_s17 + $0x86] sm:$0xff]  ;;  %v7194_v0 = vld [vmem:[%s5005_s17 + $0x112] sm:$0xff]  ;;  %v793_v32 = vmul.f32 %v9216_v14, %v7177_v36  ;;  %v7199_v42 = vld [vmem:[%s5005_s17 + $0x9e] sm:$0xff] }
 0x212   : >> { %9861 = vst [vmem:[#allocation128_spill] sm:$0xff] %v7182_v57  ;;  %v2290_v35 = vmul.f32 %v7182_v57, %v9862_v43  ;;  %v7187_v25 = vld [vmem:[%s5005_s17 + $0xc4] sm:$0xff]  ;;  %v1224_v63 = vadd.f32 %v1208_v39, %v1188_v41  ;;  %v2206_v50 = vadd.f32 %v2190_v18, %v2170_v26  ;;  %9867 = vst [vmem:[#allocation86_spill] sm:$0xff] %v7194_v0  ;;  %v9869_v57 = vld [vmem:[#allocation106_spill] sm:$0xff] }
 0x213   : >> { %9863 = vst [vmem:[#allocation125_spill] sm:$0xff] %v7187_v25  ;;  %v1803_v15 = vmul.f32 %v7187_v25, %v9864_v6  ;;  %v9865_v13 = vld [vmem:[#allocation100_spill] sm:$0xff]  ;;  %v1747_v62 = vadd.f32 %v1731_v10, %v1711_v60  ;;  %v737_v28 = vadd.f32 %v721_v33, %v701_v2  ;;  %9868 = vst [vmem:[#allocation81_spill] sm:$0xff] %v7199_v42  ;;  %v9870_v25 = vld [vmem:[#allocation66_spill] sm:$0xff] }
 0x214   : >> { %v1280_v8 = vmul.f32 %v9866_v19, %v9865_v13  ;;  %v2326_v43 = vmul.f32 %v7199_v42, %v9869_v57  ;;  %v1839_v39 = vmul.f32 %v9617_v44, %v9870_v25  ;;  %v1260_v41 = vadd.f32 %v1244_v58, %v1224_v63  ;;  %v9871_v6 = vld [vmem:[#allocation107_spill] sm:$0xff]  ;;  %v7208_v18 = vld [vmem:[%s5005_s17 + $0x10c] sm:$0xff]  ;;  %v7213_v36 = vld [vmem:[%s5005_s17 + $0xb6] sm:$0xff] }
 0x215   : >> { %v1316_v13 = vmul.f32 %v9304_v12, %v9871_v6  ;;  %v2270_v10 = vadd.f32 %v2254_v47, %v2206_v50  ;;  %9872 = vst [vmem:[#allocation37_spill] sm:$0xff] %v7208_v18  ;;  %v1783_v33 = vadd.f32 %v1767_v31, %v1747_v62  ;;  %v773_v26 = vadd.f32 %v757_v16, %v737_v28  ;;  %v4517_v60 = vld [vmem:[%s5005_s17 + $0x91] sm:$0xff]  ;;  %v9874_v42 = vld [vmem:[#allocation108_spill] sm:$0xff]  ;;  %v9878_v6 = vld [vmem:[#allocation115_spill] sm:$0xff] }
 0x216   : >> { %v857_v2 = vmul.f32 %v4517_v60, %v9808_v24  ;;  %9873 = vst [vmem:[#allocation17_spill] sm:$0xff] %v7213_v36  ;;  %v2362_v57 = vmul.f32 %v7213_v36, %v9874_v42  ;;  %v9875_v25 = vld [vmem:[#allocation46_spill] sm:$0xff]  ;;  %v1296_v58 = vadd.f32 %v1280_v8, %v1260_v41  ;;  %v1352_v47 = vmul.f32 %v9811_v11, %v7194_v0  ;;  %v7222_v62 = vld [vmem:[%s5005_s17 + $0xa9] sm:$0xff]  ;;  %v9879_v41 = vld [vmem:[#allocation131_spill] sm:$0xff] }
 0x217   : >> { %v1875_v63 = vmul.f32 %v9428_v23, %v9875_v25  ;;  %v2306_v50 = vadd.f32 %v2290_v35, %v2270_v10  ;;  %v1819_v31 = vadd.f32 %v1803_v15, %v1783_v33  ;;  %v809_v16 = vadd.f32 %v793_v32, %v773_v26  ;;  %9876 = vst [vmem:[#allocation73_spill] sm:$0xff] %v7222_v62  ;;  %v9877_v60 = vld [vmem:[#allocation90_spill] sm:$0xff]  ;;  %v9881_v10 = vld [vmem:[#allocation111_spill] sm:$0xff] }
 0x218   : >> { %v893_v28 = vmul.f32 %v7222_v62, %v9502_v40  ;;  %v2398_v24 = vmul.f32 %v9878_v6, %v9877_v60  ;;  %v1911_v36 = vmul.f32 %v9498_v59, %v7208_v18  ;;  %v1332_v8 = vadd.f32 %v1316_v13, %v1296_v58  ;;  %v7233_v0 = vld [vmem:[%s5005_s17 + $0xfe] sm:$0xff]  ;;  %v9883_v62 = vld [vmem:[#allocation116_spill] sm:$0xff]  ;;  %v9885_v13 = vld [vmem:[#allocation53_spill] sm:$0xff] }
 0x219   : >> { %v1416_v25 = vmul.f32 %v9879_v41, %v9496_v7  ;;  %9880 = vst [vmem:[#allocation76_spill] sm:$0xff] %v7233_v0  ;;  %v2342_v15 = vadd.f32 %v2326_v43, %v2306_v50  ;;  %v1855_v35 = vadd.f32 %v1839_v39, %v1819_v31  ;;  %v873_v32 = vadd.f32 %v857_v2, %v809_v16  ;;  %v9882_v26 = vld [vmem:[#allocation15_spill] sm:$0xff]  ;;  %v9884_v40 = vld [vmem:[#allocation82_spill] sm:$0xff]  ;;  %v9886_v58 = vld [vmem:[#allocation44_spill] sm:$0xff] }
 0x21a   : >> { %v929_v33 = vmul.f32 %v9881_v10, %v9508_v9  ;;  %v2434_v60 = vmul.f32 %v9883_v62, %v9882_v26  ;;  %v4520_v6 = vld [vmem:[%s5005_s17 + $0x7d] sm:$0xff]  ;;  %v1368_v59 = vadd.f32 %v1352_v47, %v1332_v8  ;;  %v1452_v23 = vmul.f32 %v9886_v58, %v9885_v13  ;;  %v9888_v2 = vld [vmem:[#allocation117_spill] sm:$0xff] }
 0x21b   : >> { %v1975_v18 = vmul.f32 %v4520_v6, %v9884_v40  ;;  %v2378_v41 = vadd.f32 %v2362_v57, %v2342_v15  ;;  %v1891_v7 = vadd.f32 %v1875_v63, %v1855_v35  ;;  %v909_v11 = vadd.f32 %v893_v28, %v873_v32  ;;  %v7244_v43 = vld [vmem:[%s5005_s17 + $0xd9] sm:$0xff]  ;;  %v9890_v57 = vld [vmem:[#allocation41_spill] sm:$0xff] }
 0x21c   : >> { %9887 = vst [vmem:[#allocation101_spill] sm:$0xff] %v7244_v43  ;;  %v965_v39 = vmul.f32 %v7244_v43, %v9823_v49  ;;  %v2470_v50 = vmul.f32 %v9888_v2, %v7233_v0  ;;  %v7251_v31 = vld [vmem:[%s5005_s17 + $0x95] sm:$0xff]  ;;  %v1432_v47 = vadd.f32 %v1416_v25, %v1368_v59  ;;  %v1488_v63 = vmul.f32 %v9890_v57, %v9824_v55  ;;  %v9891_v15 = vld [vmem:[#allocation135_spill] sm:$0xff]  ;;  %v7262_v0 = vld [vmem:[%s5005_s17 + $0xcb] sm:$0xff] }
 0x21d   : >> { %9889 = vst [vmem:[#allocation71_spill] sm:$0xff] %v7251_v31  ;;  %v2011_v6 = vmul.f32 %v7251_v31, %v9826_v38  ;;  %v2414_v16 = vadd.f32 %v2398_v24, %v2378_v41  ;;  %v1927_v28 = vadd.f32 %v1911_v36, %v1891_v7  ;;  %v945_v8 = vadd.f32 %v929_v33, %v909_v11  ;;  %v9892_v32 = vld [vmem:[#allocation134_spill] sm:$0xff]  ;;  %v9894_v10 = vld [vmem:[#allocation57_spill] sm:$0xff]  ;;  %v7267_v59 = vld [vmem:[%s5005_s17 + $0x121] sm:$0xff] }
 0x21e   : >> { %v1001_v35 = vmul.f32 %v9831_v4, %v9891_v15  ;;  %v2047_v58 = vmul.f32 %v9892_v32, %v9828_v20  ;;  %v1468_v43 = vadd.f32 %v1452_v23, %v1432_v47  ;;  %9893 = vst [vmem:[#allocation118_spill] sm:$0xff] %v7262_v0  ;;  %v1524_v31 = vmul.f32 %v7262_v0, %v9894_v10  ;;  %v7270_v57 = vld [vmem:[%s5005_s17 + $0x113] sm:$0xff]  ;;  %v7275_v36 = vld [vmem:[%s5005_s17 + $0xc5] sm:$0xff] }
 0x21f   : >> { %9895 = vst [vmem:[#allocation132_spill] sm:$0xff] %v7267_v59  ;;  %v2450_v25 = vadd.f32 %v2434_v60, %v2414_v16  ;;  %v1991_v26 = vadd.f32 %v1975_v18, %v1927_v28  ;;  %9896 = vst [vmem:[#allocation129_spill] sm:$0xff] %v7270_v57  ;;  %v981_v24 = vadd.f32 %v965_v39, %v945_v8  ;;  %v9897_v7 = vld [vmem:[#allocation38_spill] sm:$0xff]  ;;  %v9899_v33 = vld [vmem:[#allocation85_spill] sm:$0xff] }
 0x220   : >> { %v1037_v11 = vmul.f32 %v9641_v37, %v9897_v7  ;;  %9898 = vst [vmem:[#allocation110_spill] sm:$0xff] %v7275_v36  ;;  %v2083_v23 = vmul.f32 %v7275_v36, %v9899_v33  ;;  %v9900_v41 = vld [vmem:[#allocation122_spill] sm:$0xff]  ;;  %v9901_v47 = vld [vmem:[#allocation92_spill] sm:$0xff]  ;;  %v1504_v32 = vadd.f32 %v1488_v63, %v1468_v43  ;;  %v9902_v0 = vld [vmem:[#allocation77_spill] sm:$0xff]  ;;  %v1073_v28 = vmul.f32 %v9709_v46, %v7267_v59 }
 0x221   : >> { %v2119_v15 = vmul.f32 %v9901_v47, %v9900_v41  ;;  %v1560_v18 = vmul.f32 %v9774_v30, %v9902_v0  ;;  %v2486_v60 = vadd.f32 %v2470_v50, %v2450_v25  ;;  %v2027_v39 = vadd.f32 %v2011_v6, %v1991_v26  ;;  %v9903_v8 = vld [vmem:[#allocation130_spill] sm:$0xff]  ;;  %v9904_v36 = vld [vmem:[#allocation49_spill] sm:$0xff]  ;;  %v9907_v41 = vld [vmem:[#allocation32_spill] sm:$0xff] }
 0x222   : >> { %v1017_v16 = vadd.f32 %v1001_v35, %v981_v24  ;;  %v2155_v7 = vmul.f32 %v9842_v53, %v9903_v8  ;;  %v1540_v37 = vadd.f32 %v1524_v31, %v1504_v32  ;;  %v1596_v33 = vmul.f32 %v9777_v27, %v9904_v36  ;;  %v4525_v6 = vld [vmem:[%s5005_s17 + $0x92] sm:$0xff]  ;;  %v4529_v59 = vld [vmem:[%s5005_s17 + $0x7e] sm:$0xff] }
 0x223   : >> { %v1632_v43 = vmul.f32 %v9655_v21, %v7270_v57  ;;  %v7292_v0 = vadd.f32 %v9715_v61, %v2486_v60  ;;  %v2063_v50 = vadd.f32 %v2047_v58, %v2027_v39  ;;  %v1137_v63 = vmul.f32 %v4525_v6, %v9650_v51  ;;  %v7297_v35 = vld [vmem:[%s5005_s17 + $0x10d] sm:$0xff]  ;;  %v4526_v31 = vld [vmem:[%s5005_s17 + $0x98] sm:$0xff] }
 0x224   : >> { %v1053_v26 = vadd.f32 %v1037_v11, %v1017_v16  ;;  %9906 = vst [vmem:[#allocation114_spill] sm:$0xff] %v7297_v35  ;;  %v1576_v25 = vadd.f32 %v1560_v18, %v1540_v37  ;;  %v594_v24 = vmul.f32 %v4526_v31, %v5020_v34  ;;  %v614_v32 = vmul.f32 %v9907_v41, %v9712_v45  ;;  %v9908_v57 = vld [vmem:[#allocation104_spill] sm:$0xff]  ;;  %v9910_v18 = vld [vmem:[#allocation93_spill] sm:$0xff]  ;;  %v7315_v41 = vld [vmem:[%s5005_s17 + $0xe0] sm:$0xff] }
 0x225   : >> { %9905 = vst [vmem:[#allocation28_spill] sm:$0xff] %v7292_v0  ;;  %v650_v36 = vmul.f32 %v9908_v57, %v9849_v52  ;;  %v2540_v58 = vsel %vm432_vm0, %v7292_v0, 0.0  ;;  %v2099_v11 = vadd.f32 %v2083_v23, %v2063_v50  ;;  %v7308_v39 = vld [vmem:[%s5005_s17 + $0xaa] sm:$0xff]  ;;  %v1696_v6 = vmul.f32 %v9910_v18, %v9597_v3  ;;  %9911 = vst [vmem:[#allocation21_spill] sm:$0xff] %v7315_v41 }
 0x226   : >> { %v1089_v60 = vadd.f32 %v1073_v28, %v1053_v26  ;;  %9909 = vst [vmem:[#allocation18_spill] sm:$0xff] %v7308_v39  ;;  %v1173_v16 = vmul.f32 %v7308_v39, %v9717_v1  ;;  %2541 = vadd.xlane.f32.xlu1 %v2540_v58  ;;  %v1612_v37 = vadd.f32 %v1596_v33, %v1576_v25  ;;  %v9912_v0 = vld [vmem:[#allocation105_spill] sm:$0xff]  ;;  %v9913_v25 = vld [vmem:[#allocation34_spill] sm:$0xff] }
 0x227   : >> { %v630_v31 = vadd.f32 %v614_v32, %v594_v24  ;;  %v686_v23 = vmul.f32 %v7315_v41, %v9786_v54  ;;  %v2135_v28 = vadd.f32 %v2119_v15, %v2099_v11  ;;  %v2191_v50 = vmul.f32 %v9852_v22, %v7297_v35  ;;  %v9914_v32 = vld [vmem:[#allocation127_spill] sm:$0xff]  ;;  %v7342_v35 = vld [vmem:[%s5005_s17 + $0x96] sm:$0xff] }
 0x228   : >> { %v1153_v26 = vadd.f32 %v1137_v63, %v1089_v60  ;;  %v1209_v58 = vmul.f32 %v9912_v0, %v9228_v5  ;;  %v1648_v33 = vadd.f32 %v1632_v43, %v1612_v37  ;;  %v1732_v18 = vmul.f32 %v9913_v25, %v9725_v56  ;;  %v7330_v63 = vld [vmem:[%s5005_s17 + $0xda] sm:$0xff]  ;;  %v7335_v37 = vld [vmem:[%s5005_s17 + $0x128] sm:$0xff]  ;;  %v9918_v25 = vld [vmem:[#allocation69_spill] sm:$0xff]  ;;  %9921 = vst [vmem:[#allocation113_spill] sm:$0xff] %v7342_v35 }
 0x229   : >> { %v666_v24 = vadd.f32 %v650_v36, %v630_v31  ;;  %v722_v57 = vmul.f32 %v9792_v17, %v9914_v32  ;;  %v2171_v39 = vadd.f32 %v2155_v7, %v2135_v28  ;;  %v2255_v15 = vmul.f32 %v4529_v59, %v9788_v29  ;;  %9915 = vst [vmem:[#allocation133_spill] sm:$0xff] %v7330_v63  ;;  %v9916_v60 = vld [vmem:[#allocation42_spill] sm:$0xff]  ;;  %v9919_v36 = vld [vmem:[#allocation51_spill] sm:$0xff]  ;;  %v9920_v32 = vld [vmem:[#allocation40_spill] sm:$0xff] }
 0x22a   : >> { %v1189_v11 = vadd.f32 %v1173_v16, %v1153_v26  ;;  %v1245_v43 = vmul.f32 %v7330_v63, %v9916_v60  ;;  %9917 = vst [vmem:[#allocation54_spill] sm:$0xff] %v7335_v37  ;;  %v1712_v41 = vadd.f32 %v1696_v6, %v1648_v33  ;;  %v1768_v31 = vmul.f32 %v9919_v36, %v9918_v25  ;;  %v9922_v59 = vld [vmem:[#allocation99_spill] sm:$0xff]  ;;  %v9923_v8 = vld [vmem:[#allocation137_spill] sm:$0xff]  ;;  %v9925_v33 = vld [vmem:[#allocation70_spill] sm:$0xff] }
 0x22b   : >> { %v702_v0 = vadd.f32 %v686_v23, %v666_v24  ;;  %v758_v7 = vmul.f32 %v9670_v48, %v9920_v32  ;;  %v2207_v28 = vadd.f32 %v2191_v50, %v2171_v39  ;;  %v2291_v16 = vmul.f32 %v7342_v35, %v9922_v59  ;;  %v7349_v6 = vld [vmem:[%s5005_s17 + $0xcc] sm:$0xff]  ;;  %v7354_v24 = vld [vmem:[%s5005_s17 + $0x122] sm:$0xff]  ;;  %v9927_v35 = vld [vmem:[#allocation106_spill] sm:$0xff] }
 0x22c   : >> { %v1225_v26 = vadd.f32 %v1209_v58, %v1189_v11  ;;  %v1281_v63 = vmul.f32 %v9866_v19, %v9923_v8  ;;  %v1748_v60 = vadd.f32 %v1732_v18, %v1712_v41  ;;  %9924 = vst [vmem:[#allocation126_spill] sm:$0xff] %v7349_v6  ;;  %v1804_v23 = vmul.f32 %v7349_v6, %v9925_v33  ;;  %v9928_v58 = vld [vmem:[#allocation65_spill] sm:$0xff]  ;;  %v9929_v8 = vld [vmem:[#allocation96_spill] sm:$0xff]  ;;  %v9930_v19 = vld [vmem:[#allocation138_spill] sm:$0xff] }
 0x22d   : >> { %9926 = vst [vmem:[#allocation119_spill] sm:$0xff] %v7354_v24  ;;  %v738_v39 = vadd.f32 %v722_v57, %v702_v0  ;;  %v794_v50 = vmul.f32 %v9216_v14, %v7335_v37  ;;  %v2271_v36 = vadd.f32 %v2255_v15, %v2207_v28  ;;  %v2327_v11 = vmul.f32 %v9928_v58, %v9927_v35  ;;  %v4533_v33 = vld [vmem:[%s5005_s17 + $0x99] sm:$0xff]  ;;  %v7367_v37 = vld [vmem:[%s5005_s17 + $0xc6] sm:$0xff]  ;;  %v7385_v14 = vld [vmem:[%s5005_s17 + $0x10e] sm:$0xff] }
 0x22e   : >> { %v1261_v32 = vadd.f32 %v1245_v43, %v1225_v26  ;;  %v1317_v41 = vmul.f32 %v9304_v12, %v9929_v8  ;;  %v1784_v18 = vadd.f32 %v1768_v31, %v1748_v60  ;;  %v1840_v48 = vmul.f32 %v9617_v44, %v9930_v19  ;;  %v9931_v25 = vld [vmem:[#allocation26_spill] sm:$0xff]  ;;  %9932 = vst [vmem:[#allocation121_spill] sm:$0xff] %v7367_v37  ;;  %v9934_v60 = vld [vmem:[#allocation48_spill] sm:$0xff]  ;;  %v9935_v19 = vld [vmem:[#allocation123_spill] sm:$0xff] }
 0x22f   : >> { %v774_v6 = vadd.f32 %v758_v7, %v738_v39  ;;  %v858_v57 = vmul.f32 %v4533_v33, %v9931_v25  ;;  %v2307_v0 = vadd.f32 %v2291_v16, %v2271_v36  ;;  %v2363_v15 = vmul.f32 %v7367_v37, %v9874_v42  ;;  %v7372_v43 = vld [vmem:[%s5005_s17 + $0x114] sm:$0xff]  ;;  %v9936_v7 = vld [vmem:[#allocation79_spill] sm:$0xff]  ;;  %9942 = vst [vmem:[#allocation75_spill] sm:$0xff] %v7385_v14 }
 0x230   : >> { %9933 = vst [vmem:[#allocation94_spill] sm:$0xff] %v7372_v43  ;;  %v1297_v28 = vadd.f32 %v1281_v63, %v1261_v32  ;;  %v1353_v31 = vmul.f32 %v9934_v60, %v7354_v24  ;;  %v1820_v26 = vadd.f32 %v1804_v23, %v1784_v18  ;;  %v1876_v39 = vmul.f32 %v9936_v7, %v9935_v19  ;;  %v9937_v33 = vld [vmem:[#allocation27_spill] sm:$0xff]  ;;  %v9939_v25 = vld [vmem:[#allocation62_spill] sm:$0xff]  ;;  %v9941_v63 = vld [vmem:[#allocation52_spill] sm:$0xff] }
 0x231   : >> { %v810_v58 = vadd.f32 %v794_v50, %v774_v6  ;;  %v9938_v8 = vld [vmem:[#allocation139_spill] sm:$0xff]  ;;  %v2343_v16 = vadd.f32 %v2327_v11, %v2307_v0  ;;  %v4535_v42 = vld [vmem:[%s5005_s17 + $0x93] sm:$0xff]  ;;  %v9943_v18 = vld [vmem:[#allocation80_spill] sm:$0xff] }
 0x232   : >> { %v894_v36 = vmul.f32 %v9938_v8, %v9937_v33  ;;  %v9940_v44 = vld [vmem:[#allocation115_spill] sm:$0xff]  ;;  %v1333_v37 = vadd.f32 %v1317_v41, %v1297_v28  ;;  %v1417_v32 = vmul.f32 %v4535_v42, %v9941_v63  ;;  %v1856_v23 = vadd.f32 %v1840_v48, %v1820_v26  ;;  %v9944_v6 = vld [vmem:[#allocation50_spill] sm:$0xff]  ;;  %v9945_v11 = vld [vmem:[#allocation109_spill] sm:$0xff] }
 0x233   : >> { %v2399_v12 = vmul.f32 %v9940_v44, %v9939_v25  ;;  %v1912_v19 = vmul.f32 %v9943_v18, %v7372_v43  ;;  %v874_v24 = vadd.f32 %v858_v57, %v810_v58  ;;  %v930_v50 = vmul.f32 %v9944_v6, %v9508_v9  ;;  %v7394_v41 = vld [vmem:[%s5005_s17 + $0xab] sm:$0xff]  ;;  %v7401_v57 = vld [vmem:[%s5005_s17 + $0xe1] sm:$0xff] }
 0x234   : >> { %v2379_v8 = vadd.f32 %v2363_v15, %v2343_v16  ;;  %v2435_v0 = vmul.f32 %v9883_v62, %v9945_v11  ;;  %v1369_v25 = vadd.f32 %v1353_v31, %v1333_v37  ;;  %9946 = vst [vmem:[#allocation30_spill] sm:$0xff] %v7394_v41  ;;  %v1453_v42 = vmul.f32 %v7394_v41, %v9885_v13  ;;  %v9947_v48 = vld [vmem:[#allocation36_spill] sm:$0xff]  ;;  %v9951_v41 = vld [vmem:[#allocation45_spill] sm:$0xff] }
 0x235   : >> { %v1892_v28 = vadd.f32 %v1876_v39, %v1856_v23  ;;  %v1976_v26 = vmul.f32 %v9947_v48, %v9884_v40  ;;  %v910_v43 = vadd.f32 %v894_v36, %v874_v24  ;;  %9948 = vst [vmem:[#allocation16_spill] sm:$0xff] %v7401_v57  ;;  %v966_v15 = vmul.f32 %v7401_v57, %v9823_v49  ;;  %v9949_v39 = vld [vmem:[#allocation124_spill] sm:$0xff]  ;;  %v7416_v49 = vld [vmem:[%s5005_s17 + $0xdb] sm:$0xff] }
 0x236   : >> { %v2415_v58 = vadd.f32 %v2399_v12, %v2379_v8  ;;  %v2471_v37 = vmul.f32 %v9888_v2, %v7385_v14  ;;  %v1433_v31 = vadd.f32 %v1417_v32, %v1369_v25  ;;  %v1489_v16 = vmul.f32 %v9949_v39, %v9824_v55  ;;  %v9950_v48 = vld [vmem:[#allocation140_spill] sm:$0xff]  ;;  %9953 = vst [vmem:[#allocation88_spill] sm:$0xff] %v7416_v49  ;;  %v9961_v14 = vld [vmem:[#allocation89_spill] sm:$0xff] }
 0x237   : >> { %v1928_v23 = vadd.f32 %v1912_v19, %v1892_v28  ;;  %v2012_v24 = vmul.f32 %v9950_v48, %v9826_v38  ;;  %v946_v36 = vadd.f32 %v930_v50, %v910_v43  ;;  %v1002_v11 = vmul.f32 %v9831_v4, %v9951_v41  ;;  %v9952_v57 = vld [vmem:[#allocation56_spill] sm:$0xff]  ;;  %v9956_v43 = vld [vmem:[#allocation85_spill] sm:$0xff] }
 0x238   : >> { %v2451_v6 = vadd.f32 %v2435_v0, %v2415_v58  ;;  %v2048_v12 = vmul.f32 %v9952_v57, %v9828_v20  ;;  %v1469_v8 = vadd.f32 %v1453_v42, %v1433_v31  ;;  %v1525_v32 = vmul.f32 %v7416_v49, %v9894_v10  ;;  %v7421_v25 = vld [vmem:[%s5005_s17 + $0x129] sm:$0xff]  ;;  %v9960_v57 = vld [vmem:[#allocation87_spill] sm:$0xff] }
 0x239   : >> { %9954 = vst [vmem:[#allocation13_spill] sm:$0xff] %v7421_v25  ;;  %v1992_v19 = vadd.f32 %v1976_v26, %v1928_v23  ;;  %v7424_v28 = vld [vmem:[%s5005_s17 + $0xcd] sm:$0xff]  ;;  %v7429_v41 = vld [vmem:[%s5005_s17 + $0x123] sm:$0xff]  ;;  %v982_v0 = vadd.f32 %v966_v15, %v946_v36  ;;  %v2120_v49 = vmul.f32 %v9901_v47, %v9960_v57  ;;  %v1561_v26 = vmul.f32 %v9774_v30, %v9961_v14 }
 0x23a   : >> { %9955 = vst [vmem:[#allocation100_spill] sm:$0xff] %v7424_v28  ;;  %v2084_v50 = vmul.f32 %v7424_v28, %v9956_v43  ;;  %9957 = vst [vmem:[#allocation66_spill] sm:$0xff] %v7429_v41  ;;  %v9958_v58 = vld [vmem:[#allocation120_spill] sm:$0xff]  ;;  %v9959_v48 = vld [vmem:[#allocation33_spill] sm:$0xff]  ;;  %v2487_v31 = vadd.f32 %v2471_v37, %v2451_v6  ;;  %v1505_v39 = vadd.f32 %v1489_v16, %v1469_v8 }
 0x23b   : >> { %v1038_v42 = vmul.f32 %v9959_v48, %v9958_v58  ;;  %v2028_v23 = vadd.f32 %v2012_v24, %v1992_v19  ;;  %v9962_v10 = vld [vmem:[#allocation63_spill] sm:$0xff]  ;;  %v1018_v28 = vadd.f32 %v1002_v11, %v982_v0  ;;  %v1074_v15 = vmul.f32 %v9709_v46, %v7421_v25  ;;  %v7445_v58 = vld [vmem:[%s5005_s17 + $0x115] sm:$0xff]  ;;  %v9966_v19 = vld [vmem:[#allocation64_spill] sm:$0xff] }
 0x23c   : >> { %v2156_v4 = vmul.f32 %v9842_v53, %v9962_v10  ;;  %v7442_v36 = vadd.f32 %v9715_v61, %v2487_v31  ;;  %9964 = vst [vmem:[#allocation131_spill] sm:$0xff] %v7445_v58  ;;  %v1541_v6 = vadd.f32 %v1525_v32, %v1505_v39  ;;  %v9965_v37 = vld [vmem:[#allocation55_spill] sm:$0xff]  ;;  %v1633_v14 = vmul.f32 %v9655_v21, %v7429_v41  ;;  %v9967_v39 = vld [vmem:[#allocation102_spill] sm:$0xff] }
 0x23d   : >> { %v1597_v57 = vmul.f32 %v9777_v27, %v9965_v37  ;;  %v2064_v16 = vadd.f32 %v2048_v12, %v2028_v23  ;;  %v1054_v24 = vadd.f32 %v1038_v42, %v1018_v28  ;;  %v4540_v8 = vld [vmem:[%s5005_s17 + $0x9a] sm:$0xff]  ;;  %v595_v0 = vmul.f32 %v9966_v19, %v5020_v34 }
 0x23e   : >> { %9963 = vst [vmem:[#allocation90_spill] sm:$0xff] %v7442_v36  ;;  %v1138_v11 = vmul.f32 %v4540_v8, %v9650_v51  ;;  %v2543_v31 = vsel %vm432_vm0, %v7442_v36, 0.0  ;;  %v1577_v10 = vadd.f32 %v1561_v26, %v1541_v6  ;;  %v615_v32 = vmul.f32 %v9967_v39, %v9712_v45  ;;  %v9968_v37 = vld [vmem:[#allocation74_spill] sm:$0xff]  ;;  %v9969_v23 = vld [vmem:[#allocation35_spill] sm:$0xff]  ;;  %v4541_v39 = vld [vmem:[%s5005_s17 + $0xf0] sm:$0xff] }
 0x23f   : >> { %v651_v25 = vmul.f32 %v9968_v37, %v9849_v52  ;;  %2544 = vadd.xlane.f32.xlu0 %v2543_v31  ;;  %v2100_v12 = vadd.f32 %v2084_v50, %v2064_v16  ;;  %v2192_v28 = vmul.f32 %v9852_v22, %v7445_v58  ;;  %v1090_v42 = vadd.f32 %v1074_v15, %v1054_v24  ;;  %v9970_v36 = vld [vmem:[#allocation58_spill] sm:$0xff]  ;;  %v9971_v50 = vld [vmem:[#allocation128_spill] sm:$0xff] }
 0x240   : >> { %v1174_v8 = vmul.f32 %v9969_v23, %v9717_v1  ;;  %v1613_v19 = vadd.f32 %v1597_v57, %v1577_v10  ;;  %v1697_v26 = vmul.f32 %v9970_v36, %v9597_v3  ;;  %v631_v6 = vadd.f32 %v615_v32, %v595_v0  ;;  %v9972_v15 = vld [vmem:[#allocation60_spill] sm:$0xff] }
 0x241   : >> { %v687_v37 = vmul.f32 %v4541_v39, %v9786_v54  ;;  %v2136_v41 = vadd.f32 %v2120_v49, %v2100_v12  ;;  %v2256_v16 = vmul.f32 %v9971_v50, %v9788_v29  ;;  %v1154_v31 = vadd.f32 %v1138_v11, %v1090_v42  ;;  %v7474_v23 = vld [vmem:[%s5005_s17 + $0xac] sm:$0xff]  ;;  %v7483_v42 = vld [vmem:[%s5005_s17 + $0xe2] sm:$0xff]  ;;  %v9977_v39 = vld [vmem:[#allocation42_spill] sm:$0xff] }
 0x242   : >> { %v1210_v24 = vmul.f32 %v9972_v15, %v9228_v5  ;;  %v1649_v58 = vadd.f32 %v1633_v14, %v1613_v19  ;;  %9973 = vst [vmem:[#allocation116_spill] sm:$0xff] %v7474_v23  ;;  %v1733_v10 = vmul.f32 %v7474_v23, %v9725_v56  ;;  %v667_v36 = vadd.f32 %v651_v25, %v631_v6  ;;  %v9974_v57 = vld [vmem:[#allocation68_spill] sm:$0xff]  ;;  %v9975_v49 = vld [vmem:[#allocation81_spill] sm:$0xff]  ;;  %v575_v19 = vld [vmem:[%s5005_s17 + $0x138] sm:$0xff] }
 0x243   : >> { %v723_v0 = vmul.f32 %v9792_v17, %v9974_v57  ;;  %v2172_v32 = vadd.f32 %v2156_v4, %v2136_v41  ;;  %v2292_v12 = vmul.f32 %v9975_v49, %v9922_v59  ;;  %v1190_v11 = vadd.f32 %v1174_v8, %v1154_v31  ;;  %9976 = vst [vmem:[#allocation82_spill] sm:$0xff] %v7483_v42  ;;  %v9978_v23 = vld [vmem:[#allocation69_spill] sm:$0xff]  ;;  %v9981_v56 = vld [vmem:[#allocation22_spill] sm:$0xff]  ;;  %v9983_v31 = vld [vmem:[#allocation107_spill] sm:$0xff] }
 0x244   : >> { %v1246_v14 = vmul.f32 %v7483_v42, %v9977_v39  ;;  %v1713_v50 = vadd.f32 %v1697_v26, %v1649_v58  ;;  %v9979_v25 = vld [vmem:[#allocation125_spill] sm:$0xff]  ;;  %v703_v15 = vadd.f32 %v687_v37, %v667_v36  ;;  %v9984_v29 = vld [vmem:[#allocation43_spill] sm:$0xff]  ;;  %v9986_v39 = vld [vmem:[#allocation70_spill] sm:$0xff] }
 0x245   : >> { %v1769_v6 = vmul.f32 %v9979_v25, %v9978_v23  ;;  %v9980_v57 = vld [vmem:[#allocation61_spill] sm:$0xff]  ;;  %v2208_v41 = vadd.f32 %v2192_v28, %v2172_v32  ;;  %v1226_v8 = vadd.f32 %v1210_v24, %v1190_v11  ;;  %v1282_v17 = vmul.f32 %v9984_v29, %v9983_v31  ;;  %v7497_v42 = vld [vmem:[%s5005_s17 + $0xdc] sm:$0xff]  ;;  %v9988_v36 = vld [vmem:[#allocation24_spill] sm:$0xff] }
 0x246   : >> { %v759_v4 = vmul.f32 %v9981_v56, %v9980_v57  ;;  %v9982_v49 = vld [vmem:[#allocation17_spill] sm:$0xff]  ;;  %v1749_v5 = vadd.f32 %v1733_v10, %v1713_v50  ;;  %9985 = vst [vmem:[#allocation53_spill] sm:$0xff] %v7497_v42  ;;  %v1805_v58 = vmul.f32 %v7497_v42, %v9986_v39  ;;  %v739_v37 = vadd.f32 %v723_v0, %v703_v15  ;;  %v9990_v24 = vld [vmem:[#allocation108_spill] sm:$0xff]  ;;  %v9991_v10 = vld [vmem:[#allocation86_spill] sm:$0xff] }
 0x247   : >> { %v2328_v59 = vmul.f32 %v9982_v49, %v9927_v35  ;;  %v7502_v26 = vld [vmem:[%s5005_s17 + $0x12a] sm:$0xff]  ;;  %v795_v28 = vmul.f32 %v9988_v36, %v575_v19  ;;  %v2272_v32 = vadd.f32 %v2256_v16, %v2208_v41  ;;  %v1262_v31 = vadd.f32 %v1246_v14, %v1226_v8  ;;  %v9992_v50 = vld [vmem:[#allocation47_spill] sm:$0xff]  ;;  %v9993_v35 = vld [vmem:[#allocation46_spill] sm:$0xff] }
 0x248   : >> { %9987 = vst [vmem:[#allocation44_spill] sm:$0xff] %v7502_v26  ;;  %v7506_v57 = vld [vmem:[%s5005_s17 + $0xce] sm:$0xff]  ;;  %v1318_v49 = vmul.f32 %v9992_v50, %v9991_v10  ;;  %v1785_v25 = vadd.f32 %v1769_v6, %v1749_v5  ;;  %v9994_v29 = vld [vmem:[#allocation78_spill] sm:$0xff]  ;;  %v775_v39 = vadd.f32 %v759_v4, %v739_v37  ;;  %v9997_v16 = vld [vmem:[#allocation15_spill] sm:$0xff]  ;;  %v1354_v14 = vmul.f32 %v9934_v60, %v7502_v26 }
 0x249   : >> { %9989 = vst [vmem:[#allocation117_spill] sm:$0xff] %v7506_v57  ;;  %v2364_v11 = vmul.f32 %v7506_v57, %v9990_v24  ;;  %v1841_v42 = vmul.f32 %v9994_v29, %v9993_v35  ;;  %v9995_v15 = vld [vmem:[#allocation26_spill] sm:$0xff]  ;;  %v9996_v0 = vld [vmem:[#allocation73_spill] sm:$0xff]  ;;  %v2308_v19 = vadd.f32 %v2292_v12, %v2272_v32  ;;  %v2400_v41 = vmul.f32 %v9940_v44, %v9997_v16  ;;  %v7519_v36 = vld [vmem:[%s5005_s17 + $0x124] sm:$0xff] }
 0x24a   : >> { %v859_v23 = vmul.f32 %v9996_v0, %v9995_v15  ;;  %9998 = vst [vmem:[#allocation135_spill] sm:$0xff] %v7519_v36  ;;  %v1298_v57 = vadd.f32 %v1282_v17, %v1262_v31  ;;  %v7524_v8 = vld [vmem:[%s5005_s17 + $0x116] sm:$0xff]  ;;  %v1821_v5 = vadd.f32 %v1805_v58, %v1785_v25  ;;  %v811_v4 = vadd.f32 %v795_v28, %v775_v39  ;;  %v10001_v37 = vld [vmem:[#allocation111_spill] sm:$0xff]  ;;  %v10002_v32 = vld [vmem:[#allocation76_spill] sm:$0xff] }
 0x24b   : >> { %9999 = vst [vmem:[#allocation134_spill] sm:$0xff] %v7524_v8  ;;  %v10000_v6 = vld [vmem:[#allocation37_spill] sm:$0xff]  ;;  %v895_v0 = vmul.f32 %v10001_v37, %v9937_v33  ;;  %v2344_v12 = vadd.f32 %v2328_v59, %v2308_v19  ;;  %v2436_v16 = vmul.f32 %v9883_v62, %v10002_v32  ;;  %v4546_v17 = vld [vmem:[%s5005_s17 + $0x9b] sm:$0xff]  ;;  %v1913_v25 = vmul.f32 %v9943_v18, %v7519_v36 }
 0x24c   : >> { %v1877_v35 = vmul.f32 %v9936_v7, %v10000_v6  ;;  %v1334_v10 = vadd.f32 %v1318_v49, %v1298_v57  ;;  %v1418_v31 = vmul.f32 %v4546_v17, %v9941_v63  ;;  %v1857_v26 = vadd.f32 %v1841_v42, %v1821_v5  ;;  %v10003_v39 = vld [vmem:[#allocation101_spill] sm:$0xff]  ;;  %v10005_v17 = vld [vmem:[#allocation71_spill] sm:$0xff] }
 0x24d   : >> { %v875_v58 = vadd.f32 %v859_v23, %v811_v4  ;;  %v931_v28 = vmul.f32 %v10003_v39, %v9508_v9  ;;  %v2380_v6 = vadd.f32 %v2364_v11, %v2344_v12  ;;  %v2472_v59 = vmul.f32 %v9888_v2, %v7524_v8  ;;  %v10004_v37 = vld [vmem:[#allocation41_spill] sm:$0xff]  ;;  %v10008_v12 = vld [vmem:[#allocation118_spill] sm:$0xff]  ;;  %v10011_v8 = vld [vmem:[#allocation31_spill] sm:$0xff] }
 0x24e   : >> { %v1370_v19 = vadd.f32 %v1354_v14, %v1334_v10  ;;  %v1454_v49 = vmul.f32 %v10004_v37, %v9885_v13  ;;  %v1893_v57 = vadd.f32 %v1877_v35, %v1857_v26  ;;  %v1977_v42 = vmul.f32 %v10005_v17, %v9884_v40  ;;  %v4547_v32 = vld [vmem:[%s5005_s17 + $0xf1] sm:$0xff] }
 0x24f   : >> { %v911_v5 = vadd.f32 %v895_v0, %v875_v58  ;;  %v10006_v23 = vld [vmem:[#allocation29_spill] sm:$0xff]  ;;  %v2416_v39 = vadd.f32 %v2400_v41, %v2380_v6  ;;  %v1490_v26 = vmul.f32 %v10008_v12, %v9824_v55  ;;  %v10009_v37 = vld [vmem:[#allocation110_spill] sm:$0xff] }
 0x250   : >> { %v967_v4 = vmul.f32 %v4547_v32, %v10006_v23  ;;  %v7547_v11 = vld [vmem:[%s5005_s17 + $0xad] sm:$0xff]  ;;  %v1434_v14 = vadd.f32 %v1418_v31, %v1370_v19  ;;  %v1929_v35 = vadd.f32 %v1913_v25, %v1893_v57  ;;  %v2049_v0 = vmul.f32 %v10009_v37, %v9828_v20  ;;  %v10010_v17 = vld [vmem:[#allocation38_spill] sm:$0xff] }
 0x251   : >> { %10007 = vst [vmem:[#allocation122_spill] sm:$0xff] %v7547_v11  ;;  %v2013_v10 = vmul.f32 %v7547_v11, %v9826_v38  ;;  %v947_v58 = vadd.f32 %v931_v28, %v911_v5  ;;  %v1003_v32 = vmul.f32 %v10011_v8, %v10010_v17  ;;  %v2452_v36 = vadd.f32 %v2436_v16, %v2416_v39  ;;  %v7558_v41 = vld [vmem:[%s5005_s17 + $0xdd] sm:$0xff]  ;;  %v10014_v31 = vld [vmem:[#allocation57_spill] sm:$0xff]  ;;  %v10017_v39 = vld [vmem:[#allocation132_spill] sm:$0xff] }
 0x252   : >> { %10012 = vst [vmem:[#allocation77_spill] sm:$0xff] %v7558_v41  ;;  %v2085_v6 = vmul.f32 %v7558_v41, %v9956_v43  ;;  %v1470_v11 = vadd.f32 %v1454_v49, %v1434_v14  ;;  %v7563_v38 = vld [vmem:[%s5005_s17 + $0xe3] sm:$0xff]  ;;  %v839_v25 = vld [vmem:[%s5005_s17 + $0x139] sm:$0xff]  ;;  %v1993_v57 = vadd.f32 %v1977_v42, %v1929_v35  ;;  %v7571_v5 = vld [vmem:[%s5005_s17 + $0x12b] sm:$0xff]  ;;  %v1039_v17 = vmul.f32 %v9959_v48, %v10017_v39 }
 0x253   : >> { %10013 = vst [vmem:[#allocation32_spill] sm:$0xff] %v7563_v38  ;;  %v1526_v19 = vmul.f32 %v7563_v38, %v10014_v31  ;;  %v10015_v12 = vld [vmem:[#allocation130_spill] sm:$0xff]  ;;  %10016 = vst [vmem:[#allocation93_spill] sm:$0xff] %v7571_v5  ;;  %v983_v16 = vadd.f32 %v967_v4, %v947_v58  ;;  %v2488_v41 = vadd.f32 %v2472_v59, %v2452_v36  ;;  %v10019_v43 = vld [vmem:[#allocation49_spill] sm:$0xff] }
 0x254   : >> { %v2121_v28 = vmul.f32 %v9901_v47, %v10015_v12  ;;  %v10018_v49 = vld [vmem:[#allocation114_spill] sm:$0xff]  ;;  %v1506_v37 = vadd.f32 %v1490_v26, %v1470_v11  ;;  %v1562_v38 = vmul.f32 %v9774_v30, %v10019_v43  ;;  %v2029_v42 = vadd.f32 %v2013_v10, %v1993_v57  ;;  %v10020_v35 = vld [vmem:[#allocation129_spill] sm:$0xff]  ;;  %v7590_v26 = vld [vmem:[%s5005_s17 + $0x125] sm:$0xff] }
 0x255   : >> { %v2157_v14 = vmul.f32 %v9842_v53, %v10018_v49  ;;  %v1598_v12 = vmul.f32 %v9777_v27, %v10020_v35  ;;  %v1019_v47 = vadd.f32 %v1003_v32, %v983_v16  ;;  %v1075_v20 = vmul.f32 %v9709_v46, %v839_v25  ;;  %v10022_v59 = vld [vmem:[#allocation18_spill] sm:$0xff]  ;;  %10023 = vst [vmem:[#allocation127_spill] sm:$0xff] %v7590_v26  ;;  %v4551_v57 = vld [vmem:[%s5005_s17 + $0xb0] sm:$0xff]  ;;  %v10024_v25 = vld [vmem:[#allocation104_spill] sm:$0xff] }
 0x256   : >> { %v7583_v4 = vadd.f32 %v9715_v61, %v2488_v41  ;;  %v1542_v58 = vadd.f32 %v1526_v19, %v1506_v37  ;;  %v1634_v36 = vmul.f32 %v9655_v21, %v7571_v5  ;;  %v1139_v11 = vmul.f32 %v10022_v59, %v9650_v51  ;;  %v10025_v16 = vld [vmem:[#allocation105_spill] sm:$0xff]  ;;  %v576_v35 = vld [vmem:[%s5005_s17 + $0x140] sm:$0xff] }
 0x257   : >> { %v2065_v43 = vadd.f32 %v2049_v0, %v2029_v42  ;;  %v1055_v10 = vadd.f32 %v1039_v17, %v1019_v47  ;;  %v596_v32 = vmul.f32 %v4551_v57, %v5020_v34  ;;  %v616_v41 = vmul.f32 %v10024_v25, %v9712_v45  ;;  %v10026_v59 = vld [vmem:[#allocation21_spill] sm:$0xff]  ;;  %v4552_v42 = vld [vmem:[%s5005_s17 + $0xf8] sm:$0xff]  ;;  %v10027_v25 = vld [vmem:[#allocation39_spill] sm:$0xff] }
 0x258   : >> { %10021 = vst [vmem:[#allocation34_spill] sm:$0xff] %v7583_v4  ;;  %v2546_v37 = vsel %vm432_vm0, %v7583_v4, 0.0  ;;  %v1578_v19 = vadd.f32 %v1562_v38, %v1542_v58  ;;  %v1175_v39 = vmul.f32 %v10025_v16, %v9717_v1  ;;  %v652_v49 = vmul.f32 %v10026_v59, %v9849_v52  ;;  %v4553_v38 = vld [vmem:[%s5005_s17 + $0x9c] sm:$0xff]  ;;  %v10028_v16 = vld [vmem:[#allocation133_spill] sm:$0xff] }
 0x259   : >> { %2547 = vadd.xlane.f32.xlu1 %v2546_v37  ;;  %v2101_v0 = vadd.f32 %v2085_v6, %v2065_v43  ;;  %v1091_v47 = vadd.f32 %v1075_v20, %v1055_v10  ;;  %v632_v17 = vadd.f32 %v616_v41, %v596_v32  ;;  %v688_v34 = vmul.f32 %v4552_v42, %v9786_v54  ;;  %v10029_v43 = vld [vmem:[#allocation40_spill] sm:$0xff]  ;;  %v10031_v41 = vld [vmem:[#allocation98_spill] sm:$0xff]  ;;  %v10032_v59 = vld [vmem:[#allocation113_spill] sm:$0xff] }
 0x25a   : >> { %v2193_v45 = vmul.f32 %v9852_v22, %v7590_v26  ;;  %v1614_v57 = vadd.f32 %v1598_v12, %v1578_v19  ;;  %v1698_v58 = vmul.f32 %v4553_v38, %v9597_v3  ;;  %v1211_v52 = vmul.f32 %v10028_v16, %v10027_v25  ;;  %v10030_v10 = vld [vmem:[#allocation20_spill] sm:$0xff]  ;;  %v10033_v4 = vld [vmem:[#allocation67_spill] sm:$0xff]  ;;  %v4554_v26 = vld [vmem:[%s5005_s17 + $0xf2] sm:$0xff] }
 0x25b   : >> { %v2137_v37 = vadd.f32 %v2121_v28, %v2101_v0  ;;  %v1155_v6 = vadd.f32 %v1139_v11, %v1091_v47  ;;  %v668_v20 = vadd.f32 %v652_v49, %v632_v17  ;;  %v724_v32 = vmul.f32 %v10030_v10, %v10029_v43  ;;  %v10034_v12 = vld [vmem:[#allocation51_spill] sm:$0xff]  ;;  %v10035_v38 = vld [vmem:[#allocation42_spill] sm:$0xff]  ;;  %v7622_v47 = vld [vmem:[%s5005_s17 + $0xae] sm:$0xff] }
 0x25c   : >> { %v2257_v54 = vmul.f32 %v10032_v59, %v10031_v41  ;;  %v1650_v42 = vadd.f32 %v1634_v36, %v1614_v57  ;;  %v1734_v19 = vmul.f32 %v10034_v12, %v10033_v4  ;;  %v1247_v5 = vmul.f32 %v4554_v26, %v10035_v38  ;;  %v10036_v49 = vld [vmem:[#allocation54_spill] sm:$0xff]  ;;  %10037 = vst [vmem:[#allocation137_spill] sm:$0xff] %v7622_v47  ;;  %v10038_v17 = vld [vmem:[#allocation99_spill] sm:$0xff]  ;;  %v10039_v57 = vld [vmem:[#allocation69_spill] sm:$0xff] }
 0x25d   : >> { %v2173_v22 = vadd.f32 %v2157_v14, %v2137_v37  ;;  %v1191_v28 = vadd.f32 %v1175_v39, %v1155_v6  ;;  %v704_v11 = vadd.f32 %v688_v34, %v668_v20  ;;  %v760_v0 = vmul.f32 %v9981_v56, %v10036_v49  ;;  %v10040_v43 = vld [vmem:[#allocation126_spill] sm:$0xff]  ;;  %v10041_v59 = vld [vmem:[#allocation96_spill] sm:$0xff]  ;;  %v10042_v26 = vld [vmem:[#allocation43_spill] sm:$0xff] }
 0x25e   : >> { %v2293_v16 = vmul.f32 %v7622_v47, %v10038_v17  ;;  %v1714_v36 = vadd.f32 %v1698_v58, %v1650_v42  ;;  %v1770_v10 = vmul.f32 %v10040_v43, %v10039_v57  ;;  %v1283_v12 = vmul.f32 %v10042_v26, %v10041_v59  ;;  %v1119_v39 = vld [vmem:[%s5005_s17 + $0x13a] sm:$0xff]  ;;  %v10043_v6 = vld [vmem:[#allocation24_spill] sm:$0xff]  ;;  %v10045_v49 = vld [vmem:[#allocation121_spill] sm:$0xff] }
 0x25f   : >> { %v2209_v14 = vadd.f32 %v2193_v45, %v2173_v22  ;;  %v1227_v34 = vadd.f32 %v1211_v52, %v1191_v28  ;;  %v740_v37 = vadd.f32 %v724_v32, %v704_v11  ;;  %v796_v56 = vmul.f32 %v10043_v6, %v576_v35  ;;  %v10044_v20 = vld [vmem:[#allocation106_spill] sm:$0xff]  ;;  %v7635_v58 = vld [vmem:[%s5005_s17 + $0xe4] sm:$0xff] }
 0x260   : >> { %v2329_v41 = vmul.f32 %v10045_v49, %v10044_v20  ;;  %v1750_v47 = vadd.f32 %v1734_v19, %v1714_v36  ;;  %v10046_v42 = vld [vmem:[#allocation70_spill] sm:$0xff]  ;;  %v10047_v17 = vld [vmem:[#allocation119_spill] sm:$0xff]  ;;  %v1355_v6 = vmul.f32 %v9934_v60, %v1119_v39 }
 0x261   : >> { %v1806_v43 = vmul.f32 %v7635_v58, %v10046_v42  ;;  %v1319_v59 = vmul.f32 %v9992_v50, %v10047_v17  ;;  %v2273_v26 = vadd.f32 %v2257_v54, %v2209_v14  ;;  %v1263_v22 = vadd.f32 %v1247_v5, %v1227_v34  ;;  %v4557_v52 = vld [vmem:[%s5005_s17 + $0xb1] sm:$0xff]  ;;  %v7644_v32 = vld [vmem:[%s5005_s17 + $0xde] sm:$0xff]  ;;  %v7663_v39 = vld [vmem:[%s5005_s17 + $0x126] sm:$0xff] }
 0x262   : >> { %v776_v45 = vadd.f32 %v760_v0, %v740_v37  ;;  %v860_v35 = vmul.f32 %v4557_v52, %v9995_v15  ;;  %10048 = vst [vmem:[#allocation65_spill] sm:$0xff] %v7644_v32  ;;  %v2365_v19 = vmul.f32 %v7644_v32, %v9990_v24  ;;  %v1786_v28 = vadd.f32 %v1770_v10, %v1750_v47  ;;  %v10049_v11 = vld [vmem:[#allocation123_spill] sm:$0xff]  ;;  %v7652_v17 = vld [vmem:[%s5005_s17 + $0x12c] sm:$0xff]  ;;  %v10050_v0 = vld [vmem:[#allocation50_spill] sm:$0xff] }
 0x263   : >> { %v1842_v36 = vmul.f32 %v9994_v29, %v10049_v11  ;;  %v2309_v49 = vadd.f32 %v2293_v16, %v2273_v26  ;;  %v1299_v5 = vadd.f32 %v1283_v12, %v1263_v22  ;;  %v896_v14 = vmul.f32 %v10050_v0, %v9937_v33  ;;  %v10051_v15 = vld [vmem:[#allocation109_spill] sm:$0xff]  ;;  %v10052_v52 = vld [vmem:[#allocation94_spill] sm:$0xff]  ;;  %10054 = vst [vmem:[#allocation138_spill] sm:$0xff] %v7663_v39  ;;  %v10056_v22 = vld [vmem:[#allocation75_spill] sm:$0xff] }
 0x264   : >> { %v812_v54 = vadd.f32 %v796_v56, %v776_v45  ;;  %v2401_v34 = vmul.f32 %v9940_v44, %v10051_v15  ;;  %v1822_v37 = vadd.f32 %v1806_v43, %v1786_v28  ;;  %v1878_v47 = vmul.f32 %v9936_v7, %v10052_v52  ;;  %v10053_v10 = vld [vmem:[#allocation30_spill] sm:$0xff]  ;;  %v10055_v56 = vld [vmem:[#allocation16_spill] sm:$0xff] }
 0x265   : >> { %v1419_v11 = vmul.f32 %v10053_v10, %v9941_v63  ;;  %v2345_v16 = vadd.f32 %v2329_v41, %v2309_v49  ;;  %v1335_v26 = vadd.f32 %v1319_v59, %v1299_v5  ;;  %v932_v33 = vmul.f32 %v10055_v56, %v9508_v9  ;;  %v10057_v28 = vld [vmem:[#allocation124_spill] sm:$0xff]  ;;  %v4559_v41 = vld [vmem:[%s5005_s17 + $0xf9] sm:$0xff] }
 0x266   : >> { %v876_v12 = vadd.f32 %v860_v35, %v812_v54  ;;  %v2437_v45 = vmul.f32 %v9883_v62, %v10056_v22  ;;  %v1858_v0 = vadd.f32 %v1842_v36, %v1822_v37  ;;  %v1914_v43 = vmul.f32 %v9943_v18, %v7652_v17  ;;  %v4560_v35 = vld [vmem:[%s5005_s17 + $0x9d] sm:$0xff]  ;;  %v10058_v5 = vld [vmem:[#allocation88_spill] sm:$0xff] }
 0x267   : >> { %v1455_v15 = vmul.f32 %v10057_v28, %v9885_v13  ;;  %v2381_v10 = vadd.f32 %v2365_v19, %v2345_v16  ;;  %v1371_v52 = vadd.f32 %v1355_v6, %v1335_v26  ;;  %v968_v49 = vmul.f32 %v4559_v41, %v10006_v23  ;;  %v10059_v6 = vld [vmem:[#allocation120_spill] sm:$0xff]  ;;  %v10060_v26 = vld [vmem:[#allocation83_spill] sm:$0xff]  ;;  %v4561_v28 = vld [vmem:[%s5005_s17 + $0xf3] sm:$0xff] }
 0x268   : >> { %v912_v32 = vadd.f32 %v896_v14, %v876_v12  ;;  %v2473_v9 = vmul.f32 %v9888_v2, %v7663_v39  ;;  %v1894_v59 = vadd.f32 %v1878_v47, %v1858_v0  ;;  %v1978_v36 = vmul.f32 %v4560_v35, %v9884_v40  ;;  %v10061_v23 = vld [vmem:[#allocation56_spill] sm:$0xff] }
 0x269   : >> { %v1491_v54 = vmul.f32 %v10058_v5, %v9824_v55  ;;  %v2417_v37 = vadd.f32 %v2401_v34, %v2381_v10  ;;  %v1435_v56 = vadd.f32 %v1419_v11, %v1371_v52  ;;  %v1004_v14 = vmul.f32 %v10011_v8, %v10059_v6  ;;  %v840_v0 = vld [vmem:[%s5005_s17 + $0x141] sm:$0xff]  ;;  %v10062_v5 = vld [vmem:[#allocation13_spill] sm:$0xff] }
 0x26a   : >> { %v948_v19 = vadd.f32 %v932_v33, %v912_v32  ;;  %v1930_v16 = vadd.f32 %v1914_v43, %v1894_v59  ;;  %v2014_v12 = vmul.f32 %v10061_v23, %v10060_v26  ;;  %v1527_v47 = vmul.f32 %v4561_v28, %v10014_v31  ;;  %v10063_v52 = vld [vmem:[#allocation84_spill] sm:$0xff]  ;;  %v10065_v33 = vld [vmem:[#allocation55_spill] sm:$0xff]  ;;  %v4563_v28 = vld [vmem:[%s5005_s17 + $0xb2] sm:$0xff] }
 0x26b   : >> { %v2453_v41 = vadd.f32 %v2437_v45, %v2417_v37  ;;  %v1471_v35 = vadd.f32 %v1455_v15, %v1435_v56  ;;  %v1040_v34 = vmul.f32 %v9959_v48, %v10062_v5  ;;  %v10064_v11 = vld [vmem:[#allocation100_spill] sm:$0xff]  ;;  %v1563_v43 = vmul.f32 %v9774_v30, %v10065_v33  ;;  %v1399_v59 = vld [vmem:[%s5005_s17 + $0x13b] sm:$0xff]  ;;  %v10066_v37 = vld [vmem:[#allocation85_spill] sm:$0xff] }
 0x26c   : >> { %v984_v39 = vadd.f32 %v968_v49, %v948_v19  ;;  %v1994_v32 = vadd.f32 %v1978_v36, %v1930_v16  ;;  %v2050_v8 = vmul.f32 %v10064_v11, %v10063_v52  ;;  %v1076_v45 = vmul.f32 %v9709_v46, %v840_v0  ;;  %v7697_v49 = vld [vmem:[%s5005_s17 + $0xe5] sm:$0xff]  ;;  %v10067_v36 = vld [vmem:[#allocation66_spill] sm:$0xff] }
 0x26d   : >> { %v2489_v10 = vadd.f32 %v2473_v9, %v2453_v41  ;;  %v1507_v6 = vadd.f32 %v1491_v54, %v1471_v35  ;;  %v2086_v48 = vmul.f32 %v7697_v49, %v10066_v37  ;;  %v1599_v56 = vmul.f32 %v9777_v27, %v10067_v36  ;;  %v10069_v46 = vld [vmem:[#allocation92_spill] sm:$0xff] }
 0x26e   : >> { %v1020_v23 = vadd.f32 %v1004_v14, %v984_v39  ;;  %v2030_v15 = vadd.f32 %v2014_v12, %v1994_v32  ;;  %v1140_v54 = vmul.f32 %v4563_v28, %v9650_v51  ;;  %v10068_v14 = vld [vmem:[#allocation63_spill] sm:$0xff]  ;;  %v1635_v0 = vmul.f32 %v9655_v21, %v1399_v59  ;;  %v7714_v35 = vld [vmem:[%s5005_s17 + $0x12d] sm:$0xff] }
 0x26f   : >> { %v7704_v19 = vadd.f32 %v9715_v61, %v2489_v10  ;;  %v1543_v16 = vadd.f32 %v1527_v47, %v1507_v6  ;;  %v2122_v12 = vmul.f32 %v10069_v46, %v10068_v14  ;;  %v10070_v47 = vld [vmem:[#allocation60_spill] sm:$0xff]  ;;  %v10071_v51 = vld [vmem:[#allocation131_spill] sm:$0xff] }
 0x270   : >> { %v1056_v9 = vadd.f32 %v1040_v34, %v1020_v23  ;;  %v2066_v39 = vadd.f32 %v2050_v8, %v2030_v15  ;;  %v1176_v34 = vmul.f32 %v10070_v47, %v9717_v1  ;;  %v2158_v8 = vmul.f32 %v9842_v53, %v10071_v51  ;;  %v10072_v6 = vld [vmem:[#allocation116_spill] sm:$0xff]  ;;  %v10073_v15 = vld [vmem:[#allocation82_spill] sm:$0xff] }
 0x271   : >> { %v2549_v41 = vsel %vm432_vm0, %v7704_v19, 0.0  ;;  %v1579_v5 = vadd.f32 %v1563_v43, %v1543_v16  ;;  %v1699_v59 = vmul.f32 %v10072_v6, %v9597_v3  ;;  %v1212_v36 = vmul.f32 %v10073_v15, %v10027_v25  ;;  %v10074_v43 = vld [vmem:[#allocation95_spill] sm:$0xff]  ;;  %v10078_v25 = vld [vmem:[#allocation53_spill] sm:$0xff] }
 0x272   : >> { %v1092_v32 = vadd.f32 %v1076_v45, %v1056_v9  ;;  %2550 = vadd.xlane.f32.xlu0 %v2549_v41  ;;  %v2102_v33 = vadd.f32 %v2086_v48, %v2066_v39  ;;  %v2194_v45 = vmul.f32 %v10074_v43, %v7714_v35  ;;  %v10075_v48 = vld [vmem:[#allocation125_spill] sm:$0xff]  ;;  %v4564_v39 = vld [vmem:[%s5005_s17 + $0xfa] sm:$0xff] }
 0x273   : >> { %v1615_v10 = vadd.f32 %v1599_v56, %v1579_v5  ;;  %v1735_v16 = vmul.f32 %v10075_v48, %v10033_v4  ;;  %v1248_v56 = vmul.f32 %v4564_v39, %v10035_v38  ;;  %v10076_v41 = vld [vmem:[#allocation98_spill] sm:$0xff]  ;;  %v10080_v6 = vld [vmem:[#allocation43_spill] sm:$0xff]  ;;  %v10082_v48 = vld [vmem:[#allocation17_spill] sm:$0xff] }
 0x274   : >> { %v1156_v23 = vadd.f32 %v1140_v54, %v1092_v32  ;;  %v2138_v28 = vadd.f32 %v2122_v12, %v2102_v33  ;;  %v10077_v54 = vld [vmem:[#allocation81_spill] sm:$0xff]  ;;  %v1771_v12 = vmul.f32 %v10078_v25, %v10039_v57  ;;  %v10079_v33 = vld [vmem:[#allocation86_spill] sm:$0xff] }
 0x275   : >> { %v1651_v1 = vadd.f32 %v1635_v0, %v1615_v10  ;;  %v2258_v5 = vmul.f32 %v10077_v54, %v10076_v41  ;;  %v1284_v15 = vmul.f32 %v10080_v6, %v10079_v33  ;;  %v10081_v10 = vld [vmem:[#allocation99_spill] sm:$0xff] }
 0x276   : >> { %v1192_v9 = vadd.f32 %v1176_v34, %v1156_v23  ;;  %v2174_v14 = vadd.f32 %v2158_v8, %v2138_v28  ;;  %v2294_v34 = vmul.f32 %v10082_v48, %v10081_v10  ;;  %v1120_v23 = vld [vmem:[%s5005_s17 + $0x142] sm:$0xff]  ;;  %v4565_v8 = vld [vmem:[%s5005_s17 + $0xf4] sm:$0xff] }
 0x277   : >> { %v1715_v32 = vadd.f32 %v1699_v59, %v1651_v1  ;;  %v1807_v28 = vmul.f32 %v4565_v8, %v10046_v42  ;;  %v10083_v1 = vld [vmem:[#allocation44_spill] sm:$0xff]  ;;  %v4567_v8 = vld [vmem:[%s5005_s17 + $0xb3] sm:$0xff] }
 0x278   : >> { %v1228_v47 = vadd.f32 %v1212_v36, %v1192_v9  ;;  %v2210_v0 = vadd.f32 %v2194_v45, %v2174_v14  ;;  %v1320_v39 = vmul.f32 %v9992_v50, %v10083_v1  ;;  %v10084_v9 = vld [vmem:[#allocation117_spill] sm:$0xff]  ;;  %v7749_v6 = vld [vmem:[%s5005_s17 + $0xe6] sm:$0xff] }
 0x279   : >> { %v1751_v38 = vadd.f32 %v1735_v16, %v1715_v32  ;;  %v2330_v54 = vmul.f32 %v10084_v9, %v10044_v20  ;;  %v10085_v14 = vld [vmem:[#allocation37_spill] sm:$0xff]  ;;  %v1356_v16 = vmul.f32 %v9934_v60, %v1120_v23  ;;  %v10087_v1 = vld [vmem:[#allocation76_spill] sm:$0xff] }
 0x27a   : >> { %v1264_v59 = vadd.f32 %v1248_v56, %v1228_v47  ;;  %v2274_v36 = vadd.f32 %v2258_v5, %v2210_v0  ;;  %v1843_v25 = vmul.f32 %v9994_v29, %v10085_v14  ;;  %v2366_v56 = vmul.f32 %v7749_v6, %v9990_v24  ;;  %v1679_v47 = vld [vmem:[%s5005_s17 + $0x13c] sm:$0xff]  ;;  %v7761_v60 = vld [vmem:[%s5005_s17 + $0x12e] sm:$0xff] }
 0x27b   : >> { %v1787_v45 = vadd.f32 %v1771_v12, %v1751_v38  ;;  %v10086_v5 = vld [vmem:[#allocation135_spill] sm:$0xff]  ;;  %v1420_v12 = vmul.f32 %v4567_v8, %v9941_v63  ;;  %v1915_v23 = vmul.f32 %v9943_v18, %v1679_v47  ;;  %v10089_v14 = vld [vmem:[#allocation134_spill] sm:$0xff] }
 0x27c   : >> { %v1300_v33 = vadd.f32 %v1284_v15, %v1264_v59  ;;  %v2310_v32 = vadd.f32 %v2294_v34, %v2274_v36  ;;  %v1879_v0 = vmul.f32 %v9936_v7, %v10086_v5  ;;  %v2402_v15 = vmul.f32 %v9940_v44, %v10087_v1  ;;  %v10090_v63 = vld [vmem:[#allocation122_spill] sm:$0xff]  ;;  %v10091_v5 = vld [vmem:[#allocation32_spill] sm:$0xff] }
 0x27d   : >> { %v1823_v50 = vadd.f32 %v1807_v28, %v1787_v45  ;;  %v10088_v28 = vld [vmem:[#allocation118_spill] sm:$0xff]  ;;  %v1492_v8 = vmul.f32 %v10091_v5, %v9824_v55 }
 0x27e   : >> { %v1336_v48 = vadd.f32 %v1320_v39, %v1300_v33  ;;  %v2346_v38 = vadd.f32 %v2330_v54, %v2310_v32  ;;  %v1456_v36 = vmul.f32 %v10088_v28, %v9885_v13  ;;  %v2438_v39 = vmul.f32 %v9883_v62, %v10089_v14  ;;  %v10092_v13 = vld [vmem:[#allocation110_spill] sm:$0xff] }
 0x27f   : >> { %v1859_v34 = vadd.f32 %v1843_v25, %v1823_v50  ;;  %v1979_v54 = vmul.f32 %v10090_v63, %v9884_v40  ;;  %v10096_v5 = vld [vmem:[#allocation114_spill] sm:$0xff] }
 0x280   : >> { %v1372_v59 = vadd.f32 %v1356_v16, %v1336_v48  ;;  %v2382_v45 = vadd.f32 %v2366_v56, %v2346_v38  ;;  %v2474_v16 = vmul.f32 %v9888_v2, %v7761_v60  ;;  %v2015_v56 = vmul.f32 %v10092_v13, %v10060_v26  ;;  %v4568_v48 = vld [vmem:[%s5005_s17 + $0xfb] sm:$0xff] }
 0x281   : >> { %v1895_v33 = vadd.f32 %v1879_v0, %v1859_v34  ;;  %v1528_v0 = vmul.f32 %v4568_v48, %v10014_v31  ;;  %v4570_v48 = vld [vmem:[%s5005_s17 + $0xb4] sm:$0xff] }
 0x282   : >> { %v1436_v32 = vadd.f32 %v1420_v12, %v1372_v59  ;;  %v2418_v25 = vadd.f32 %v2402_v15, %v2382_v45  ;;  %v10093_v12 = vld [vmem:[#allocation77_spill] sm:$0xff]  ;;  %v1400_v45 = vld [vmem:[%s5005_s17 + $0x143] sm:$0xff] }
 0x283   : >> { %v1931_v47 = vadd.f32 %v1915_v23, %v1895_v33  ;;  %v2051_v34 = vmul.f32 %v10093_v12, %v10063_v52  ;;  %v10094_v59 = vld [vmem:[#allocation129_spill] sm:$0xff] }
 0x284   : >> { %v1472_v50 = vadd.f32 %v1456_v36, %v1436_v32  ;;  %v2454_v38 = vadd.f32 %v2438_v39, %v2418_v25  ;;  %v1564_v15 = vmul.f32 %v9774_v30, %v10094_v59  ;;  %v4569_v33 = vld [vmem:[%s5005_s17 + $0xf5] sm:$0xff]  ;;  %v1636_v30 = vmul.f32 %v9655_v21, %v1400_v45 }
 0x285   : >> { %v1995_v1 = vadd.f32 %v1979_v54, %v1931_v47  ;;  %v2087_v36 = vmul.f32 %v4569_v33, %v10066_v37  ;;  %v10095_v32 = vld [vmem:[#allocation93_spill] sm:$0xff]  ;;  %v1959_v47 = vld [vmem:[%s5005_s17 + $0x13d] sm:$0xff] }
 0x286   : >> { %v1508_v55 = vadd.f32 %v1492_v8, %v1472_v50  ;;  %v2490_v28 = vadd.f32 %v2474_v16, %v2454_v38  ;;  %v1600_v31 = vmul.f32 %v9777_v27, %v10095_v32  ;;  %v2123_v8 = vmul.f32 %v10069_v46, %v10096_v5  ;;  %v10098_v21 = vld [vmem:[#allocation126_spill] sm:$0xff] }
 0x287   : >> { %v2031_v23 = vadd.f32 %v2015_v56, %v1995_v1  ;;  %v10097_v56 = vld [vmem:[#allocation127_spill] sm:$0xff]  ;;  %v2195_v1 = vmul.f32 %v10074_v43, %v1959_v47  ;;  %v4572_v47 = vld [vmem:[%s5005_s17 + $0xf6] sm:$0xff] }
 0x288   : >> { %v1544_v63 = vadd.f32 %v1528_v0, %v1508_v55  ;;  %v7788_v39 = vadd.f32 %v9715_v61, %v2490_v28  ;;  %v2159_v50 = vmul.f32 %v9842_v53, %v10097_v56  ;;  %v1700_v0 = vmul.f32 %v4570_v48, %v9597_v3  ;;  %v2515_v55 = vpop.xlane.xlu0 %2514  ;;  %v10100_v3 = vld [vmem:[#allocation121_spill] sm:$0xff]  ;;  %v4571_v32 = vld [vmem:[%s5005_s17 + $0xfc] sm:$0xff] }
 0x289   : >> { %v2067_v54 = vadd.f32 %v2051_v34, %v2031_v23  ;;  %v1736_v34 = vmul.f32 %v10098_v21, %v10033_v4  ;;  %v1772_v23 = vmul.f32 %v7635_v58, %v10039_v57 }
 0x28a   : >> { %v1580_v25 = vadd.f32 %v1564_v15, %v1544_v63  ;;  %v2552_v16 = vsel %vm432_vm0, %v7788_v39, 0.0  ;;  %v10099_v15 = vld [vmem:[#allocation137_spill] sm:$0xff] }
 0x28b   : >> { %2553 = vadd.xlane.f32.xlu1 %v2552_v16  ;;  %v2103_v13 = vadd.f32 %v2087_v36, %v2067_v54  ;;  %v2259_v28 = vmul.f32 %v10099_v15, %v10076_v41  ;;  %v2295_v36 = vmul.f32 %v10100_v3, %v10081_v10  ;;  %v10101_v54 = vld [vmem:[#allocation65_spill] sm:$0xff]  ;;  %v1680_v16 = vld [vmem:[%s5005_s17 + $0x144] sm:$0xff]  ;;  %v2562_v15 = vmul.f32 0.03125, %v2515_v55 }
 0x28c   : >> { %v1616_v27 = vadd.f32 %v1600_v31, %v1580_v25  ;;  %v1808_v31 = vmul.f32 %v4571_v32, %v10046_v42  ;;  %v2331_v5 = vmul.f32 %v10101_v54, %v10044_v20  ;;  %v10102_v25 = vld [vmem:[#allocation94_spill] sm:$0xff]  ;;  %v7816_v57 = vpop.xlane.xlu0 %2517  ;;  %v1880_v42 = vmul.f32 %v9936_v7, %v7652_v17 }
 0x28d   : >> { %v2139_v38 = vadd.f32 %v2123_v8, %v2103_v13  ;;  %v2367_v13 = vmul.f32 %v4572_v47, %v9990_v24  ;;  %v2124_v54 = vmul.f32 %v10069_v46, %v10071_v51  ;;  %v2160_v46 = vmul.f32 %v9842_v53, %v7714_v35 }
 0x28e   : >> { %v1652_v12 = vadd.f32 %v1636_v30, %v1616_v27  ;;  %v1844_v30 = vmul.f32 %v9994_v29, %v10102_v25  ;;  %v2403_v27 = vmul.f32 %v9940_v44, %v10056_v22  ;;  %v2239_v29 = vld [vmem:[%s5005_s17 + $0x13e] sm:$0xff]  ;;  %v2296_v53 = vmul.f32 %v10084_v9, %v10081_v10 }
 0x28f   : >> { %v2175_v59 = vadd.f32 %v2159_v50, %v2139_v38  ;;  %v10103_v38 = vld [vmem:[#allocation138_spill] sm:$0xff]  ;;  %v1960_v25 = vld [vmem:[%s5005_s17 + $0x145] sm:$0xff] }
 0x290   : >> { %v1716_v45 = vadd.f32 %v1700_v0, %v1652_v12  ;;  %v1916_v0 = vmul.f32 %v9943_v18, %v1680_v16  ;;  %v2527_v7 = vpop.xlane.xlu0 %2526  ;;  %v2016_v18 = vmul.f32 %v10064_v11, %v10060_v26  ;;  %v2196_v51 = vmul.f32 %v10074_v43, %v1960_v25 }
 0x291   : >> { %v2211_v33 = vadd.f32 %v2195_v1, %v2175_v59  ;;  %v2439_v1 = vmul.f32 %v9883_v62, %v10103_v38  ;;  %v10107_v38 = vld [vmem:[#allocation103_spill] sm:$0xff] }
 0x292   : >> { %v1752_v63 = vadd.f32 %v1736_v34, %v1716_v45  ;;  %v4573_v34 = vld [vmem:[%s5005_s17 + $0xb5] sm:$0xff]  ;;  %v2475_v45 = vmul.f32 %v9888_v2, %v2239_v29 }
 0x293   : >> { %v2275_v4 = vadd.f32 %v2259_v28, %v2211_v33  ;;  %v1980_v59 = vmul.f32 %v4573_v34, %v9884_v40  ;;  %v2521_v28 = vpop.xlane.xlu1 %2520 }
 0x294   : >> { %v1788_v8 = vadd.f32 %v1772_v23, %v1752_v63  ;;  %v2564_v23 = vmul.f32 0.03125, %v2521_v28  ;;  %v10104_v63 = vld [vmem:[#allocation23_spill] sm:$0xff]  ;;  %v2533_v26 = vpop.xlane.xlu0 %2532 }
 0x295   : >> { %v2311_v58 = vadd.f32 %v2295_v36, %v2275_v4  ;;  %v2052_v36 = vmul.f32 %v7697_v49, %v10063_v52  ;;  %v7836_v32 = vsub.f32 %v10104_v63, %v2562_v15 }
 0x296   : >> { %v1824_v56 = vadd.f32 %v1808_v31, %v1788_v8  ;;  %v4574_v31 = vld [vmem:[%s5005_s17 + $0xfd] sm:$0xff] }
 0x297   : >> { %v2347_v50 = vadd.f32 %v2331_v5, %v2311_v58  ;;  %v2088_v4 = vmul.f32 %v4574_v31, %v10066_v37  ;;  %v10105_v5 = vld [vmem:[#allocation97_spill] sm:$0xff]  ;;  %v2594_v49 = vmul.f32 %v7836_v32, %v7836_v32  ;;  %v2524_v10 = vpop.xlane.xlu1 %2523 }
 0x298   : >> { %v1860_v48 = vadd.f32 %v1844_v30, %v1824_v56  ;;  %v7843_v8 = vsub.f32 %v10105_v5, %v2564_v23  ;;  %v2566_v30 = vmul.f32 0.03125, %v2527_v7  ;;  %v10106_v56 = vld [vmem:[#allocation72_spill] sm:$0xff]  ;;  %v10108_v7 = vld [vmem:[#allocation25_spill] sm:$0xff]  ;;  %v2565_v31 = vmul.f32 0.03125, %v2524_v10 }
 0x299   : >> { %v2383_v12 = vadd.f32 %v2367_v13, %v2347_v50  ;;  %v2610_v13 = vsel %vm432_vm0, %v2594_v49, 0.0  ;;  %v2568_v50 = vmul.f32 0.03125, %v2533_v26  ;;  %v2240_v23 = vld [vmem:[%s5005_s17 + $0x146] sm:$0xff] }
 0x29a   : >> { %v1896_v21 = vadd.f32 %v1880_v42, %v1860_v48  ;;  %v2596_v58 = vmul.f32 %v7843_v8, %v7843_v8  ;;  %v7860_v42 = vsub.f32 %v10106_v56, %v2566_v30  ;;  %v10113_v56 = vld [vmem:[#allocation28_spill] sm:$0xff] }
 0x29b   : >> { %v2419_v17 = vadd.f32 %v2403_v27, %v2383_v12  ;;  %v2539_v27 = vpop.xlane.xlu0 %2538 }
 0x29c   : >> { %v1932_v22 = vadd.f32 %v1916_v0, %v1896_v21  ;;  %v4575_v0 = vld [vmem:[%s5005_s17 + $0xb6] sm:$0xff]  ;;  %v2616_v35 = vsel %vm432_vm0, %v2596_v58, 0.0  ;;  %v2598_v12 = vmul.f32 %v7860_v42, %v7860_v42  ;;  %v2570_v21 = vmul.f32 0.03125, %v2539_v27 }
 0x29d   : >> { %v2455_v33 = vadd.f32 %v2439_v1, %v2419_v17  ;;  %v2260_v29 = vmul.f32 %v4575_v0, %v10076_v41  ;;  %v7868_v1 = vsub.f32 %v10107_v38, %v2568_v50  ;;  %v4576_v41 = vld [vmem:[%s5005_s17 + $0xfe] sm:$0xff] }
 0x29e   : >> { %v1996_v3 = vadd.f32 %v1980_v59, %v1932_v22  ;;  %v2332_v59 = vmul.f32 %v7749_v6, %v10044_v20  ;;  %v2368_v15 = vmul.f32 %v4576_v41, %v9990_v24  ;;  %v2622_v28 = vsel %vm432_vm0, %v2598_v12, 0.0 }
 0x29f   : >> { %v2491_v40 = vadd.f32 %v2475_v45, %v2455_v33  ;;  %v7878_v17 = vsub.f32 %v10108_v7, %v2570_v21  ;;  %v2600_v45 = vmul.f32 %v7868_v1, %v7868_v1  ;;  %v2440_v20 = vmul.f32 %v9883_v62, %v7761_v60 }
 0x2a0   : >> { %v2032_v55 = vadd.f32 %v2016_v18, %v1996_v3  ;;  %v2404_v18 = vmul.f32 %v9940_v44, %v10089_v14  ;;  %v2563_v6 = vmul.f32 0.03125, %v7816_v57  ;;  %v10109_v44 = vld [vmem:[#allocation112_spill] sm:$0xff] }
 0x2a1   : >> { %v7846_v11 = vadd.f32 %v9715_v61, %v2491_v40  ;;  %v2628_v33 = vsel %vm432_vm0, %v2600_v45, 0.0  ;;  %v2602_v3 = vmul.f32 %v7878_v17, %v7878_v17  ;;  %v2476_v40 = vmul.f32 %v9888_v2, %v2240_v23 }
 0x2a2   : >> { %v2068_v52 = vadd.f32 %v2052_v36, %v2032_v55  ;;  %v2530_v36 = vpop.xlane.xlu1 %2529  ;;  %v7893_v14 = vsub.f32 %v10109_v44, %v2563_v6 }
 0x2a3   : >> { %v2555_v37 = vsel %vm432_vm0, %v7846_v11, 0.0  ;;  %v2634_v62 = vsel %vm432_vm0, %v2602_v3, 0.0  ;;  %v2567_v26 = vmul.f32 0.03125, %v2530_v36 }
 0x2a4   : >> { %v2104_v16 = vadd.f32 %v2088_v4, %v2068_v52  ;;  %2556 = vadd.xlane.f32.xlu0 %v2555_v37  ;;  %v2595_v2 = vmul.f32 %v7893_v14, %v7893_v14  ;;  %v10111_v52 = vld [vmem:[#allocation136_spill] sm:$0xff] }
 0x2a5   : >> { %v7907_v49 = vsub.f32 %v10111_v52, %v2567_v26 }
 0x2a6   : >> { %v2140_v47 = vadd.f32 %v2124_v54, %v2104_v16  ;;  %v2536_v4 = vpop.xlane.xlu1 %2535  ;;  %v10110_v54 = vld [vmem:[#allocation59_spill] sm:$0xff]  ;;  %v2613_v30 = vsel %vm432_vm0, %v2595_v2, 0.0 }
 0x2a7   : >> { %v7900_v5 = vsub.f32 %v10110_v54, %v2565_v31  ;;  %v2569_v37 = vmul.f32 0.03125, %v2536_v4 }
 0x2a8   : >> { %v2176_v48 = vadd.f32 %v2160_v46, %v2140_v47  ;;  %2611 = vadd.xlane.f32.xlu0 %v2610_v13  ;;  %v10112_v46 = vld [vmem:[#allocation91_spill] sm:$0xff]  ;;  %v2599_v13 = vmul.f32 %v7907_v49, %v7907_v49 }
 0x2aa   : >> { %v2212_v43 = vadd.f32 %v2196_v51, %v2176_v48  ;;  %v7913_v51 = vsub.f32 %v10112_v46, %v2569_v37  ;;  %v2625_v27 = vsel %vm432_vm0, %v2599_v13, 0.0  ;;  %v10116_v37 = vld [vmem:[#allocation19_spill] sm:$0xff] }
 0x2ac   : >> { %v2276_v34 = vadd.f32 %v2260_v29, %v2212_v43  ;;  %2617 = vadd.xlane.f32.xlu0 %v2616_v35  ;;  %v2601_v48 = vmul.f32 %v7913_v51, %v7913_v51  ;;  %v10114_v43 = vld [vmem:[#allocation90_spill] sm:$0xff] }
 0x2ae   : >> { %v2312_v9 = vadd.f32 %v2296_v53, %v2276_v34  ;;  %v2631_v29 = vsel %vm432_vm0, %v2601_v48, 0.0 }
 0x2af   : >> { %v2542_v16 = vpop.xlane.xlu1 %2541 }
 0x2b0   : >> { %v2348_v22 = vadd.f32 %v2332_v59, %v2312_v9  ;;  %2623 = vadd.xlane.f32.xlu0 %v2622_v28  ;;  %v2571_v47 = vmul.f32 0.03125, %v2542_v16 }
 0x2b2   : >> { %v2384_v24 = vadd.f32 %v2368_v15, %v2348_v22  ;;  %v7919_v50 = vsub.f32 %v10113_v56, %v2571_v47  ;;  %v10115_v15 = vld [vmem:[#allocation34_spill] sm:$0xff] }
 0x2b3   : >> { %v10118_v47 = vld [vmem:[#allocation14_spill] sm:$0xff] }
 0x2b4   : >> { %v2420_v63 = vadd.f32 %v2404_v18, %v2384_v24  ;;  %2629 = vadd.xlane.f32.xlu0 %v2628_v33  ;;  %v2603_v53 = vmul.f32 %v7919_v50, %v7919_v50 }
 0x2b6   : >> { %v2456_v55 = vadd.f32 %v2440_v20, %v2420_v63  ;;  %v2637_v12 = vsel %vm432_vm0, %v2603_v53, 0.0 }
 0x2b8   : >> { %v2492_v60 = vadd.f32 %v2476_v40, %v2456_v55  ;;  %2635 = vadd.xlane.f32.xlu0 %v2634_v62 }
 0x2ba   : >> { %v7897_v57 = vadd.f32 %v9715_v61, %v2492_v60  ;;  %v2597_v61 = vmul.f32 %v7900_v5, %v7900_v5 }
 0x2bc   : >> { %v2558_v25 = vsel %vm432_vm0, %v7897_v57, 0.0  ;;  %v2619_v58 = vsel %vm432_vm0, %v2597_v61, 0.0  ;;  %v10117_v61 = vld [vmem:[#allocation11_spill] sm:$0xff] }
 0x2bd   : >> { %2559 = vadd.xlane.f32.xlu1 %v2558_v25  ;;  %v7961_v16 = vrot.slane %v10117_v61, %v10116_v37  ;;  %v7965_v13 = vrot.slane %v10117_v61, %v10118_v47 }
 0x2c1   : >> { %2614 = vadd.xlane.f32.xlu1 %v2613_v30 }
 0x2c5   : >> { %2620 = vadd.xlane.f32.xlu1 %v2619_v58 }
 0x2c8   : >> { %v2545_v0 = vpop.xlane.xlu0 %2544 }
 0x2c9   : >> { %2626 = vadd.xlane.f32.xlu1 %v2625_v27  ;;  %v2572_v35 = vmul.f32 0.03125, %v2545_v0 }
 0x2cb   : >> { %v7928_v38 = vsub.f32 %v10114_v43, %v2572_v35 }
 0x2cd   : >> { %2632 = vadd.xlane.f32.xlu1 %v2631_v29  ;;  %v2604_v21 = vmul.f32 %v7928_v38, %v7928_v38 }
 0x2cf   : >> { %v2640_v34 = vsel %vm432_vm0, %v2604_v21, 0.0 }
 0x2d0   : >> { %2641 = vadd.xlane.f32.xlu0 %v2640_v34 }
 0x2d1   : >> { %2638 = vadd.xlane.f32.xlu1 %v2637_v12 }
 0x2e2   : >> { %v2548_v59 = vpop.xlane.xlu1 %2547 }
 0x2e3   : >> { %v2573_v41 = vmul.f32 0.03125, %v2548_v59 }
 0x2e5   : >> { %v7935_v10 = vsub.f32 %v10115_v15, %v2573_v41 }
 0x2e7   : >> { %v2605_v9 = vmul.f32 %v7935_v10, %v7935_v10 }
 0x2e9   : >> { %v2643_v28 = vsel %vm432_vm0, %v2605_v9, 0.0 }
 0x2ea   : >> { %2644 = vadd.xlane.f32.xlu1 %v2643_v28 }
 0x2fb   : >> { %v2551_v7 = vpop.xlane.xlu0 %2550 }
 0x2fc   : >> { %v2574_v45 = vmul.f32 0.03125, %v2551_v7 }
 0x2fe   : >> { %v7941_v22 = vsub.f32 %v7704_v19, %v2574_v45 }
 0x300   : >> { %v2606_v18 = vmul.f32 %v7941_v22, %v7941_v22 }
 0x302   : >> { %v2646_v23 = vsel %vm432_vm0, %v2606_v18, 0.0 }
 0x303   : >> { %2647 = vadd.xlane.f32.xlu0 %v2646_v23 }
 0x314   : >> { %v2554_v20 = vpop.xlane.xlu1 %2553 }
 0x315   : >> { %v2575_v24 = vmul.f32 0.03125, %v2554_v20 }
 0x317   : >> { %v7947_v6 = vsub.f32 %v7788_v39, %v2575_v24 }
 0x319   : >> { %v2607_v33 = vmul.f32 %v7947_v6, %v7947_v6 }
 0x31b   : >> { %v2649_v3 = vsel %vm432_vm0, %v2607_v33, 0.0 }
 0x31c   : >> { %2650 = vadd.xlane.f32.xlu1 %v2649_v3 }
 0x32d   : >> { %v2557_v36 = vpop.xlane.xlu0 %2556 }
 0x32e   : >> { %v2576_v19 = vmul.f32 0.03125, %v2557_v36 }
 0x330   : >> { %v7953_v63 = vsub.f32 %v7846_v11, %v2576_v19 }
 0x331   : >> { %v2612_v40 = vpop.xlane.xlu0 %2611 }
 0x332   : >> { %v2608_v55 = vmul.f32 %v7953_v63, %v7953_v63  ;;  %v2658_v44 = vmul.f32 0.03125, %v2612_v40 }
 0x334   : >> { %v2652_v39 = vsel %vm432_vm0, %v2608_v55, 0.0  ;;  %v2674_v31 = vadd.f32 1e-06, %v2658_v44 }
 0x335   : >> { %2653 = vadd.xlane.f32.xlu0 %v2652_v39  ;;  %v2618_v62 = vpop.xlane.xlu0 %2617 }
 0x336   : >> { %4402 = vrsqrt.f32 %v2674_v31  ;;  %v2660_v60 = vmul.f32 0.03125, %v2618_v62 }
 0x338   : >> { %v2676_v4 = vadd.f32 1e-06, %v2660_v60 }
 0x339   : >> { %v2624_v54 = vpop.xlane.xlu0 %2623 }
 0x33a   : >> { %4404 = vrsqrt.f32 %v2676_v4  ;;  %v2662_v26 = vmul.f32 0.03125, %v2624_v54 }
 0x33c   : >> { %v2678_v2 = vadd.f32 1e-06, %v2662_v26 }
 0x33d   : >> { %v2630_v11 = vpop.xlane.xlu0 %2629 }
 0x33e   : >> { %4406 = vrsqrt.f32 %v2678_v2  ;;  %v2664_v25 = vmul.f32 0.03125, %v2630_v11 }
 0x340   : >> { %v2680_v52 = vadd.f32 1e-06, %v2664_v25 }
 0x341   : >> { %v2636_v30 = vpop.xlane.xlu0 %2635 }
 0x342   : >> { %4408 = vrsqrt.f32 %v2680_v52  ;;  %v2666_v46 = vmul.f32 0.03125, %v2636_v30 }
 0x343   : >> { %v4403_v58 = vpop.eup %4402 }
 0x344   : >> { %v2706_v56 = vmul.f32 %v4403_v58, %v7836_v32  ;;  %v2682_v27 = vadd.f32 1e-06, %v2666_v46 }
 0x346   : >> { %v2560_v48 = vpop.xlane.xlu1 %2559  ;;  %v2726_v29 = vmul.f32 %v7961_v16, %v2706_v56  ;;  %4410 = vrsqrt.f32 %v2682_v27 }
 0x347   : >> { %v2577_v0 = vmul.f32 0.03125, %v2560_v48  ;;  %v4405_v53 = vpop.eup %4404 }
 0x348   : >> { %v2746_v43 = vadd.f32 %v7965_v13, %v2726_v29  ;;  %v2708_v12 = vmul.f32 %v4405_v53, %v7843_v8 }
 0x349   : >> { %v7970_v35 = vsub.f32 %v7897_v57, %v2577_v0 }
 0x34a   : >> { %v2615_v21 = vpop.xlane.xlu1 %2614  ;;  %v4236_v32 = vpack.c.bf16 %v2746_v43, %v2746_v43  ;;  %v2728_v41 = vmul.f32 %v7961_v16, %v2708_v12 }
 0x34b   : >> { %v2609_v34 = vmul.f32 %v7970_v35, %v7970_v35  ;;  %v2659_v59 = vmul.f32 0.03125, %v2615_v21  ;;  %v4407_v15 = vpop.eup %4406 }
 0x34c   : >> { %2831 = vst.msk [vmem:[%s7978_s21] sm:$0xf] %vm399_vm2, %v4236_v32  ;;  %v2748_v8 = vadd.f32 %v7965_v13, %v2728_v41  ;;  %v2710_v28 = vmul.f32 %v4407_v15, %v7860_v42 }
 0x34d   : >> { %v2655_v9 = vsel %vm432_vm0, %v2609_v34, 0.0  ;;  %v2675_v57 = vadd.f32 1e-06, %v2659_v59 }
 0x34e   : >> { %2656 = vadd.xlane.f32.xlu1 %v2655_v9  ;;  %v2621_v7 = vpop.xlane.xlu1 %2620  ;;  %v4238_v45 = vpack.c.bf16 %v2748_v8, %v2748_v8  ;;  %v2730_v23 = vmul.f32 %v7961_v16, %v2710_v28 }
 0x34f   : >> { %4412 = vrsqrt.f32 %v2675_v57  ;;  %v2661_v18 = vmul.f32 0.03125, %v2621_v7  ;;  %v4409_v20 = vpop.eup %4408 }
 0x350   : >> { %2833 = vst.msk [vmem:[%s7978_s21 + $0x8] sm:$0xf] %vm399_vm2, %v4238_v45  ;;  %v2750_v33 = vadd.f32 %v7965_v13, %v2730_v23  ;;  %v2712_v3 = vmul.f32 %v4409_v20, %v7868_v1 }
 0x351   : >> { %v2677_v24 = vadd.f32 1e-06, %v2661_v18 }
 0x352   : >> { %v2627_v36 = vpop.xlane.xlu1 %2626  ;;  %v4240_v42 = vpack.c.bf16 %v2750_v33, %v2750_v33  ;;  %v2732_v40 = vmul.f32 %v7961_v16, %v2712_v3 }
 0x353   : >> { %4414 = vrsqrt.f32 %v2677_v24  ;;  %v2663_v19 = vmul.f32 0.03125, %v2627_v36  ;;  %v4411_v55 = vpop.eup %4410 }
 0x354   : >> { %2835 = vst.msk [vmem:[%s7978_s21 + $0x10] sm:$0xf] %vm399_vm2, %v4240_v42  ;;  %v2752_v39 = vadd.f32 %v7965_v13, %v2732_v40  ;;  %v2714_v31 = vmul.f32 %v4411_v55, %v7878_v17 }
 0x355   : >> { %v2679_v44 = vadd.f32 1e-06, %v2663_v19 }
 0x356   : >> { %v2633_v62 = vpop.xlane.xlu1 %2632  ;;  %v4242_v60 = vpack.c.bf16 %v2752_v39, %v2752_v39  ;;  %v2734_v4 = vmul.f32 %v7961_v16, %v2714_v31 }
 0x357   : >> { %4416 = vrsqrt.f32 %v2679_v44  ;;  %v2665_v1 = vmul.f32 0.03125, %v2633_v62 }
 0x358   : >> { %2837 = vst.msk [vmem:[%s7978_s21 + $0x18] sm:$0xf] %vm399_vm2, %v4242_v60  ;;  %v2754_v26 = vadd.f32 %v7965_v13, %v2734_v4 }
 0x359   : >> { %v2681_v54 = vadd.f32 1e-06, %v2665_v1  ;;  %v2642_v52 = vpop.xlane.xlu0 %2641 }
 0x35a   : >> { %v2639_v2 = vpop.xlane.xlu1 %2638  ;;  %v4244_v11 = vpack.c.bf16 %v2754_v26, %v2754_v26  ;;  %v2668_v17 = vmul.f32 0.03125, %v2642_v52 }
 0x35b   : >> { %4418 = vrsqrt.f32 %v2681_v54  ;;  %v2667_v25 = vmul.f32 0.03125, %v2639_v2 }
 0x35c   : >> { %v4413_v30 = vpop.eup %4412  ;;  %2839 = vst.msk [vmem:[%s7978_s21 + $0x20] sm:$0xf] %vm399_vm2, %v4244_v11  ;;  %v2684_v58 = vadd.f32 1e-06, %v2668_v17 }
 0x35d   : >> { %v2707_v37 = vmul.f32 %v4413_v30, %v7893_v14  ;;  %v2683_v46 = vadd.f32 1e-06, %v2667_v25 }
 0x35f   : >> { %v2727_v47 = vmul.f32 %v7961_v16, %v2707_v37  ;;  %4420 = vrsqrt.f32 %v2683_v46 }
 0x360   : >> { %v4415_v56 = vpop.eup %4414  ;;  %4422 = vrsqrt.f32 %v2684_v58 }
 0x361   : >> { %v2747_v27 = vadd.f32 %v7965_v13, %v2727_v47  ;;  %v2709_v48 = vmul.f32 %v4415_v56, %v7900_v5 }
 0x363   : >> { %v4237_v0 = vpack.c.bf16 %v2747_v27, %v2747_v27  ;;  %v2729_v29 = vmul.f32 %v7961_v16, %v2709_v48 }
 0x364   : >> { %v4417_v53 = vpop.eup %4416 }
 0x365   : >> { %2832 = vst.msk [vmem:[%s7978_s21 + $0x4] sm:$0xf] %vm399_vm2, %v4237_v0  ;;  %v2749_v14 = vadd.f32 %v7965_v13, %v2729_v29  ;;  %v2711_v43 = vmul.f32 %v4417_v53, %v7907_v49 }
 0x367   : >> { %v4239_v12 = vpack.c.bf16 %v2749_v14, %v2749_v14  ;;  %v2731_v21 = vmul.f32 %v7961_v16, %v2711_v43 }
 0x368   : >> { %v4419_v34 = vpop.eup %4418 }
 0x369   : >> { %2834 = vst.msk [vmem:[%s7978_s21 + $0xc] sm:$0xf] %vm399_vm2, %v4239_v12  ;;  %v2751_v5 = vadd.f32 %v7965_v13, %v2731_v21  ;;  %v2713_v32 = vmul.f32 %v4419_v34, %v7913_v51  ;;  %v4595_v34 = vld [vmem:[#allocation4 + $0x10] sm:$0xff] (%p542_p4)  }
 0x36a   : > { %3610 = vrot.lane.b32.xlu0 (%p542_p4), %v4595_v34, %s4698_s27 }
 0x36b   : >> { %v4241_v59 = vpack.c.bf16 %v2751_v5, %v2751_v5  ;;  %v2733_v41 = vmul.f32 %v7961_v16, %v2713_v32  ;;  %v4596_v5 = vld [vmem:[#allocation4 + $0x18] sm:$0xff] (%p542_p4)  }
 0x36c   : >> { %v4421_v15 = vpop.eup %4420 }
 0x36d   : >> { %v4423_v9 = vpop.eup %4422  ;;  %2836 = vst.msk [vmem:[%s7978_s21 + $0x14] sm:$0xf] %vm399_vm2, %v4241_v59  ;;  %v2753_v49 = vadd.f32 %v7965_v13, %v2733_v41  ;;  %v2715_v57 = vmul.f32 %v4421_v15, %v7919_v50  ;;  %v4600_v41 = vld [vmem:[#allocation4 + $0x20] sm:$0xff] (%p542_p4)   ;;  %v4597_v15 = vld [vmem:[#allocation4 + $0x30] sm:$0xff] (%p542_p4)  }
 0x36e   : >> { %v2716_v8 = vmul.f32 %v4423_v9, %v7928_v38  ;;  %3612 = vrot.lane.b32.xlu0 (%p542_p4), %v4596_v5, %s4698_s27  ;;  %3614 = vrot.lane.b32.xlu1 (%p542_p4), %v4600_v41, %s4698_s27  ;;  %v4601_v9 = vld [vmem:[#allocation4 + $0x28] sm:$0xff] (%p542_p4)  }
 0x36f   : >> { %v4243_v28 = vpack.c.bf16 %v2753_v49, %v2753_v49  ;;  %v2735_v7 = vmul.f32 %v7961_v16, %v2715_v57  ;;  %v4598_v49 = vld [vmem:[#allocation4] sm:$0xff] (%p542_p4)   ;;  %v4602_v57 = vld [vmem:[#allocation4 + $0x38] sm:$0xff] (%p542_p4)  }
 0x370   : >> { %v2736_v51 = vmul.f32 %v7961_v16, %v2716_v8 }
 0x371   : >> { %2838 = vst.msk [vmem:[%s7978_s21 + $0x1c] sm:$0xf] %vm399_vm2, %v4243_v28  ;;  %v2755_v45 = vadd.f32 %v7965_v13, %v2735_v7  ;;  %v4599_v7 = vld [vmem:[#allocation4 + $0x8] sm:$0xff] (%p542_p4)  }
 0x372   : >> { %v2756_v18 = vadd.f32 %v7965_v13, %v2736_v51  ;;  %3618 = vrot.lane.b32.xlu0 (%p542_p4), %v4597_v15, %s4698_s27  ;;  %3616 = vrot.lane.b32.xlu1 (%p542_p4), %v4601_v9, %s4698_s27  ;;  %v4603_v51 = vld [vmem:[#allocation4 + $0x40] sm:$0xff] (%p542_p4)  }
 0x373   : >> { %v4245_v23 = vpack.c.bf16 %v2755_v45, %v2755_v45  ;;  %v2645_v24 = vpop.xlane.xlu1 %2644  ;;  %v4606_v45 = vld [vmem:[#allocation4 + $0x50] sm:$0xff] (%p542_p4)  }
 0x374   : >> { %v4246_v20 = vpack.c.bf16 %v2756_v18, %v2756_v18  ;;  %v2669_v50 = vmul.f32 0.03125, %v2645_v24  ;;  %v4604_v18 = vld [vmem:[#allocation4 + $0x48] sm:$0xff] (%p542_p4)   ;;  %v4608_v24 = vld [vmem:[#allocation4 + $0x60] sm:$0xff] (%p542_p4)  }
 0x375   : >> { %2840 = vst.msk [vmem:[%s7978_s21 + $0x24] sm:$0xf] %vm399_vm2, %v4245_v23 }
 0x376   : >> { %2841 = vst.msk [vmem:[%s7978_s21 + $0x28] sm:$0xf] %vm399_vm2, %v4246_v20  ;;  %v2685_v38 = vadd.f32 1e-06, %v2669_v50  ;;  %3606 = vrot.lane.b32.xlu0 (%p542_p4), %v4598_v49, %s4698_s27  ;;  %3620 = vrot.lane.b32.xlu1 (%p542_p4), %v4602_v57, %s4698_s27  ;;  %v4605_v50 = vld [vmem:[#allocation4 + $0x58] sm:$0xff] (%p542_p4)  }
 0x378   : >> { %4424 = vrsqrt.f32 %v2685_v38  ;;  %v4610_v38 = vld [vmem:[#allocation4 + $0x70] sm:$0xff] (%p542_p4)  }
 0x37a   : > { %3608 = vrot.lane.b32.xlu0 (%p542_p4), %v4599_v7, %s4698_s27  ;;  %3622 = vrot.lane.b32.xlu1 (%p542_p4), %v4603_v51, %s4698_s27 }
 0x37e   : > { %3626 = vrot.lane.b32.xlu0 (%p542_p4), %v4606_v45, %s4698_s27  ;;  %3624 = vrot.lane.b32.xlu1 (%p542_p4), %v4604_v18, %s4698_s27 }
 0x382   : > { %3630 = vrot.lane.b32.xlu0 (%p542_p4), %v4608_v24, %s4698_s27  ;;  %3628 = vrot.lane.b32.xlu1 (%p542_p4), %v4605_v50, %s4698_s27 }
 0x385   : >> { %v4425_v33 = vpop.eup %4424 }
 0x386   : >> { %v2717_v3 = vmul.f32 %v4425_v33, %v7935_v10  ;;  %v4607_v33 = vld [vmem:[#allocation4 + $0x68] sm:$0xff] (%p542_p4)   ;;  %3634 = vrot.lane.b32.xlu0 (%p542_p4), %v4610_v38, %s4698_s27 }
 0x387   : > { %3632 = vrot.lane.b32.xlu1 (%p542_p4), %v4607_v33, %s4698_s27 }
 0x388   : >> { %v2737_v36 = vmul.f32 %v7961_v16, %v2717_v3 }
 0x38a   : >> { %v2757_v42 = vadd.f32 %v7965_v13, %v2737_v36 }
 0x38c   : >> { %v4247_v19 = vpack.c.bf16 %v2757_v42, %v2757_v42  ;;  %v2648_v40 = vpop.xlane.xlu0 %2647  ;;  %v4609_v42 = vld [vmem:[#allocation4 + $0x78] sm:$0xff] (%p542_p4)  }
 0x38d   : >> { %v2670_v55 = vmul.f32 0.03125, %v2648_v40  ;;  %3636 = vrot.lane.b32.xlu1 (%p542_p4), %v4609_v42, %s4698_s27 }
 0x38e   : >> { %2842 = vst.msk [vmem:[%s7978_s21 + $0x2c] sm:$0xf] %vm399_vm2, %v4247_v19 }
 0x38f   : >> { %v2686_v44 = vadd.f32 1e-06, %v2670_v55 }
 0x391   : >> { %4426 = vrsqrt.f32 %v2686_v44  ;;  %v4611_v44 = vld [vmem:[%s8498_s3 + $0x28] sm:$0xff] (%p542_p4)  }
 0x392   : > { %4372 = vmatprep.subr.bf16.mxu1 (%p542_p4), %v4611_v44 }
 0x393   : > { %4378 = vmatpush3.bf16.msra.mxu1 (%p542_p4), %v4611_v44 }
 0x39e   : >> { %v4427_v39 = vpop.eup %4426 }
 0x39f   : >> { %v2718_v31 = vmul.f32 %v4427_v39, %v7941_v22  ;;  %v4612_v39 = vld [vmem:[%s8498_s3 + $0x20] sm:$0xff] (%p542_p4)  }
 0x3a0   : > { %4373 = vmatprep.subr.bf16.mxu1 (%p542_p4), %v4612_v39 }
 0x3a1   : >> { %v2738_v62 = vmul.f32 %v7961_v16, %v2718_v31  ;;  %4379 = vmatpush3.bf16.msra.mxu1 (%p542_p4), %v4612_v39  ;;  %v4613_v31 = vld [vmem:[%s8498_s3 + $0x18] sm:$0xff] (%p542_p4)  }
 0x3a2   : > { %4374 = vmatprep.subr.bf16.mxu1 (%p542_p4), %v4613_v31 }
 0x3a3   : >> { %v2758_v10 = vadd.f32 %v7965_v13, %v2738_v62  ;;  %v4614_v62 = vld [vmem:[%s8498_s3 + $0x10] sm:$0xff] (%p542_p4)  }
 0x3a5   : >> { %v4248_v60 = vpack.c.bf16 %v2758_v10, %v2758_v10  ;;  %v2651_v1 = vpop.xlane.xlu1 %2650  ;;  %4380 = vmatpush3.bf16.msra.mxu1 (%p542_p4), %v4613_v31  ;;  %v4615_v10 = vld [vmem:[%s8498_s3 + $0x8] sm:$0xff] (%p542_p4)  }
 0x3a6   : >> { %v2671_v4 = vmul.f32 0.03125, %v2651_v1  ;;  %4375 = vmatprep.subr.bf16.mxu1 (%p542_p4), %v4614_v62  ;;  %v2883_v1 = vld [vmem:[%s8497_s2 + $0x10] sm:$0x1] (%p542_p4) }
 0x3a7   : >> { %2843 = vst.msk [vmem:[%s7978_s21 + $0x30] sm:$0xf] %vm399_vm2, %v4248_v60  ;;  %v4616_v60 = vld [vmem:[%s8498_s3] sm:$0xff] (%p542_p4)  }
 0x3a8   : >> { %v2687_v54 = vadd.f32 1e-06, %v2671_v4  ;;  %v2884_v4 = vunpack.c.l.bf16 (%p542_p4), %v2883_v1 }
 0x3a9   : > { %4381 = vmatpush3.bf16.msra.mxu1 (%p542_p4), %v4614_v62 }
 0x3aa   : >> { %4428 = vrsqrt.f32 %v2687_v54  ;;  %4376 = vmatprep.subr.bf16.mxu1 (%p542_p4), %v4615_v10  ;;  %v10119_v54 = vld [vmem:[#allocation12_spill] sm:$0xff] (%p542_p4) }
 0x3ad   : > { %4382 = vmatpush3.bf16.msra.mxu1 (%p542_p4), %v4615_v10 }
 0x3ae   : > { %4377 = vmatprep.subr.bf16.mxu1 (%p542_p4), %v4616_v60 }
 0x3b1   : > { %4383 = vmatpush3.bf16.msra.mxu1 (%p542_p4), %v4616_v60 }
 0x3b7   : >> { %v4429_v26 = vpop.eup %4428 }
 0x3b8   : >> { %v2719_v2 = vmul.f32 %v4429_v26, %v7947_v6  ;;  %v8118_v26 = vrot.slane (%p542_p4), %v2884_v4, %v10119_v54 }
 0x3ba   : >> { %v2739_v11 = vmul.f32 %v7961_v16, %v2719_v2 }
 0x3bc   : >> { %v2759_v22 = vadd.f32 %v7965_v13, %v2739_v11 }
 0x3be   : >> { %v4249_v25 = vpack.c.bf16 %v2759_v22, %v2759_v22  ;;  %v2654_v52 = vpop.xlane.xlu0 %2653 }
 0x3bf   : >> { %v2672_v30 = vmul.f32 0.03125, %v2654_v52 }
 0x3c0   : >> { %2844 = vst.msk [vmem:[%s7978_s21 + $0x34] sm:$0xf] %vm399_vm2, %v4249_v25 }
 0x3c1   : >> { %v2688_v17 = vadd.f32 1e-06, %v2672_v30 }
 0x3c3   : >> { %4430 = vrsqrt.f32 %v2688_v17 }
 0x3d0   : >> { %v4431_v37 = vpop.eup %4430 }
 0x3d1   : >> { %v2720_v46 = vmul.f32 %v4431_v37, %v7953_v63  ;;  %v4577_v63 = vld [vmem:[%s8497_s2 + $0x8] sm:$0xff] (%p542_p4)  }
 0x3d2   : > { %4292 = vmatprep.subr.bf16.mxu0 (%p542_p4), %v4577_v63 }
 0x3d3   : >> { %v2740_v58 = vmul.f32 %v7961_v16, %v2720_v46  ;;  %4293 = vmatpush3.bf16.msra.mxu0 (%p542_p4), %v4577_v63 }
 0x3d5   : >> { %v2760_v6 = vadd.f32 %v7965_v13, %v2740_v58 }
 0x3d7   : >> { %v2657_v47 = vpop.xlane.xlu1 %2656  ;;  %v4250_v56 = vpack.c.bf16 %v2760_v6, %v2760_v6 }
 0x3d8   : >> { %v2673_v27 = vmul.f32 0.03125, %v2657_v47 }
 0x3d9   : >> { %2845 = vst.msk [vmem:[%s7978_s21 + $0x38] sm:$0xf] %vm399_vm2, %v4250_v56 }
 0x3da   : >> { %v2689_v48 = vadd.f32 1e-06, %v2673_v27 }
 0x3dc   : >> { %4432 = vrsqrt.f32 %v2689_v48  ;;  %v8159_v57 = vpop.permute.xlu0 (%p542_p4), %3610 }
 0x3e9   : >> { %v4433_v0 = vpop.eup %4432 }
 0x3ea   : >> { %v2721_v29 = vmul.f32 %v4433_v0, %v7970_v35  ;;  %v4578_v35 = vld [vmem:[%s8497_s2] sm:$0xff] (%p542_p4)  }
 0x3eb   : > { %4294 = vmatprep.subr.bf16.mxu0 (%p542_p4), %v4578_v35 }
 0x3ec   : >> { %v2741_v53 = vmul.f32 %v7961_v16, %v2721_v29  ;;  %4295 = vmatpush3.bf16.msra.mxu0 (%p542_p4), %v4578_v35 }
 0x3ed   : > { %4328 = vmatprep.subr.bf16.mxu0 (%p542_p4), %v4611_v44 }
 0x3ee   : >> { %v2761_v14 = vadd.f32 %v7965_v13, %v2741_v53  ;;  %544 = sbr.rel (!%p542_p4) target bundleno = 205 (0xcd), region = 76 }
 0x3f0   : >> { %v4251_v43 = vpack.c.bf16 %v2761_v14, %v2761_v14 }
 0x3f2   : >> { %2846 = vst.msk [vmem:[%s7978_s21 + $0x3c] sm:$0xf] %vm399_vm2, %v4251_v43 }
 0x3f9   : > { %v4579_v16 = vld [vmem:[#allocation3] sm:$0xff]   ;;  %v4580_v13 = vld [vmem:[#allocation3 + $0x8] sm:$0xff]   ;;  %v4581_v12 = vld [vmem:[#allocation3 + $0x10] sm:$0xff]  }
 0x3fa   : > { %4296 = vmatprep.mubr.msk.bf16.mxu0 %vm432_vm0, %v4579_v16  ;;  %v4582_v61 = vld [vmem:[#allocation3 + $0x18] sm:$0xff]   ;;  %v4583_v21 = vld [vmem:[#allocation3 + $0x20] sm:$0xff]   ;;  %v4584_v32 = vld [vmem:[#allocation3 + $0x28] sm:$0xff]  }
 0x3fb   : > { %4297 = vmatmul.mubr.msk.bf16.vlgmr.msra.gmra.mxu0 %vm432_vm0, %v4580_v13  ;;  %v4585_v59 = vld [vmem:[#allocation3 + $0x30] sm:$0xff]   ;;  %v4586_v8 = vld [vmem:[#allocation3 + $0x38] sm:$0xff]   ;;  %v4587_v28 = vld [vmem:[#allocation3 + $0x40] sm:$0xff]  }
 0x3fc   : > { %4300 = vmatprep.mubr.msk.bf16.mxu0 %vm432_vm0, %v4581_v12  ;;  %v4588_v23 = vld [vmem:[#allocation3 + $0x48] sm:$0xff]   ;;  %v4589_v20 = vld [vmem:[#allocation3 + $0x50] sm:$0xff]   ;;  %v4590_v3 = vld [vmem:[#allocation3 + $0x58] sm:$0xff]   ;;  %4329 = vmatpush3.bf16.msra.mxu0 %v4611_v44 }
 0x3fd   : > { %v4591_v36 = vld [vmem:[#allocation3 + $0x60] sm:$0xff]   ;;  %v4592_v19 = vld [vmem:[#allocation3 + $0x68] sm:$0xff]   ;;  %v4593_v40 = vld [vmem:[#allocation3 + $0x70] sm:$0xff]   ;;  %4330 = vmatprep.subr.bf16.mxu0 %v4612_v39 }
 0x3fe   : > { %v4594_v55 = vld [vmem:[#allocation3 + $0x78] sm:$0xff]  }
 0x400   : > { %4331 = vmatpush3.bf16.msra.mxu0 %v4612_v39 }
 0x401   : > { %4332 = vmatprep.subr.bf16.mxu0 %v4613_v31 }
 0x403   : > { %4301 = vmatmul.mubr.msk.bf16.gmra.mxu0 %vm432_vm0, %v4582_v61 }
 0x404   : > { %4304 = vmatprep.mubr.msk.bf16.mxu0 %vm432_vm0, %v4583_v21  ;;  %4333 = vmatpush3.bf16.msra.mxu0 %v4613_v31 }
 0x405   : > { %4334 = vmatprep.subr.bf16.mxu0 %v4614_v62 }
 0x408   : > { %4335 = vmatpush3.bf16.msra.mxu0 %v4614_v62 }
 0x409   : > { %4336 = vmatprep.subr.bf16.mxu0 %v4615_v10 }
 0x40b   : > { %4305 = vmatmul.mubr.msk.bf16.gmra.mxu0 %vm432_vm0, %v4584_v32 }
 0x40c   : > { %4308 = vmatprep.mubr.msk.bf16.mxu0 %vm432_vm0, %v4585_v59  ;;  %4337 = vmatpush3.bf16.msra.mxu0 %v4615_v10 }
 0x40d   : > { %4338 = vmatprep.subr.bf16.mxu0 %v4616_v60 }
 0x410   : > { %4339 = vmatpush3.bf16.msra.mxu0 %v4616_v60 }
 0x413   : > { %4309 = vmatmul.mubr.msk.bf16.gmra.mxu0 %vm432_vm0, %v4586_v8 }
 0x414   : > { %4312 = vmatprep.mubr.msk.bf16.mxu0 %vm432_vm0, %v4587_v28 }
 0x41b   : > { %4313 = vmatmul.mubr.msk.bf16.gmra.mxu0 %vm432_vm0, %v4588_v23 }
 0x41c   : > { %4316 = vmatprep.mubr.msk.bf16.mxu0 %vm432_vm0, %v4589_v20 }
 0x423   : > { %4317 = vmatmul.mubr.msk.bf16.gmra.mxu0 %vm432_vm0, %v4590_v3 }
 0x424   : > { %4320 = vmatprep.mubr.msk.bf16.mxu0 %vm432_vm0, %v4591_v36 }
 0x42b   : > { %4321 = vmatmul.mubr.msk.bf16.gmra.mxu0 %vm432_vm0, %v4592_v19 }
 0x42c   : > { %4324 = vmatprep.mubr.msk.bf16.mxu0 %vm432_vm0, %v4593_v40  ;;  %v8176_v40 = vpop.permute.xlu0 %3612 }
 0x433   : > { %4325 = vmatmul.mubr.msk.bf16.gmra.mxu0 %vm432_vm0, %v4594_v55 }
 0x4bb   : > { %v4298_v2 = vpop.f32.mrf.mxu0 }
 0x4bc   : > { %v8121_v11 = vadd.f32 %v4298_v2, %v8118_v26 }
 0x4bd   : > { %v3063_v22 = vpop.f32.mrf.mxu0 }
 0x4be   : > { %v3224_v25 = vmul.f32 0.044715, %v8121_v11  ;;  %v8125_v52 = vadd.f32 %v3063_v22, %v8118_v26 }
 0x4bf   : > { %v4299_v30 = vpop.f32.mrf.mxu0 }
 0x4c0   : > { %v3256_v17 = vmul.f32 %v3224_v25, %v8121_v11  ;;  %v3222_v37 = vmul.f32 0.044715, %v8125_v52  ;;  %v8130_v46 = vadd.f32 %v4299_v30, %v8118_v26 }
 0x4c1   : > { %v3066_v58 = vpop.f32.mrf.mxu0 }
 0x4c2   : > { %v3288_v6 = vmul.f32 %v3256_v17, %v8121_v11  ;;  %v3254_v47 = vmul.f32 %v3222_v37, %v8125_v52  ;;  %v3225_v56 = vmul.f32 0.044715, %v8130_v46  ;;  %v8136_v27 = vadd.f32 %v3066_v58, %v8118_v26 }
 0x4c3   : > { %v4302_v48 = vpop.f32.mrf.mxu0  ;;  %v3190_v17 = vmul.f32 0.5, %v8125_v52  ;;  %v3192_v37 = vmul.f32 0.5, %v8121_v11 }
 0x4c4   : > { %v3320_v0 = vadd.f32 %v3288_v6, %v8121_v11  ;;  %v3286_v29 = vmul.f32 %v3254_v47, %v8125_v52  ;;  %v3257_v53 = vmul.f32 %v3225_v56, %v8130_v46  ;;  %v3223_v14 = vmul.f32 0.044715, %v8136_v27 }
 0x4c5   : > { %v8143_v43 = vadd.f32 %v4302_v48, %v8118_v26  ;;  %v3079_v63 = vpop.f32.mrf.mxu0  ;;  %v8198_v48 = vpop.permute.xlu0 %3618 }
 0x4c6   : > { %v3352_v35 = vmul.f32 0.7978846, %v3320_v0  ;;  %v3318_v16 = vadd.f32 %v3286_v29, %v8125_v52  ;;  %v3289_v13 = vmul.f32 %v3257_v53, %v8130_v46  ;;  %v3255_v12 = vmul.f32 %v3223_v14, %v8136_v27 }
 0x4c7   : > { %v3228_v61 = vmul.f32 0.044715, %v8143_v43  ;;  %v8150_v21 = vadd.f32 %v3079_v63, %v8118_v26  ;;  %v4303_v34 = vpop.f32.mrf.mxu0  ;;  %v3193_v0 = vmul.f32 0.5, %v8130_v46  ;;  %v8206_v11 = vmul.f32 0.5, %v8143_v43 }
 0x4c8   : > { %v3350_v5 = vmul.f32 0.7978846, %v3318_v16  ;;  %v3321_v32 = vadd.f32 %v3289_v13, %v8130_v46  ;;  %v3287_v59 = vmul.f32 %v3255_v12, %v8136_v27  ;;  %v8155_v41 = vadd.f32 %v4303_v34, %v8118_v26 }
 0x4c9   : > { %v3260_v15 = vmul.f32 %v3228_v61, %v8143_v43  ;;  %v3226_v9 = vmul.f32 0.044715, %v8150_v21  ;;  %v3082_v49 = vpop.f32.mrf.mxu0  ;;  %4617 = vtanh.f32 %v3352_v35  ;;  %v3191_v16 = vmul.f32 0.5, %v8136_v27 }
 0x4ca   : > { %v3353_v8 = vmul.f32 0.7978846, %v3321_v32  ;;  %v3319_v28 = vadd.f32 %v3287_v59, %v8136_v27  ;;  %v3229_v7 = vmul.f32 0.044715, %v8155_v41  ;;  %v8164_v51 = vadd.f32 %v3082_v49, %v8118_v26 }
 0x4cb   : > { %v3258_v45 = vmul.f32 %v3226_v9, %v8150_v21  ;;  %v4306_v18 = vpop.f32.mrf.mxu0  ;;  %4619 = vtanh.f32 %v3350_v5  ;;  %v3292_v20 = vmul.f32 %v3260_v15, %v8143_v43  ;;  %v8215_v34 = vmul.f32 0.5, %v8150_v21 }
 0x4cc   : > { %v3351_v23 = vmul.f32 0.7978846, %v3319_v28  ;;  %v3261_v24 = vmul.f32 %v3229_v7, %v8155_v41  ;;  %v3227_v50 = vmul.f32 0.044715, %v8164_v51  ;;  %4621 = vtanh.f32 %v3353_v8  ;;  %v3607_v28 = vpop.permute.xlu0 %3606 }
 0x4cd   : > { %v3095_v38 = vpop.f32.mrf.mxu0  ;;  %v3290_v33 = vmul.f32 %v3258_v45, %v8150_v21  ;;  %v3324_v55 = vadd.f32 %v3292_v20, %v8143_v43  ;;  %v8182_v31 = vadd.f32 %v4306_v18, %v8118_v26  ;;  %v8220_v32 = vmul.f32 0.5, %v8155_v41 }
 0x4ce   : > { %v3293_v3 = vmul.f32 %v3261_v24, %v8155_v41  ;;  %v3259_v36 = vmul.f32 %v3227_v50, %v8164_v51  ;;  %v8174_v42 = vadd.f32 %v3095_v38, %v8118_v26  ;;  %4623 = vtanh.f32 %v3351_v23 }
 0x4cf   : > { %v4307_v19 = vpop.f32.mrf.mxu0  ;;  %v3322_v60 = vadd.f32 %v3290_v33, %v8150_v21  ;;  %v3356_v30 = vmul.f32 0.7978846, %v3324_v55  ;;  %v3232_v58 = vmul.f32 0.044715, %v8182_v31  ;;  %v8234_v50 = vmul.f32 0.5, %v8164_v51 }
 0x4d0   : > { %v3325_v44 = vadd.f32 %v3293_v3, %v8155_v41  ;;  %v3291_v39 = vmul.f32 %v3259_v36, %v8164_v51  ;;  %v3230_v62 = vmul.f32 0.044715, %v8174_v42  ;;  %v8187_v4 = vadd.f32 %v4307_v19, %v8118_v26 }
 0x4d1   : > { %v3098_v10 = vpop.f32.mrf.mxu0  ;;  %v3354_v52 = vmul.f32 0.7978846, %v3322_v60  ;;  %v3264_v5 = vmul.f32 %v3232_v58, %v8182_v31 }
 0x4d2   : > { %v3357_v1 = vmul.f32 0.7978846, %v3325_v44  ;;  %v3323_v2 = vadd.f32 %v3291_v39, %v8164_v51  ;;  %v8191_v22 = vadd.f32 %v3098_v10, %v8118_v26  ;;  %v3262_v6 = vmul.f32 %v3230_v62, %v8174_v42 }
 0x4d3   : > { %v4310_v25 = vpop.f32.mrf.mxu0  ;;  %v3233_v53 = vmul.f32 0.044715, %v8187_v4  ;;  %v3296_v55 = vmul.f32 %v3264_v5, %v8182_v31 }
 0x4d4   : > { %v3231_v47 = vmul.f32 0.044715, %v8191_v22  ;;  %4625 = vtanh.f32 %v3357_v1  ;;  %v8209_v63 = vadd.f32 %v4310_v25, %v8118_v26  ;;  %v3355_v13 = vmul.f32 0.7978846, %v3323_v2 }
 0x4d5   : > { %v3111_v56 = vpop.f32.mrf.mxu0  ;;  %4627 = vtanh.f32 %v3356_v30  ;;  %v3294_v43 = vmul.f32 %v3262_v6, %v8174_v42  ;;  %v3265_v9 = vmul.f32 %v3233_v53, %v8187_v4  ;;  %v8248_v6 = vmul.f32 0.5, %v8182_v31 }
 0x4d6   : > { %v4618_v29 = vpop.eup %4617  ;;  %v8203_v14 = vadd.f32 %v3111_v56, %v8118_v26  ;;  %v3263_v46 = vmul.f32 %v3231_v47, %v8191_v22  ;;  %4629 = vtanh.f32 %v3354_v52  ;;  %v3236_v8 = vmul.f32 0.044715, %v8209_v63 }
 0x4d7   : > { %v4311_v35 = vpop.f32.mrf.mxu0  ;;  %v3416_v21 = vadd.f32 1.0, %v4618_v29  ;;  %4631 = vtanh.f32 %v3355_v13  ;;  %v3326_v38 = vadd.f32 %v3294_v43, %v8174_v42  ;;  %v3297_v44 = vmul.f32 %v3265_v9, %v8187_v4  ;;  %v3609_v29 = vpop.permute.xlu0 %3608 }
 0x4d8   : > { %v4620_v12 = vpop.eup %4619  ;;  %v3234_v61 = vmul.f32 0.044715, %v8203_v14  ;;  %v8223_v27 = vadd.f32 %v4311_v35, %v8118_v26  ;;  %v3295_v23 = vmul.f32 %v3263_v46, %v8191_v22  ;;  %v3268_v10 = vmul.f32 %v3236_v8, %v8209_v63 }
 0x4d9   : > { %v3114_v59 = vpop.f32.mrf.mxu0  ;;  %v4622_v15 = vpop.eup %4621  ;;  %v3414_v7 = vadd.f32 1.0, %v4620_v12  ;;  %v3448_v62 = vmul.f32 %v3416_v21, %v3192_v37  ;;  %v3358_v47 = vmul.f32 0.7978846, %v3326_v38  ;;  %v8257_v35 = vmul.f32 0.5, %v8174_v42 }
 0x4da   : > { %v8227_v49 = vadd.f32 %v3114_v59, %v8118_v26  ;;  %v3417_v41 = vadd.f32 1.0, %v4622_v15  ;;  %v3266_v20 = vmul.f32 %v3234_v61, %v8203_v14  ;;  %v3237_v33 = vmul.f32 0.044715, %v8223_v27 }
 0x4db   : > { %v4314_v45 = vpop.f32.mrf.mxu0  ;;  %v4624_v18 = vpop.eup %4623  ;;  %v3446_v60 = vmul.f32 %v3414_v7, %v3190_v17  ;;  %v3327_v25 = vadd.f32 %v3295_v23, %v8191_v22  ;;  %v3328_v17 = vadd.f32 %v3296_v55, %v8182_v31  ;;  %v3329_v12 = vadd.f32 %v3297_v44, %v8187_v4 }
 0x4dc   : > { %v3235_v24 = vmul.f32 0.044715, %v8227_v49  ;;  %v3415_v3 = vadd.f32 1.0, %v4624_v18  ;;  %v3449_v19 = vmul.f32 %v3417_v41, %v3193_v0  ;;  %v8241_v39 = vadd.f32 %v4314_v45, %v8118_v26 }
 0x4dd   : > { %v3127_v36 = vpop.f32.mrf.mxu0  ;;  %v3298_v30 = vmul.f32 %v3266_v20, %v8203_v14  ;;  %v3269_v56 = vmul.f32 %v3237_v33, %v8223_v27  ;;  %v3300_v46 = vmul.f32 %v3268_v10, %v8209_v63  ;;  %v3359_v59 = vmul.f32 0.7978846, %v3327_v25 }
 0x4de   : > { %v3267_v51 = vmul.f32 %v3235_v24, %v8227_v49  ;;  %v3447_v1 = vmul.f32 %v3415_v3, %v3191_v16  ;;  %v3479_v58 = vpack.c.bf16 %v3449_v19, %v3448_v62  ;;  %v8252_v37 = vadd.f32 %v3127_v36, %v8118_v26 }
 0x4df   : > { %v4315_v2 = vpop.f32.mrf.mxu0  ;;  %v3240_v52 = vmul.f32 0.044715, %v8241_v39  ;;  %v8260_v16 = vmul.f32 0.5, %v8187_v4  ;;  %v3330_v31 = vadd.f32 %v3298_v30, %v8203_v14  ;;  %v3301_v4 = vmul.f32 %v3269_v56, %v8223_v27 }
 0x4e0   : > { %v3478_v0 = vpack.c.bf16 %v3447_v1, %v3446_v60  ;;  %v3299_v61 = vmul.f32 %v3267_v51, %v8227_v49  ;;  %v3644_v15 = vsel %vm3638_vm3, %v3479_v58, %v3609_v29  ;;  %v8269_v42 = vadd.f32 %v4315_v2, %v8118_v26 }
 0x4e1   : > { %v3130_v53 = vpop.f32.mrf.mxu0  ;;  %v4626_v13 = vpop.eup %4625  ;;  %v3238_v21 = vmul.f32 0.044715, %v8252_v37  ;;  %4633 = vtanh.f32 %v3358_v47  ;;  %v3360_v7 = vmul.f32 0.7978846, %v3328_v17  ;;  %v3272_v41 = vmul.f32 %v3240_v52, %v8241_v39 }
 0x4e2   : > { %v3641_v5 = vsel %vm3638_vm3, %v3478_v0, %v3607_v28  ;;  %v4628_v9 = vpop.eup %4627  ;;  %v8275_v8 = vadd.f32 %v3130_v53, %v8118_v26  ;;  %v3421_v45 = vadd.f32 1.0, %v4626_v13  ;;  %v3361_v20 = vmul.f32 0.7978846, %v3329_v12 }
 0x4e3   : > { %v4318_v43 = vpop.f32.mrf.mxu0  ;;  %4340 = vmatprep.mubr.msk.bf16.mxu0 %vm3741_vm4, %v3641_v5  ;;  %v4630_v23 = vpop.eup %4629  ;;  %v3332_v24 = vadd.f32 %v3300_v46, %v8209_v63  ;;  %v3331_v38 = vadd.f32 %v3299_v61, %v8227_v49  ;;  %v3241_v33 = vmul.f32 0.044715, %v8269_v42  ;;  %v3420_v19 = vadd.f32 1.0, %v4628_v9 }
 0x4e4   : > { %4341 = vmatmul.mubr.msk.bf16.vlgmr.msra.gmra.mxu0 %vm3741_vm4, %v3644_v15  ;;  %v8280_v18 = vadd.f32 %v4318_v43, %v8118_v26  ;;  %v4632_v36 = vpop.eup %4631  ;;  %v3362_v55 = vmul.f32 0.7978846, %v3330_v31  ;;  %v3333_v10 = vadd.f32 %v3301_v4, %v8223_v27  ;;  %v3270_v51 = vmul.f32 %v3238_v21, %v8252_v37 }
 0x4e5   : > { %v3143_v28 = vpop.f32.mrf.mxu0  ;;  %v3239_v60 = vmul.f32 0.044715, %v8275_v8  ;;  %4635 = vtanh.f32 %v3359_v59  ;;  %v3453_v2 = vmul.f32 %v3421_v45, %v8220_v32  ;;  %v3304_v25 = vmul.f32 %v3272_v41, %v8241_v39 }
 0x4e6   : > { %v8286_v44 = vadd.f32 %v3143_v28, %v8118_v26  ;;  %v3244_v30 = vmul.f32 0.044715, %v8280_v18  ;;  %v3363_v47 = vmul.f32 0.7978846, %v3331_v38  ;;  %v3273_v56 = vmul.f32 %v3241_v33, %v8269_v42 }
 0x4e7   : > { %v4319_v3 = vpop.f32.mrf.mxu0  ;;  %v3418_v29 = vadd.f32 1.0, %v4630_v23  ;;  %v3419_v53 = vadd.f32 1.0, %v4632_v36  ;;  %v3452_v17 = vmul.f32 %v3420_v19, %v8206_v11  ;;  %v8302_v52 = vmul.f32 0.7978846, %v3332_v24 }
 0x4e8   : > { %v8289_v62 = vadd.f32 %v4319_v3, %v8118_v26  ;;  %v3242_v13 = vmul.f32 0.044715, %v8286_v44  ;;  %4637 = vtanh.f32 %v3362_v55  ;;  %v8306_v12 = vmul.f32 0.7978846, %v3333_v10 }
 0x4e9   : > { %v3146_v1 = vpop.f32.mrf.mxu0  ;;  %v3302_v46 = vmul.f32 %v3270_v51, %v8252_v37  ;;  %v3271_v61 = vmul.f32 %v3239_v60, %v8275_v8  ;;  %v3481_v43 = vpack.c.bf16 %v3453_v2, %v3452_v17  ;;  %v3336_v59 = vadd.f32 %v3304_v25, %v8241_v39 }
 0x4ea   : > { %v8298_v58 = vadd.f32 %v3146_v1, %v8118_v26  ;;  %v3245_v32 = vmul.f32 0.044715, %v8289_v62  ;;  %v3276_v31 = vmul.f32 %v3244_v30, %v8280_v18  ;;  %4639 = vtanh.f32 %v3363_v47 }
 0x4eb   : > { %v4322_v0 = vpop.f32.mrf.mxu0  ;;  %v3305_v15 = vmul.f32 %v3273_v56, %v8269_v42  ;;  %v3450_v9 = vmul.f32 %v3418_v29, %v8215_v34  ;;  %v3451_v4 = vmul.f32 %v3419_v53, %v8234_v50  ;;  %v3274_v28 = vmul.f32 %v3242_v13, %v8286_v44 }
 0x4ec   : > { %v3243_v11 = vmul.f32 0.044715, %v8298_v58  ;;  %v3277_v45 = vmul.f32 %v3245_v32, %v8289_v62  ;;  %4641 = vtanh.f32 %v3360_v7  ;;  %v3334_v23 = vadd.f32 %v3302_v46, %v8252_v37 }
 0x4ed   : > { %v3159_v5 = vpop.f32.mrf.mxu0  ;;  %v3303_v24 = vmul.f32 %v3271_v61, %v8275_v8  ;;  %v3480_v38 = vpack.c.bf16 %v3451_v4, %v3450_v9  ;;  %4643 = vtanh.f32 %v3361_v20  ;;  %v3308_v34 = vmul.f32 %v3276_v31, %v8280_v18 }
 0x4ee   : > { %v8319_v41 = vadd.f32 %v3159_v5, %v8118_v26  ;;  %v4634_v3 = vpop.eup %4633  ;;  %v3275_v50 = vmul.f32 %v3243_v11, %v8298_v58  ;;  %v8326_v36 = vadd.f32 %v4322_v0, %v8118_v26  ;;  %v3650_v7 = vsel %vm3638_vm3, %v3481_v43, %v8176_v40 }
 0x4ef   : > { %v4323_v21 = vpop.f32.mrf.mxu0  ;;  %v3337_v55 = vadd.f32 %v3305_v15, %v8269_v42  ;;  %v3647_v20 = vsel %vm3638_vm3, %v3480_v38, %v8159_v57  ;;  %v3306_v60 = vmul.f32 %v3274_v28, %v8286_v44  ;;  %v3309_v1 = vmul.f32 %v3277_v45, %v8289_v62 }
 0x4f0   : > { %v8329_v19 = vadd.f32 %v4323_v21, %v8118_v26  ;;  %v3422_v2 = vadd.f32 1.0, %v4634_v3  ;;  %4344 = vmatprep.mubr.msk.bf16.mxu1 %vm3741_vm4, %v3647_v20  ;;  %v3246_v25 = vmul.f32 0.044715, %v8319_v41  ;;  %v8343_v30 = vmul.f32 0.7978846, %v3336_v59 }
 0x4f1   : > { %v3162_v33 = vpop.f32.mrf.mxu0  ;;  %v3366_v40 = vmul.f32 0.7978846, %v3334_v23  ;;  %v3335_v47 = vadd.f32 %v3303_v24, %v8275_v8  ;;  %4345 = vmatmul.mubr.msk.bf16.vlgmr.msra.gmra.mxu1 %vm3741_vm4, %v3650_v7  ;;  %v3340_v29 = vadd.f32 %v3308_v34, %v8280_v18  ;;  %v3307_v53 = vmul.f32 %v3275_v50, %v8298_v58  ;;  %v3615_v7 = vpop.permute.xlu1 %3614 }
 0x4f2   : > { %v8337_v10 = vadd.f32 %v3162_v33, %v8118_v26  ;;  %v3249_v57 = vmul.f32 0.044715, %v8329_v19  ;;  %v4636_v0 = vpop.eup %4635  ;;  %v3248_v17 = vmul.f32 0.044715, %v8326_v36  ;;  %v8354_v32 = vmul.f32 0.7978846, %v3337_v55 }
 0x4f3   : > { %v4326_v51 = vpop.f32.mrf.mxu0  ;;  %v3199_v46 = vmul.f32 0.5, %v8191_v22  ;;  %v3423_v61 = vadd.f32 1.0, %v4636_v0  ;;  %v3338_v59 = vadd.f32 %v3306_v60, %v8286_v44  ;;  %v3341_v31 = vadd.f32 %v3309_v1, %v8289_v62 }
 0x4f4   : > { %v3247_v5 = vmul.f32 0.044715, %v8337_v10  ;;  %v3454_v11 = vmul.f32 %v3422_v2, %v8257_v35  ;;  %v3278_v15 = vmul.f32 %v3246_v25, %v8319_v41  ;;  %v3281_v4 = vmul.f32 %v3249_v57, %v8329_v19 }
 0x4f5   : > { %v3175_v56 = vpop.f32.mrf.mxu0  ;;  %v3455_v9 = vmul.f32 %v3423_v61, %v3199_v46  ;;  %4645 = vtanh.f32 %v8302_v52  ;;  %v4638_v28 = vpop.eup %4637  ;;  %v3367_v45 = vmul.f32 0.7978846, %v3335_v47  ;;  %v3372_v23 = vmul.f32 0.7978846, %v3340_v29 }
 0x4f6   : > { %v8352_v13 = vadd.f32 %v3175_v56, %v8118_v26  ;;  %v3339_v24 = vadd.f32 %v3307_v53, %v8298_v58  ;;  %v3280_v38 = vmul.f32 %v3248_v17, %v8326_v36  ;;  %v3279_v35 = vmul.f32 %v3247_v5, %v8337_v10 }
 0x4f7   : > { %v4327_v43 = vpop.f32.mrf.mxu0  ;;  %v3482_v33 = vpack.c.bf16 %v3455_v9, %v3454_v11  ;;  %4647 = vtanh.f32 %v8306_v12  ;;  %v4640_v34 = vpop.eup %4639  ;;  %v3370_v50 = vmul.f32 0.7978846, %v3338_v59  ;;  %v3310_v52 = vmul.f32 %v3278_v15, %v8319_v41 }
 0x4f8   : > { %v3250_v21 = vmul.f32 0.044715, %v8352_v13  ;;  %v8370_v3 = vadd.f32 %v4327_v43, %v8118_v26  ;;  %v8374_v55 = vadd.f32 %v4326_v51, %v8118_v26  ;;  %v3373_v1 = vmul.f32 0.7978846, %v3341_v31  ;;  %v3617_v11 = vpop.permute.xlu1 %3616 }
 0x4f9   : > { %v3178_v22 = vpop.f32.mrf.mxu0  ;;  %v4642_v60 = vpop.eup %4641  ;;  %v3653_v2 = vsel %vm3638_vm3, %v3482_v33, %v3615_v7  ;;  %v3313_v12 = vmul.f32 %v3281_v4, %v8329_v19  ;;  %v3371_v57 = vmul.f32 0.7978846, %v3339_v24  ;;  %v3312_v56 = vmul.f32 %v3280_v38, %v8326_v36 }
 0x4fa   : > { %v8377_v20 = vadd.f32 %v3178_v22, %v8118_v26  ;;  %v3282_v25 = vmul.f32 %v3250_v21, %v8352_v13  ;;  %v4644_v47 = vpop.eup %4643  ;;  %v3424_v0 = vadd.f32 1.0, %v4642_v60  ;;  %4348 = vmatprep.mubr.msk.bf16.mxu1 %vm3741_vm4, %v3653_v2  ;;  %v3311_v26 = vmul.f32 %v3279_v35, %v8337_v10 }
 0x4fb   : > { %v3425_v29 = vadd.f32 1.0, %v4644_v47  ;;  %v3253_v53 = vmul.f32 0.044715, %v8370_v3  ;;  %4649 = vtanh.f32 %v3366_v40  ;;  %v3342_v17 = vadd.f32 %v3310_v52, %v8319_v41 }
 0x4fc   : > { %v3251_v51 = vmul.f32 0.044715, %v8377_v20  ;;  %v3252_v46 = vmul.f32 0.044715, %v8374_v55  ;;  %4651 = vtanh.f32 %v3367_v45  ;;  %v3456_v5 = vmul.f32 %v3424_v0, %v8248_v6 }
 0x4fd   : > { %v3457_v43 = vmul.f32 %v3425_v29, %v8260_v16  ;;  %v3345_v59 = vadd.f32 %v3313_v12, %v8329_v19  ;;  %v3314_v31 = vmul.f32 %v3282_v25, %v8352_v13  ;;  %v3202_v15 = vmul.f32 0.5, %v8203_v14  ;;  %v3621_v25 = vpop.permute.xlu1 %3620 }
 0x4fe   : > { %v3283_v61 = vmul.f32 %v3251_v51, %v8377_v20  ;;  %v3203_v40 = vmul.f32 0.5, %v8227_v49  ;;  %v3426_v9 = vadd.f32 1.0, %v4638_v28  ;;  %v3427_v4 = vadd.f32 1.0, %v4640_v34 }
 0x4ff   : > { %v3483_v21 = vpack.c.bf16 %v3457_v43, %v3456_v5  ;;  %v3343_v22 = vadd.f32 %v3311_v26, %v8337_v10  ;;  %v3285_v45 = vmul.f32 %v3253_v53, %v8370_v3  ;;  %4653 = vtanh.f32 %v8343_v30 }
 0x500   : > { %v3315_v6 = vmul.f32 %v3283_v61, %v8377_v20  ;;  %v3458_v16 = vmul.f32 %v3426_v9, %v3202_v15  ;;  %v3459_v24 = vmul.f32 %v3427_v4, %v3203_v40  ;;  %4655 = vtanh.f32 %v8354_v32 }
 0x501   : > { %v3344_v38 = vadd.f32 %v3312_v56, %v8326_v36  ;;  %v3656_v14 = vsel %vm3638_vm3, %v3483_v21, %v3617_v11  ;;  %v3284_v49 = vmul.f32 %v3252_v46, %v8374_v55  ;;  %4657 = vtanh.f32 %v3372_v23 }
 0x502   : > { %v4646_v28 = vpop.eup %4645  ;;  %v3377_v33 = vmul.f32 0.7978846, %v3345_v59  ;;  %4349 = vmatmul.mubr.msk.bf16.gmra.mxu1 %vm3741_vm4, %v3656_v14  ;;  %v3346_v35 = vadd.f32 %v3314_v31, %v8352_v13  ;;  %v3484_v30 = vpack.c.bf16 %v3459_v24, %v3458_v16  ;;  %4659 = vtanh.f32 %v3373_v1  ;;  %v3623_v31 = vpop.permute.xlu1 %3622 }
 0x503   : > { %v3374_v34 = vmul.f32 0.7978846, %v3342_v17  ;;  %v3428_v7 = vadd.f32 1.0, %v4646_v28  ;;  %v3317_v52 = vmul.f32 %v3285_v45, %v8370_v3  ;;  %4661 = vtanh.f32 %v3370_v50 }
 0x504   : > { %v4648_v32 = vpop.eup %4647  ;;  %v3375_v60 = vmul.f32 0.7978846, %v3343_v22  ;;  %v3347_v2 = vadd.f32 %v3315_v6, %v8377_v20  ;;  %v3659_v23 = vsel %vm3638_vm3, %v3484_v30, %v8198_v48  ;;  %4663 = vtanh.f32 %v3371_v57 }
 0x505   : > { %v3316_v12 = vmul.f32 %v3284_v49, %v8374_v55  ;;  %v3204_v47 = vmul.f32 0.5, %v8209_v63  ;;  %v3205_v1 = vmul.f32 0.5, %v8223_v27  ;;  %v3429_v56 = vadd.f32 1.0, %v4648_v32  ;;  %4352 = vmatprep.mubr.msk.bf16.mxu1 %vm3741_vm4, %v3659_v23 }
 0x506   : > { %v3376_v0 = vmul.f32 0.7978846, %v3344_v38  ;;  %v3378_v50 = vmul.f32 0.7978846, %v3346_v35  ;;  %4665 = vtanh.f32 %v3377_v33  ;;  %v3349_v26 = vadd.f32 %v3317_v52, %v8370_v3  ;;  %v3625_v35 = vpop.permute.xlu1 %3624 }
 0x507   : > { %v3460_v51 = vmul.f32 %v3428_v7, %v3204_v47  ;;  %v3461_v29 = vmul.f32 %v3429_v56, %v3205_v1  ;;  %4667 = vtanh.f32 %v3374_v34  ;;  %v3379_v57 = vmul.f32 0.7978846, %v3347_v2 }
 0x508   : > { %v4650_v48 = vpop.eup %4649  ;;  %4669 = vtanh.f32 %v3375_v60  ;;  %v3348_v17 = vadd.f32 %v3316_v12, %v8374_v55  ;;  %v3206_v27 = vmul.f32 0.5, %v8252_v37  ;;  %v3207_v61 = vmul.f32 0.5, %v8275_v8 }
 0x509   : > { %v4652_v53 = vpop.eup %4651  ;;  %v3485_v63 = vpack.c.bf16 %v3461_v29, %v3460_v51  ;;  %v3430_v46 = vadd.f32 1.0, %v4650_v48  ;;  %4671 = vtanh.f32 %v3376_v0  ;;  %v3381_v59 = vmul.f32 0.7978846, %v3349_v26 }
 0x50a   : > { %v3431_v5 = vadd.f32 1.0, %v4652_v53  ;;  %4673 = vtanh.f32 %v3378_v50  ;;  %v3380_v4 = vmul.f32 0.7978846, %v3348_v17  ;;  %v3208_v8 = vmul.f32 0.5, %v8241_v39 }
 0x50b   : > { %v3662_v43 = vsel %vm3638_vm3, %v3485_v63, %v3621_v25  ;;  %v3462_v15 = vmul.f32 %v3430_v46, %v3206_v27  ;;  %4675 = vtanh.f32 %v3379_v57  ;;  %v3209_v45 = vmul.f32 0.5, %v8269_v42  ;;  %v3629_v27 = vpop.permute.xlu1 %3628 }
 0x50c   : > { %v4654_v11 = vpop.eup %4653  ;;  %v3463_v40 = vmul.f32 %v3431_v5, %v3207_v61  ;;  %4353 = vmatmul.mubr.msk.bf16.gmra.mxu1 %vm3741_vm4, %v3662_v43  ;;  %4677 = vtanh.f32 %v3381_v59  ;;  %v3213_v30 = vmul.f32 0.5, %v8289_v62  ;;  %v3210_v39 = vmul.f32 0.5, %v8286_v44  ;;  %v3627_v44 = vpop.permute.xlu0 %3626 }
 0x50d   : > { %v4656_v9 = vpop.eup %4655  ;;  %v3432_v21 = vadd.f32 1.0, %v4654_v11  ;;  %v3211_v52 = vmul.f32 0.5, %v8298_v58  ;;  %4679 = vtanh.f32 %v3380_v4  ;;  %v3212_v2 = vmul.f32 0.5, %v8280_v18 }
 0x50e   : > { %v4658_v22 = vpop.eup %4657  ;;  %v3486_v37 = vpack.c.bf16 %v3463_v40, %v3462_v15  ;;  %v3433_v6 = vadd.f32 1.0, %v4656_v9  ;;  %v3214_v58 = vmul.f32 0.5, %v8319_v41  ;;  %v3215_v51 = vmul.f32 0.5, %v8337_v10 }
 0x50f   : > { %v4660_v16 = vpop.eup %4659  ;;  %v3464_v14 = vmul.f32 %v3432_v21, %v3208_v8  ;;  %v3436_v34 = vadd.f32 1.0, %v4658_v22  ;;  %v3217_v61 = vmul.f32 0.5, %v8329_v19  ;;  %v3219_v10 = vmul.f32 0.5, %v8377_v20 }
 0x510   : > { %v4662_v24 = vpop.eup %4661  ;;  %v3665_v38 = vsel %vm3638_vm3, %v3486_v37, %v3623_v31  ;;  %v3465_v49 = vmul.f32 %v3433_v6, %v3209_v45  ;;  %v3437_v28 = vadd.f32 1.0, %v4660_v16  ;;  %v3631_v5 = vpop.permute.xlu0 %3630  ;;  %v3216_v11 = vmul.f32 0.5, %v8326_v36 }
 0x511   : > { %v4664_v33 = vpop.eup %4663  ;;  %4356 = vmatprep.mubr.msk.bf16.mxu1 %vm3741_vm4, %v3665_v38  ;;  %v3434_v7 = vadd.f32 1.0, %v4662_v24  ;;  %v3468_v62 = vmul.f32 %v3436_v34, %v3212_v2  ;;  %v3218_v15 = vmul.f32 0.5, %v8352_v13  ;;  %v3633_v16 = vpop.permute.xlu1 %3632  ;;  %v3220_v13 = vmul.f32 0.5, %v8374_v55 }
 0x512   : > { %v3487_v42 = vpack.c.bf16 %v3465_v49, %v3464_v14  ;;  %v3435_v32 = vadd.f32 1.0, %v4664_v33  ;;  %v3469_v23 = vmul.f32 %v3437_v28, %v3213_v30  ;;  %v3221_v24 = vmul.f32 0.5, %v8370_v3  ;;  %v3699_v3 = vld [vmem:[%s8498_s3 + $0x30] sm:$0x1] }
 0x513   : > { %v4666_v60 = vpop.eup %4665  ;;  %v3466_v47 = vmul.f32 %v3434_v7, %v3210_v39  ;;  %v3700_v55 = vunpack.c.l.bf16 %v3699_v3 }
 0x514   : > { %v4668_v12 = vpop.eup %4667  ;;  %v3668_v25 = vsel %vm3638_vm3, %v3487_v42, %v3625_v35  ;;  %v3467_v1 = vmul.f32 %v3435_v32, %v3211_v52  ;;  %v3489_v18 = vpack.c.bf16 %v3469_v23, %v3468_v62  ;;  %v3441_v53 = vadd.f32 1.0, %v4666_v60  ;;  %v3635_v36 = vpop.permute.xlu0 %3634 }
 0x515   : > { %v4670_v56 = vpop.eup %4669  ;;  %4357 = vmatmul.mubr.msk.bf16.gmra.mxu1 %vm3741_vm4, %v3668_v25  ;;  %v3438_v0 = vadd.f32 1.0, %v4668_v12  ;;  %v3637_v30 = vpop.permute.xlu1 %3636  ;;  %v8454_v7 = vrot.slane %v3700_v55, %v10119_v54 }
 0x516   : > { %v3488_v50 = vpack.c.bf16 %v3467_v1, %v3466_v47  ;;  %v3439_v29 = vadd.f32 1.0, %v4670_v56  ;;  %v4672_v26 = vpop.eup %4671  ;;  %v3674_v9 = vsel %vm3638_vm3, %v3489_v18, %v3629_v27  ;;  %v3473_v4 = vmul.f32 %v3441_v53, %v3217_v61 }
 0x517   : > { %v4674_v48 = vpop.eup %4673  ;;  %v3470_v17 = vmul.f32 %v3438_v0, %v3214_v58  ;;  %v3440_v41 = vadd.f32 1.0, %v4672_v26 }
 0x518   : > { %v3671_v57 = vsel %vm3638_vm3, %v3488_v50, %v3627_v44  ;;  %v3471_v63 = vmul.f32 %v3439_v29, %v3215_v51  ;;  %v4676_v46 = vpop.eup %4675  ;;  %v3442_v43 = vadd.f32 1.0, %v4674_v48 }
 0x519   : > { %4360 = vmatprep.mubr.msk.bf16.mxu1 %vm3741_vm4, %v3671_v57  ;;  %v3443_v31 = vadd.f32 1.0, %v4676_v46  ;;  %v4678_v40 = vpop.eup %4677  ;;  %v3472_v37 = vmul.f32 %v3440_v41, %v3216_v11 }
 0x51a   : > { %v3490_v59 = vpack.c.bf16 %v3471_v63, %v3470_v17  ;;  %v3474_v19 = vmul.f32 %v3442_v43, %v3218_v15  ;;  %v4680_v8 = vpop.eup %4679  ;;  %v3445_v6 = vadd.f32 1.0, %v4678_v40 }
 0x51b   : > { %v3475_v22 = vmul.f32 %v3443_v31, %v3219_v10  ;;  %v3491_v45 = vpack.c.bf16 %v3473_v4, %v3472_v37  ;;  %v3444_v38 = vadd.f32 1.0, %v4680_v8 }
 0x51c   : > { %v3677_v21 = vsel %vm3638_vm3, %v3490_v59, %v3631_v5  ;;  %v3477_v28 = vmul.f32 %v3445_v6, %v3221_v24 }
 0x51d   : > { %4361 = vmatmul.mubr.msk.bf16.gmra.mxu1 %vm3741_vm4, %v3674_v9  ;;  %v3492_v20 = vpack.c.bf16 %v3475_v22, %v3474_v19  ;;  %v3680_v49 = vsel %vm3638_vm3, %v3491_v45, %v3633_v16  ;;  %v3476_v33 = vmul.f32 %v3444_v38, %v3220_v13 }
 0x51e   : > { %4364 = vmatprep.mubr.msk.bf16.mxu1 %vm3741_vm4, %v3677_v21 }
 0x51f   : > { %v3683_v14 = vsel %vm3638_vm3, %v3492_v20, %v3635_v36  ;;  %v3493_v35 = vpack.c.bf16 %v3477_v28, %v3476_v33 }
 0x521   : > { %v3686_v34 = vsel %vm3638_vm3, %v3493_v35, %v3637_v30 }
 0x525   : > { %4365 = vmatmul.mubr.msk.bf16.gmra.mxu1 %vm3741_vm4, %v3680_v49 }
 0x526   : > { %4368 = vmatprep.mubr.msk.bf16.mxu1 %vm3741_vm4, %v3683_v14 }
 0x52d   : > { %4369 = vmatmul.mubr.msk.bf16.gmra.mxu1 %vm3741_vm4, %v3686_v34 }
 0x5a4   : > { %v4342_v39 = vpop.f32.mrf.mxu0 }
 0x5a5   : > { %v3817_v23 = vadd.f32 %v4342_v39, %v8454_v7 }
 0x5a6   : > { %v3808_v42 = vpop.f32.mrf.mxu0 }
 0x5a7   : > { %v3809_v52 = vadd.f32 %v3808_v42, %v8454_v7 }
 0x5a8   : > { %v4343_v32 = vpop.f32.mrf.mxu0 }
 0x5a9   : > { %3935 = vxpose.xlu0.b32.start [1/16] (narrow) %v3809_v52, 16  ;;  %v3820_v12 = vadd.f32 %v4343_v32, %v8454_v7 }
 0x5aa   : > { %v3811_v60 = vpop.f32.mrf.mxu0 }
 0x5ab   : > { %v3812_v2 = vadd.f32 %v3811_v60, %v8454_v7 }
 0x5ad   : > { %3936 = vxpose.xlu0.b32.cont [2/16] (narrow) %v3812_v2, 16 }
 0x5b1   : > { %3937 = vxpose.xlu0.b32.cont [3/16] (narrow) %v3817_v23, 16  ;;  %v4346_v25 = vpop.f32.mrf.mxu1 }
 0x5b2   : > { %v3833_v44 = vadd.f32 %v4346_v25, %v8454_v7 }
 0x5b3   : > { %v3824_v47 = vpop.f32.mrf.mxu1 }
 0x5b4   : > { %v3825_v54 = vadd.f32 %v3824_v47, %v8454_v7 }
 0x5b5   : > { %3938 = vxpose.xlu0.b32.cont [4/16] (narrow) %v3820_v12, 16  ;;  %v4347_v1 = vpop.f32.mrf.mxu1 }
 0x5b6   : > { %v3836_v0 = vadd.f32 %v4347_v1, %v8454_v7 }
 0x5b7   : > { %v3827_v56 = vpop.f32.mrf.mxu1 }
 0x5b8   : > { %v3828_v62 = vadd.f32 %v3827_v56, %v8454_v7 }
 0x5b9   : > { %3939 = vxpose.xlu0.b32.cont [5/16] (narrow) %v3825_v54, 16 }
 0x5bd   : > { %3940 = vxpose.xlu0.b32.cont [6/16] (narrow) %v3828_v62, 16 }
 0x5c1   : > { %3941 = vxpose.xlu0.b32.cont [7/16] (narrow) %v3833_v44, 16 }
 0x5c2   : > { %v4350_v50 = vpop.f32.mrf.mxu1 }
 0x5c3   : > { %v3849_v57 = vadd.f32 %v4350_v50, %v8454_v7 }
 0x5c4   : > { %v3840_v58 = vpop.f32.mrf.mxu1 }
 0x5c5   : > { %3942 = vxpose.xlu0.b32.cont [8/16] (narrow) %v3836_v0, 16  ;;  %v3841_v51 = vadd.f32 %v3840_v58, %v8454_v7 }
 0x5c6   : > { %v4351_v29 = vpop.f32.mrf.mxu1 }
 0x5c7   : > { %v3852_v63 = vadd.f32 %v4351_v29, %v8454_v7 }
 0x5c8   : > { %v3843_v26 = vpop.f32.mrf.mxu1 }
 0x5c9   : > { %3943 = vxpose.xlu0.b32.cont [9/16] (narrow) %v3841_v51, 16  ;;  %v3844_v18 = vadd.f32 %v3843_v26, %v8454_v7 }
 0x5cc   : > { %v4354_v48 = vpop.f32.mrf.mxu1 }
 0x5cd   : > { %3944 = vxpose.xlu0.b32.cont [10/16] (narrow) %v3844_v18, 16  ;;  %v3865_v11 = vadd.f32 %v4354_v48, %v8454_v7 }
 0x5ce   : > { %v3856_v53 = vpop.f32.mrf.mxu1 }
 0x5cf   : > { %v3857_v27 = vadd.f32 %v3856_v53, %v8454_v7 }
 0x5d0   : > { %v4355_v17 = vpop.f32.mrf.mxu1 }
 0x5d1   : > { %3945 = vxpose.xlu0.b32.cont [11/16] (narrow) %v3849_v57, 16  ;;  %v3868_v9 = vadd.f32 %v4355_v17, %v8454_v7 }
 0x5d2   : > { %v3859_v46 = vpop.f32.mrf.mxu1 }
 0x5d3   : > { %v3860_v41 = vadd.f32 %v3859_v46, %v8454_v7 }
 0x5d5   : > { %3946 = vxpose.xlu0.b32.cont [12/16] (narrow) %v3852_v63, 16  ;;  %v4358_v61 = vpop.f32.mrf.mxu1 }
 0x5d6   : > { %v3881_v40 = vadd.f32 %v4358_v61, %v8454_v7 }
 0x5d7   : > { %v3872_v5 = vpop.f32.mrf.mxu1 }
 0x5d8   : > { %v3873_v43 = vadd.f32 %v3872_v5, %v8454_v7 }
 0x5d9   : > { %3947 = vxpose.xlu0.b32.cont [13/16] (narrow) %v3857_v27, 16  ;;  %v4359_v59 = vpop.f32.mrf.mxu1 }
 0x5da   : > { %3967 = vxpose.xlu1.b32.start [1/16] (narrow) %v3873_v43, 16  ;;  %v3884_v21 = vadd.f32 %v4359_v59, %v8454_v7 }
 0x5db   : > { %v3875_v10 = vpop.f32.mrf.mxu1 }
 0x5dc   : > { %v3876_v31 = vadd.f32 %v3875_v10, %v8454_v7 }
 0x5dd   : > { %3948 = vxpose.xlu0.b32.cont [14/16] (narrow) %v3860_v41, 16  ;;  %v4362_v15 = vpop.f32.mrf.mxu1 }
 0x5de   : > { %3968 = vxpose.xlu1.b32.cont [2/16] (narrow) %v3876_v31, 16  ;;  %v3897_v45 = vadd.f32 %v4362_v15, %v8454_v7 }
 0x5df   : > { %v3888_v4 = vpop.f32.mrf.mxu1 }
 0x5e0   : > { %v3889_v19 = vadd.f32 %v3888_v4, %v8454_v7 }
 0x5e1   : > { %3949 = vxpose.xlu0.b32.cont [15/16] (narrow) %v3865_v11, 16  ;;  %v4363_v22 = vpop.f32.mrf.mxu1 }
 0x5e2   : > { %3969 = vxpose.xlu1.b32.cont [3/16] (narrow) %v3881_v40, 16  ;;  %v3900_v36 = vadd.f32 %v4363_v22, %v8454_v7 }
 0x5e3   : > { %v3891_v37 = vpop.f32.mrf.mxu1 }
 0x5e4   : > { %v3892_v8 = vadd.f32 %v3891_v37, %v8454_v7 }
 0x5e5   : > { %3950 = vxpose.xlu0.b32.end [16/16] (narrow) %v3868_v9, 16  ;;  %v4366_v20 = vpop.f32.mrf.mxu1 }
 0x5e6   : > { %3970 = vxpose.xlu1.b32.cont [4/16] (narrow) %v3884_v21, 16  ;;  %v3913_v49 = vadd.f32 %v4366_v20, %v8454_v7 }
 0x5e7   : > { %v3904_v6 = vpop.f32.mrf.mxu1 }
 0x5e8   : > { %v3905_v13 = vadd.f32 %v3904_v6, %v8454_v7 }
 0x5e9   : > { %v4367_v16 = vpop.f32.mrf.mxu1 }
 0x5ea   : > { %3971 = vxpose.xlu1.b32.cont [5/16] (narrow) %v3889_v19, 16  ;;  %v3916_v33 = vadd.f32 %v4367_v16, %v8454_v7 }
 0x5eb   : > { %v3907_v24 = vpop.f32.mrf.mxu1 }
 0x5ec   : > { %v3908_v38 = vadd.f32 %v3907_v24, %v8454_v7 }
 0x5ed   : > { %v4370_v14 = vpop.f32.mrf.mxu1 }
 0x5ee   : > { %3972 = vxpose.xlu1.b32.cont [6/16] (narrow) %v3892_v8, 16  ;;  %v3929_v55 = vadd.f32 %v4370_v14, %v8454_v7 }
 0x5ef   : > { %v3920_v28 = vpop.f32.mrf.mxu1 }
 0x5f0   : > { %v3921_v30 = vadd.f32 %v3920_v28, %v8454_v7 }
 0x5f1   : > { %v4371_v35 = vpop.f32.mrf.mxu1 }
 0x5f2   : > { %3973 = vxpose.xlu1.b32.cont [7/16] (narrow) %v3897_v45, 16  ;;  %v3932_v39 = vadd.f32 %v4371_v35, %v8454_v7 }
 0x5f3   : > { %v3923_v34 = vpop.f32.mrf.mxu1 }
 0x5f4   : > { %v3924_v3 = vadd.f32 %v3923_v34, %v8454_v7 }
 0x5f6   : > { %3974 = vxpose.xlu1.b32.cont [8/16] (narrow) %v3900_v36, 16 }
 0x5fa   : > { %3975 = vxpose.xlu1.b32.cont [9/16] (narrow) %v3905_v13, 16 }
 0x5fe   : > { %3976 = vxpose.xlu1.b32.cont [10/16] (narrow) %v3908_v38, 16 }
 0x602   : > { %3977 = vxpose.xlu1.b32.cont [11/16] (narrow) %v3913_v49, 16 }
 0x606   : > { %3978 = vxpose.xlu1.b32.cont [12/16] (narrow) %v3916_v33, 16 }
 0x60a   : > { %3979 = vxpose.xlu1.b32.cont [13/16] (narrow) %v3921_v30, 16 }
 0x60e   : > { %3980 = vxpose.xlu1.b32.cont [14/16] (narrow) %v3924_v3, 16 }
 0x612   : > { %3981 = vxpose.xlu1.b32.cont [15/16] (narrow) %v3929_v55, 16 }
 0x616   : > { %3982 = vxpose.xlu1.b32.end [16/16] (narrow) %v3932_v39, 16 }
 0x625   : > { %v3951_v42 = vpop.trf.xlu0 }
 0x626   : > { %3999 = vst [vmem:[%s4838_s25] sm:$0xff] %v3951_v42 }
 0x629   : > { %v3952_v52 = vpop.trf.xlu0 }
 0x62a   : > { %4001 = vst [vmem:[%s4838_s25 + $0x10] sm:$0xff] %v3952_v52 }
 0x656   : > { %v3983_v32 = vpop.trf.xlu1 }
 0x657   : > { %4000 = vst [vmem:[%s4838_s25 + $0x8] sm:$0xff] %v3983_v32 }
 0x65a   : > { %v3984_v60 = vpop.trf.xlu1 }
 0x65b   : > { %4002 = vst [vmem:[%s4838_s25 + $0x18] sm:$0xff] %v3984_v60 }
 0x65c PF: > { %s14_s15 = sadd.s32 1, %s4691_s15  }
 0x65d   : > { %p11_p5 = scmp.ge.s32.totalorder %s14_s15, 4  }
 0x65f   :  { %13 = sbr.rel (!%p11_p5) target bundleno = 1 (0x1), region = 87 }

</bundles_post_ra>
